<compile_context>
chip_gen: v5e
topology: v5e:2x2
jax: 0.10.0
libtpu: 0.0.40
codegen_flags: <defaults>
</compile_context>

<pallas_src>
import functools
import numpy as np
import jax
import jax.numpy as jnp
from jax.experimental import pallas as pl
from jax.experimental.pallas import tpu as pltpu


def _round_up(x, m):
    return ((x + m - 1) // m) * m


# -----------------------------------------------------------------------------
# Fused kernel: harmonic encoding + every AttentionSineLayer in one body.
#   refs = (att_smem, coords_tile, wpack, bpack, out, xenc_scratch)
#   plan = static tuple of per-layer
#          (w_off, b_off, d_out, d_in, skip_off, activate, omega_0, delta_omega_0)
#   enc  = static (in_dim, n_enc, r1, enc_off, d_s)
# -----------------------------------------------------------------------------
def _attention_siren_kernel(att_ref, x_ref, wpack_ref, bpack_ref, o_ref, xenc_ref,
                            *, enc, plan, bf16_sin):
    in_dim, n_enc, r1, enc_off, d_s = enc

    # ---- harmonic input encoding, built in-kernel into the VMEM scratch -------
    if n_enc > 0:
        # InputEncoding: x01 = (x + 1)/2 + 1 maps [-1, 1] -> [1, 2] (torch semantics).
        x01 = (x_ref[...] + 1.0) * 0.5 + 1.0                       # [in_dim, T]
        # xe[k*in_dim + d, :] = 2^k * x01[d, :]  via broadcast MACs against the
        # per-dim frequency columns stored in the packed weight slab.
        xe = wpack_ref[enc_off:enc_off + r1, 0:1] * x01[0:1, :]
        for d in range(1, in_dim):
            fd = wpack_ref[enc_off + d * r1:enc_off + (d + 1) * r1, 0:1]
            xe = xe + fd * x01[d:d + 1, :]
        # Slab layout (weight columns were remapped host-side to match):
        #   rows [0, r1)        -> sin(xe)   (pad rows carry 0 and zero weights)
        #   rows [r1, 2*r1)     -> cos(xe)
        #   rows [2*r1, 2*r1+D) -> shifted coords (append_coords=True)
        xenc_ref[0:r1, :] = jnp.sin(xe)
        xenc_ref[r1:2 * r1, :] = jnp.cos(xe)
        xenc_ref[2 * r1:2 * r1 + in_dim, :] = x01
    else:
        xenc_ref[...] = x_ref[...]

    # ---- layer stack -----------------------------------------------------------
    # Re-reading the encoded slab from VMEM here and at the mid-skip bounds its
    # live range (it is not held in vregs across every layer).
    h = xenc_ref[...]                                              # [d_s, T]
    for li, (w_off, b_off, d_out, d_in, skip_off,
             activate, omega_0, delta_omega_0) in enumerate(plan):
        w = wpack_ref[w_off:w_off + d_out, 0:d_in]                 # [d_out, d_in]
        z = jnp.dot(w, h, preferred_element_type=jnp.float32)      # MXU
        if skip_off >= 0:
            # torch.cat([h, add_to_skip]) @ W.T  ==  W_h @ h + W_e @ x_enc
            w_e = wpack_ref[skip_off:skip_off + d_out, 0:d_s]
            z = z + jnp.dot(w_e, xenc_ref[...], preferred_element_type=jnp.float32)
        z = z + bpack_ref[b_off:b_off + d_out, 0:1]                # lane-broadcast bias
        if activate:
            # attention = Linear(1,1)(mean(|z|, feature axis)) -> per-point scalar
            m = jnp.mean(jnp.abs(z), axis=0, keepdims=True)        # [1, T]
            attn = att_ref[li, 0] * m + att_ref[li, 1]
            freq = omega_0 + delta_omega_0 * jnp.tanh(attn)        # [1, T]
            arg = freq * z                                         # sublane broadcast
            if bf16_sin:
                # v6e/v7x option: bf16 sin on the EUP/VPU. Off by default; gate
                # behind an accuracy check vs. the f32 torch reference.
                h = jnp.sin(arg.astype(jnp.bfloat16)).astype(jnp.float32)
            else:
                h = jnp.sin(arg)
        else:
            h = z                                                  # plain last Linear
    o_ref[...] = h.astype(o_ref.dtype)


# -----------------------------------------------------------------------------
# Jitted forward: transpose/pad raw coords + ONE pallas_call, one executable.
# -----------------------------------------------------------------------------
@functools.partial(jax.jit, static_argnums=(0, 1))
def _forward_jit(plan, cfg, att, wpack, bpack, coords):
    in_dim, n_enc, r1, enc_off, d_s, tile_n, bf16_sin = cfg
    n = coords.shape[0]
    out_dim = plan[-1][2]

    # Only the RAW coords (8 B/point) cross into the kernel; the 13x larger
    # harmonic encoding is built in VMEM inside the kernel body.
    x_t = coords.astype(jnp.float32).T                             # [in_dim, N]
    n_pad = _round_up(max(n, 1), tile_n)
    if n_pad != n:
        x_t = jnp.pad(x_t, ((0, 0), (0, n_pad - n)))

    # Advisory cost estimate for XLA's scheduler.
    mm = 0
    transc = 2 * n_enc * in_dim
    for (_, _, d_out, d_in, skip_off, activate, _, _) in plan:
        k_total = d_in + (d_s if skip_off >= 0 else 0)
        mm += 2 * d_out * k_total
        if activate:
            transc += d_out + 1                                    # sin per feature + tanh
    cost = pl.CostEstimate(
        flops=int(mm) * int(n_pad),
        transcendentals=int(transc) * int(n_pad),
        bytes_accessed=int(4 * (in_dim + out_dim) * n_pad
                           + 4 * (wpack.size + bpack.size + att.size)),
    )

    kernel = functools.partial(
        _attention_siren_kernel,
        enc=(in_dim, n_enc, r1, enc_off, d_s),
        plan=plan, bf16_sin=bf16_sin)

    out_t = pl.pallas_call(
        kernel,
        out_shape=jax.ShapeDtypeStruct((out_dim, n_pad), jnp.float32),
        grid_spec=pltpu.PrefetchScalarGridSpec(
            num_scalar_prefetch=0,
            grid=(n_pad // tile_n,),
            in_specs=[
                pl.BlockSpec(memory_space=pltpu.MemorySpace.SMEM),     # attention scalars
                pl.BlockSpec((in_dim, tile_n), lambda i: (0, i)),      # raw coord tile
                pl.BlockSpec(wpack.shape, lambda i: (0, 0)),           # packed weights
                pl.BlockSpec(bpack.shape, lambda i: (0, 0)),           # packed biases
            ],
            out_specs=pl.BlockSpec((out_dim, tile_n), lambda i: (0, i)),  # lane-dense out
            scratch_shapes=[pltpu.VMEM((d_s, tile_n), jnp.float32)],   # encoded slab
        ),
        compiler_params=pltpu.CompilerParams(dimension_semantics=("parallel",)),
        cost_estimate=cost,
    )(att, x_t, wpack, bpack)

    # Epilogue: for out_dim==1 a reshape of [1, n_pad] is a free re-view (no
    # transpose pass); slice only when N was actually padded.
    out = out_t.reshape(n_pad, out_dim) if out_dim == 1 else out_t.T
    if n_pad != n:
        out = out[:n]
    return out, coords


# -----------------------------------------------------------------------------
# Parameter init mirroring AttentionSirenNet.__init__ / AttentionSineLayer.init_weights
# -----------------------------------------------------------------------------
def init_attention_siren_params(key, *, input_dim, hidden_dim, hidden_n_layers,
                                output_dim, is_last_linear=False, mid_skip=True,
                                input_omega_0=30.0, hidden_omega_0=30.0,
                                delta_omega_0=20.0, input_n_encoding_functions=0,
                                last_layer_weights_small=False):
    if input_n_encoding_functions > 0:
        first_in = 2 * input_n_encoding_functions * input_dim + input_dim
    else:
        first_in = input_dim
    skip_dim = first_in

    def sine_layer(k, d_in, d_out, is_first, omega_0):
        kw, kb, kaw, kab = jax.random.split(k, 4)
        bw = (1.0 / d_in) if is_first else (np.sqrt(6.0 / d_in) / omega_0)
        w = jax.random.uniform(kw, (d_out, d_in), jnp.float32, -bw, bw)
        bb = 1.0 / np.sqrt(d_in)                      # torch Linear default bias init
        b = jax.random.uniform(kb, (d_out,), jnp.float32, -bb, bb)
        a_w = jax.random.uniform(kaw, (), jnp.float32, -1.0, 1.0)   # nn.Linear(1,1) defaults
        a_b = jax.random.uniform(kab, (), jnp.float32, -1.0, 1.0)
        return {"w": w, "b": b, "a_w": a_w, "a_b": a_b,
                "omega_0": float(omega_0), "delta_omega_0": float(delta_omega_0),
                "activate": True}

    layers, n_skip = [], -1
    keys = jax.random.split(key, hidden_n_layers + 2)
    ki = 0
    layers.append(sine_layer(keys[ki], first_in, hidden_dim, True, input_omega_0)); ki += 1
    for i in range(hidden_n_layers):
        if i + 1 == int(np.ceil(hidden_n_layers / 2)) and mid_skip:
            layers.append(sine_layer(keys[ki], hidden_dim + skip_dim, hidden_dim,
                                     False, hidden_omega_0))
            n_skip = len(layers)
        else:
            layers.append(sine_layer(keys[ki], hidden_dim, hidden_dim,
                                     False, hidden_omega_0))
        ki += 1
    if is_last_linear:
        kw, kb = jax.random.split(keys[ki])
        bw = 1e-4 if last_layer_weights_small else np.sqrt(6.0 / hidden_dim) / hidden_omega_0
        w = jax.random.uniform(kw, (output_dim, hidden_dim), jnp.float32, -bw, bw)
        b = jax.random.uniform(kb, (output_dim,), jnp.float32,
                               -1.0 / np.sqrt(hidden_dim), 1.0 / np.sqrt(hidden_dim))
        layers.append({"w": w, "b": b, "a_w": jnp.zeros((), jnp.float32),
                       "a_b": jnp.zeros((), jnp.float32), "omega_0": 0.0,
                       "delta_omega_0": 0.0, "activate": False})
    else:
        layers.append(sine_layer(keys[ki], hidden_dim, output_dim, False, hidden_omega_0))

    return {"layers": layers, "n_skip": n_skip, "mid_skip": bool(mid_skip),
            "n_enc": int(input_n_encoding_functions), "hidden_dim": int(hidden_dim),
            "in_dim": int(input_dim)}


# -----------------------------------------------------------------------------
# One-time host-side prep: remap encoded-input weight columns to the kernel's
# slab layout and pack all weights / biases into two VMEM slabs.
# -----------------------------------------------------------------------------
def flatten_for_kernel(params):
    hidden = params["hidden_dim"]
    in_dim = params["in_dim"]
    n_enc = params["n_enc"]
    ne = in_dim * n_enc
    r1 = _round_up(ne, 8) if n_enc > 0 else 0
    d_s = (2 * r1 + in_dim) if n_enc > 0 else in_dim          # rows of the encoded slab

    def remap_enc(w_t):
        # torch columns: [sin (dim-major,freq-minor) | cos (same) | shifted x]
        # kernel slab rows: [sin (freq-major,dim-minor)+pad | cos ... +pad | shifted x]
        d_out = w_t.shape[0]
        w_k = np.zeros((d_out, d_s), np.float32)
        for k in range(n_enc):
            for d in range(in_dim):
                r = k * in_dim + d
                tc = d * n_enc + k
                w_k[:, r] = w_t[:, tc]                        # sin part
                w_k[:, r1 + r] = w_t[:, ne + tc]              # cos part
        w_k[:, 2 * r1:2 * r1 + in_dim] = w_t[:, 2 * ne:]      # append_coords part
        return w_k

    wblocks, bblocks, att_rows, plan = [], [], [], []
    w_off, b_off = 0, 0

    enc_off = -1
    if n_enc > 0:
        enc_off = w_off
        for d in range(in_dim):                               # per-dim frequency columns
            fblk = np.zeros((r1, 1), np.float32)
            for k in range(n_enc):
                fblk[k * in_dim + d, 0] = 2.0 ** k
            wblocks.append((w_off, fblk))
            w_off += r1

    for li, layer in enumerate(params["layers"]):
        use_skip = params["mid_skip"] and (li + 1) == params["n_skip"]
        w = np.asarray(layer["w"], np.float32)
        b = np.asarray(layer["b"], np.float32).reshape(-1, 1)
        d_out = w.shape[0]

        skip_blk = None
        if li == 0 and n_enc > 0:
            main, d_in = remap_enc(w), d_s
        elif use_skip:
            main, d_in = w[:, :hidden], hidden
            skip_blk = remap_enc(w[:, hidden:]) if n_enc > 0 else w[:, hidden:]
        else:
            main, d_in = w, w.shape[1]

        mo = w_off
        wblocks.append((mo, main)); w_off += _round_up(d_out, 8)
        skip_off = -1
        if skip_blk is not None:
            skip_off = w_off
            wblocks.append((skip_off, skip_blk)); w_off += _round_up(d_out, 8)

        bo = b_off
        bblocks.append((bo, b)); b_off += _round_up(d_out, 8)

        att_rows.append([float(layer["a_w"]), float(layer["a_b"])])
        plan.append((int(mo), int(bo), int(d_out), int(d_in), int(skip_off),
                     bool(layer["activate"]),
                     float(layer["omega_0"]), float(layer["delta_omega_0"])))

    width = _round_up(max(blk.shape[1] for _, blk in wblocks), 128)
    wpack = np.zeros((_round_up(w_off, 8), width), np.float32)
    for off, blk in wblocks:
        wpack[off:off + blk.shape[0], :blk.shape[1]] = blk
    bpack = np.zeros((_round_up(max(b_off, 8), 8), 1), np.float32)
    for off, blk in bblocks:
        bpack[off:off + blk.shape[0], :] = blk

    return {"plan": tuple(plan),
            "att": jnp.asarray(np.asarray(att_rows, np.float32)),   # [n_layers, 2]
            "wpack": jnp.asarray(wpack),
            "bpack": jnp.asarray(bpack),
            "in_dim": int(in_dim), "n_enc": int(n_enc),
            "r1": int(r1), "enc_off": int(enc_off), "d_s": int(d_s)}


def attention_siren_forward(flat, coords, tile_n=None, bf16_sin=False):
    """Fused AttentionSirenNet.forward (clone=True path). Returns (out, coords)."""
    # TODO(synk): autograd tracking of `coords` (clone/detach/requires_grad_) has
    # no Pallas equivalent; only the forward values are computed here.
    n = coords.shape[0]
    if tile_n is None:
        if n > 8192:
            tile_n = 4096                                 # big-N default (sweep 2048-8192)
        elif n > 256:
            tile_n = _round_up((n + 1) // 2, 128)         # >=2 grid steps (v7x: 2 TCs)
        else:
            tile_n = _round_up(max(n, 1), 128)            # tiny N: single tile
    cfg = (flat["in_dim"], flat["n_enc"], flat["r1"], flat["enc_off"], flat["d_s"],
           int(tile_n), bool(bf16_sin))
    return _forward_jit(flat["plan"], cfg, flat["att"], flat["wpack"],
                        flat["bpack"], coords)


if __name__ == "__main__":
    # Small shapes consistent with the module:
    #   coords [N, input_dim=2] in [-1, 1]; hidden_dim=32, 3 hidden layers,
    #   output_dim=1, 6 encoding functions, mid-skip enabled, sine last layer.
    key = jax.random.PRNGKey(0)
    k_params, k_coords, k_coords2 = jax.random.split(key, 3)

    params = init_attention_siren_params(
        k_params,
        input_dim=2, hidden_dim=32, hidden_n_layers=3, output_dim=1,
        is_last_linear=False, mid_skip=True,
        input_omega_0=30.0, hidden_omega_0=30.0, delta_omega_0=20.0,
        input_n_encoding_functions=6)
    flat = flatten_for_kernel(params)

    # Run 1: single-tile path.
    coords = jax.random.uniform(k_coords, (256, 2), jnp.float32, minval=-1.0, maxval=1.0)
    out, coords_out = attention_siren_forward(flat, coords)
    out = jax.block_until_ready(out)
    assert out.shape == (256, 1) and out.dtype == jnp.float32
    assert coords_out.shape == coords.shape
    assert bool(jnp.all(jnp.isfinite(out)))
    # Last layer is sin((omega_0 + delta_omega) * z) -> bounded output.
    assert bool(jnp.all(jnp.abs(out) <= 1.0 + 1e-5))

    # Run 2: ragged N exercising the multi-step "parallel" grid + padding path.
    coords2 = jax.random.uniform(k_coords2, (1000, 2), jnp.float32, minval=-1.0, maxval=1.0)
    out2, _ = attention_siren_forward(flat, coords2)
    out2 = jax.block_until_ready(out2)
    assert out2.shape == (1000, 1)
    assert bool(jnp.all(jnp.isfinite(out2)))
    assert bool(jnp.all(jnp.abs(out2) <= 1.0 + 1e-5))

    print("KERNEL_OK")
</pallas_src>

<mosaic_0001>
module attributes {stable_mosaic.version = 11 : i64} {
  func.func @_attention_siren_kernel(%arg0: i32, %arg1: memref<5x2xf32, #tpu.memory_space<smem>>, %arg2: memref<2x256xf32, #tpu.memory_space<vmem>>, %arg3: memref<200x128xf32, #tpu.memory_space<vmem>>, %arg4: memref<136x1xf32, #tpu.memory_space<vmem>>, %arg5: memref<1x256xf32, #tpu.memory_space<vmem>>, %arg6: memref<34x256xf32, #tpu.memory_space<vmem>>) attributes {dimension_semantics = [#tpu.dimension_semantics<parallel>], iteration_bounds = array<i64: 1>, scalar_prefetch = 0 : i64, scratch_operands = 1 : i64, tpu.core_type = #tpu.core_type<tc>, window_params = [{transform_indices = @transform_0, window_bounds = array<i64: 5, 2>}, {transform_indices = @transform_1, window_bounds = array<i64: 2, 256>}, {pipeline_mode = #tpu.pipeline_mode<synchronous>, transform_indices = @transform_2, window_bounds = array<i64: 200, 128>}, {pipeline_mode = #tpu.pipeline_mode<synchronous>, transform_indices = @transform_3, window_bounds = array<i64: 136, 1>}, {transform_indices = @transform_4, window_bounds = array<i64: 1, 256>}]} {
    %c0 = arith.constant 0 : index
    %c0_0 = arith.constant 0 : index
    %0 = vector.load %arg2[%c0, %c0_0] : memref<2x256xf32, #tpu.memory_space<vmem>>, vector<2x256xf32>
    %cst = arith.constant 1.000000e+00 : f32
    %1 = vector.broadcast %cst : f32 to vector<2x256xf32>
    %2 = arith.addf %0, %1 : vector<2x256xf32>
    %cst_1 = arith.constant 5.000000e-01 : f32
    %3 = vector.broadcast %cst_1 : f32 to vector<2x256xf32>
    %4 = arith.mulf %2, %3 : vector<2x256xf32>
    %cst_2 = arith.constant 1.000000e+00 : f32
    %5 = vector.broadcast %cst_2 : f32 to vector<2x256xf32>
    %6 = arith.addf %4, %5 : vector<2x256xf32>
    %c0_3 = arith.constant 0 : index
    %c0_4 = arith.constant 0 : index
    %7 = vector.load %arg3[%c0_3, %c0_4] : memref<200x128xf32, #tpu.memory_space<vmem>>, vector<16x1xf32>
    %8 = vector.extract_strided_slice %6 {offsets = [0, 0], sizes = [1, 256], strides = [1, 1]} : vector<2x256xf32> to vector<1x256xf32>
    %9 = vector.broadcast %7 : vector<16x1xf32> to vector<16x256xf32>
    %10 = vector.broadcast %8 : vector<1x256xf32> to vector<16x256xf32>
    %11 = arith.mulf %9, %10 : vector<16x256xf32>
    %c16 = arith.constant 16 : index
    %c0_5 = arith.constant 0 : index
    %12 = vector.load %arg3[%c16, %c0_5] : memref<200x128xf32, #tpu.memory_space<vmem>>, vector<16x1xf32>
    %13 = vector.extract_strided_slice %6 {offsets = [1, 0], sizes = [1, 256], strides = [1, 1]} : vector<2x256xf32> to vector<1x256xf32>
    %14 = vector.broadcast %12 : vector<16x1xf32> to vector<16x256xf32>
    %15 = vector.broadcast %13 : vector<1x256xf32> to vector<16x256xf32>
    %16 = arith.mulf %14, %15 : vector<16x256xf32>
    %17 = arith.addf %11, %16 : vector<16x256xf32>
    %18 = math.sin %17 : vector<16x256xf32>
    %c0_6 = arith.constant 0 : index
    %c0_7 = arith.constant 0 : index
    %19 = vector.load %arg6[%c0_6, %c0_7] : memref<34x256xf32, #tpu.memory_space<vmem>>, vector<16x256xf32>
    tpu.vector_store %arg6[%c0_6, %c0_7], %18 {strides = array<i32>} : memref<34x256xf32, #tpu.memory_space<vmem>>, vector<16x256xf32>,
    %20 = math.cos %17 : vector<16x256xf32>
    %c16_8 = arith.constant 16 : index
    %c0_9 = arith.constant 0 : index
    %21 = vector.load %arg6[%c16_8, %c0_9] : memref<34x256xf32, #tpu.memory_space<vmem>>, vector<16x256xf32>
    tpu.vector_store %arg6[%c16_8, %c0_9], %20 {strides = array<i32>} : memref<34x256xf32, #tpu.memory_space<vmem>>, vector<16x256xf32>,
    %c32 = arith.constant 32 : index
    %c0_10 = arith.constant 0 : index
    %22 = vector.load %arg6[%c32, %c0_10] : memref<34x256xf32, #tpu.memory_space<vmem>>, vector<2x256xf32>
    tpu.vector_store %arg6[%c32, %c0_10], %6 {strides = array<i32>} : memref<34x256xf32, #tpu.memory_space<vmem>>, vector<2x256xf32>,
    %c0_11 = arith.constant 0 : index
    %c0_12 = arith.constant 0 : index
    %23 = vector.load %arg6[%c0_11, %c0_12] : memref<34x256xf32, #tpu.memory_space<vmem>>, vector<34x256xf32>
    %c32_13 = arith.constant 32 : index
    %c0_14 = arith.constant 0 : index
    %24 = vector.load %arg3[%c32_13, %c0_14] : memref<200x128xf32, #tpu.memory_space<vmem>>, vector<32x34xf32>
    %cst_15 = arith.constant dense<0.000000e+00> : vector<32x256xf32>
    %25 = tpu.matmul %24, %23, %cst_15 {dimension_numbers = #tpu.dot_dimension_numbers<[1], [0], [0], [1], [0, 0, 1, 1], [], []>} : vector<32x34xf32>, vector<34x256xf32>, vector<32x256xf32> -> vector<32x256xf32>
    %c0_16 = arith.constant 0 : index
    %c0_17 = arith.constant 0 : index
    %26 = vector.load %arg4[%c0_16, %c0_17] : memref<136x1xf32, #tpu.memory_space<vmem>>, vector<32x1xf32>
    %27 = vector.broadcast %26 : vector<32x1xf32> to vector<32x256xf32>
    %28 = arith.addf %25, %27 : vector<32x256xf32>
    %29 = math.absf %28 : vector<32x256xf32>
    %cst_18 = arith.constant dense<0.000000e+00> : vector<256xf32>
    %30 = vector.multi_reduction <add>, %29, %cst_18 [0] : vector<32x256xf32> to vector<256xf32>
    %31 = vector.shape_cast %30 : vector<256xf32> to vector<1x256xf32>
    %cst_19 = arith.constant 3.200000e+01 : f32
    %32 = vector.broadcast %cst_19 : f32 to vector<1x256xf32>
    %33 = arith.divf %31, %32 : vector<1x256xf32>
    %c0_20 = arith.constant 0 : index
    %c0_21 = arith.constant 0 : index
    %34 = memref.load %arg1[%c0_20, %c0_21] : memref<5x2xf32, #tpu.memory_space<smem>>
    %35 = vector.broadcast %34 : f32 to vector<1x256xf32>
    %36 = arith.mulf %35, %33 : vector<1x256xf32>
    %c0_22 = arith.constant 0 : index
    %c1 = arith.constant 1 : index
    %37 = memref.load %arg1[%c0_22, %c1] : memref<5x2xf32, #tpu.memory_space<smem>>
    %38 = vector.broadcast %37 : f32 to vector<1x256xf32>
    %39 = arith.addf %36, %38 : vector<1x256xf32>
    %40 = math.tanh %39 : vector<1x256xf32>
    %cst_23 = arith.constant 2.000000e+01 : f32
    %41 = vector.broadcast %cst_23 : f32 to vector<1x256xf32>
    %42 = arith.mulf %41, %40 : vector<1x256xf32>
    %cst_24 = arith.constant 3.000000e+01 : f32
    %43 = vector.broadcast %cst_24 : f32 to vector<1x256xf32>
    %44 = arith.addf %43, %42 : vector<1x256xf32>
    %45 = vector.broadcast %44 : vector<1x256xf32> to vector<32x256xf32>
    %46 = arith.mulf %45, %28 : vector<32x256xf32>
    %47 = math.sin %46 : vector<32x256xf32>
    %c64 = arith.constant 64 : index
    %c0_25 = arith.constant 0 : index
    %48 = vector.load %arg3[%c64, %c0_25] : memref<200x128xf32, #tpu.memory_space<vmem>>, vector<32x32xf32>
    %cst_26 = arith.constant dense<0.000000e+00> : vector<32x256xf32>
    %49 = tpu.matmul %48, %47, %cst_26 {dimension_numbers = #tpu.dot_dimension_numbers<[1], [0], [0], [1], [0, 0, 1, 1], [], []>} : vector<32x32xf32>, vector<32x256xf32>, vector<32x256xf32> -> vector<32x256xf32>
    %c32_27 = arith.constant 32 : index
    %c0_28 = arith.constant 0 : index
    %50 = vector.load %arg4[%c32_27, %c0_28] : memref<136x1xf32, #tpu.memory_space<vmem>>, vector<32x1xf32>
    %51 = vector.broadcast %50 : vector<32x1xf32> to vector<32x256xf32>
    %52 = arith.addf %49, %51 : vector<32x256xf32>
    %53 = math.absf %52 : vector<32x256xf32>
    %cst_29 = arith.constant dense<0.000000e+00> : vector<256xf32>
    %54 = vector.multi_reduction <add>, %53, %cst_29 [0] : vector<32x256xf32> to vector<256xf32>
    %55 = vector.shape_cast %54 : vector<256xf32> to vector<1x256xf32>
    %cst_30 = arith.constant 3.200000e+01 : f32
    %56 = vector.broadcast %cst_30 : f32 to vector<1x256xf32>
    %57 = arith.divf %55, %56 : vector<1x256xf32>
    %c1_31 = arith.constant 1 : index
    %c0_32 = arith.constant 0 : index
    %58 = memref.load %arg1[%c1_31, %c0_32] : memref<5x2xf32, #tpu.memory_space<smem>>
    %59 = vector.broadcast %58 : f32 to vector<1x256xf32>
    %60 = arith.mulf %59, %57 : vector<1x256xf32>
    %c1_33 = arith.constant 1 : index
    %c1_34 = arith.constant 1 : index
    %61 = memref.load %arg1[%c1_33, %c1_34] : memref<5x2xf32, #tpu.memory_space<smem>>
    %62 = vector.broadcast %61 : f32 to vector<1x256xf32>
    %63 = arith.addf %60, %62 : vector<1x256xf32>
    %64 = math.tanh %63 : vector<1x256xf32>
    %cst_35 = arith.constant 2.000000e+01 : f32
    %65 = vector.broadcast %cst_35 : f32 to vector<1x256xf32>
    %66 = arith.mulf %65, %64 : vector<1x256xf32>
    %cst_36 = arith.constant 3.000000e+01 : f32
    %67 = vector.broadcast %cst_36 : f32 to vector<1x256xf32>
    %68 = arith.addf %67, %66 : vector<1x256xf32>
    %69 = vector.broadcast %68 : vector<1x256xf32> to vector<32x256xf32>
    %70 = arith.mulf %69, %52 : vector<32x256xf32>
    %71 = math.sin %70 : vector<32x256xf32>
    %c96 = arith.constant 96 : index
    %c0_37 = arith.constant 0 : index
    %72 = vector.load %arg3[%c96, %c0_37] : memref<200x128xf32, #tpu.memory_space<vmem>>, vector<32x32xf32>
    %cst_38 = arith.constant dense<0.000000e+00> : vector<32x256xf32>
    %73 = tpu.matmul %72, %71, %cst_38 {dimension_numbers = #tpu.dot_dimension_numbers<[1], [0], [0], [1], [0, 0, 1, 1], [], []>} : vector<32x32xf32>, vector<32x256xf32>, vector<32x256xf32> -> vector<32x256xf32>
    %c128 = arith.constant 128 : index
    %c0_39 = arith.constant 0 : index
    %74 = vector.load %arg3[%c128, %c0_39] : memref<200x128xf32, #tpu.memory_space<vmem>>, vector<32x34xf32>
    %c0_40 = arith.constant 0 : index
    %c0_41 = arith.constant 0 : index
    %75 = vector.load %arg6[%c0_40, %c0_41] : memref<34x256xf32, #tpu.memory_space<vmem>>, vector<34x256xf32>
    %cst_42 = arith.constant dense<0.000000e+00> : vector<32x256xf32>
    %76 = tpu.matmul %74, %75, %cst_42 {dimension_numbers = #tpu.dot_dimension_numbers<[1], [0], [0], [1], [0, 0, 1, 1], [], []>} : vector<32x34xf32>, vector<34x256xf32>, vector<32x256xf32> -> vector<32x256xf32>
    %77 = arith.addf %73, %76 : vector<32x256xf32>
    %c64_43 = arith.constant 64 : index
    %c0_44 = arith.constant 0 : index
    %78 = vector.load %arg4[%c64_43, %c0_44] : memref<136x1xf32, #tpu.memory_space<vmem>>, vector<32x1xf32>
    %79 = vector.broadcast %78 : vector<32x1xf32> to vector<32x256xf32>
    %80 = arith.addf %77, %79 : vector<32x256xf32>
    %81 = math.absf %80 : vector<32x256xf32>
    %cst_45 = arith.constant dense<0.000000e+00> : vector<256xf32>
    %82 = vector.multi_reduction <add>, %81, %cst_45 [0] : vector<32x256xf32> to vector<256xf32>
    %83 = vector.shape_cast %82 : vector<256xf32> to vector<1x256xf32>
    %cst_46 = arith.constant 3.200000e+01 : f32
    %84 = vector.broadcast %cst_46 : f32 to vector<1x256xf32>
    %85 = arith.divf %83, %84 : vector<1x256xf32>
    %c2 = arith.constant 2 : index
    %c0_47 = arith.constant 0 : index
    %86 = memref.load %arg1[%c2, %c0_47] : memref<5x2xf32, #tpu.memory_space<smem>>
    %87 = vector.broadcast %86 : f32 to vector<1x256xf32>
    %88 = arith.mulf %87, %85 : vector<1x256xf32>
    %c2_48 = arith.constant 2 : index
    %c1_49 = arith.constant 1 : index
    %89 = memref.load %arg1[%c2_48, %c1_49] : memref<5x2xf32, #tpu.memory_space<smem>>
    %90 = vector.broadcast %89 : f32 to vector<1x256xf32>
    %91 = arith.addf %88, %90 : vector<1x256xf32>
    %92 = math.tanh %91 : vector<1x256xf32>
    %cst_50 = arith.constant 2.000000e+01 : f32
    %93 = vector.broadcast %cst_50 : f32 to vector<1x256xf32>
    %94 = arith.mulf %93, %92 : vector<1x256xf32>
    %cst_51 = arith.constant 3.000000e+01 : f32
    %95 = vector.broadcast %cst_51 : f32 to vector<1x256xf32>
    %96 = arith.addf %95, %94 : vector<1x256xf32>
    %97 = vector.broadcast %96 : vector<1x256xf32> to vector<32x256xf32>
    %98 = arith.mulf %97, %80 : vector<32x256xf32>
    %99 = math.sin %98 : vector<32x256xf32>
    %c160 = arith.constant 160 : index
    %c0_52 = arith.constant 0 : index
    %100 = vector.load %arg3[%c160, %c0_52] : memref<200x128xf32, #tpu.memory_space<vmem>>, vector<32x32xf32>
    %cst_53 = arith.constant dense<0.000000e+00> : vector<32x256xf32>
    %101 = tpu.matmul %100, %99, %cst_53 {dimension_numbers = #tpu.dot_dimension_numbers<[1], [0], [0], [1], [0, 0, 1, 1], [], []>} : vector<32x32xf32>, vector<32x256xf32>, vector<32x256xf32> -> vector<32x256xf32>
    %c96_54 = arith.constant 96 : index
    %c0_55 = arith.constant 0 : index
    %102 = vector.load %arg4[%c96_54, %c0_55] : memref<136x1xf32, #tpu.memory_space<vmem>>, vector<32x1xf32>
    %103 = vector.broadcast %102 : vector<32x1xf32> to vector<32x256xf32>
    %104 = arith.addf %101, %103 : vector<32x256xf32>
    %105 = math.absf %104 : vector<32x256xf32>
    %cst_56 = arith.constant dense<0.000000e+00> : vector<256xf32>
    %106 = vector.multi_reduction <add>, %105, %cst_56 [0] : vector<32x256xf32> to vector<256xf32>
    %107 = vector.shape_cast %106 : vector<256xf32> to vector<1x256xf32>
    %cst_57 = arith.constant 3.200000e+01 : f32
    %108 = vector.broadcast %cst_57 : f32 to vector<1x256xf32>
    %109 = arith.divf %107, %108 : vector<1x256xf32>
    %c3 = arith.constant 3 : index
    %c0_58 = arith.constant 0 : index
    %110 = memref.load %arg1[%c3, %c0_58] : memref<5x2xf32, #tpu.memory_space<smem>>
    %111 = vector.broadcast %110 : f32 to vector<1x256xf32>
    %112 = arith.mulf %111, %109 : vector<1x256xf32>
    %c3_59 = arith.constant 3 : index
    %c1_60 = arith.constant 1 : index
    %113 = memref.load %arg1[%c3_59, %c1_60] : memref<5x2xf32, #tpu.memory_space<smem>>
    %114 = vector.broadcast %113 : f32 to vector<1x256xf32>
    %115 = arith.addf %112, %114 : vector<1x256xf32>
    %116 = math.tanh %115 : vector<1x256xf32>
    %cst_61 = arith.constant 2.000000e+01 : f32
    %117 = vector.broadcast %cst_61 : f32 to vector<1x256xf32>
    %118 = arith.mulf %117, %116 : vector<1x256xf32>
    %cst_62 = arith.constant 3.000000e+01 : f32
    %119 = vector.broadcast %cst_62 : f32 to vector<1x256xf32>
    %120 = arith.addf %119, %118 : vector<1x256xf32>
    %121 = vector.broadcast %120 : vector<1x256xf32> to vector<32x256xf32>
    %122 = arith.mulf %121, %104 : vector<32x256xf32>
    %123 = math.sin %122 : vector<32x256xf32>
    %c192 = arith.constant 192 : index
    %c0_63 = arith.constant 0 : index
    %124 = vector.load %arg3[%c192, %c0_63] : memref<200x128xf32, #tpu.memory_space<vmem>>, vector<1x32xf32>
    %cst_64 = arith.constant dense<0.000000e+00> : vector<1x256xf32>
    %125 = tpu.matmul %124, %123, %cst_64 {dimension_numbers = #tpu.dot_dimension_numbers<[1], [0], [0], [1], [0, 0, 1, 1], [], []>} : vector<1x32xf32>, vector<32x256xf32>, vector<1x256xf32> -> vector<1x256xf32>
    %c128_65 = arith.constant 128 : index
    %c0_66 = arith.constant 0 : index
    %126 = vector.load %arg4[%c128_65, %c0_66] : memref<136x1xf32, #tpu.memory_space<vmem>>, vector<1x1xf32>
    %127 = vector.broadcast %126 : vector<1x1xf32> to vector<1x256xf32>
    %128 = arith.addf %125, %127 : vector<1x256xf32>
    %129 = math.absf %128 : vector<1x256xf32>
    %cst_67 = arith.constant dense<0.000000e+00> : vector<256xf32>
    %130 = vector.multi_reduction <add>, %129, %cst_67 [0] : vector<1x256xf32> to vector<256xf32>
    %131 = vector.shape_cast %130 : vector<256xf32> to vector<1x256xf32>
    %cst_68 = arith.constant 1.000000e+00 : f32
    %132 = vector.broadcast %cst_68 : f32 to vector<1x256xf32>
    %133 = arith.divf %131, %132 : vector<1x256xf32>
    %c4 = arith.constant 4 : index
    %c0_69 = arith.constant 0 : index
    %134 = memref.load %arg1[%c4, %c0_69] : memref<5x2xf32, #tpu.memory_space<smem>>
    %135 = vector.broadcast %134 : f32 to vector<1x256xf32>
    %136 = arith.mulf %135, %133 : vector<1x256xf32>
    %c4_70 = arith.constant 4 : index
    %c1_71 = arith.constant 1 : index
    %137 = memref.load %arg1[%c4_70, %c1_71] : memref<5x2xf32, #tpu.memory_space<smem>>
    %138 = vector.broadcast %137 : f32 to vector<1x256xf32>
    %139 = arith.addf %136, %138 : vector<1x256xf32>
    %140 = math.tanh %139 : vector<1x256xf32>
    %cst_72 = arith.constant 2.000000e+01 : f32
    %141 = vector.broadcast %cst_72 : f32 to vector<1x256xf32>
    %142 = arith.mulf %141, %140 : vector<1x256xf32>
    %cst_73 = arith.constant 3.000000e+01 : f32
    %143 = vector.broadcast %cst_73 : f32 to vector<1x256xf32>
    %144 = arith.addf %143, %142 : vector<1x256xf32>
    %145 = arith.mulf %144, %128 : vector<1x256xf32>
    %146 = math.sin %145 : vector<1x256xf32>
    %c0_74 = arith.constant 0 : index
    %c0_75 = arith.constant 0 : index
    %147 = vector.load %arg5[%c0_74, %c0_75] : memref<1x256xf32, #tpu.memory_space<vmem>>, vector<1x256xf32>
    tpu.vector_store %arg5[%c0_74, %c0_75], %146 {strides = array<i32>} : memref<1x256xf32, #tpu.memory_space<vmem>>, vector<1x256xf32>,
    return
  }
  func.func @transform_0(%arg0: i32) -> (i32, i32) {
    %c0_i32 = arith.constant 0 : i32
    %c0_i32_0 = arith.constant 0 : i32
    %c0_i32_1 = arith.constant 0 : i32
    return %c0_i32, %c0_i32_0 : i32, i32
  }
  func.func @transform_1(%arg0: i32) -> (i32, i32) {
    %c0_i32 = arith.constant 0 : i32
    %c0_i32_0 = arith.constant 0 : i32
    return %c0_i32, %arg0 : i32, i32
  }
  func.func @transform_2(%arg0: i32) -> (i32, i32) {
    %c0_i32 = arith.constant 0 : i32
    %c0_i32_0 = arith.constant 0 : i32
    %c0_i32_1 = arith.constant 0 : i32
    return %c0_i32, %c0_i32_0 : i32, i32
  }
  func.func @transform_3(%arg0: i32) -> (i32, i32) {
    %c0_i32 = arith.constant 0 : i32
    %c0_i32_0 = arith.constant 0 : i32
    %c0_i32_1 = arith.constant 0 : i32
    return %c0_i32, %c0_i32_0 : i32, i32
  }
  func.func @transform_4(%arg0: i32) -> (i32, i32) {
    %c0_i32 = arith.constant 0 : i32
    %c0_i32_0 = arith.constant 0 : i32
    return %c0_i32, %arg0 : i32, i32
  }
}

</mosaic_0001>

<bundles_post_ra>
// kernel: _forward_jit.1
= control target key start
LH: loop header
LB: loop body
LE: loop exit
PB: predicated region body
PF: predicated region fallthrough
CT: control target
= control target key end

     0   :  { %9 = vsyncpa [#allocation6], 0  ;;  %s12103_s0 = inlined_call_operand.vmem [shape: f32[5,2], index: 0, kind: input, shape index: {}]   ;;  %s12104_s1 = inlined_call_operand.vmem [shape: f32[2,256], index: 1, kind: input, shape index: {}]   ;;  %s12105_s2 = inlined_call_operand.hbm [shape: f32[200,128], index: 2, kind: input, shape index: {}]   ;;  %s12106_s3 = inlined_call_operand.vmem [shape: f32[136,1], index: 3, kind: input, shape index: {}]   ;;  %s12107_s4 = inlined_call_operand.hbm [shape: f32[1,256], index: 4, kind: output, shape index: {}]  }
   0x1   :  { %10 = vsyncpa [#allocation4], 0 }
   0x2   :  { %11 = vsyncpa [#allocation5], 0  ;;  %s17_s17 = sshll.u32 %s12103_s0, 4  ;;  %s27_s20 = sshll.u32 %s12105_s2, 4  ;;  %s18_s17 = int_to_ptr.vmem [resolvable:$true] %s17_s17  ;;  %s28_s20 = int_to_ptr.hbm [resolvable:$true] %s27_s20 }
   0x3   :  { %s7723_s21 = smov [#allocation3]   ;;  %s7724_s22 = smov [#allocation7]  }
   0x4   :  { %20 = dma.vmem_to_smem %s18_s17, 128, %s7723_s21, [#allocation6]  }
   0x5   :  { %s29_s23 = sshll.u32 %s7724_s22, 4  ;;  %s7725_s24 = smov 128   ;;  %s30_s23 = int_to_ptr.vmem [resolvable:$true] %s29_s23 }
   0x6   :  { %s7726_s25 = smov 8  }
   0x7   :  { %35 = dma.hbm_to_vmem [thread:$0]  %s28_s20, 3200, %s30_s23, [#allocation4], %s7725_s24, %s7725_s24, %s7726_s25  }
   0x8   :  { %7717 = dma.done.wait [#allocation6], 128  }
   0x9   :  { %7718 = vsyncadd [#allocation6], 4294967168 }
   0xa   :  { %7719 = dma.done.wait [#allocation4], 3200  }
   0xb   :  { %7720 = vsyncadd [#allocation4], 4294964096 }
   0xc   :  { %46 = sfence }
   0xd   :  { %v52_v0 = vld [vmem:[#allocation7 + $0x8] sm:$0xff]  ;;  %v51_v1 = vld [vmem:[#allocation7] sm:$0xff]  ;;  %v7727_v2 = vmov 0   ;;  %v75_v3 = vld [vmem:[#allocation7 + $0x18] sm:$0xff]  ;;  %s8308_s5 = sld [smem:[#allocation3 + $0x1]]  ;;  %s7735_s14 = smov [#allocation8]  }
   0xe   :  { %7623 = vset.pattern.permute.xlu1 %v7727_v2  ;;  %7622 = vset.pattern.permute.xlu0 %v7727_v2  ;;  %v74_v4 = vld [vmem:[#allocation7 + $0x10] sm:$0xff]  ;;  %v1367_v5 = vld [vmem:[%s12106_s3 + $0x10] sm:$0xff]  ;;  %v1368_v6 = vld [vmem:[%s12106_s3 + $0x18] sm:$0xff]  ;;  %s9202_s6 = sld [smem:[#allocation3 + $0x80]]  ;;  %s7407_s15 = sshll.u32 %s7735_s14, 4  ;;  %s7408_s15 = int_to_ptr.vmem [resolvable:$true] %s7407_s15 }
   0xf   :  { %60 = vperm.xlu0 %7622, %v52_v0   ;;  %55 = vperm.xlu1 %7623, %v51_v1   ;;  %v2769_v7 = vld [vmem:[%s12106_s3 + $0x28] sm:$0xff]  ;;  %v2770_v8 = vld [vmem:[%s12106_s3 + $0x30] sm:$0xff]  ;;  %v4301_v9 = vld [vmem:[%s12106_s3 + $0x40] sm:$0xff]  ;;  %s9204_s7 = sld [smem:[#allocation3 + $0x81]]  ;;  %s7409_s18 = sshll.u32 %s12107_s4, 4  ;;  %s7410_s18 = int_to_ptr.hbm [resolvable:$true] %s7409_s18 }
  0x10   :  { %7624 = vset.pattern.permute.xlu2 %v7727_v2  ;;  %v4302_v10 = vld [vmem:[%s12106_s3 + $0x48] sm:$0xff]  ;;  %v4304_v11 = vld [vmem:[%s12106_s3 + $0x58] sm:$0xff]  ;;  %v5627_v12 = vld [vmem:[%s12106_s3 + $0x60] sm:$0xff]  ;;  %s10125_s8 = sld [smem:[#allocation3 + $0x100]] }
  0x11   :  { %v5629_v13 = vld [vmem:[%s12106_s3 + $0x70] sm:$0xff]  ;;  %v5630_v14 = vld [vmem:[%s12106_s3 + $0x78] sm:$0xff]  ;;  %v47_v15 = vld [vmem:[%s12104_s1] sm:$0xf]  ;;  %s10127_s9 = sld [smem:[#allocation3 + $0x101]] }
  0x12   :  { %v48_v16 = vadd.f32 1.0, %v47_v15  ;;  %s11011_s10 = sld [smem:[#allocation3 + $0x180]] }
  0x13   :  { %s11013_s11 = sld [smem:[#allocation3 + $0x181]] }
  0x14   :  { %v49_v17 = vmul.f32 0.5, %v48_v16  ;;  %v7731_v16 = vmov 2102212464   ;;  %s11884_s12 = sld [smem:[#allocation3 + $0x200]] }
  0x15   :  { %s11886_s13 = sld [smem:[#allocation3 + $0x201]] }
  0x16   :  { %v50_v18 = vadd.f32 1.0, %v49_v17 }
  0x17   :  { %83 = vperm.xlu0 %7622, %v75_v3   ;;  %78 = vperm.xlu1 %7623, %v74_v4  }
  0x18   :  { %1344 = vst [vmem:[#allocation1] ss:$4 sm:$0xff] %v50_v18  ;;  %v64_v20 = vperm.slane %v50_v18, 0  ;;  %v65_v21 = vperm.slane %v50_v18, 2  ;;  %v86_v23 = vperm.slane %v50_v18, 1  ;;  %v87_v24 = vperm.slane %v50_v18, 3 }
  0x1a   :  { %v68_v25 = vperm.slane %v64_v20, 0  ;;  %v69_v26 = vperm.slane %v65_v21, 0  ;;  %v90_v27 = vperm.slane %v86_v23, 1  ;;  %v91_v28 = vperm.slane %v87_v24, 1 }
  0x1f   :  { %1381 = vperm.xlu0 %7622, %v1367_v5   ;;  %1386 = vperm.xlu1 %7623, %v1368_v6  }
  0x27   :  { %2779 = vperm.xlu0 %7622, %v2769_v7   ;;  %2784 = vperm.xlu1 %7623, %v2770_v8   ;;  %v7728_v7 = vmov 683565275  }
  0x2f   :  { %4307 = vperm.xlu0 %7622, %v4301_v9   ;;  %4312 = vperm.xlu1 %7623, %v4302_v10   ;;  %v7729_v9 = vmov 2475754826  }
  0x37   :  { %4322 = vperm.xlu0 %7622, %v4304_v11   ;;  %5633 = vperm.xlu1 %7623, %v5627_v12  }
  0x3f   :  { %5643 = vperm.xlu0 %7622, %v5629_v13   ;;  %5648 = vperm.xlu1 %7623, %v5630_v14   ;;  %v7730_v13 = vmov 2131351028  }
  0x81   :  { %v61_v19 = vpop.permute.xlu0 %60  ;;  %v56_v22 = vpop.permute.xlu1 %55 }
  0x82   :  { %v72_v29 = vmul.f32 %v68_v25, %v61_v19  ;;  %v73_v30 = vmul.f32 %v69_v26, %v61_v19  ;;  %v71_v31 = vmul.f32 %v69_v26, %v56_v22  ;;  %v70_v38 = vmul.f32 %v68_v25, %v56_v22 }
  0x83   :  { %v7732_v19 = vmov 920167782   ;;  %v7733_v22 = vmov 1326507024  }
  0x89   :  { %v84_v32 = vpop.permute.xlu0 %83  ;;  %v79_v33 = vpop.permute.xlu1 %78 }
  0x8a   :  { %v94_v34 = vmul.f32 %v90_v27, %v84_v32  ;;  %v95_v35 = vmul.f32 %v91_v28, %v84_v32  ;;  %v92_v36 = vmul.f32 %v90_v27, %v79_v33  ;;  %v93_v37 = vmul.f32 %v91_v28, %v79_v33 }
  0x8c   :  { %v7803_v39 = vadd.f32 %v94_v34, %v72_v29  ;;  %v7805_v40 = vadd.f32 %v95_v35, %v73_v30  ;;  %v7807_v41 = vadd.f32 %v93_v37, %v71_v31  ;;  %v7809_v42 = vadd.f32 %v92_v36, %v70_v38 }
  0x8e   :  { %v410_v43 = vand.u32 2147483647, %v7803_v39  ;;  %v413_v44 = vand.u32 2139095040, %v7803_v39  ;;  %v565_v45 = vand.u32 2147483647, %v7805_v40  ;;  %v568_v46 = vand.u32 2139095040, %v7805_v40 }
  0x8f   :  { %v103_v51 = vand.u32 2139095040, %v7809_v42 }
  0x90   :  { %v414_v47 = vshrl.u32 %v413_v44, 23  ;;  %v417_v48 = vand.u32 8388607, %v410_v43  ;;  %v569_v49 = vshrl.u32 %v568_v46, 23  ;;  %v572_v50 = vand.u32 8388607, %v565_v45 }
  0x91   :  { %v104_v58 = vshrl.u32 %v103_v51, 23 }
  0x92   :  { %v7426_v52 = vadd.s32 4294967169, %v414_v47  ;;  %v418_v53 = vor.u32 8388608, %v417_v48  ;;  %v7429_v54 = vadd.s32 4294967169, %v569_v49  ;;  %v573_v55 = vor.u32 8388608, %v572_v50 }
  0x93   :  { %v7824_v0 = vadd.s32 4294967169, %v104_v58 }
  0x94   :  { %v420_v56 = vadd.s32 1, %v7426_v52  ;;  %v575_v57 = vadd.s32 1, %v7429_v54  ;;  %v7820_v59 = vshll.u32 %v418_v53, 8  ;;  %v7822_v61 = vshll.u32 %v573_v55, 8 }
  0x96   :  { %vm421_vm0 = vcmp.gt.s32.totalorder %v420_v56, 0  ;;  %vm576_vm1 = vcmp.gt.s32.totalorder %v575_v57, 0  ;;  %v7827_v3 = vand.u32 65535, %v7820_v59  ;;  %v7830_v4 = vshrl.u32 %v7820_v59, 16 }
  0x97   :  { %v422_v60 = vsel %vm421_vm0, %v420_v56, 0  ;;  %v577_v63 = vsel %vm576_vm1, %v575_v57, 0  ;;  %v7839_v11 = vand.u32 65535, %v7822_v61 }
  0x98   :  { %v424_v62 = vand.u32 31, %v422_v60  ;;  %v7832_v5 = vand.u32 31, %v577_v63  ;;  %v7834_v6 = vshrl.u32 %v422_v60, 5  ;;  %v7881_v56 = vshrl.u32 %v577_v63, 5 }
  0x9a   :  { %v425_v1 = vsub.s32 32, %v424_v62  ;;  %v427_v8 = vshll.u32 %v7728_v7, %v424_v62  ;;  %v430_v10 = vshll.u32 %v7729_v9, %v424_v62  ;;  %v433_v15 = vshll.u32 %v7730_v13, %v424_v62 }
  0x9b   :  { %v436_v18 = vshll.u32 %v7731_v16, %v424_v62  ;;  %v439_v21 = vshll.u32 %v7732_v19, %v424_v62  ;;  %v7850_v27 = vsub.s32 32, %v7832_v5  ;;  %vm442_vm2 = vcmp.lt.s32.totalorder %v7834_v6, 1 }
  0x9c   :  { %v428_v12 = vshrl.u32 %v7729_v9, %v425_v1  ;;  %v431_v14 = vshrl.u32 %v7730_v13, %v425_v1  ;;  %v434_v17 = vshrl.u32 %v7731_v16, %v425_v1  ;;  %v437_v20 = vshrl.u32 %v7732_v19, %v425_v1 }
  0x9d   :  { %v440_v23 = vshrl.u32 %v7733_v22, %v425_v1  ;;  %vm443_vm3 = vcmp.lt.s32.totalorder %v7834_v6, 2  ;;  %v426_v30 = vshrl.u32 %v7728_v7, %v425_v1  ;;  %vm445_vm4 = vcmp.lt.s32.totalorder %v7834_v6, 4 }
  0x9e   :  { %v429_v24 = vor.u32 %v428_v12, %v427_v8  ;;  %v432_v25 = vor.u32 %v431_v14, %v430_v10  ;;  %v435_v26 = vor.u32 %v434_v17, %v433_v15  ;;  %v438_v28 = vor.u32 %v437_v20, %v436_v18 }
  0x9f   :  { %v441_v29 = vor.u32 %v440_v23, %v439_v21  ;;  %vm444_vm5 = vcmp.lt.s32.totalorder %v7834_v6, 3  ;;  %v582_v35 = vshll.u32 %v7728_v7, %v7832_v5  ;;  %v583_v44 = vshrl.u32 %v7729_v9, %v7850_v27 }
  0xa0   :  { %v450_v31 = vsel %vm442_vm2, %v429_v24, %v432_v25  ;;  %v454_v32 = vsel %vm442_vm2, %v432_v25, %v435_v26  ;;  %v451_v33 = vsel %vm445_vm4, %v438_v28, 920167782  ;;  %v447_v36 = vsel %vm445_vm4, %v435_v26, 2102212464 }
  0xa1   :  { %v455_v34 = vsel %vm445_vm4, %v441_v29, 1326507024  ;;  %v452_v37 = vsel %vm444_vm5, %v435_v26, %v451_v33  ;;  %v585_v48 = vshll.u32 %v7729_v9, %v7832_v5  ;;  %v586_v49 = vshrl.u32 %v7730_v13, %v7850_v27 }
  0xa2   :  { %v456_v38 = vsel %vm444_vm5, %v438_v28, %v455_v34  ;;  %v453_v46 = vsel %vm443_vm3, %v450_v31, %v452_v37  ;;  %v446_v54 = vsel %vm442_vm2, %v426_v30, %v429_v24  ;;  %v448_v55 = vsel %vm444_vm5, %v432_v25, %v447_v36 }
  0xa3   :  { %v457_v47 = vsel %vm443_vm3, %v454_v32, %v456_v38  ;;  %v483_v52 = vand.u32 65535, %v453_v46  ;;  %v484_v53 = vshrl.u32 %v453_v46, 16  ;;  %v7883_v57 = vor.u32 %v583_v44, %v582_v35 }
  0xa4   :  { %v461_v50 = vand.u32 65535, %v457_v47  ;;  %v462_v51 = vshrl.u32 %v457_v47, 16  ;;  %v7887_v62 = vor.u32 %v586_v49, %v585_v48  ;;  %v589_v1 = vshrl.u32 %v7731_v16, %v7850_v27 }
  0xa5   :  { %v486_v10 = vmul.u32 %v484_v53, %v7827_v3  ;;  %v487_v12 = vmul.u32 %v483_v52, %v7830_v4  ;;  %v588_v63 = vshll.u32 %v7730_v13, %v7832_v5  ;;  %v485_v17 = vmul.u32 %v483_v52, %v7827_v3 }
  0xa6   :  { %v464_v58 = vmul.u32 %v462_v51, %v7827_v3  ;;  %v465_v60 = vmul.u32 %v461_v50, %v7830_v4  ;;  %v463_v8 = vmul.u32 %v461_v50, %v7827_v3  ;;  %v466_v14 = vmul.u32 %v462_v51, %v7830_v4 }
  0xa7   :  { %v488_v18 = vmul.u32 %v484_v53, %v7830_v4  ;;  %v489_v24 = vshll.u32 %v486_v10, 16  ;;  %v491_v26 = vshll.u32 %v487_v12, 16  ;;  %v7899_v28 = vor.u32 %v589_v1, %v588_v63 }
  0xa8   :  { %v467_v15 = vshll.u32 %v464_v58, 16  ;;  %v468_v20 = vshrl.u32 %v464_v58, 16  ;;  %v469_v21 = vshll.u32 %v465_v60, 16  ;;  %v470_v23 = vshrl.u32 %v465_v60, 16 }
  0xa9   :  { %vm493_vm7 = vc.u32 %v485_v17, %v489_v24  ;;  %v495_v30 = vadd.s32 %v489_v24, %v485_v17  ;;  %v592_v31 = vshrl.u32 %v7732_v19, %v7850_v27  ;;  %v591_v4 = vshll.u32 %v7731_v16, %v7832_v5 }
  0xaa   :  { %vm471_vm6 = vc.u32 %v463_v8, %v467_v15  ;;  %v473_v25 = vadd.s32 %v467_v15, %v463_v8  ;;  %v494_v3 = vsel %vm493_vm7, 1, %v7727_v2  ;;  %v594_v35 = vshll.u32 %v7732_v19, %v7832_v5 }
  0xab   :  { %v472_v29 = vsel %vm471_vm6, 1, %v7727_v2  ;;  %v496_v34 = vadd.s32 %v494_v3, %v488_v18  ;;  %vm497_vm9 = vc.u32 %v495_v30, %v491_v26  ;;  %v593_v38 = vor.u32 %v592_v31, %v591_v4 }
  0xac   :  { %v474_v32 = vadd.s32 %v472_v29, %v466_v14  ;;  %vm475_vm8 = vc.u32 %v473_v25, %v469_v21  ;;  %v498_v37 = vsel %vm497_vm9, 1, %v7727_v2  ;;  %v595_v44 = vshrl.u32 %v7733_v22, %v7850_v27 }
  0xad   :  { %v476_v33 = vsel %vm475_vm8, 1, %v7727_v2  ;;  %v490_v46 = vshrl.u32 %v486_v10, 16  ;;  %v492_v47 = vshrl.u32 %v487_v12, 16  ;;  %v7913_v48 = vadd.s32 %v495_v30, %v491_v26 }
  0xae   :  { %v478_v36 = vadd.s32 %v476_v33, %v474_v32  ;;  %v500_v49 = vadd.s32 %v498_v37, %v496_v34  ;;  %v596_v51 = vor.u32 %v595_v44, %v594_v35  ;;  %vm597_vm10 = vcmp.lt.s32.totalorder %v7881_v56, 1 }
  0xaf   :  { %vm600_vm11 = vcmp.lt.s32.totalorder %v7881_v56, 4  ;;  %vm599_vm12 = vcmp.lt.s32.totalorder %v7881_v56, 3  ;;  %v605_v5 = vsel %vm597_vm10, %v7883_v57, %v7887_v62  ;;  %vm598_vm13 = vcmp.lt.s32.totalorder %v7881_v56, 2 }
  0xb0   :  { %v479_v50 = vadd.s32 %v478_v36, %v468_v20  ;;  %v501_v52 = vadd.s32 %v500_v49, %v490_v46  ;;  %v606_v53 = vsel %vm600_vm11, %v593_v38, 920167782  ;;  %v609_v1 = vsel %vm597_vm10, %v7887_v62, %v7899_v28 }
  0xb1   :  { %v607_v60 = vsel %vm599_vm12, %v7899_v28, %v606_v53  ;;  %v449_v8 = vsel %vm443_vm3, %v446_v54, %v448_v55  ;;  %v610_v63 = vsel %vm600_vm11, %v596_v51, 1326507024  ;;  %v615_v15 = vshrl.u32 %v7822_v61, 16 }
  0xb2   :  { %v7924_v58 = vadd.s32 %v479_v50, %v470_v23  ;;  %v502_v10 = vadd.s32 %v501_v52, %v492_v47  ;;  %v608_v12 = vsel %vm598_vm13, %v605_v5, %v607_v60  ;;  %v611_v14 = vsel %vm599_vm12, %v593_v38, %v610_v63 }
  0xb3   :  { %v638_v17 = vand.u32 65535, %v608_v12  ;;  %v612_v6 = vsel %vm598_vm13, %v609_v1, %v611_v14  ;;  %v639_v54 = vshrl.u32 %v608_v12, 16  ;;  %v110_v55 = vadd.s32 1, %v7824_v0 }
  0xb4   :  { %vm505_vm14 = vc.u32 %v7924_v58, %v7913_v48  ;;  %v506_v18 = vadd.s32 1, %v502_v10  ;;  %v503_v20 = vmul.u32 %v7820_v59, %v449_v8  ;;  %v616_v21 = vand.u32 65535, %v612_v6 }
  0xb5   :  { %v617_v23 = vshrl.u32 %v612_v6, 16  ;;  %v641_v25 = vmul.u32 %v639_v54, %v7839_v11  ;;  %v642_v26 = vmul.u32 %v638_v17, %v615_v15  ;;  %v640_v32 = vmul.u32 %v638_v17, %v7839_v11 }
  0xb6   :  { %v507_v24 = vsel %vm505_vm14, %v506_v18, %v502_v10  ;;  %v620_v31 = vmul.u32 %v616_v21, %v615_v15  ;;  %v643_v3 = vmul.u32 %v639_v54, %v615_v15  ;;  %vm111_vm15 = vcmp.gt.s32.totalorder %v110_v55, 0 }
  0xb7   :  { %v508_v29 = vadd.s32 %v507_v24, %v503_v20  ;;  %v619_v30 = vmul.u32 %v617_v23, %v7839_v11  ;;  %v644_v4 = vshll.u32 %v641_v25, 16  ;;  %v618_v0 = vmul.u32 %v616_v21, %v7839_v11 }
  0xb8   :  { %v621_v34 = vmul.u32 %v617_v23, %v615_v15  ;;  %v624_v35 = vshll.u32 %v620_v31, 16  ;;  %v646_v36 = vshll.u32 %v642_v26, 16  ;;  %v100_v50 = vand.u32 2147483647, %v7809_v42 }
  0xb9   :  { %v509_v33 = vadd.s32 536870912, %v508_v29  ;;  %v622_v59 = vshll.u32 %v619_v30, 16  ;;  %vm648_vm0 = vc.u32 %v640_v32, %v644_v4  ;;  %v650_v37 = vadd.s32 %v644_v4, %v640_v32 }
  0xba   :  { %v649_v46 = vsel %vm648_vm0, 1, %v7727_v2  ;;  %v602_v11 = vsel %vm600_vm11, %v7899_v28, 2102212464  ;;  %v581_v5 = vshrl.u32 %v7728_v7, %v7850_v27  ;;  %v112_v1 = vsel %vm111_vm15, %v110_v55, 0 }
  0xbb   :  { %v510_v38 = vshrl.u32 %v509_v33, 30  ;;  %vm626_vm1 = vc.u32 %v618_v0, %v622_v59  ;;  %v628_v44 = vadd.s32 %v622_v59, %v618_v0  ;;  %v651_v49 = vadd.s32 %v649_v46, %v643_v3 }
  0xbc   :  { %v627_v47 = vsel %vm626_vm1, 1, %v7727_v2  ;;  %vm652_vm2 = vc.u32 %v650_v37, %v646_v36  ;;  %v623_v10 = vshrl.u32 %v619_v30, 16  ;;  %v601_v14 = vsel %vm597_vm10, %v581_v5, %v7883_v57 }
  0xbd   :  { %v511_v51 = vshll.u32 %v510_v38, 30  ;;  %v629_v52 = vadd.s32 %v627_v47, %v621_v34  ;;  %vm630_vm3 = vc.u32 %v628_v44, %v624_v35  ;;  %v653_v60 = vsel %vm652_vm2, 1, %v7727_v2 }
  0xbe   :  { %v631_v53 = vsel %vm630_vm3, 1, %v7727_v2  ;;  %v655_v63 = vadd.s32 %v653_v60, %v651_v49  ;;  %v603_v28 = vsel %vm599_vm12, %v7887_v62, %v602_v11  ;;  %v645_v15 = vshrl.u32 %v641_v25, 16 }
  0xbf   :  { %v512_v8 = vsub.s32 %v508_v29, %v511_v51  ;;  %v633_v12 = vadd.s32 %v631_v53, %v629_v52  ;;  %v114_v27 = vand.u32 31, %v112_v1  ;;  %v625_v18 = vshrl.u32 %v620_v31, 16 }
  0xc0   :  { %v647_v54 = vshrl.u32 %v642_v26, 16  ;;  %v656_v55 = vadd.s32 %v655_v63, %v645_v15  ;;  %v107_v20 = vand.u32 8388607, %v100_v50  ;;  %v534_v23 = vsub.s32 4, %v510_v38 }
  0xc1   :  { %vm513_vm4 = vcmp.lt.s32.totalorder %v512_v8, 0  ;;  %v514_v17 = vsub.s32 0, %v512_v8  ;;  %v634_v6 = vadd.s32 %v633_v12, %v623_v10  ;;  %v7974_v57 = vsub.s32 32, %v114_v27 }
  0xc2   :  { %v604_v62 = vsel %vm598_vm13, %v601_v14, %v603_v28  ;;  %v7978_v25 = vadd.s32 %v650_v37, %v646_v36  ;;  %v657_v30 = vadd.s32 %v656_v55, %v647_v54  ;;  %vm7982_vm5 = vcmp.le.f32.partialorder %v410_v43, 0.7853982 }
  0xc3   :  { %v515_v21 = vsel %vm513_vm4, %v514_v17, %v512_v8  ;;  %v7972_v24 = vadd.s32 %v634_v6, %v625_v18  ;;  %vm412_vm6 = vcmp.lt.s32.totalorder %v7803_v39, 0  ;;  %v108_v3 = vor.u32 8388608, %v107_v20 }
  0xc4   :  { %v516_v29 = vclz %v515_v21  ;;  %v661_v32 = vadd.s32 1, %v657_v30  ;;  %v504_v56 = vadd.s32 %v7913_v48, %v7924_v58  ;;  %v535_v4 = vsel %vm412_vm6, %v534_v23, %v510_v38 }
  0xc5   :  { %vm660_vm7 = vc.u32 %v7972_v24, %v7978_v25  ;;  %v658_v33 = vmul.u32 %v7822_v61, %v604_v62  ;;  %v118_v43 = vshrl.u32 %v7729_v9, %v7974_v57  ;;  %v7996_v34 = vshrl.u32 %v112_v1, 5 }
  0xc6   :  { %v7427_v31 = vadd.s32 4294967294, %v516_v29  ;;  %v662_v0 = vsel %vm660_vm7, %v661_v32, %v657_v30  ;;  %v117_v59 = vshll.u32 %v7728_v7, %v114_v27  ;;  %v121_v37 = vshrl.u32 %v7730_v13, %v7974_v57 }
  0xc7   :  { %v663_v36 = vadd.s32 %v662_v0, %v658_v33  ;;  %v124_v48 = vshrl.u32 %v7731_v16, %v7974_v57  ;;  %v120_v61 = vshll.u32 %v7729_v9, %v114_v27  ;;  %v123_v44 = vshll.u32 %v7730_v13, %v114_v27 }
  0xc8   :  { %vm7428_vm8 = vcmp.lt.s32.totalorder %v7427_v31, 0  ;;  %v119_v47 = vor.u32 %v118_v43, %v117_v59  ;;  %v126_v49 = vshll.u32 %v7731_v16, %v114_v27  ;;  %v127_v51 = vshrl.u32 %v7732_v19, %v7974_v57 }
  0xc9   :  { %v519_v35 = vsel %vm7428_vm8, 0, %v7427_v31  ;;  %v664_v46 = vadd.s32 536870912, %v663_v36  ;;  %v130_v53 = vshrl.u32 %v7733_v22, %v7974_v57  ;;  %v122_v1 = vor.u32 %v121_v37, %v120_v61 }
  0xca   :  { %v520_v58 = vsub.s32 32, %v519_v35  ;;  %v524_v38 = vsub.s32 4294967266, %v519_v35  ;;  %v521_v11 = vshll.u32 %v512_v8, %v519_v35  ;;  %v125_v10 = vor.u32 %v124_v48, %v123_v44 }
  0xcb   :  { %v665_v60 = vshrl.u32 %v664_v46, 30  ;;  %v128_v12 = vor.u32 %v127_v51, %v126_v49  ;;  %v537_v28 = vsel %vm7982_vm5, 0, %v535_v4  ;;  %v129_v15 = vshll.u32 %v7732_v19, %v114_v27 }
  0xcc   :  { %v522_v52 = vshrl.u32 %v504_v56, %v520_v58  ;;  %v525_v5 = vadd.s32 127, %v524_v38  ;;  %vm132_vm9 = vcmp.lt.s32.totalorder %v7996_v34, 1  ;;  %vm135_vm10 = vcmp.lt.s32.totalorder %v7996_v34, 4 }
  0xcd   :  { %v666_v17 = vshll.u32 %v665_v60, 30  ;;  %v8015_v8 = vshll.u32 %v108_v3, 8  ;;  %v131_v6 = vor.u32 %v130_v53, %v129_v15  ;;  %vm134_vm11 = vcmp.lt.s32.totalorder %v7996_v34, 3 }
  0xce   :  { %v523_v63 = vor.u32 %v522_v52, %v521_v11  ;;  %v526_v14 = vshll.u32 %v525_v5, 23  ;;  %v141_v54 = vsel %vm135_vm10, %v128_v12, 920167782  ;;  %v554_v55 = vadd.s32 3, %v537_v28 }
  0xcf   :  { %v667_v20 = vsub.s32 %v663_v36, %v666_v17  ;;  %v140_v21 = vsel %vm132_vm9, %v119_v47, %v122_v1  ;;  %v142_v27 = vsel %vm134_vm11, %v125_v10, %v141_v54  ;;  %vm567_vm12 = vcmp.lt.s32.totalorder %v7805_v40, 0 }
  0xd0   :  { %v527_v18 = vor.u32 4788187, %v526_v14  ;;  %v530_v29 = vcvt.s32.f32 %v523_v63  ;;  %vm133_vm14 = vcmp.lt.s32.totalorder %v7996_v34, 2  ;;  %v149_v30 = vand.u32 65535, %v8015_v8 }
  0xd1   :  { %vm668_vm13 = vcmp.lt.s32.totalorder %v667_v20, 0  ;;  %v669_v62 = vsub.s32 0, %v667_v20  ;;  %v8029_v32 = vsel %vm133_vm14, %v140_v21, %v142_v27  ;;  %v144_v3 = vsel %vm132_vm9, %v122_v1, %v125_v10 }
  0xd2   :  { %v528_v23 = vand.u32 2147483647, %v527_v18  ;;  %v145_v56 = vsel %vm135_vm10, %v131_v6, 1326507024  ;;  %v8035_v4 = vand.u32 3, %v554_v55  ;;  %v659_v33 = vadd.s32 %v7978_v25, %v7972_v24 }
  0xd3   :  { %v670_v43 = vsel %vm668_vm13, %v669_v62, %v667_v20  ;;  %v8039_v0 = vand.u32 3, %v537_v28  ;;  %v116_v36 = vshrl.u32 %v7728_v7, %v7974_v57  ;;  %v146_v37 = vsel %vm134_vm11, %v128_v12, %v145_v56 }
  0xd4   :  { %v531_v31 = vmul.f32 %v530_v29, %v528_v23  ;;  %v671_v35 = vclz %v670_v43  ;;  %v689_v48 = vsub.s32 4, %v665_v60  ;;  %v137_v58 = vsel %vm135_vm10, %v125_v10, 2102212464 }
  0xd5   :  { %v147_v38 = vsel %vm133_vm14, %v144_v3, %v146_v37  ;;  %v173_v24 = vand.u32 65535, %v8029_v32  ;;  %v8059_v49 = vsel %vm132_vm9, %v116_v36, %v119_v47  ;;  %v150_v51 = vshrl.u32 %v8015_v8, 16 }
  0xd6   :  { %v532_v59 = vxor.u32 2147483648, %v531_v31  ;;  %v7430_v61 = vadd.s32 4294967294, %v671_v35  ;;  %v151_v44 = vand.u32 65535, %v147_v38  ;;  %v152_v46 = vshrl.u32 %v147_v38, 16 }
  0xd7   :  { %v174_v11 = vshrl.u32 %v8029_v32, 16  ;;  %v138_v5 = vsel %vm134_vm11, %v122_v1, %v137_v58  ;;  %v8069_v26 = vsel %vm567_vm12, %v689_v48, %v665_v60  ;;  %v8073_v47 = vmul.u32 %v173_v24, %v150_v51 }
  0xd8   :  { %v533_v25 = vsel %vm412_vm6, %v532_v59, %v531_v31  ;;  %vm7431_vm15 = vcmp.lt.s32.totalorder %v7430_v61, 0  ;;  %v154_v53 = vmul.u32 %v152_v46, %v149_v30  ;;  %v8071_v12 = vmul.u32 %v151_v44, %v150_v51 }
  0xd9   :  { %v8055_v57 = vsel %vm7982_vm5, %v7803_v39, %v533_v25  ;;  %v674_v10 = vsel %vm7431_vm15, 0, %v7430_v61  ;;  %v153_v15 = vmul.u32 %v151_v44, %v149_v30  ;;  %v156_v18 = vmul.u32 %v152_v46, %v150_v51 }
  0xda   :  { %v538_v52 = vmul.f32 %v8055_v57, %v8055_v57  ;;  %v675_v28 = vsub.s32 32, %v674_v10  ;;  %v679_v17 = vsub.s32 4294967266, %v674_v10  ;;  %v157_v6 = vshll.u32 %v154_v53, 16 }
  0xdb   :  { %v8075_v54 = vmul.u32 %v174_v11, %v149_v30  ;;  %v676_v21 = vshll.u32 %v667_v20, %v674_v10  ;;  %v159_v60 = vshll.u32 %v8071_v12, 16  ;;  %vm8080_vm1 = vcmp.le.f32.partialorder %v565_v45, 0.7853982 }
  0xdc   :  { %v539_v63 = vmul.f32 -0.001358992, %v538_v52  ;;  %v546_v14 = vmul.f32 -0.00019511016, %v538_v52  ;;  %v677_v27 = vshrl.u32 %v659_v33, %v675_v28  ;;  %v680_v23 = vadd.s32 127, %v679_v17 }
  0xdd   :  { %vm161_vm0 = vc.u32 %v153_v15, %v157_v6  ;;  %v163_v29 = vadd.s32 %v157_v6, %v153_v15  ;;  %v179_v20 = vshll.u32 %v8075_v54, 16  ;;  %vm560_vm3 = vcmp.eq.s32.totalorder %v8035_v4, 2 }
  0xde   :  { %v540_v1 = vadd.f32 0.041655596, %v539_v63  ;;  %v547_v55 = vadd.f32 0.008332121, %v546_v14  ;;  %v678_v3 = vor.u32 %v677_v27, %v676_v21  ;;  %v162_v56 = vsel %vm161_vm0, 1, %v7727_v2 }
  0xdf   :  { %v681_v43 = vshll.u32 %v680_v23, 23  ;;  %v164_v59 = vadd.s32 %v162_v56, %v156_v18  ;;  %vm165_vm2 = vc.u32 %v163_v29, %v159_v60  ;;  %v175_v37 = vmul.u32 %v173_v24, %v149_v30 }
  0xe0   :  { %v541_v62 = vmul.f32 %v540_v1, %v538_v52  ;;  %v548_v31 = vmul.f32 %v547_v55, %v538_v52  ;;  %v166_v36 = vsel %vm165_vm2, 1, %v7727_v2  ;;  %vm557_vm4 = vcmp.eq.s32.totalorder %v8035_v4, 0 }
  0xe1   :  { %v682_v45 = vor.u32 4788187, %v681_v43  ;;  %vm1178_vm5 = vcmp.eq.s32.totalorder %v8039_v0, 0  ;;  %v158_v48 = vshrl.u32 %v154_v53, 16  ;;  %v168_v58 = vadd.s32 %v166_v36, %v164_v59 }
  0xe2   :  { %v542_v33 = vadd.f32 -0.4999988, %v541_v62  ;;  %v549_v35 = vadd.f32 -0.16666654, %v548_v31  ;;  %v178_v38 = vmul.u32 %v174_v11, %v150_v51  ;;  %vm556_vm6 = vcmp.lt.s32.totalorder %v8035_v4, 2 }
  0xe3   :  { %v685_v44 = vcvt.s32.f32 %v678_v3  ;;  %vm1177_vm7 = vcmp.lt.s32.totalorder %v8039_v0, 2  ;;  %vm183_vm8 = vc.u32 %v175_v37, %v179_v20  ;;  %vm553_vm9 = vweird.f32 %v7803_v39 }
  0xe4   :  { %v543_v25 = vmul.f32 %v542_v33, %v538_v52  ;;  %v550_v61 = vmul.f32 %v549_v35, %v538_v52  ;;  %v683_v46 = vand.u32 2147483647, %v682_v45  ;;  %v181_v30 = vshll.u32 %v8073_v47, 16 }
  0xe5   :  { %v184_v24 = vsel %vm183_vm8, 1, %v7727_v2  ;;  %v185_v10 = vadd.s32 %v179_v20, %v175_v37  ;;  %v169_v14 = vadd.s32 %v168_v58, %v158_v48  ;;  %vm1181_vm10 = vcmp.eq.s32.totalorder %v8039_v0, 2 }
  0xe6   :  { %v544_v63 = vadd.f32 1.0, %v543_v25  ;;  %v551_v53 = vadd.f32 1.0, %v550_v61  ;;  %v186_v51 = vadd.s32 %v184_v24, %v178_v38  ;;  %v686_v11 = vmul.f32 %v685_v44, %v683_v46 }
  0xe7   :  { %v139_v52 = vsel %vm133_vm14, %v8059_v49, %v138_v5  ;;  %vm187_vm11 = vc.u32 %v185_v10, %v181_v30  ;;  %v160_v17 = vshrl.u32 %v8071_v12, 16  ;;  %v692_v1 = vsel %vm8080_vm1, 0, %v8069_v26 }
  0xe8   :  { %v552_v28 = vmul.f32 %v551_v53, %v8055_v57  ;;  %v561_v15 = vxor.u32 2147483648, %v544_v63  ;;  %v188_v18 = vsel %vm187_vm11, 1, %v7727_v2  ;;  %v687_v6 = vxor.u32 2147483648, %v686_v11 }
  0xe9   :  { %v180_v55 = vshrl.u32 %v8075_v54, 16  ;;  %v190_v21 = vadd.s32 %v188_v18, %v186_v51  ;;  %v8106_v23 = vadd.s32 %v169_v14, %v160_v17  ;;  %v182_v34 = vshrl.u32 %v8073_v47, 16 }
  0xea   :  { %v558_v27 = vxor.u32 2147483648, %v552_v28  ;;  %v8109_v49 = vadd.s32 %v185_v10, %v181_v30  ;;  %v562_v57 = vsel %vm560_vm3, %v561_v15, %v552_v28  ;;  %v688_v5 = vsel %vm567_vm12, %v687_v6, %v686_v11 }
  0xeb   :  { %v191_v12 = vadd.s32 %v190_v21, %v180_v55  ;;  %v258_v60 = vand.u32 2139095040, %v7807_v41  ;;  %v691_v54 = vsel %vm8080_vm1, %v7805_v40, %v688_v5  ;;  %v1183_v29 = vsel %vm1181_vm10, %v561_v15, %v552_v28 }
  0xec   :  { %v559_v26 = vsel %vm557_vm4, %v544_v63, %v558_v27  ;;  %v1180_v47 = vsel %vm1178_vm5, %v544_v63, %v558_v27  ;;  %v693_v31 = vmul.f32 %v691_v54, %v691_v54  ;;  %vm195_vm12 = vc.u32 %v8106_v23, %v8109_v49 }
  0xed   :  { %v563_v62 = vsel %vm556_vm6, %v559_v26, %v562_v57  ;;  %v1184_v3 = vsel %vm1177_vm7, %v1180_v47, %v1183_v29  ;;  %v192_v56 = vadd.s32 %v191_v12, %v182_v34  ;;  %v259_v59 = vshrl.u32 %v258_v60, 23 }
  0xee   :  { %v8131_v43 = vsel %vm553_vm9, nan, %v563_v62  ;;  %v8135_v32 = vsel %vm553_vm9, nan, %v1184_v3  ;;  %v694_v20 = vmul.f32 -0.001358992, %v693_v31  ;;  %v701_v4 = vmul.f32 -0.00019511016, %v693_v31 }
  0xef   :  { %722 = vst [vmem:[#allocation2 + $0x18] sm:$0xff] %v8131_v43  ;;  %v196_v33 = vadd.s32 1, %v192_v56  ;;  %v193_v0 = vmul.u32 %v8015_v8, %v139_v52  ;;  %v7423_v35 = vadd.s32 4294967169, %v259_v59  ;;  %v709_v39 = vadd.s32 3, %v692_v1 }
  0xf0   :  { %1342 = vst [vmem:[#allocation2 + $0x8] sm:$0xff] %v8135_v32  ;;  %v695_v36 = vadd.f32 0.041655596, %v694_v20  ;;  %v702_v37 = vadd.f32 0.008332121, %v701_v4  ;;  %v1330_v44 = vand.u32 3, %v692_v1  ;;  %vm708_vm14 = vweird.f32 %v7805_v40 }
  0xf1   :  { %v197_v45 = vsel %vm195_vm12, %v196_v33, %v192_v56  ;;  %v265_v58 = vadd.s32 1, %v7423_v35  ;;  %v255_v61 = vand.u32 2147483647, %v7807_v41  ;;  %v710_v63 = vand.u32 3, %v709_v39 }
  0xf2   :  { %v198_v48 = vadd.s32 %v197_v45, %v193_v0  ;;  %v696_v38 = vmul.f32 %v695_v36, %v693_v31  ;;  %v703_v25 = vmul.f32 %v702_v37, %v693_v31  ;;  %vm1331_vm15 = vcmp.lt.s32.totalorder %v1330_v44, 2 }
  0xf3   :  { %vm266_vm13 = vcmp.gt.s32.totalorder %v265_v58, 0  ;;  %v262_v11 = vand.u32 8388607, %v255_v61  ;;  %vm1332_vm0 = vcmp.eq.s32.totalorder %v1330_v44, 0  ;;  %vm711_vm1 = vcmp.lt.s32.totalorder %v710_v63, 2 }
  0xf4   :  { %v199_v46 = vadd.s32 536870912, %v198_v48  ;;  %v697_v30 = vadd.f32 -0.4999988, %v696_v38  ;;  %v704_v24 = vadd.f32 -0.16666654, %v703_v25  ;;  %v267_v10 = vsel %vm266_vm13, %v265_v58, 0 }
  0xf5   :  { %v269_v8 = vand.u32 31, %v267_v10  ;;  %vm712_vm2 = vcmp.eq.s32.totalorder %v710_v63, 0  ;;  %vm1335_vm3 = vcmp.eq.s32.totalorder %v1330_v44, 2  ;;  %vm715_vm4 = vcmp.eq.s32.totalorder %v710_v63, 2 }
  0xf6   :  { %v8143_v53 = vshrl.u32 %v199_v46, 30  ;;  %v698_v14 = vmul.f32 %v697_v30, %v693_v31  ;;  %v705_v51 = vmul.f32 %v704_v24, %v693_v31  ;;  %v263_v55 = vor.u32 8388608, %v262_v11 }
  0xf7   :  { %v8149_v17 = vsub.s32 32, %v269_v8  ;;  %v8151_v27 = vshrl.u32 %v267_v10, 5  ;;  %v272_v34 = vshll.u32 %v7728_v7, %v269_v8  ;;  %v275_v12 = vshll.u32 %v7729_v9, %v269_v8 }
  0xf8   :  { %v201_v52 = vshll.u32 %v8143_v53, 30  ;;  %v699_v28 = vadd.f32 1.0, %v698_v14  ;;  %v706_v15 = vadd.f32 1.0, %v705_v51  ;;  %v278_v4 = vshll.u32 %v7730_v13, %v269_v8 }
  0xf9   :  { %v273_v5 = vshrl.u32 %v7729_v9, %v8149_v17  ;;  %v276_v60 = vshrl.u32 %v7730_v13, %v8149_v17  ;;  %v279_v29 = vshrl.u32 %v7731_v16, %v8149_v17  ;;  %v282_v56 = vshrl.u32 %v7732_v19, %v8149_v17 }
  0xfa   :  { %v202_v18 = vsub.s32 %v198_v48, %v201_v52  ;;  %v707_v6 = vmul.f32 %v706_v15, %v691_v54  ;;  %v716_v1 = vxor.u32 2147483648, %v699_v28  ;;  %v281_v33 = vshll.u32 %v7731_v16, %v269_v8 }
  0xfb   :  { %v274_v37 = vor.u32 %v273_v5, %v272_v34  ;;  %v8178_v45 = vor.u32 %v276_v60, %v275_v12  ;;  %v284_v48 = vshll.u32 %v7732_v19, %v269_v8  ;;  %v285_v58 = vshrl.u32 %v7733_v22, %v8149_v17 }
  0xfc   :  { %vm203_vm5 = vcmp.lt.s32.totalorder %v202_v18, 0  ;;  %v204_v21 = vsub.s32 0, %v202_v18  ;;  %v713_v57 = vxor.u32 2147483648, %v707_v6  ;;  %v717_v26 = vsel %vm715_vm4, %v716_v1, %v707_v6 }
  0xfd   :  { %v1337_v54 = vsel %vm1335_vm3, %v716_v1, %v707_v6  ;;  %v283_v39 = vor.u32 %v282_v56, %v281_v33  ;;  %v194_v38 = vadd.s32 %v8109_v49, %v8106_v23  ;;  %v280_v40 = vor.u32 %v279_v29, %v278_v4 }
  0xfe   :  { %v205_v47 = vsel %vm203_vm5, %v204_v21, %v202_v18  ;;  %v714_v62 = vsel %vm712_vm2, %v699_v28, %v713_v57  ;;  %v1334_v31 = vsel %vm1332_vm0, %v699_v28, %v713_v57  ;;  %v286_v44 = vor.u32 %v285_v58, %v284_v48 }
  0xff   :  { %v206_v3 = vclz %v205_v47  ;;  %v718_v59 = vsel %vm711_vm1, %v714_v62, %v717_v26  ;;  %v1338_v20 = vsel %vm1331_vm15, %v1334_v31, %v1337_v54  ;;  %vm287_vm7 = vcmp.lt.s32.totalorder %v8151_v27, 1 }
 0x100   :  { %v8171_v0 = vsel %vm708_vm14, nan, %v718_v59  ;;  %v8175_v35 = vsel %vm708_vm14, nan, %v1338_v20  ;;  %v8187_v46 = vshll.u32 %v263_v55, 8  ;;  %vm288_vm8 = vcmp.lt.s32.totalorder %v8151_v27, 2 }
 0x101   :  { %v7421_v36 = vadd.s32 4294967294, %v206_v3  ;;  %723 = vst [vmem:[#allocation2 + $0x10] sm:$0xff] %v8171_v0  ;;  %vm290_vm9 = vcmp.lt.s32.totalorder %v8151_v27, 4  ;;  %vm289_vm10 = vcmp.lt.s32.totalorder %v8151_v27, 3  ;;  %v295_v23 = vsel %vm287_vm7, %v274_v37, %v8178_v45 }
 0x102   :  { %1343 = vst [vmem:[#allocation2 + $0x20] sm:$0xff] %v8175_v35  ;;  %v296_v49 = vsel %vm290_vm9, %v283_v39, 920167782  ;;  %v299_v51 = vsel %vm287_vm7, %v8178_v45, %v280_v40  ;;  %v300_v52 = vsel %vm290_vm9, %v286_v44, 1326507024  ;;  %vm102_vm11 = vcmp.lt.s32.totalorder %v7809_v42, 0 }
 0x103   :  { %vm7422_vm6 = vcmp.lt.s32.totalorder %v7421_v36, 0  ;;  %v297_v14 = vsel %vm289_vm10, %v280_v40, %v296_v49  ;;  %v304_v55 = vand.u32 65535, %v8187_v46  ;;  %v305_v21 = vshrl.u32 %v8187_v46, 16 }
 0x104   :  { %v209_v25 = vsel %vm7422_vm6, 0, %v7421_v36  ;;  %v298_v11 = vsel %vm288_vm8, %v295_v23, %v297_v14  ;;  %vm8215_vm12 = vcmp.le.f32.partialorder %v100_v50, 0.7853982  ;;  %v224_v26 = vsub.s32 4, %v8143_v53 }
 0x105   :  { %v210_v30 = vsub.s32 32, %v209_v25  ;;  %v214_v24 = vsub.s32 4294967266, %v209_v25  ;;  %v211_v10 = vshll.u32 %v202_v18, %v209_v25  ;;  %v301_v18 = vsel %vm289_vm10, %v283_v39, %v300_v52 }
 0x106   :  { %v328_v6 = vand.u32 65535, %v298_v11  ;;  %v302_v1 = vsel %vm288_vm8, %v299_v51, %v301_v18  ;;  %v329_v34 = vshrl.u32 %v298_v11, 16  ;;  %v271_v54 = vshrl.u32 %v7728_v7, %v8149_v17 }
 0x107   :  { %v212_v63 = vshrl.u32 %v194_v38, %v210_v30  ;;  %v215_v8 = vadd.s32 127, %v214_v24  ;;  %v306_v12 = vand.u32 65535, %v302_v1  ;;  %v307_v60 = vshrl.u32 %v302_v1, 16 }
 0x108   :  { %v331_v47 = vmul.u32 %v329_v34, %v304_v55  ;;  %v332_v29 = vmul.u32 %v328_v6, %v305_v21  ;;  %v291_v50 = vsel %vm287_vm7, %v271_v54, %v274_v37  ;;  %v330_v59 = vmul.u32 %v328_v6, %v304_v55 }
 0x109   :  { %v213_v28 = vor.u32 %v212_v63, %v211_v10  ;;  %v216_v15 = vshll.u32 %v215_v8, 23  ;;  %v309_v3 = vmul.u32 %v307_v60, %v304_v55  ;;  %v310_v56 = vmul.u32 %v306_v12, %v305_v21 }
 0x10a   :  { %v333_v20 = vmul.u32 %v329_v34, %v305_v21  ;;  %v334_v4 = vshll.u32 %v331_v47, 16  ;;  %v308_v36 = vmul.u32 %v306_v12, %v304_v55  ;;  %v311_v39 = vmul.u32 %v307_v60, %v305_v21 }
 0x10b   :  { %v217_v5 = vor.u32 4788187, %v216_v15  ;;  %v220_v31 = vcvt.s32.f32 %v213_v28  ;;  %v312_v48 = vshll.u32 %v309_v3, 16  ;;  %v314_v58 = vshll.u32 %v310_v56, 16 }
 0x10c   :  { %v336_v38 = vshll.u32 %v332_v29, 16  ;;  %vm338_vm13 = vc.u32 %v330_v59, %v334_v4  ;;  %v340_v17 = vadd.s32 %v334_v4, %v330_v59  ;;  %v292_v24 = vsel %vm290_vm9, %v280_v40, 2102212464 }
 0x10d   :  { %v218_v62 = vand.u32 2147483647, %v217_v5  ;;  %vm316_vm14 = vc.u32 %v308_v36, %v312_v48  ;;  %v318_v44 = vadd.s32 %v312_v48, %v308_v36  ;;  %v339_v30 = vsel %vm338_vm13, 1, %v7727_v2 }
 0x10e   :  { %v317_v37 = vsel %vm316_vm14, 1, %v7727_v2  ;;  %v341_v10 = vadd.s32 %v339_v30, %v333_v20  ;;  %vm342_vm15 = vc.u32 %v340_v17, %v336_v38  ;;  %v335_v51 = vshrl.u32 %v331_v47, 16 }
 0x10f   :  { %v221_v33 = vmul.f32 %v220_v31, %v218_v62  ;;  %v319_v49 = vadd.s32 %v317_v37, %v311_v39  ;;  %vm320_vm0 = vc.u32 %v318_v44, %v314_v58  ;;  %v343_v63 = vsel %vm342_vm15, 1, %v7727_v2 }
 0x110   :  { %v321_v14 = vsel %vm320_vm0, 1, %v7727_v2  ;;  %v345_v11 = vadd.s32 %v343_v63, %v341_v10  ;;  %v293_v52 = vsel %vm289_vm10, %v8178_v45, %v292_v24  ;;  %v313_v28 = vshrl.u32 %v309_v3, 16 }
 0x111   :  { %v222_v25 = vxor.u32 2147483648, %v221_v33  ;;  %v323_v15 = vadd.s32 %v321_v14, %v319_v49  ;;  %v225_v18 = vsel %vm102_vm11, %v224_v26, %v8143_v53  ;;  %v337_v6 = vshrl.u32 %v332_v29, 16  ;;  %v1345_v14 = vld.sshfl [vmem:[#allocation1] sm:$0xff pattern:$0x73625140] }
 0x112   :  { %v346_v1 = vadd.s32 %v345_v11, %v335_v51  ;;  %v315_v34 = vshrl.u32 %v310_v56, 16  ;;  %v294_v12 = vsel %vm288_vm8, %v291_v50, %v293_v52  ;;  %v344_v45 = vadd.s32 %v340_v17, %v336_v38  ;;  %v1346_v51 = vld.sshfl [vmem:[#allocation1 + $0x8] sm:$0xff pattern:$0x73625140]  ;;  %1349 = vst [vmem:[#allocation2 + $0x40] sm:$0x3] %v1345_v14 }
 0x113   :  { %v223_v23 = vsel %vm102_vm11, %v222_v25, %v221_v33  ;;  %v324_v5 = vadd.s32 %v323_v15, %v313_v28  ;;  %v227_v31 = vsel %vm8215_vm12, 0, %v225_v18  ;;  %v348_v26 = vmul.u32 %v8187_v46, %v294_v12  ;;  %1350 = vst [vmem:[#allocation2 + $0x38] sm:$0x3] %v1346_v51 }
 0x114   :  { %v226_v8 = vsel %vm8215_vm12, %v7809_v42, %v223_v23  ;;  %v347_v60 = vadd.s32 %v346_v1, %v337_v6  ;;  %v244_v27 = vadd.s32 3, %v227_v31  ;;  %vm243_vm6 = vweird.f32 %v7809_v42  ;;  %v8262_v42 = vld [vmem:[#allocation7 + $0x20] sm:$0xff] }
 0x115   :  { %v228_v40 = vmul.f32 %v226_v8, %v226_v8  ;;  %v325_v62 = vadd.s32 %v324_v5, %v315_v34  ;;  %v868_v15 = vand.u32 3, %v227_v31  ;;  %vm1402_vm11 = vcmask 1041408  }
 0x116   :  { %v351_v3 = vadd.s32 1, %v347_v60  ;;  %v245_v57 = vand.u32 3, %v244_v27  ;;  %vm1389_vm12 = vcmask 277504   ;;  %vm257_vm13 = vcmp.lt.s32.totalorder %v7807_v41, 0 }
 0x117   :  { %v229_v55 = vmul.f32 -0.001358992, %v228_v40  ;;  %v236_v21 = vmul.f32 -0.00019511016, %v228_v40  ;;  %vm350_vm1 = vc.u32 %v325_v62, %v344_v45  ;;  %vm870_vm8 = vcmp.eq.s32.totalorder %v868_v15, 0 }
 0x118   :  { %v352_v29 = vsel %vm350_vm1, %v351_v3, %v347_v60  ;;  %vm246_vm2 = vcmp.lt.s32.totalorder %v245_v57, 2  ;;  %vm247_vm3 = vcmp.eq.s32.totalorder %v245_v57, 0  ;;  %vm250_vm4 = vcmp.eq.s32.totalorder %v245_v57, 2 }
 0x119   :  { %v230_v54 = vadd.f32 0.041655596, %v229_v55  ;;  %v237_v47 = vadd.f32 0.008332121, %v236_v21  ;;  %v353_v4 = vadd.s32 %v352_v29, %v348_v26  ;;  %vm873_vm9 = vcmp.eq.s32.totalorder %v868_v15, 2  ;;  %v1366_v26 = vld [vmem:[%s12106_s3 + $0x8] sm:$0xff] }
 0x11a   :  { %vm869_vm10 = vcmp.lt.s32.totalorder %v868_v15, 2  ;;  %v1359_v12 = vld [vmem:[#allocation2 + $0x40] sm:$0x3]  ;;  %vm256_vm14 = vcmp.le.f32.partialorder %v255_v61, 0.7853982  ;;  %v2768_v61 = vld [vmem:[%s12106_s3 + $0x20] sm:$0xff] }
 0x11b   :  { %v231_v59 = vmul.f32 %v230_v54, %v228_v40  ;;  %v238_v53 = vmul.f32 %v237_v47, %v228_v40  ;;  %v354_v36 = vadd.s32 536870912, %v353_v4  ;;  %7444 = vmatpush.msk.msra.mxu0 %vm1402_vm11, %v1359_v12  ;;  %v1360_v47 = vld [vmem:[#allocation2 + $0x38] sm:$0x3] }
 0x11c   :  { %7449 = vmatpush.msk.msra.mxu1 %vm1402_vm11, %v1360_v47 }
 0x11d   :  { %v232_v56 = vadd.f32 -0.4999988, %v231_v59  ;;  %v239_v20 = vadd.f32 -0.16666654, %v238_v53  ;;  %v8246_v58 = vshrl.u32 %v354_v36, 30  ;;  %1421 = vmatpush.msra.mxu0 %v8135_v32 }
 0x11e   :  { %1450 = vmatpush.msra.mxu1 %v8175_v35 }
 0x11f   :  { %v233_v50 = vmul.f32 %v232_v56, %v228_v40  ;;  %v240_v33 = vmul.f32 %v239_v20, %v228_v40  ;;  %v356_v25 = vshll.u32 %v8246_v58, 30  ;;  %v349_v40 = vadd.s32 %v344_v45, %v325_v62  ;;  %v1365_v45 = vld [vmem:[%s12106_s3] sm:$0xff] }
 0x120   :  { %1371 = vperm.xlu2 %7624, %v1365_v45   ;;  %v379_v35 = vsub.s32 4, %v8246_v58 }
 0x121   :  { %v234_v39 = vadd.f32 1.0, %v233_v50  ;;  %v241_v48 = vadd.f32 1.0, %v240_v33  ;;  %v357_v46 = vsub.s32 %v353_v4, %v356_v25  ;;  %v1362_v33 = vld [vmem:[#allocation7 + $0x28] sm:$0xff] }
 0x122   :  { %v380_v4 = vsel %vm257_vm13, %v379_v35, %v8246_v58 }
 0x123   :  { %v242_v38 = vmul.f32 %v241_v48, %v226_v8  ;;  %v251_v17 = vxor.u32 2147483648, %v234_v39  ;;  %vm358_vm5 = vcmp.lt.s32.totalorder %v357_v46, 0  ;;  %v359_v37 = vsub.s32 0, %v357_v46 }
 0x124   :  { %v382_v36 = vsel %vm256_vm14, 0, %v380_v4 }
 0x125   :  { %v248_v44 = vxor.u32 2147483648, %v242_v38  ;;  %v252_v24 = vsel %vm250_vm4, %v251_v17, %v242_v38  ;;  %v360_v49 = vsel %vm358_vm5, %v359_v37, %v357_v46  ;;  %v875_v5 = vsel %vm873_vm9, %v251_v17, %v242_v38 }
 0x126   :  { %v361_v63 = vclz %v360_v49  ;;  %v399_v17 = vadd.s32 3, %v382_v36  ;;  %vm398_vm5 = vweird.f32 %v7807_v41 }
 0x127   :  { %v249_v30 = vsel %vm247_vm3, %v234_v39, %v248_v44  ;;  %v872_v34 = vsel %vm870_vm8, %v234_v39, %v248_v44 }
 0x128   :  { %v253_v10 = vsel %vm246_vm2, %v249_v30, %v252_v24  ;;  %v7424_v8 = vadd.s32 4294967294, %v361_v63  ;;  %v876_v54 = vsel %vm869_vm10, %v872_v34, %v875_v5  ;;  %1376 = vperm.xlu2 %7624, %v1366_v26   ;;  %v1022_v30 = vand.u32 3, %v382_v36  ;;  %v1363_v24 = vld [vmem:[#allocation7 + $0x30] sm:$0xff] }
 0x129   :  { %v254_v23 = vsel %vm243_vm6, nan, %v253_v10  ;;  %v877_v62 = vsel %vm243_vm6, nan, %v876_v54  ;;  %v400_v37 = vand.u32 3, %v399_v17  ;;  %v2771_v10 = vld [vmem:[%s12106_s3 + $0x38] sm:$0xff]  ;;  %v1382_v54 = vpop.permute.xlu0 %1381 }
 0x12a   :  { %720 = vst [vmem:[#allocation2 + $0x30] sm:$0xff] %v254_v23  ;;  %vm7425_vm7 = vcmp.lt.s32.totalorder %v7424_v8, 0  ;;  %1422 = vmatpush.msra.mxu0 %v877_v62  ;;  %vm1023_vm15 = vcmp.lt.s32.totalorder %v1022_v30, 2  ;;  %vm1024_vm0 = vcmp.eq.s32.totalorder %v1022_v30, 0  ;;  %vm1027_vm4 = vcmp.eq.s32.totalorder %v1022_v30, 2 }
 0x12b   :  { %v364_v11 = vsel %vm7425_vm7, 0, %v7424_v8  ;;  %1340 = vst [vmem:[#allocation2 + $0x48] sm:$0xff] %v877_v62  ;;  %vm401_vm1 = vcmp.lt.s32.totalorder %v400_v37, 2  ;;  %vm402_vm2 = vcmp.eq.s32.totalorder %v400_v37, 0  ;;  %vm405_vm3 = vcmp.eq.s32.totalorder %v400_v37, 2 }
 0x12c   :  { %v365_v52 = vsub.s32 32, %v364_v11  ;;  %v369_v28 = vsub.s32 4294967266, %v364_v11  ;;  %v366_v18 = vshll.u32 %v357_v46, %v364_v11  ;;  %1423 = vmatpush.msra.mxu0 %v8131_v43  ;;  %v1507_v30 = vstv %s8308_s5 }
 0x12e   :  { %v367_v6 = vshrl.u32 %v349_v40, %v365_v52  ;;  %v370_v1 = vadd.s32 127, %v369_v28  ;;  %1424 = vmatpush.msra.mxu0 %v254_v23 }
 0x12f   :  { %7445 = vmatmul.msk.f32.vlgmr.msra.gmra.mxu0 %vm1389_vm12, %v8262_v42 }
 0x130   :  { %v368_v55 = vor.u32 %v367_v6, %v366_v18  ;;  %v371_v21 = vshll.u32 %v370_v1, 23  ;;  %2774 = vperm.xlu2 %7624, %v2768_v61   ;;  %v1364_v18 = vld [vmem:[#allocation7 + $0x38] sm:$0xff]  ;;  %v7012_v1 = vld [vmem:[%s12106_s3 + $0x80] sm:$0x1] }
 0x131   :  { %v4303_v6 = vld [vmem:[%s12106_s3 + $0x50] sm:$0xff] }
 0x132   :  { %v372_v60 = vor.u32 4788187, %v371_v21  ;;  %v375_v3 = vcvt.s32.f32 %v368_v55 }
 0x134   :  { %v373_v31 = vand.u32 2147483647, %v372_v60  ;;  %v7734_v60 = vmov 32.0  }
 0x135   :  { %7625 = vrcp.f32 %v7734_v60 }
 0x136   :  { %v376_v59 = vmul.f32 %v375_v3, %v373_v31 }
 0x137   :  { %7446 = vmatmul.msk.f32.gmra.mxu0 %vm1389_vm12, %v1362_v33 }
 0x138   :  { %v377_v53 = vxor.u32 2147483648, %v376_v59  ;;  %2789 = vperm.xlu2 %7624, %v2771_v10  }
 0x13a   :  { %v378_v32 = vsel %vm257_vm13, %v377_v53, %v376_v59  ;;  %v1387_v53 = vpop.permute.xlu1 %1386 }
 0x13b   :  { %v381_v29 = vsel %vm256_vm14, %v7807_v41, %v378_v32  ;;  %v5628_v41 = vld [vmem:[%s12106_s3 + $0x68] sm:$0xff]  ;;  %v7626_v31 = vpop.eup %7625  ;;  %s8306_s3 = sld [smem:[#allocation3]] }
 0x13c   :  { %v383_v43 = vmul.f32 %v381_v29, %v381_v29  ;;  %v1494_v26 = vmul.f32 32.0, %v7626_v31  ;;  %vm1498_vm6 = vweird.f32 %v7626_v31 }
 0x13e   :  { %v384_v56 = vmul.f32 -0.001358992, %v383_v43  ;;  %v391_v20 = vmul.f32 -0.00019511016, %v383_v43 }
 0x13f   :  { %7447 = vmatmul.msk.f32.gmra.mxu0 %vm1389_vm12, %v1363_v24 }
 0x140   :  { %v385_v27 = vadd.f32 0.041655596, %v384_v56  ;;  %v392_v50 = vadd.f32 0.008332121, %v391_v20  ;;  %4317 = vperm.xlu2 %7624, %v4303_v6   ;;  %v1495_v20 = vsub.f32 1.0, %v1494_v26 }
 0x142   :  { %v386_v39 = vmul.f32 %v385_v27, %v383_v43  ;;  %v393_v48 = vmul.f32 %v392_v50, %v383_v43  ;;  %v1496_v50 = vmul.f32 %v7626_v31, %v1495_v20 }
 0x144   :  { %v387_v57 = vadd.f32 -0.4999988, %v386_v39  ;;  %v394_v38 = vadd.f32 -0.16666654, %v393_v48  ;;  %v1497_v39 = vadd.f32 %v7626_v31, %v1496_v50 }
 0x146   :  { %v388_v25 = vmul.f32 %v387_v57, %v383_v43  ;;  %v395_v44 = vmul.f32 %v394_v38, %v383_v43  ;;  %v8310_v38 = vsel %vm1498_vm6, %v7626_v31, %v1497_v39 }
 0x147   :  { %7448 = vmatmul.msk.f32.gmra.mxu0 %vm1389_vm12, %v1364_v18 }
 0x148   :  { %v389_v46 = vadd.f32 1.0, %v388_v25  ;;  %v396_v58 = vadd.f32 1.0, %v395_v44  ;;  %5638 = vperm.xlu2 %7624, %v5628_v41   ;;  %v1503_v25 = vstv %s8306_s3 }
 0x14a   :  { %v397_v23 = vmul.f32 %v396_v58, %v381_v29  ;;  %v406_v49 = vxor.u32 2147483648, %v389_v46 }
 0x14c   :  { %v403_v63 = vxor.u32 2147483648, %v397_v23  ;;  %v407_v14 = vsel %vm405_vm3, %v406_v49, %v397_v23  ;;  %v1029_v11 = vsel %vm1027_vm4, %v406_v49, %v397_v23 }
 0x14e   :  { %v404_v8 = vsel %vm402_vm2, %v389_v46, %v403_v63  ;;  %v1026_v51 = vsel %vm1024_vm0, %v389_v46, %v403_v63 }
 0x14f   :  { %v408_v40 = vsel %vm401_vm1, %v404_v8, %v407_v14  ;;  %v1030_v52 = vsel %vm1023_vm15, %v1026_v51, %v1029_v11 }
 0x150   :  { %v409_v28 = vsel %vm398_vm5, nan, %v408_v40  ;;  %v1031_v15 = vsel %vm398_vm5, nan, %v1030_v52  ;;  %7015 = vperm.xlu2 %7624, %v7012_v1  }
 0x151   :  { %721 = vst [vmem:[#allocation2] sm:$0xff] %v409_v28  ;;  %1451 = vmatpush.msra.mxu1 %v1031_v15 }
 0x152   :  { %1341 = vst [vmem:[#allocation2 + $0x28] sm:$0xff] %v1031_v15 }
 0x153   :  { %1452 = vmatpush.msra.mxu1 %v8171_v0 }
 0x155   :  { %1453 = vmatpush.msra.mxu1 %v409_v28 }
 0x156   :  { %7450 = vmatmul.msk.f32.vlgmr.msra.gmra.mxu1 %vm1389_vm12, %v8262_v42 }
 0x15e   :  { %7451 = vmatmul.msk.f32.gmra.mxu1 %vm1389_vm12, %v1362_v33 }
 0x166   :  { %7452 = vmatmul.msk.f32.gmra.mxu1 %vm1389_vm12, %v1363_v24 }
 0x16e   :  { %7453 = vmatmul.msk.f32.gmra.mxu1 %vm1389_vm12, %v1364_v18 }
 0x17a   :  { %v1372_v55 = vpop.permute.xlu2 %1371 }
 0x182   :  { %v1377_v34 = vpop.permute.xlu2 %1376 }
 0x1ac   :  { %v1426_v0 = vpop.f32.mrf.mxu0 }
 0x1ad   :  { %v8302_v47 = vadd.f32 %v1426_v0, %v1372_v55 }
 0x1af   :  { %v1467_v3 = vand.u32 2147483647, %v8302_v47 }
 0x1b4   :  { %v1429_v21 = vpop.f32.mrf.mxu0 }
 0x1b5   :  { %v8300_v12 = vadd.f32 %v1429_v21, %v1377_v34 }
 0x1b7   :  { %v1469_v45 = vand.u32 2147483647, %v8300_v12 }
 0x1b9   :  { %v1475_v32 = vadd.f32 %v1469_v45, %v1467_v3 }
 0x1bc   :  { %v1432_v5 = vpop.f32.mrf.mxu0 }
 0x1bd   :  { %v1433_v62 = vadd.f32 %v1432_v5, %v1382_v54 }
 0x1bf   :  { %v1471_v59 = vand.u32 2147483647, %v1433_v62 }
 0x1c1   :  { %v1476_v43 = vadd.f32 %v1475_v32, %v1471_v59 }
 0x1c4   :  { %v1435_v42 = vpop.f32.mrf.mxu0 }
 0x1c5   :  { %v1436_v35 = vadd.f32 %v1435_v42, %v1387_v53 }
 0x1c7   :  { %v1473_v56 = vand.u32 2147483647, %v1436_v35 }
 0x1c9   :  { %v1477_v4 = vadd.f32 %v1476_v43, %v1473_v56 }
 0x1cb   :  { %v1478_v27 = vrot.slane %v1477_v4, 4 }
 0x1cd   :  { %v1479_v33 = vadd.f32 %v1478_v27, %v1477_v4 }
 0x1cf   :  { %v1480_v36 = vrot.slane %v1479_v33, 2 }
 0x1d1   :  { %v1481_v48 = vadd.f32 %v1480_v36, %v1479_v33 }
 0x1d3   :  { %v1455_v29 = vpop.f32.mrf.mxu1  ;;  %v1482_v57 = vrot.slane %v1481_v48, 1 }
 0x1d4   :  { %v8317_v37 = vadd.f32 %v1455_v29, %v1372_v55 }
 0x1d5   :  { %v1483_v17 = vadd.f32 %v1482_v57, %v1481_v48 }
 0x1d6   :  { %v1468_v63 = vand.u32 2147483647, %v8317_v37 }
 0x1d7   :  { %v1500_v46 = vmul.f32 %v8310_v38, %v1483_v17 }
 0x1d9   :  { %v1504_v24 = vmul.f32 %v1503_v25, %v1500_v46 }
 0x1db   :  { %v1458_v61 = vpop.f32.mrf.mxu1  ;;  %v1508_v23 = vadd.f32 %v1507_v30, %v1504_v24 }
 0x1dc   :  { %v8314_v58 = vadd.f32 %v1458_v61, %v1377_v34 }
 0x1dd   :  { %7627 = vtanh.f32 %v1508_v23 }
 0x1de   :  { %v1470_v49 = vand.u32 2147483647, %v8314_v58 }
 0x1e0   :  { %v1484_v51 = vadd.f32 %v1470_v49, %v1468_v63 }
 0x1e3   :  { %v1461_v44 = vpop.f32.mrf.mxu1  ;;  %v7628_v28 = vpop.eup %7627 }
 0x1e4   :  { %v8319_v10 = vadd.f32 %v1461_v44, %v1382_v54  ;;  %v1512_v15 = vmul.f32 20.0, %v7628_v28 }
 0x1e6   :  { %v1472_v8 = vand.u32 2147483647, %v8319_v10  ;;  %v8327_v6 = vadd.f32 30.0, %v1512_v15 }
 0x1e8   :  { %v1485_v40 = vadd.f32 %v1484_v51, %v1472_v8  ;;  %v8330_v1 = vmul.f32 %v8327_v6, %v1436_v35  ;;  %v8337_v3 = vmul.f32 %v8327_v6, %v1433_v62 }
 0x1ea   :  { %v2457_v55 = vand.u32 2139095040, %v8330_v1  ;;  %v2454_v34 = vand.u32 2147483647, %v8330_v1  ;;  %v2147_v32 = vand.u32 2139095040, %v8337_v3 }
 0x1eb   :  { %v1464_v14 = vpop.f32.mrf.mxu1 }
 0x1ec   :  { %v8324_v11 = vadd.f32 %v1464_v14, %v1387_v53  ;;  %v2458_v5 = vshrl.u32 %v2457_v55, 23  ;;  %v2461_v31 = vand.u32 8388607, %v2454_v34  ;;  %v2148_v27 = vshrl.u32 %v2147_v32, 23 }
 0x1ee   :  { %v1474_v52 = vand.u32 2147483647, %v8324_v11  ;;  %v7473_v54 = vadd.s32 4294967169, %v2458_v5  ;;  %v2462_v26 = vor.u32 8388608, %v2461_v31  ;;  %v7467_v23 = vadd.s32 4294967169, %v2148_v27 }
 0x1f0   :  { %v1486_v18 = vadd.f32 %v1485_v40, %v1474_v52  ;;  %v2464_v59 = vadd.s32 1, %v7473_v54  ;;  %v8341_v4 = vshll.u32 %v2462_v26, 8  ;;  %v2154_v55 = vadd.s32 1, %v7467_v23 }
 0x1f2   :  { %v1487_v41 = vrot.slane %v1486_v18, 4  ;;  %vm2465_vm7 = vcmp.gt.s32.totalorder %v2464_v59, 0  ;;  %v2503_v24 = vand.u32 65535, %v8341_v4  ;;  %v2504_v40 = vshrl.u32 %v8341_v4, 16 }
 0x1f3   :  { %v2466_v35 = vsel %vm2465_vm7, %v2464_v59, 0  ;;  %vm2155_vm14 = vcmp.gt.s32.totalorder %v2154_v55, 0 }
 0x1f4   :  { %v1488_v0 = vadd.f32 %v1487_v41, %v1486_v18  ;;  %v2468_v29 = vand.u32 31, %v2466_v35  ;;  %v8343_v50 = vshrl.u32 %v2466_v35, 5 }
 0x1f6   :  { %v1489_v21 = vrot.slane %v1488_v0, 2  ;;  %v2469_v56 = vsub.s32 32, %v2468_v29  ;;  %v2471_v62 = vshll.u32 %v7728_v7, %v2468_v29  ;;  %v2474_v33 = vshll.u32 %v7729_v9, %v2468_v29 }
 0x1f7   :  { %v2477_v61 = vshll.u32 %v7730_v13, %v2468_v29  ;;  %v2480_v48 = vshll.u32 %v7731_v16, %v2468_v29  ;;  %vm2486_vm8 = vcmp.lt.s32.totalorder %v8343_v50, 1  ;;  %vm2489_vm9 = vcmp.lt.s32.totalorder %v8343_v50, 4 }
 0x1f8   :  { %v1490_v60 = vadd.f32 %v1489_v21, %v1488_v0  ;;  %v2472_v36 = vshrl.u32 %v7729_v9, %v2469_v56  ;;  %v2475_v39 = vshrl.u32 %v7730_v13, %v2469_v56  ;;  %v2478_v57 = vshrl.u32 %v7731_v16, %v2469_v56 }
 0x1f9   :  { %v2481_v17 = vshrl.u32 %v7732_v19, %v2469_v56  ;;  %v2484_v44 = vshrl.u32 %v7733_v22, %v2469_v56  ;;  %v2470_v14 = vshrl.u32 %v7728_v7, %v2469_v56  ;;  %vm2488_vm10 = vcmp.lt.s32.totalorder %v8343_v50, 3 }
 0x1fa   :  { %v1491_v45 = vrot.slane %v1490_v60, 1  ;;  %v2473_v46 = vor.u32 %v2472_v36, %v2471_v62  ;;  %v2479_v49 = vor.u32 %v2478_v57, %v2477_v61  ;;  %vm2487_vm13 = vcmp.lt.s32.totalorder %v8343_v50, 2 }
 0x1fb   :  { %v2482_v63 = vor.u32 %v2481_v17, %v2480_v48 }
 0x1fc   :  { %v1492_v53 = vadd.f32 %v1491_v45, %v1490_v60  ;;  %v2491_v5 = vsel %vm2489_vm9, %v2479_v49, 2102212464  ;;  %v2490_v26 = vsel %vm2486_vm8, %v2470_v14, %v2473_v46 }
 0x1fd   :  { %v2495_v52 = vsel %vm2489_vm9, %v2482_v63, 920167782 }
 0x1fe   :  { %v1501_v42 = vmul.f32 %v8310_v38, %v1492_v53  ;;  %v2496_v41 = vsel %vm2488_vm10, %v2479_v49, %v2495_v52 }
 0x200   :  { %v1505_v43 = vmul.f32 %v1503_v25, %v1501_v42  ;;  %v2483_v25 = vshll.u32 %v7732_v19, %v2468_v29 }
 0x202   :  { %v1509_v20 = vadd.f32 %v1507_v30, %v1505_v43  ;;  %v2476_v30 = vor.u32 %v2475_v39, %v2474_v33  ;;  %v2485_v8 = vor.u32 %v2484_v44, %v2483_v25 }
 0x204   :  { %7629 = vtanh.f32 %v1509_v20  ;;  %v2494_v51 = vsel %vm2486_vm8, %v2473_v46, %v2476_v30  ;;  %v2498_v28 = vsel %vm2486_vm8, %v2476_v30, %v2479_v49  ;;  %v2499_v15 = vsel %vm2489_vm9, %v2485_v8, 1326507024 }
 0x205   :  { %v2500_v0 = vsel %vm2488_vm10, %v2482_v63, %v2499_v15  ;;  %v2497_v60 = vsel %vm2487_vm13, %v2494_v51, %v2496_v41  ;;  %v2492_v43 = vsel %vm2488_vm10, %v2476_v30, %v2491_v5 }
 0x206   :  { %v2501_v54 = vsel %vm2487_vm13, %v2498_v28, %v2500_v0  ;;  %v2527_v59 = vand.u32 65535, %v2497_v60  ;;  %v2528_v53 = vshrl.u32 %v2497_v60, 16 }
 0x207   :  { %v2505_v45 = vand.u32 65535, %v2501_v54  ;;  %v2506_v31 = vshrl.u32 %v2501_v54, 16 }
 0x208   :  { %v2530_v56 = vmul.u32 %v2528_v53, %v2503_v24  ;;  %v2531_v20 = vmul.u32 %v2527_v59, %v2504_v40  ;;  %v2529_v39 = vmul.u32 %v2527_v59, %v2503_v24  ;;  %v2532_v17 = vmul.u32 %v2528_v53, %v2504_v40 }
 0x209   :  { %v2508_v32 = vmul.u32 %v2506_v31, %v2503_v24  ;;  %v2509_v35 = vmul.u32 %v2505_v45, %v2504_v40  ;;  %v2507_v27 = vmul.u32 %v2505_v45, %v2503_v24  ;;  %v2510_v62 = vmul.u32 %v2506_v31, %v2504_v40 }
 0x20a   :  { %v7630_v18 = vpop.eup %7629  ;;  %v2533_v48 = vshll.u32 %v2530_v56, 16  ;;  %v2535_v25 = vshll.u32 %v2531_v20, 16  ;;  %v2534_v28 = vshrl.u32 %v2530_v56, 16  ;;  %v2536_v5 = vshrl.u32 %v2531_v20, 16 }
 0x20b   :  { %v1513_v21 = vmul.f32 20.0, %v7630_v18  ;;  %v2511_v33 = vshll.u32 %v2508_v32, 16  ;;  %v2513_v36 = vshll.u32 %v2509_v35, 16  ;;  %v2512_v14 = vshrl.u32 %v2508_v32, 16 }
 0x20c   :  { %vm2537_vm0 = vc.u32 %v2529_v39, %v2533_v48  ;;  %v2539_v46 = vadd.s32 %v2533_v48, %v2529_v39  ;;  %v2493_v18 = vsel %vm2487_vm13, %v2490_v26, %v2492_v43  ;;  %v2514_v41 = vshrl.u32 %v2509_v35, 16 }
 0x20d   :  { %v8374_v42 = vadd.f32 30.0, %v1513_v21  ;;  %vm2515_vm15 = vc.u32 %v2507_v27, %v2511_v33  ;;  %v2517_v57 = vadd.s32 %v2511_v33, %v2507_v27  ;;  %v2538_v23 = vsel %vm2537_vm0, 1, %v7727_v2 }
 0x20e   :  { %v2516_v44 = vsel %vm2515_vm15, 1, %v7727_v2  ;;  %v2540_v24 = vadd.s32 %v2538_v23, %v2532_v17  ;;  %vm2541_vm2 = vc.u32 %v2539_v46, %v2535_v25  ;;  %v2156_v21 = vsel %vm2155_vm14, %v2154_v55, 0 }
 0x20f   :  { %v8380_v29 = vmul.f32 %v8374_v42, %v8324_v11  ;;  %v2518_v30 = vadd.s32 %v2516_v44, %v2510_v62  ;;  %vm2519_vm1 = vc.u32 %v2517_v57, %v2513_v36  ;;  %v2542_v40 = vsel %vm2541_vm2, 1, %v7727_v2 }
 0x210   :  { %v2520_v8 = vsel %vm2519_vm1, 1, %v7727_v2  ;;  %v2544_v15 = vadd.s32 %v2542_v40, %v2540_v24  ;;  %v8397_v59 = vadd.s32 %v2539_v46, %v2535_v25  ;;  %v2547_v50 = vmul.u32 %v8341_v4, %v2493_v18 }
 0x211   :  { %v2612_v61 = vand.u32 2139095040, %v8380_v29  ;;  %v2609_v49 = vand.u32 2147483647, %v8380_v29  ;;  %v2522_v51 = vadd.s32 %v2520_v8, %v2518_v30  ;;  %v2144_v55 = vand.u32 2147483647, %v8337_v3 }
 0x212   :  { %v2545_v60 = vadd.s32 %v2544_v15, %v2534_v28  ;;  %v8403_v26 = vand.u32 31, %v2156_v21  ;;  %vm2456_vm0 = vcmp.lt.s32.totalorder %v8330_v1, 0 }
 0x213   :  { %v2613_v11 = vshrl.u32 %v2612_v61, 23  ;;  %v2523_v0 = vadd.s32 %v2522_v51, %v2512_v14  ;;  %v2616_v54 = vand.u32 8388607, %v2609_v49  ;;  %v8420_v30 = vand.u32 8388607, %v2144_v55 }
 0x214   :  { %v2546_v32 = vadd.s32 %v2545_v60, %v2536_v5  ;;  %v8426_v51 = vsub.s32 32, %v8403_v26 }
 0x215   :  { %v7476_v63 = vadd.s32 4294967169, %v2613_v11  ;;  %v8395_v31 = vadd.s32 %v2523_v0, %v2514_v41  ;;  %v2617_v20 = vor.u32 8388608, %v2616_v54  ;;  %v2152_v60 = vor.u32 8388608, %v8420_v30 }
 0x216   :  { %v2550_v56 = vadd.s32 1, %v2546_v32  ;;  %v8442_v54 = vshrl.u32 %v2156_v21, 5 }
 0x217   :  { %v2619_v52 = vadd.s32 1, %v7476_v63  ;;  %vm2549_vm4 = vc.u32 %v8395_v31, %v8397_v59  ;;  %v8431_v28 = vshll.u32 %v2617_v20, 8 }
 0x218   :  { %v2551_v61 = vsel %vm2549_vm4, %v2550_v56, %v2546_v32  ;;  %vm2176_vm4 = vcmp.lt.s32.totalorder %v8442_v54, 1 }
 0x219   :  { %vm2620_vm3 = vcmp.gt.s32.totalorder %v2619_v52, 0  ;;  %v2552_v57 = vadd.s32 %v2551_v61, %v2547_v50  ;;  %v2162_v50 = vshrl.u32 %v7729_v9, %v8426_v51  ;;  %v2659_v21 = vshrl.u32 %v8431_v28, 16 }
 0x21a   :  { %v2621_v45 = vsel %vm2620_vm3, %v2619_v52, 0  ;;  %vm2179_vm3 = vcmp.lt.s32.totalorder %v8442_v54, 4 }
 0x21b   :  { %v2623_v53 = vand.u32 31, %v2621_v45  ;;  %v8405_v35 = vshrl.u32 %v2621_v45, 5  ;;  %v2553_v23 = vadd.s32 536870912, %v2552_v57 }
 0x21d   :  { %v2624_v43 = vsub.s32 32, %v2623_v53  ;;  %v2626_v27 = vshll.u32 %v7728_v7, %v2623_v53  ;;  %v2629_v62 = vshll.u32 %v7729_v9, %v2623_v53  ;;  %v2632_v33 = vshll.u32 %v7730_v13, %v2623_v53 }
 0x21e   :  { %v2635_v4 = vshll.u32 %v7731_v16, %v2623_v53  ;;  %v2638_v48 = vshll.u32 %v7732_v19, %v2623_v53  ;;  %vm2641_vm5 = vcmp.lt.s32.totalorder %v8405_v35, 1  ;;  %vm2644_vm6 = vcmp.lt.s32.totalorder %v8405_v35, 4 }
 0x21f   :  { %v2627_v36 = vshrl.u32 %v7729_v9, %v2624_v43  ;;  %v2630_v39 = vshrl.u32 %v7730_v13, %v2624_v43  ;;  %v2633_v17 = vshrl.u32 %v7731_v16, %v2624_v43  ;;  %v2636_v25 = vshrl.u32 %v7732_v19, %v2624_v43 }
 0x220   :  { %v2639_v11 = vshrl.u32 %v7733_v22, %v2624_v43  ;;  %v8428_v40 = vshrl.u32 %v2553_v23, 30  ;;  %vm2643_vm7 = vcmp.lt.s32.totalorder %v8405_v35, 3  ;;  %vm2642_vm8 = vcmp.lt.s32.totalorder %v8405_v35, 2 }
 0x221   :  { %v2628_v44 = vor.u32 %v2627_v36, %v2626_v27  ;;  %v2631_v46 = vor.u32 %v2630_v39, %v2629_v62  ;;  %v2634_v63 = vor.u32 %v2633_v17, %v2632_v33  ;;  %v2637_v8 = vor.u32 %v2636_v25, %v2635_v4 }
 0x222   :  { %v2640_v24 = vor.u32 %v2639_v11, %v2638_v48  ;;  %v2555_v0 = vshll.u32 %v8428_v40, 30  ;;  %v2625_v20 = vshrl.u32 %v7728_v7, %v2624_v43  ;;  %v2658_v33 = vand.u32 65535, %v8431_v28 }
 0x223   :  { %v2649_v14 = vsel %vm2641_vm5, %v2628_v44, %v2631_v46  ;;  %v2650_v52 = vsel %vm2644_vm6, %v2637_v8, 920167782  ;;  %v2653_v18 = vsel %vm2641_vm5, %v2631_v46, %v2634_v63  ;;  %v2646_v45 = vsel %vm2644_vm6, %v2634_v63, 2102212464 }
 0x224   :  { %v2651_v15 = vsel %vm2643_vm7, %v2634_v63, %v2650_v52  ;;  %v2654_v41 = vsel %vm2644_vm6, %v2640_v24, 1326507024  ;;  %v2556_v56 = vsub.s32 %v2552_v57, %v2555_v0  ;;  %v2645_v39 = vsel %vm2641_vm5, %v2625_v20, %v2628_v44 }
 0x225   :  { %v2652_v5 = vsel %vm2642_vm8, %v2649_v14, %v2651_v15  ;;  %v2655_v53 = vsel %vm2643_vm7, %v2637_v8, %v2654_v41  ;;  %v2647_v48 = vsel %vm2643_vm7, %v2631_v46, %v2646_v45  ;;  %v2161_v25 = vshll.u32 %v7728_v7, %v8403_v26 }
 0x226   :  { %v2683_v32 = vshrl.u32 %v2652_v5, 16  ;;  %v2656_v27 = vsel %vm2642_vm8, %v2653_v18, %v2655_v53  ;;  %v2682_v62 = vand.u32 65535, %v2652_v5  ;;  %vm2557_vm9 = vcmp.lt.s32.totalorder %v2556_v56, 0 }
 0x227   :  { %v2660_v4 = vand.u32 65535, %v2656_v27  ;;  %v2661_v61 = vshrl.u32 %v2656_v27, 16  ;;  %v2558_v36 = vsub.s32 0, %v2556_v56  ;;  %v2548_v11 = vadd.s32 %v8397_v59, %v8395_v31 }
 0x228   :  { %v2685_v17 = vmul.u32 %v2683_v32, %v2658_v33  ;;  %v2578_v63 = vsub.s32 4, %v8428_v40  ;;  %v2686_v8 = vmul.u32 %v2682_v62, %v2659_v21  ;;  %v8464_v44 = vsel %vm2642_vm8, %v2645_v39, %v2647_v48 }
 0x229   :  { %v2663_v57 = vmul.u32 %v2661_v61, %v2658_v33  ;;  %v2664_v43 = vmul.u32 %v2660_v4, %v2659_v21  ;;  %v2559_v23 = vsel %vm2557_vm9, %v2558_v36, %v2556_v56  ;;  %v2662_v14 = vmul.u32 %v2660_v4, %v2658_v33 }
 0x22a   :  { %v2560_v24 = vclz %v2559_v23  ;;  %v2665_v52 = vmul.u32 %v2661_v61, %v2659_v21  ;;  %v2684_v18 = vmul.u32 %v2682_v62, %v2658_v33  ;;  %v8466_v41 = vor.u32 %v2162_v50, %v2161_v25 }
 0x22b   :  { %v2666_v46 = vshll.u32 %v2663_v57, 16  ;;  %v2668_v15 = vshll.u32 %v2664_v43, 16  ;;  %v2688_v31 = vshll.u32 %v2685_v17, 16  ;;  %v2667_v59 = vshrl.u32 %v2663_v57, 16 }
 0x22c   :  { %v7474_v0 = vadd.s32 4294967294, %v2560_v24  ;;  %v2687_v53 = vmul.u32 %v2683_v32, %v2659_v21  ;;  %v2690_v20 = vshll.u32 %v2686_v8, 16  ;;  %v2669_v36 = vshrl.u32 %v2664_v43, 16 }
 0x22d   :  { %vm2670_vm10 = vc.u32 %v2662_v14, %v2666_v46  ;;  %v2672_v5 = vadd.s32 %v2666_v46, %v2662_v14  ;;  %vm2692_vm15 = vc.u32 %v2684_v18, %v2688_v31  ;;  %v2694_v50 = vadd.s32 %v2688_v31, %v2684_v18 }
 0x22e   :  { %v2671_v45 = vsel %vm2670_vm10, 1, %v7727_v2  ;;  %vm7475_vm13 = vcmp.lt.s32.totalorder %v7474_v0, 0  ;;  %v2693_v62 = vsel %vm2692_vm15, 1, %v7727_v2  ;;  %v2689_v57 = vshrl.u32 %v2685_v17, 16 }
 0x22f   :  { %v2673_v35 = vadd.s32 %v2671_v45, %v2665_v52  ;;  %vm2674_vm14 = vc.u32 %v2672_v5, %v2668_v15  ;;  %v2563_v27 = vsel %vm7475_vm13, 0, %v7474_v0  ;;  %v2695_v32 = vadd.s32 %v2693_v62, %v2687_v53 }
 0x230   :  { %v2675_v4 = vsel %vm2674_vm14, 1, %v7727_v2  ;;  %v2564_v33 = vsub.s32 32, %v2563_v27  ;;  %v2568_v61 = vsub.s32 4294967266, %v2563_v27  ;;  %v2565_v48 = vshll.u32 %v2556_v56, %v2563_v27 }
 0x231   :  { %v2677_v39 = vadd.s32 %v2675_v4, %v2673_v35  ;;  %vm2696_vm1 = vc.u32 %v2694_v50, %v2690_v20  ;;  %v2164_v46 = vshll.u32 %v7729_v9, %v8403_v26  ;;  %v2165_v52 = vshrl.u32 %v7730_v13, %v8426_v51 }
 0x232   :  { %v2566_v21 = vshrl.u32 %v2548_v11, %v2564_v33  ;;  %v2569_v25 = vadd.s32 127, %v2568_v61  ;;  %v2697_v24 = vsel %vm2696_vm1, 1, %v7727_v2  ;;  %v2168_v43 = vshrl.u32 %v7731_v16, %v8426_v51 }
 0x233   :  { %v2678_v23 = vadd.s32 %v2677_v39, %v2667_v59  ;;  %v2699_v14 = vadd.s32 %v2697_v24, %v2695_v32  ;;  %v2167_v11 = vshll.u32 %v7730_v13, %v8403_v26  ;;  %v2691_v18 = vshrl.u32 %v2686_v8, 16 }
 0x234   :  { %v2567_v15 = vor.u32 %v2566_v21, %v2565_v48  ;;  %v2570_v56 = vshll.u32 %v2569_v25, 23  ;;  %v2170_v5 = vshll.u32 %v7731_v16, %v8403_v26  ;;  %v2171_v31 = vshrl.u32 %v7732_v19, %v8426_v51 }
 0x235   :  { %v2679_v17 = vadd.s32 %v2678_v23, %v2669_v36  ;;  %v2700_v0 = vadd.s32 %v2699_v14, %v2689_v57  ;;  %v2698_v45 = vadd.s32 %v2694_v50, %v2690_v20  ;;  %v8485_v53 = vor.u32 %v2165_v52, %v2164_v46 }
 0x236   :  { %v2571_v59 = vor.u32 4788187, %v2570_v56  ;;  %v2169_v35 = vor.u32 %v2168_v43, %v2167_v11  ;;  %v2172_v4 = vor.u32 %v2171_v31, %v2170_v5  ;;  %v2173_v62 = vshll.u32 %v7732_v19, %v8403_v26 }
 0x237   :  { %v2701_v27 = vadd.s32 %v2700_v0, %v2691_v18  ;;  %v2174_v8 = vshrl.u32 %v7733_v22, %v8426_v51  ;;  %v2574_v61 = vcvt.s32.f32 %v2567_v15  ;;  %v2702_v36 = vmul.u32 %v8431_v28, %v8464_v44 }
 0x238   :  { %v2572_v33 = vand.u32 2147483647, %v2571_v59  ;;  %vm2704_vm2 = vc.u32 %v2679_v17, %v2698_v45  ;;  %v2579_v20 = vsel %vm2456_vm0, %v2578_v63, %v8428_v40  ;;  %vm2178_vm5 = vcmp.lt.s32.totalorder %v8442_v54, 3 }
 0x239   :  { %v2705_v50 = vadd.s32 1, %v2701_v27  ;;  %v2175_v39 = vor.u32 %v2174_v8, %v2173_v62  ;;  %v2185_v48 = vsel %vm2179_vm3, %v2172_v4, 920167782  ;;  %vm8505_vm6 = vcmp.le.f32.partialorder %v2454_v34, 0.7853982 }
 0x23a   :  { %v2575_v26 = vmul.f32 %v2574_v61, %v2572_v33  ;;  %v2184_v40 = vsel %vm2176_vm4, %v8466_v41, %v8485_v53  ;;  %v2186_v63 = vsel %vm2178_vm5, %v2169_v35, %v2185_v48  ;;  %v2581_v32 = vsel %vm8505_vm6, 0, %v2579_v20 }
 0x23b   :  { %v2706_v44 = vsel %vm2704_vm2, %v2705_v50, %v2701_v27  ;;  %v2188_v34 = vsel %vm2176_vm4, %v8485_v53, %v2169_v35  ;;  %vm2177_vm7 = vcmp.lt.s32.totalorder %v8442_v54, 2  ;;  %v2189_v25 = vsel %vm2179_vm3, %v2175_v39, 1326507024 }
 0x23c   :  { %v2576_v57 = vxor.u32 2147483648, %v2575_v26  ;;  %v2707_v21 = vadd.s32 %v2706_v44, %v2702_v36  ;;  %v8525_v23 = vshll.u32 %v2152_v60, 8  ;;  %v2187_v46 = vsel %vm2177_vm7, %v2184_v40, %v2186_v63 }
 0x23d   :  { %v2190_v52 = vsel %vm2178_vm5, %v2172_v4, %v2189_v25  ;;  %v2598_v15 = vadd.s32 3, %v2581_v32  ;;  %v2217_v31 = vand.u32 65535, %v2187_v46  ;;  %v2218_v59 = vshrl.u32 %v2187_v46, 16 }
 0x23e   :  { %v2577_v24 = vsel %vm2456_vm0, %v2576_v57, %v2575_v26  ;;  %v2708_v14 = vadd.s32 536870912, %v2707_v21  ;;  %v2191_v30 = vsel %vm2177_vm7, %v2188_v34, %v2190_v52  ;;  %v2193_v0 = vand.u32 65535, %v8525_v23 }
 0x23f   :  { %v8536_v43 = vsel %vm8505_vm6, %v8330_v1, %v2577_v24  ;;  %v2195_v11 = vand.u32 65535, %v2191_v30  ;;  %v2196_v18 = vshrl.u32 %v2191_v30, 16  ;;  %v2194_v5 = vshrl.u32 %v8525_v23, 16 }
 0x240   :  { %v2582_v60 = vmul.f32 %v8536_v43, %v8536_v43  ;;  %v8542_v56 = vshrl.u32 %v2708_v14, 30  ;;  %v2160_v8 = vshrl.u32 %v7728_v7, %v8426_v51  ;;  %v8549_v33 = vand.u32 3, %v2598_v15 }
 0x241   :  { %v2703_v61 = vadd.s32 %v2698_v45, %v2679_v17  ;;  %v2198_v36 = vmul.u32 %v2196_v18, %v2193_v0  ;;  %v8551_v20 = vmul.u32 %v2195_v11, %v2194_v5  ;;  %v2181_v48 = vsel %vm2179_vm3, %v2169_v35, 2102212464 }
 0x242   :  { %v2583_v27 = vmul.f32 -0.001358992, %v2582_v60  ;;  %v2590_v4 = vmul.f32 -0.00019511016, %v2582_v60  ;;  %v2710_v62 = vshll.u32 %v8542_v56, 30  ;;  %v2197_v28 = vmul.u32 %v2195_v11, %v2193_v0 }
 0x243   :  { %v2201_v44 = vshll.u32 %v2198_v36, 16  ;;  %v8557_v40 = vmul.u32 %v2218_v59, %v2193_v0  ;;  %v8559_v63 = vmul.u32 %v2217_v31, %v2194_v5  ;;  %v2200_v45 = vmul.u32 %v2196_v18, %v2194_v5 }
 0x244   :  { %v2584_v50 = vadd.f32 0.041655596, %v2583_v27  ;;  %v2591_v39 = vadd.f32 0.008332121, %v2590_v4  ;;  %v8553_v26 = vsub.s32 %v2707_v21, %v2710_v62  ;;  %v2203_v32 = vshll.u32 %v8551_v20, 16 }
 0x245   :  { %vm2205_vm9 = vc.u32 %v2197_v28, %v2201_v44  ;;  %v2207_v21 = vadd.s32 %v2201_v44, %v2197_v28  ;;  %vm2601_vm10 = vcmp.eq.s32.totalorder %v8549_v33, 0  ;;  %vm2604_vm13 = vcmp.eq.s32.totalorder %v8549_v33, 2 }
 0x246   :  { %v2585_v51 = vmul.f32 %v2584_v50, %v2582_v60  ;;  %v2592_v57 = vmul.f32 %v2591_v39, %v2582_v60  ;;  %vm2712_vm8 = vcmp.lt.s32.totalorder %v8553_v26, 0  ;;  %v2713_v17 = vsub.s32 0, %v8553_v26 }
 0x247   :  { %v2206_v24 = vsel %vm2205_vm9, 1, %v7727_v2  ;;  %v2180_v46 = vsel %vm2176_vm4, %v2160_v8, %v8466_v41  ;;  %vm2209_vm14 = vc.u32 %v2207_v21, %v2203_v32  ;;  %vm2600_vm15 = vcmp.lt.s32.totalorder %v8549_v33, 2 }
 0x248   :  { %v2586_v34 = vadd.f32 -0.4999988, %v2585_v51  ;;  %v2593_v25 = vadd.f32 -0.16666654, %v2592_v57  ;;  %v2714_v35 = vsel %vm2712_vm8, %v2713_v17, %v8553_v26  ;;  %v2208_v52 = vadd.s32 %v2206_v24, %v2200_v45 }
 0x249   :  { %v2715_v14 = vclz %v2714_v35  ;;  %v2210_v11 = vsel %vm2209_vm14, 1, %v7727_v2  ;;  %v2223_v18 = vshll.u32 %v8557_v40, 16  ;;  %vm2597_vm0 = vweird.f32 %v8330_v1 }
 0x24a   :  { %v2587_v15 = vmul.f32 %v2586_v34, %v2582_v60  ;;  %v2594_v30 = vmul.f32 %v2593_v25, %v2582_v60  ;;  %v2182_v4 = vsel %vm2178_vm5, %v8485_v53, %v2181_v48  ;;  %v2219_v62 = vmul.u32 %v2217_v31, %v2193_v0 }
 0x24b   :  { %v7477_v27 = vadd.s32 4294967294, %v2715_v14  ;;  %v2222_v50 = vmul.u32 %v2218_v59, %v2194_v5  ;;  %v2212_v39 = vadd.s32 %v2210_v11, %v2208_v52  ;;  %v2225_v60 = vshll.u32 %v8559_v63, 16 }
 0x24c   :  { %v2588_v41 = vadd.f32 1.0, %v2587_v15  ;;  %v2595_v8 = vadd.f32 1.0, %v2594_v30  ;;  %v2733_v28 = vsub.s32 4, %v8542_v56  ;;  %vm2227_vm2 = vc.u32 %v2219_v62, %v2223_v18 }
 0x24d   :  { %vm7478_vm1 = vcmp.lt.s32.totalorder %v7477_v27, 0  ;;  %v2229_v44 = vadd.s32 %v2223_v18, %v2219_v62  ;;  %v2202_v45 = vshrl.u32 %v2198_v36, 16  ;;  %v2204_v53 = vshrl.u32 %v8551_v20, 16 }
 0x24e   :  { %v2596_v51 = vmul.f32 %v2595_v8, %v8536_v43  ;;  %v2605_v57 = vxor.u32 2147483648, %v2588_v41  ;;  %v2718_v17 = vsel %vm7478_vm1, 0, %v7477_v27  ;;  %v2228_v0 = vsel %vm2227_vm2, 1, %v7727_v2 }
 0x24f   :  { %v2719_v32 = vsub.s32 32, %v2718_v17  ;;  %v2723_v21 = vsub.s32 4294967266, %v2718_v17  ;;  %v2213_v31 = vadd.s32 %v2212_v39, %v2202_v45  ;;  %v2224_v59 = vshrl.u32 %v8557_v40, 16 }
 0x250   :  { %v2602_v5 = vxor.u32 2147483648, %v2596_v51  ;;  %v2230_v48 = vadd.s32 %v2228_v0, %v2222_v50  ;;  %v2720_v34 = vshll.u32 %v8553_v26, %v2718_v17  ;;  %vm2231_vm3 = vc.u32 %v2229_v44, %v2225_v60 }
 0x251   :  { %v2721_v25 = vshrl.u32 %v2703_v61, %v2719_v32  ;;  %v2724_v35 = vadd.s32 127, %v2723_v21  ;;  %v2606_v36 = vsel %vm2604_vm13, %v2605_v57, %v2596_v51  ;;  %v2232_v20 = vsel %vm2231_vm3, 1, %v7727_v2 }
 0x252   :  { %v2603_v43 = vsel %vm2601_vm10, %v2588_v41, %v2602_v5  ;;  %v8592_v24 = vmul.f32 %v8374_v42, %v8319_v10  ;;  %v2234_v61 = vadd.s32 %v2232_v20, %v2230_v48  ;;  %vm2611_vm4 = vcmp.lt.s32.totalorder %v8380_v29, 0 }
 0x253   :  { %v2607_v40 = vsel %vm2600_vm15, %v2603_v43, %v2606_v36  ;;  %v2722_v14 = vor.u32 %v2721_v25, %v2720_v34  ;;  %v2725_v26 = vshll.u32 %v2724_v35, 23  ;;  %v2214_v15 = vadd.s32 %v2213_v31, %v2204_v53 }
 0x254   :  { %v2608_v52 = vsel %vm2597_vm0, nan, %v2607_v40  ;;  %v2299_v30 = vand.u32 2147483647, %v8592_v24  ;;  %v2183_v10 = vsel %vm2177_vm7, %v2180_v46, %v2182_v4  ;;  %v2226_v33 = vshrl.u32 %v8559_v63, 16 }
 0x255   :  { %2817 = vmatpush.msrb.mxu0 %v2608_v52  ;;  %7601 = vmatpush.msra.mxu2 %v2608_v52  ;;  %v2726_v11 = vor.u32 4788187, %v2725_v26  ;;  %v2235_v18 = vadd.s32 %v2234_v61, %v2224_v59  ;;  %v2729_v27 = vcvt.s32.f32 %v2722_v14  ;;  %v2734_v1 = vsel %vm2611_vm4, %v2733_v28, %v8542_v56 }
 0x256   :  { %v2233_v62 = vadd.s32 %v2229_v44, %v2225_v60  ;;  %v2302_v50 = vand.u32 2139095040, %v8592_v24  ;;  %v2306_v39 = vand.u32 8388607, %v2299_v30  ;;  %v8611_v54 = vmul.f32 %v8327_v6, %v8300_v12 }
 0x257   :  { %v2727_v41 = vand.u32 2147483647, %v2726_v11  ;;  %v2236_v8 = vadd.s32 %v2235_v18, %v2226_v33  ;;  %vm2610_vm6 = vcmp.le.f32.partialorder %v2609_v49, 0.7853982  ;;  %v2237_v60 = vmul.u32 %v8525_v23, %v2183_v10 }
 0x258   :  { %vm2239_vm5 = vc.u32 %v2214_v15, %v2233_v62  ;;  %v2303_v63 = vshrl.u32 %v2302_v50, 23  ;;  %v2736_v56 = vsel %vm2610_vm6, 0, %v2734_v1  ;;  %v1837_v44 = vand.u32 2139095040, %v8611_v54 }
 0x259   :  { %v2730_v46 = vmul.f32 %v2729_v27, %v2727_v41  ;;  %v2240_v4 = vadd.s32 1, %v2236_v8  ;;  %v2307_v17 = vor.u32 8388608, %v2306_v39  ;;  %v2753_v21 = vadd.s32 3, %v2736_v56 }
 0x25a   :  { %v7470_v28 = vadd.s32 4294967169, %v2303_v63  ;;  %v1838_v53 = vshrl.u32 %v1837_v44, 23  ;;  %vm8626_vm8 = vcmp.le.f32.partialorder %v2144_v55, 0.7853982  ;;  %vm2146_vm9 = vcmp.lt.s32.totalorder %v8337_v3, 0 }
 0x25b   :  { %v2731_v51 = vxor.u32 2147483648, %v2730_v46  ;;  %v2241_v57 = vsel %vm2239_vm5, %v2240_v4, %v2236_v8  ;;  %v8620_v23 = vshll.u32 %v2307_v17, 8  ;;  %v8622_v43 = vand.u32 3, %v2753_v21 }
 0x25c   :  { %v2242_v45 = vadd.s32 %v2241_v57, %v2237_v60  ;;  %v2309_v32 = vadd.s32 1, %v7470_v28  ;;  %v7461_v34 = vadd.s32 4294967169, %v1838_v53  ;;  %v8631_v20 = vadd.s32 %v2233_v62, %v2214_v15 }
 0x25d   :  { %v2732_v12 = vsel %vm2611_vm4, %v2731_v51, %v2730_v46  ;;  %v1834_v26 = vand.u32 2147483647, %v8611_v54  ;;  %v8635_v10 = vand.u32 65535, %v8620_v23  ;;  %v8642_v18 = vshrl.u32 %v8620_v23, 16 }
 0x25e   :  { %v2735_v49 = vsel %vm2610_vm6, %v8380_v29, %v2732_v12  ;;  %v2243_v0 = vadd.s32 536870912, %v2242_v45  ;;  %vm2310_vm7 = vcmp.gt.s32.totalorder %v2309_v32, 0  ;;  %v8644_v27 = vadd.s32 1, %v7461_v34 }
 0x25f   :  { %v2737_v5 = vmul.f32 %v2735_v49, %v2735_v49  ;;  %v2311_v31 = vsel %vm2310_vm7, %v2309_v32, 0  ;;  %vm2759_vm10 = vcmp.eq.s32.totalorder %v8622_v43, 2  ;;  %vm2756_vm14 = vcmp.eq.s32.totalorder %v8622_v43, 0 }
 0x260   :  { %v2244_v59 = vshrl.u32 %v2243_v0, 30  ;;  %v2313_v48 = vand.u32 31, %v2311_v31  ;;  %v8639_v55 = vshrl.u32 %v2311_v31, 5  ;;  %vm2755_vm15 = vcmp.lt.s32.totalorder %v8622_v43, 2 }
 0x261   :  { %v2738_v25 = vmul.f32 -0.001358992, %v2737_v5  ;;  %v2745_v35 = vmul.f32 -0.00019511016, %v2737_v5  ;;  %vm2752_vm0 = vweird.f32 %v8380_v29  ;;  %vm1845_vm6 = vcmp.gt.s32.totalorder %v8644_v27, 0 }
 0x262   :  { %v2245_v40 = vshll.u32 %v2244_v59, 30  ;;  %v2314_v14 = vsub.s32 32, %v2313_v48  ;;  %v2268_v11 = vsub.s32 4, %v2244_v59  ;;  %v2316_v62 = vshll.u32 %v7728_v7, %v2313_v48 }
 0x263   :  { %v2739_v61 = vadd.f32 0.041655596, %v2738_v25  ;;  %v2746_v52 = vadd.f32 0.008332121, %v2745_v35  ;;  %v2319_v50 = vshll.u32 %v7729_v9, %v2313_v48  ;;  %v2322_v44 = vshll.u32 %v7730_v13, %v2313_v48 }
 0x264   :  { %v8637_v33 = vsub.s32 %v2242_v45, %v2245_v40  ;;  %v2317_v8 = vshrl.u32 %v7729_v9, %v2314_v14  ;;  %v2320_v39 = vshrl.u32 %v7730_v13, %v2314_v14  ;;  %v8655_v4 = vsel %vm2146_vm9, %v2268_v11, %v2244_v59 }
 0x265   :  { %v2740_v15 = vmul.f32 %v2739_v61, %v2737_v5  ;;  %v2747_v1 = vmul.f32 %v2746_v52, %v2737_v5  ;;  %v2323_v56 = vshrl.u32 %v7731_v16, %v2314_v14  ;;  %v2315_v28 = vshrl.u32 %v7728_v7, %v2314_v14 }
 0x266   :  { %vm2247_vm13 = vcmp.lt.s32.totalorder %v8637_v33, 0  ;;  %v2248_v41 = vsub.s32 0, %v8637_v33  ;;  %v2326_v51 = vshrl.u32 %v7732_v19, %v2314_v14  ;;  %v2325_v32 = vshll.u32 %v7731_v16, %v2313_v48 }
 0x267   :  { %v2741_v63 = vadd.f32 -0.4999988, %v2740_v15  ;;  %v2748_v46 = vadd.f32 -0.16666654, %v2747_v1  ;;  %v2271_v12 = vsel %vm8626_vm8, 0, %v8655_v4  ;;  %v2318_v21 = vor.u32 %v2317_v8, %v2316_v62 }
 0x268   :  { %v2249_v60 = vsel %vm2247_vm13, %v2248_v41, %v8637_v33  ;;  %v2321_v53 = vor.u32 %v2320_v39, %v2319_v50  ;;  %v2324_v0 = vor.u32 %v2323_v56, %v2322_v44  ;;  %v2327_v25 = vor.u32 %v2326_v51, %v2325_v32 }
 0x269   :  { %v2742_v57 = vmul.f32 %v2741_v63, %v2737_v5  ;;  %v2749_v17 = vmul.f32 %v2748_v46, %v2737_v5  ;;  %v2250_v45 = vclz %v2249_v60  ;;  %v2328_v5 = vshll.u32 %v7732_v19, %v2313_v48 }
 0x26a   :  { %v2329_v35 = vshrl.u32 %v7733_v22, %v2314_v14  ;;  %vm2331_vm1 = vcmp.lt.s32.totalorder %v8639_v55, 1  ;;  %vm2332_vm2 = vcmp.lt.s32.totalorder %v8639_v55, 2  ;;  %vm2334_vm4 = vcmp.lt.s32.totalorder %v8639_v55, 4 }
 0x26b   :  { %v2743_v31 = vadd.f32 1.0, %v2742_v57  ;;  %v2750_v59 = vadd.f32 1.0, %v2749_v17  ;;  %v7468_v34 = vadd.s32 4294967294, %v2250_v45  ;;  %vm2333_vm5 = vcmp.lt.s32.totalorder %v8639_v55, 3 }
 0x26c   :  { %v2330_v11 = vor.u32 %v2329_v35, %v2328_v5  ;;  %v2336_v15 = vsel %vm2334_vm4, %v2324_v0, 2102212464  ;;  %v2335_v62 = vsel %vm2331_vm1, %v2315_v28, %v2318_v21  ;;  %v2339_v41 = vsel %vm2331_vm1, %v2318_v21, %v2321_v53 }
 0x26d   :  { %v2751_v40 = vmul.f32 %v2750_v59, %v2735_v49  ;;  %v2760_v61 = vxor.u32 2147483648, %v2743_v31  ;;  %vm7469_vm3 = vcmp.lt.s32.totalorder %v7468_v34, 0  ;;  %v2340_v8 = vsel %vm2334_vm4, %v2327_v25, 920167782 }
 0x26e   :  { %v2253_v52 = vsel %vm7469_vm3, 0, %v7468_v34  ;;  %v2337_v46 = vsel %vm2333_vm5, %v2321_v53, %v2336_v15  ;;  %v2341_v4 = vsel %vm2333_vm5, %v2324_v0, %v2340_v8  ;;  %v2343_v28 = vsel %vm2331_vm1, %v2321_v53, %v2324_v0 }
 0x26f   :  { %v2757_v1 = vxor.u32 2147483648, %v2751_v40  ;;  %v2761_v48 = vsel %vm2759_vm10, %v2760_v61, %v2751_v40  ;;  %v2254_v14 = vsub.s32 32, %v2253_v52  ;;  %v2255_v49 = vshll.u32 %v8637_v33, %v2253_v52 }
 0x270   :  { %v2258_v50 = vsub.s32 4294967266, %v2253_v52  ;;  %v2342_v60 = vsel %vm2332_vm2, %v2339_v41, %v2341_v4  ;;  %v2344_v51 = vsel %vm2334_vm4, %v2330_v11, 1326507024  ;;  %v8705_v43 = vsel %vm2332_vm2, %v2335_v62, %v2337_v46 }
 0x271   :  { %v2758_v39 = vsel %vm2756_vm14, %v2743_v31, %v2757_v1  ;;  %v2256_v63 = vshrl.u32 %v8631_v20, %v2254_v14  ;;  %v2372_v57 = vand.u32 65535, %v2342_v60  ;;  %v2345_v45 = vsel %vm2333_vm5, %v2327_v25, %v2344_v51 }
 0x272   :  { %v2762_v33 = vsel %vm2755_vm15, %v2758_v39, %v2761_v48  ;;  %v2259_v56 = vadd.s32 127, %v2258_v50  ;;  %v2373_v32 = vshrl.u32 %v2342_v60, 16  ;;  %v2346_v29 = vsel %vm2332_vm2, %v2343_v28, %v2345_v45 }
 0x273   :  { %v2763_v44 = vsel %vm2752_vm0, nan, %v2762_v33  ;;  %v2257_v20 = vor.u32 %v2256_v63, %v2255_v49  ;;  %v2376_v21 = vmul.u32 %v2372_v57, %v8642_v18  ;;  %v2350_v0 = vand.u32 65535, %v2346_v29 }
 0x274   :  { %2846 = vmatpush.msrb.mxu1 %v2763_v44  ;;  %7605 = vmatpush.msra.mxu3 %v2763_v44  ;;  %v2260_v17 = vshll.u32 %v2259_v56, 23  ;;  %v2351_v31 = vshrl.u32 %v2346_v29, 16  ;;  %v2375_v59 = vmul.u32 %v2373_v32, %v8635_v10  ;;  %v8713_v5 = vadd.s32 3, %v2271_v12 }
 0x275   :  { %v2264_v34 = vcvt.s32.f32 %v2257_v20  ;;  %v2392_v35 = vmul.u32 %v8620_v23, %v8705_v43  ;;  %v8719_v25 = vand.u32 8388607, %v1834_v26  ;;  %v2354_v61 = vmul.u32 %v2350_v0, %v8642_v18 }
 0x276   :  { %v2261_v53 = vor.u32 4788187, %v2260_v17  ;;  %v2353_v55 = vmul.u32 %v2351_v31, %v8635_v10  ;;  %v2374_v52 = vmul.u32 %v2372_v57, %v8635_v10  ;;  %v2377_v11 = vmul.u32 %v2373_v32, %v8642_v18 }
 0x277   :  { %v2378_v12 = vshll.u32 %v2375_v59, 16  ;;  %v2380_v15 = vshll.u32 %v2376_v21, 16  ;;  %v2352_v48 = vmul.u32 %v2350_v0, %v8635_v10  ;;  %v2355_v14 = vmul.u32 %v2351_v31, %v8642_v18 }
 0x278   :  { %v2262_v40 = vand.u32 2147483647, %v2261_v53  ;;  %v2356_v62 = vshll.u32 %v2353_v55, 16  ;;  %v2358_v49 = vshll.u32 %v2354_v61, 16  ;;  %v1846_v41 = vsel %vm1845_vm6, %v8644_v27, 0 }
 0x279   :  { %vm2382_vm7 = vc.u32 %v2374_v52, %v2378_v12  ;;  %v2384_v50 = vadd.s32 %v2378_v12, %v2374_v52  ;;  %v2379_v4 = vshrl.u32 %v2375_v59, 16  ;;  %v1848_v44 = vand.u32 31, %v1846_v41 }
 0x27a   :  { %v2265_v1 = vmul.f32 %v2264_v34, %v2262_v40  ;;  %vm2360_vm10 = vc.u32 %v2352_v48, %v2356_v62  ;;  %v2362_v39 = vadd.s32 %v2356_v62, %v2352_v48  ;;  %v2383_v63 = vsel %vm2382_vm7, 1, %v7727_v2 }
 0x27b   :  { %v2361_v46 = vsel %vm2360_vm10, 1, %v7727_v2  ;;  %v2385_v33 = vadd.s32 %v2383_v63, %v2377_v11  ;;  %vm2386_vm13 = vc.u32 %v2384_v50, %v2380_v15  ;;  %v2357_v51 = vshrl.u32 %v2353_v55, 16 }
 0x27c   :  { %v2266_v8 = vxor.u32 2147483648, %v2265_v1  ;;  %v2363_v18 = vadd.s32 %v2361_v46, %v2355_v14  ;;  %vm2364_vm14 = vc.u32 %v2362_v39, %v2358_v49  ;;  %v2387_v56 = vsel %vm2386_vm13, 1, %v7727_v2 }
 0x27d   :  { %v2365_v60 = vsel %vm2364_vm14, 1, %v7727_v2  ;;  %v2389_v28 = vadd.s32 %v2387_v56, %v2385_v33  ;;  %v2381_v17 = vshrl.u32 %v2376_v21, 16  ;;  %v2359_v45 = vshrl.u32 %v2354_v61, 16 }
 0x27e   :  { %v2267_v10 = vsel %vm2146_vm9, %v2266_v8, %v2265_v1  ;;  %v2367_v57 = vadd.s32 %v2365_v60, %v2363_v18  ;;  %v8738_v29 = vshrl.u32 %v1846_v41, 5  ;;  %v8740_v53 = vsub.s32 32, %v1848_v44 }
 0x27f   :  { %v2270_v27 = vsel %vm8626_vm8, %v8337_v3, %v2267_v10  ;;  %v2390_v32 = vadd.s32 %v2389_v28, %v2379_v4  ;;  %v8742_v34 = vadd.s32 %v2384_v50, %v2380_v15  ;;  %v1851_v40 = vshll.u32 %v7728_v7, %v1848_v44 }
 0x280   :  { %v2272_v20 = vmul.f32 %v2270_v27, %v2270_v27  ;;  %v2368_v59 = vadd.s32 %v2367_v57, %v2357_v51  ;;  %v1852_v52 = vshrl.u32 %v7729_v9, %v8740_v53  ;;  %v1855_v21 = vshrl.u32 %v7730_v13, %v8740_v53 }
 0x281   :  { %v2391_v36 = vadd.s32 %v2390_v32, %v2381_v17  ;;  %v1854_v12 = vshll.u32 %v7729_v9, %v1848_v44  ;;  %v1857_v15 = vshll.u32 %v7730_v13, %v1848_v44  ;;  %v1858_v14 = vshrl.u32 %v7731_v16, %v8740_v53 }
 0x282   :  { %v2273_v0 = vmul.f32 -0.001358992, %v2272_v20  ;;  %v2280_v31 = vmul.f32 -0.00019511016, %v2272_v20  ;;  %v8749_v11 = vadd.s32 %v2368_v59, %v2359_v45  ;;  %v8752_v48 = vor.u32 %v1852_v52, %v1851_v40 }
 0x283   :  { %v2395_v1 = vadd.s32 1, %v2391_v36  ;;  %v8759_v50 = vor.u32 %v1855_v21, %v1854_v12  ;;  %v1860_v8 = vshll.u32 %v7731_v16, %v1848_v44  ;;  %v1861_v39 = vshrl.u32 %v7732_v19, %v8740_v53 }
 0x284   :  { %v2274_v55 = vadd.f32 0.041655596, %v2273_v0  ;;  %v2281_v61 = vadd.f32 0.008332121, %v2280_v31  ;;  %vm2394_vm8 = vc.u32 %v8749_v11, %v8742_v34  ;;  %v1863_v63 = vshll.u32 %v7732_v19, %v1848_v44 }
 0x285   :  { %v2396_v41 = vsel %vm2394_vm8, %v2395_v1, %v2391_v36  ;;  %v1864_v10 = vshrl.u32 %v7733_v22, %v8740_v53  ;;  %v1842_v18 = vor.u32 8388608, %v8719_v25  ;;  %v1859_v56 = vor.u32 %v1858_v14, %v1857_v15 }
 0x286   :  { %v2275_v62 = vmul.f32 %v2274_v55, %v2272_v20  ;;  %v2282_v49 = vmul.f32 %v2281_v61, %v2272_v20  ;;  %v2397_v33 = vadd.s32 %v2396_v41, %v2392_v35  ;;  %v1862_v60 = vor.u32 %v1861_v39, %v1860_v8 }
 0x287   :  { %vm1869_vm9 = vcmp.lt.s32.totalorder %v8738_v29, 4  ;;  %v1865_v17 = vor.u32 %v1864_v10, %v1863_v63  ;;  %v2289_v44 = vand.u32 3, %v8713_v5  ;;  %vm1866_vm15 = vcmp.lt.s32.totalorder %v8738_v29, 1 }
 0x288   :  { %v2276_v46 = vadd.f32 -0.4999988, %v2275_v62  ;;  %v2283_v4 = vadd.f32 -0.16666654, %v2282_v49  ;;  %v2398_v57 = vadd.s32 536870912, %v2397_v33  ;;  %vm1868_vm0 = vcmp.lt.s32.totalorder %v8738_v29, 3 }
 0x289   :  { %v1875_v23 = vsel %vm1869_vm9, %v1862_v60, 920167782  ;;  %vm1867_vm1 = vcmp.lt.s32.totalorder %v8738_v29, 2  ;;  %v1879_v45 = vsel %vm1869_vm9, %v1865_v17, 1326507024  ;;  %v8788_v32 = vshll.u32 %v1842_v18, 8 }
 0x28a   :  { %v2277_v28 = vmul.f32 %v2276_v46, %v2272_v20  ;;  %v2284_v51 = vmul.f32 %v2283_v4, %v2272_v20  ;;  %v8777_v25 = vshrl.u32 %v2398_v57, 30  ;;  %v1874_v20 = vsel %vm1866_vm15, %v8752_v48, %v8759_v50 }
 0x28b   :  { %v1876_v5 = vsel %vm1868_vm0, %v1859_v56, %v1875_v23  ;;  %v1878_v36 = vsel %vm1866_vm15, %v8759_v50, %v1859_v56  ;;  %vm2287_vm2 = vweird.f32 %v8337_v3  ;;  %v1880_v52 = vsel %vm1868_vm0, %v1862_v60, %v1879_v45 }
 0x28c   :  { %v2278_v43 = vadd.f32 1.0, %v2277_v28  ;;  %v2285_v35 = vadd.f32 1.0, %v2284_v51  ;;  %v2400_v59 = vshll.u32 %v8777_v25, 30  ;;  %v1877_v40 = vsel %vm1867_vm1, %v1874_v20, %v1876_v5 }
 0x28d   :  { %vm2290_vm3 = vcmp.lt.s32.totalorder %v2289_v44, 2  ;;  %vm2291_vm4 = vcmp.eq.s32.totalorder %v2289_v44, 0  ;;  %vm2294_vm5 = vcmp.eq.s32.totalorder %v2289_v44, 2  ;;  %v1883_v61 = vand.u32 65535, %v8788_v32 }
 0x28e   :  { %v2286_v0 = vmul.f32 %v2285_v35, %v2270_v27  ;;  %v2295_v31 = vxor.u32 2147483648, %v2278_v43  ;;  %v2401_v55 = vsub.s32 %v2397_v33, %v2400_v59  ;;  %v1881_v27 = vsel %vm1867_vm1, %v1878_v36, %v1880_v52 }
 0x28f   :  { %v1908_v12 = vshrl.u32 %v1877_v40, 16  ;;  %v1884_v49 = vshrl.u32 %v8788_v32, 16  ;;  %v1885_v41 = vand.u32 65535, %v1881_v27  ;;  %v1886_v8 = vshrl.u32 %v1881_v27, 16 }
 0x290   :  { %v2292_v21 = vxor.u32 2147483648, %v2286_v0  ;;  %v2296_v15 = vsel %vm2294_vm5, %v2295_v31, %v2286_v0  ;;  %vm2402_vm6 = vcmp.lt.s32.totalorder %v2401_v55, 0  ;;  %v2403_v14 = vsub.s32 0, %v2401_v55 }
 0x291   :  { %v1907_v46 = vand.u32 65535, %v1877_v40  ;;  %v1910_v4 = vmul.u32 %v1908_v12, %v1883_v61  ;;  %v1850_v10 = vshrl.u32 %v7728_v7, %v8740_v53  ;;  %v1888_v18 = vmul.u32 %v1886_v8, %v1883_v61 }
 0x292   :  { %v2293_v1 = vsel %vm2291_vm4, %v2278_v43, %v2292_v21  ;;  %v2404_v63 = vsel %vm2402_vm6, %v2403_v14, %v2401_v55  ;;  %v2393_v60 = vadd.s32 %v8742_v34, %v8749_v11  ;;  %v1889_v28 = vmul.u32 %v1885_v41, %v1884_v49 }
 0x293   :  { %v2297_v62 = vsel %vm2290_vm3, %v2293_v1, %v2296_v15  ;;  %v2405_v33 = vclz %v2404_v63  ;;  %v1870_v3 = vsel %vm1866_vm15, %v1850_v10, %v8752_v48  ;;  %v1887_v57 = vmul.u32 %v1885_v41, %v1883_v61 }
 0x294   :  { %v2298_v39 = vsel %vm2287_vm2, nan, %v2297_v62  ;;  %v1891_v17 = vshll.u32 %v1888_v18, 16  ;;  %v1871_v44 = vsel %vm1869_vm9, %v1859_v56, 2102212464  ;;  %v1909_v23 = vmul.u32 %v1907_v46, %v1883_v61 }
 0x295   :  { %2818 = vmatpush.msrb.mxu0 %v2298_v39  ;;  %7602 = vmatpush.msra.mxu2 %v2298_v39  ;;  %v7471_v51 = vadd.s32 4294967294, %v2405_v33  ;;  %v1911_v43 = vmul.u32 %v1907_v46, %v1884_v49  ;;  %v1913_v35 = vshll.u32 %v1910_v4, 16  ;;  %v1890_v53 = vmul.u32 %v1886_v8, %v1884_v49 }
 0x296   :  { %vm1895_vm10 = vc.u32 %v1887_v57, %v1891_v17  ;;  %v1897_v20 = vadd.s32 %v1891_v17, %v1887_v57  ;;  %v1893_v34 = vshll.u32 %v1889_v28, 16  ;;  %v1912_v45 = vmul.u32 %v1908_v12, %v1884_v49 }
 0x297   :  { %vm7472_vm7 = vcmp.lt.s32.totalorder %v7471_v51, 0  ;;  %v1896_v11 = vsel %vm1895_vm10, 1, %v7727_v2  ;;  %v1915_v59 = vshll.u32 %v1911_v43, 16  ;;  %vm1917_vm14 = vc.u32 %v1909_v23, %v1913_v35 }
 0x298   :  { %v2408_v5 = vsel %vm7472_vm7, 0, %v7471_v51  ;;  %v1898_v48 = vadd.s32 %v1896_v11, %v1890_v53  ;;  %vm1899_vm13 = vc.u32 %v1897_v20, %v1893_v34  ;;  %v1919_v56 = vadd.s32 %v1913_v35, %v1909_v23 }
 0x299   :  { %v2409_v0 = vsub.s32 32, %v2408_v5  ;;  %v2413_v31 = vsub.s32 4294967266, %v2408_v5  ;;  %v2410_v36 = vshll.u32 %v2401_v55, %v2408_v5  ;;  %v1900_v21 = vsel %vm1899_vm13, 1, %v7727_v2 }
 0x29a   :  { %v1918_v27 = vsel %vm1917_vm14, 1, %v7727_v2  ;;  %v1892_v61 = vshrl.u32 %v1888_v18, 16  ;;  %v1902_v1 = vadd.s32 %v1900_v21, %v1898_v48  ;;  %vm1921_vm8 = vc.u32 %v1919_v56, %v1915_v59 }
 0x29b   :  { %v2411_v40 = vshrl.u32 %v2393_v60, %v2409_v0  ;;  %v2414_v52 = vadd.s32 127, %v2413_v31  ;;  %v1920_v15 = vadd.s32 %v1918_v27, %v1912_v45  ;;  %v1894_v62 = vshrl.u32 %v1889_v28, 16 }
 0x29c   :  { %v1922_v49 = vsel %vm1921_vm8, 1, %v7727_v2  ;;  %v1903_v41 = vadd.s32 %v1902_v1, %v1892_v61  ;;  %v1914_v55 = vshrl.u32 %v1910_v4, 16  ;;  %v8820_v39 = vmul.f32 %v8374_v42, %v8314_v58 }
 0x29d   :  { %v2412_v14 = vor.u32 %v2411_v40, %v2410_v36  ;;  %v2415_v12 = vshll.u32 %v2414_v52, 23  ;;  %v1924_v8 = vadd.s32 %v1922_v49, %v1920_v15  ;;  %v2423_v46 = vsub.s32 4, %v8777_v25 }
 0x29e   :  { %v1872_v33 = vsel %vm1868_vm0, %v8759_v50, %v1871_v44  ;;  %v1916_v10 = vshrl.u32 %v1911_v43, 16  ;;  %v1904_v18 = vadd.s32 %v1903_v41, %v1894_v62  ;;  %v1989_v28 = vand.u32 2147483647, %v8820_v39 }
 0x29f   :  { %v2416_v63 = vor.u32 4788187, %v2415_v12  ;;  %v1925_v60 = vadd.s32 %v1924_v8, %v1914_v55  ;;  %v8829_v4 = vmul.f32 %v8327_v6, %v8302_v47  ;;  %v2419_v57 = vcvt.s32.f32 %v2412_v14 }
 0x2a0   :  { %v1923_v58 = vadd.s32 %v1919_v56, %v1915_v59  ;;  %v1992_v17 = vand.u32 2139095040, %v8820_v39  ;;  %v1873_v23 = vsel %vm1867_vm1, %v1870_v3, %v1872_v33  ;;  %vm2301_vm9 = vcmp.lt.s32.totalorder %v8592_v24, 0 }
 0x2a1   :  { %v2417_v51 = vand.u32 2147483647, %v2416_v63  ;;  %v1926_v35 = vadd.s32 %v1925_v60, %v1916_v10  ;;  %v2424_v43 = vsel %vm2301_vm9, %v2423_v46, %v8777_v25  ;;  %v1996_v47 = vand.u32 8388607, %v1989_v28 }
 0x2a2   :  { %vm1929_vm15 = vc.u32 %v1904_v18, %v1923_v58  ;;  %v1993_v44 = vshrl.u32 %v1992_v17, 23  ;;  %v1527_v6 = vand.u32 2139095040, %v8829_v4  ;;  %v1927_v5 = vmul.u32 %v8788_v32, %v1873_v23 }
 0x2a3   :  { %v2420_v50 = vmul.f32 %v2419_v57, %v2417_v51  ;;  %v1930_v53 = vadd.s32 1, %v1926_v35  ;;  %vm2300_vm0 = vcmp.le.f32.partialorder %v2299_v30, 0.7853982  ;;  %v1997_v31 = vor.u32 8388608, %v1996_v47 }
 0x2a4   :  { %v7464_v34 = vadd.s32 4294967169, %v1993_v44  ;;  %v2426_v11 = vsel %vm2300_vm0, 0, %v2424_v43  ;;  %v1528_v48 = vshrl.u32 %v1527_v6, 23  ;;  %v1524_v8 = vand.u32 2147483647, %v8829_v4 }
 0x2a5   :  { %v2421_v20 = vxor.u32 2147483648, %v2420_v50  ;;  %v1931_v29 = vsel %vm1929_vm15, %v1930_v53, %v1926_v35  ;;  %v2443_v56 = vadd.s32 3, %v2426_v11  ;;  %v8845_v30 = vshll.u32 %v1997_v31, 8 }
 0x2a6   :  { %v1932_v45 = vadd.s32 %v1931_v29, %v1927_v5  ;;  %v1999_v0 = vadd.s32 1, %v7464_v34  ;;  %v7455_v61 = vadd.s32 4294967169, %v1528_v48  ;;  %v1928_v63 = vadd.s32 %v1923_v58, %v1904_v18 }
 0x2a7   :  { %v2422_v3 = vsel %vm2301_vm9, %v2421_v20, %v2420_v50  ;;  %v8848_v12 = vand.u32 3, %v2443_v56  ;;  %v8854_v46 = vand.u32 65535, %v8845_v30  ;;  %v8857_v33 = vshrl.u32 %v8845_v30, 16 }
 0x2a8   :  { %v2425_v25 = vsel %vm2300_vm0, %v8592_v24, %v2422_v3  ;;  %v1933_v36 = vadd.s32 536870912, %v1932_v45  ;;  %vm2000_vm1 = vcmp.gt.s32.totalorder %v1999_v0, 0  ;;  %v8859_v10 = vadd.s32 1, %v7455_v61 }
 0x2a9   :  { %v2427_v59 = vmul.f32 %v2425_v25, %v2425_v25  ;;  %v2001_v40 = vsel %vm2000_vm1, %v1999_v0, 0  ;;  %vm2446_vm3 = vcmp.eq.s32.totalorder %v8848_v12, 0  ;;  %vm2449_vm4 = vcmp.eq.s32.totalorder %v8848_v12, 2 }
 0x2aa   :  { %v8843_v21 = vshrl.u32 %v1933_v36, 30  ;;  %v2003_v27 = vand.u32 31, %v2001_v40  ;;  %v8866_v58 = vshrl.u32 %v2001_v40, 5  ;;  %vm2445_vm5 = vcmp.lt.s32.totalorder %v8848_v12, 2 }
 0x2ab   :  { %v2428_v52 = vmul.f32 -0.001358992, %v2427_v59  ;;  %v2435_v32 = vmul.f32 -0.00019511016, %v2427_v59  ;;  %vm2442_vm6 = vweird.f32 %v8592_v24  ;;  %vm1836_vm7 = vcmp.lt.s32.totalorder %v8611_v54, 0 }
 0x2ac   :  { %v1935_v14 = vshll.u32 %v8843_v21, 30  ;;  %v2004_v62 = vsub.s32 32, %v2003_v27  ;;  %v1958_v18 = vsub.s32 4, %v8843_v21  ;;  %v2006_v17 = vshll.u32 %v7728_v7, %v2003_v27 }
 0x2ad   :  { %v2429_v1 = vadd.f32 0.041655596, %v2428_v52  ;;  %v2436_v15 = vadd.f32 0.008332121, %v2435_v32  ;;  %v2009_v47 = vshll.u32 %v7729_v9, %v2003_v27  ;;  %v2015_v29 = vshll.u32 %v7731_v16, %v2003_v27 }
 0x2ae   :  { %v8850_v55 = vsub.s32 %v1932_v45, %v1935_v14  ;;  %v2007_v23 = vshrl.u32 %v7729_v9, %v2004_v62  ;;  %v2010_v43 = vshrl.u32 %v7730_v13, %v2004_v62  ;;  %v2013_v6 = vshrl.u32 %v7731_v16, %v2004_v62 }
 0x2af   :  { %v2430_v49 = vmul.f32 %v2429_v1, %v2427_v59  ;;  %v2437_v41 = vmul.f32 %v2436_v15, %v2427_v59  ;;  %v2016_v20 = vshrl.u32 %v7732_v19, %v2004_v62  ;;  %v2019_v3 = vshrl.u32 %v7733_v22, %v2004_v62 }
 0x2b0   :  { %vm1937_vm2 = vcmp.lt.s32.totalorder %v8850_v55, 0  ;;  %v1938_v57 = vsub.s32 0, %v8850_v55  ;;  %v2008_v45 = vor.u32 %v2007_v23, %v2006_v17  ;;  %v2012_v0 = vshll.u32 %v7730_v13, %v2003_v27 }
 0x2b1   :  { %v2431_v60 = vadd.f32 -0.4999988, %v2430_v49  ;;  %v2438_v51 = vadd.f32 -0.16666654, %v2437_v41  ;;  %v2018_v31 = vshll.u32 %v7732_v19, %v2003_v27  ;;  %v2011_v36 = vor.u32 %v2010_v43, %v2009_v47 }
 0x2b2   :  { %v1939_v44 = vsel %vm1937_vm2, %v1938_v57, %v8850_v55  ;;  %v2017_v56 = vor.u32 %v2016_v20, %v2015_v29  ;;  %v2005_v40 = vshrl.u32 %v7728_v7, %v2004_v62  ;;  %v2014_v52 = vor.u32 %v2013_v6, %v2012_v0 }
 0x2b3   :  { %v2432_v35 = vmul.f32 %v2431_v60, %v2427_v59  ;;  %v2439_v50 = vmul.f32 %v2438_v51, %v2427_v59  ;;  %v1940_v53 = vclz %v1939_v44  ;;  %v2020_v32 = vor.u32 %v2019_v3, %v2018_v31 }
 0x2b4   :  { %vm1535_vm13 = vcmp.gt.s32.totalorder %v8859_v10, 0  ;;  %vm8886_vm14 = vcmp.le.f32.partialorder %v1834_v26, 0.7853982  ;;  %vm2021_vm8 = vcmp.lt.s32.totalorder %v8866_v58, 1  ;;  %vm2022_vm9 = vcmp.lt.s32.totalorder %v8866_v58, 2 }
 0x2b5   :  { %v2433_v5 = vadd.f32 1.0, %v2432_v35  ;;  %v2440_v34 = vadd.f32 1.0, %v2439_v50  ;;  %v7462_v11 = vadd.s32 4294967294, %v1940_v53  ;;  %vm2023_vm15 = vcmp.lt.s32.totalorder %v8866_v58, 3 }
 0x2b6   :  { %vm2024_vm0 = vcmp.lt.s32.totalorder %v8866_v58, 4  ;;  %v2029_v62 = vsel %vm2021_vm8, %v2008_v45, %v2011_v36  ;;  %v2033_v50 = vsel %vm2021_vm8, %v2011_v36, %v2014_v52  ;;  %v2025_v20 = vsel %vm2021_vm8, %v2005_v40, %v2008_v45 }
 0x2b7   :  { %v2441_v48 = vmul.f32 %v2440_v34, %v2425_v25  ;;  %v2450_v59 = vxor.u32 2147483648, %v2433_v5  ;;  %vm7463_vm10 = vcmp.lt.s32.totalorder %v7462_v11, 0  ;;  %v2030_v49 = vsel %vm2024_vm0, %v2017_v56, 920167782 }
 0x2b8   :  { %v1943_v15 = vsel %vm7463_vm10, 0, %v7462_v11  ;;  %v2026_v23 = vsel %vm2024_vm0, %v2014_v52, 2102212464  ;;  %v2031_v35 = vsel %vm2023_vm15, %v2014_v52, %v2030_v49  ;;  %v2034_v24 = vsel %vm2024_vm0, %v2020_v32, 1326507024 }
 0x2b9   :  { %v2447_v61 = vxor.u32 2147483648, %v2441_v48  ;;  %v1944_v25 = vsub.s32 32, %v1943_v15  ;;  %v1948_v27 = vsub.s32 4294967266, %v1943_v15  ;;  %v2451_v26 = vsel %vm2449_vm4, %v2450_v59, %v2441_v48 }
 0x2ba   :  { %v1945_v60 = vshll.u32 %v8850_v55, %v1943_v15  ;;  %v2032_v55 = vsel %vm2022_vm9, %v2029_v62, %v2031_v35  ;;  %v2035_v43 = vsel %vm2023_vm15, %v2017_v56, %v2034_v24  ;;  %v1536_v56 = vsel %vm1535_vm13, %v8859_v10, 0 }
 0x2bb   :  { %v2448_v14 = vsel %vm2446_vm3, %v2433_v5, %v2447_v61  ;;  %v1946_v51 = vshrl.u32 %v1928_v63, %v1944_v25  ;;  %v1949_v57 = vadd.s32 127, %v1948_v27  ;;  %v1959_v63 = vsel %vm1836_vm7, %v1958_v18, %v8843_v21 }
 0x2bc   :  { %v2452_v41 = vsel %vm2445_vm5, %v2448_v14, %v2451_v26  ;;  %v2062_v53 = vand.u32 65535, %v2032_v55  ;;  %v2063_v47 = vshrl.u32 %v2032_v55, 16  ;;  %v2027_v5 = vsel %vm2023_vm15, %v2011_v36, %v2026_v23 }
 0x2bd   :  { %v2453_v17 = vsel %vm2442_vm6, nan, %v2452_v41  ;;  %v1947_v12 = vor.u32 %v1946_v51, %v1945_v60  ;;  %v1950_v44 = vshll.u32 %v1949_v57, 23  ;;  %v2036_v34 = vsel %vm2022_vm9, %v2033_v50, %v2035_v43 }
 0x2be   :  { %2847 = vmatpush.msrb.mxu1 %v2453_v17  ;;  %7606 = vmatpush.msra.mxu3 %v2453_v17  ;;  %v2040_v29 = vand.u32 65535, %v2036_v34  ;;  %v2041_v3 = vshrl.u32 %v2036_v34, 16  ;;  %v2065_v11 = vmul.u32 %v2063_v47, %v8854_v46  ;;  %v8931_v21 = vand.u32 8388607, %v1524_v8 }
 0x2bf   :  { %v1951_v6 = vor.u32 4788187, %v1950_v44  ;;  %v1954_v0 = vcvt.s32.f32 %v1947_v12  ;;  %v1961_v31 = vsel %vm8886_vm14, 0, %v1959_v63  ;;  %v2066_v45 = vmul.u32 %v2062_v53, %v8857_v33 }
 0x2c0   :  { %v8938_v48 = vsel %vm2022_vm9, %v2025_v20, %v2027_v5  ;;  %v2043_v59 = vmul.u32 %v2041_v3, %v8854_v46  ;;  %v2044_v36 = vmul.u32 %v2040_v29, %v8857_v33  ;;  %v2064_v52 = vmul.u32 %v2062_v53, %v8854_v46 }
 0x2c1   :  { %v1952_v18 = vand.u32 2147483647, %v1951_v6  ;;  %v2067_v32 = vmul.u32 %v2063_v47, %v8857_v33  ;;  %v2068_v61 = vshll.u32 %v2065_v11, 16  ;;  %v2042_v15 = vmul.u32 %v2040_v29, %v8854_v46 }
 0x2c2   :  { %v2045_v58 = vmul.u32 %v2041_v3, %v8857_v33  ;;  %v2046_v25 = vshll.u32 %v2043_v59, 16  ;;  %v2070_v27 = vshll.u32 %v2066_v45, 16  ;;  %v2048_v26 = vshll.u32 %v2044_v36, 16 }
 0x2c3   :  { %v1955_v40 = vmul.f32 %v1954_v0, %v1952_v18  ;;  %vm2072_vm1 = vc.u32 %v2064_v52, %v2068_v61  ;;  %v2074_v62 = vadd.s32 %v2068_v61, %v2064_v52  ;;  %v1538_v41 = vand.u32 31, %v1536_v56 }
 0x2c4   :  { %vm2050_vm2 = vc.u32 %v2042_v15, %v2046_v25  ;;  %v2052_v49 = vadd.s32 %v2046_v25, %v2042_v15  ;;  %v2073_v10 = vsel %vm2072_vm1, 1, %v7727_v2  ;;  %v2069_v50 = vshrl.u32 %v2065_v11, 16 }
 0x2c5   :  { %v1956_v14 = vxor.u32 2147483648, %v1955_v40  ;;  %v2051_v51 = vsel %vm2050_vm2, 1, %v7727_v2  ;;  %v2075_v57 = vadd.s32 %v2073_v10, %v2067_v32  ;;  %vm2076_vm3 = vc.u32 %v2074_v62, %v2070_v27 }
 0x2c6   :  { %v2053_v33 = vadd.s32 %v2051_v51, %v2045_v58  ;;  %vm2054_vm4 = vc.u32 %v2052_v49, %v2048_v26  ;;  %v2077_v17 = vsel %vm2076_vm3, 1, %v7727_v2  ;;  %v1978_v44 = vadd.s32 3, %v1961_v31 }
 0x2c7   :  { %v1957_v60 = vsel %vm1836_vm7, %v1956_v14, %v1955_v40  ;;  %v2055_v35 = vsel %vm2054_vm4, 1, %v7727_v2  ;;  %v2079_v12 = vadd.s32 %v2077_v17, %v2075_v57  ;;  %v2047_v55 = vshrl.u32 %v2043_v59, 16 }
 0x2c8   :  { %v1960_v46 = vsel %vm8886_vm14, %v8611_v54, %v1957_v60  ;;  %v2057_v24 = vadd.s32 %v2055_v35, %v2053_v33  ;;  %v8958_v63 = vsub.s32 32, %v1538_v41  ;;  %v2071_v47 = vshrl.u32 %v2066_v45, 16 }
 0x2c9   :  { %v1962_v23 = vmul.f32 %v1960_v46, %v1960_v46  ;;  %v2080_v6 = vadd.s32 %v2079_v12, %v2069_v50  ;;  %v2049_v1 = vshrl.u32 %v2044_v36, 16  ;;  %v2082_v5 = vmul.u32 %v8845_v30, %v8938_v48 }
 0x2ca   :  { %v2058_v20 = vadd.s32 %v2057_v24, %v2047_v55  ;;  %v8962_v34 = vshrl.u32 %v1536_v56, 5  ;;  %v8964_v11 = vadd.s32 %v2074_v62, %v2070_v27  ;;  %v1544_v31 = vshll.u32 %v7729_v9, %v1538_v41 }
 0x2cb   :  { %v1963_v43 = vmul.f32 -0.001358992, %v1962_v23  ;;  %v1970_v53 = vmul.f32 -0.00019511016, %v1962_v23  ;;  %v2081_v18 = vadd.s32 %v2080_v6, %v2071_v47  ;;  %v1545_v45 = vshrl.u32 %v7730_v13, %v8958_v63 }
 0x2cc   :  { %v8966_v0 = vadd.s32 %v2058_v20, %v2049_v1  ;;  %v1547_v59 = vshll.u32 %v7730_v13, %v1538_v41  ;;  %v1548_v30 = vshrl.u32 %v7731_v16, %v8958_v63  ;;  %v1542_v48 = vshrl.u32 %v7729_v9, %v8958_v63 }
 0x2cd   :  { %v1964_v29 = vadd.f32 0.041655596, %v1963_v43  ;;  %v1971_v3 = vadd.f32 0.008332121, %v1970_v53  ;;  %v2085_v52 = vadd.s32 1, %v2081_v18  ;;  %v1550_v56 = vshll.u32 %v7731_v16, %v1538_v41 }
 0x2ce   :  { %vm2084_vm5 = vc.u32 %v8966_v0, %v8964_v11  ;;  %v1551_v32 = vshrl.u32 %v7732_v19, %v8958_v63  ;;  %v1554_v25 = vshrl.u32 %v7733_v22, %v8958_v63  ;;  %v1541_v14 = vshll.u32 %v7728_v7, %v1538_v41 }
 0x2cf   :  { %v1965_v36 = vmul.f32 %v1964_v29, %v1962_v23  ;;  %v1972_v40 = vmul.f32 %v1971_v3, %v1962_v23  ;;  %v2086_v58 = vsel %vm2084_vm5, %v2085_v52, %v2081_v18  ;;  %v1553_v62 = vshll.u32 %v7732_v19, %v1538_v41 }
 0x2d0   :  { %v2087_v27 = vadd.s32 %v2086_v58, %v2082_v5  ;;  %v1552_v26 = vor.u32 %v1551_v32, %v1550_v56  ;;  %v8985_v60 = vor.u32 %v1545_v45, %v1544_v31  ;;  %v1549_v51 = vor.u32 %v1548_v30, %v1547_v59 }
 0x2d1   :  { %v1966_v61 = vadd.f32 -0.4999988, %v1965_v36  ;;  %v1973_v15 = vadd.f32 -0.16666654, %v1972_v40  ;;  %v8987_v33 = vor.u32 %v1542_v48, %v1541_v14  ;;  %v1555_v17 = vor.u32 %v1554_v25, %v1553_v62 }
 0x2d2   :  { %v2088_v57 = vadd.s32 536870912, %v2087_v27  ;;  %vm1559_vm6 = vcmp.lt.s32.totalorder %v8962_v34, 4  ;;  %v1532_v12 = vor.u32 8388608, %v8931_v21  ;;  %vm1977_vm7 = vweird.f32 %v8611_v54 }
 0x2d3   :  { %v1967_v49 = vmul.f32 %v1966_v61, %v1962_v23  ;;  %v1974_v10 = vmul.f32 %v1973_v15, %v1962_v23  ;;  %v1565_v55 = vsel %vm1559_vm6, %v1552_v26, 920167782  ;;  %v1979_v41 = vand.u32 3, %v1978_v44 }
 0x2d4   :  { %v8994_v23 = vshrl.u32 %v2088_v57, 30  ;;  %vm1556_vm10 = vcmp.lt.s32.totalorder %v8962_v34, 1  ;;  %vm1558_vm13 = vcmp.lt.s32.totalorder %v8962_v34, 3  ;;  %vm1557_vm14 = vcmp.lt.s32.totalorder %v8962_v34, 2 }
 0x2d5   :  { %v1968_v35 = vadd.f32 1.0, %v1967_v49  ;;  %v1975_v50 = vadd.f32 1.0, %v1974_v10  ;;  %v1568_v53 = vsel %vm1556_vm10, %v8985_v60, %v1549_v51  ;;  %v1564_v47 = vsel %vm1556_vm10, %v8987_v33, %v8985_v60 }
 0x2d6   :  { %v2090_v21 = vshll.u32 %v8994_v23, 30  ;;  %v1566_v44 = vsel %vm1558_vm13, %v1549_v51, %v1565_v55  ;;  %v9013_v20 = vshll.u32 %v1532_v12, 8  ;;  %vm1981_vm8 = vcmp.eq.s32.totalorder %v1979_v41, 0 }
 0x2d7   :  { %v1976_v24 = vmul.f32 %v1975_v50, %v1960_v46  ;;  %v1985_v43 = vxor.u32 2147483648, %v1968_v35  ;;  %v1569_v46 = vsel %vm1559_vm6, %v1555_v17, 1326507024  ;;  %vm1984_vm9 = vcmp.eq.s32.totalorder %v1979_v41, 2 }
 0x2d8   :  { %v1570_v1 = vsel %vm1558_vm13, %v1552_v26, %v1569_v46  ;;  %v2091_v5 = vsub.s32 %v2087_v27, %v2090_v21  ;;  %vm1980_vm15 = vcmp.lt.s32.totalorder %v1979_v41, 2  ;;  %v1567_v31 = vsel %vm1557_vm14, %v1564_v47, %v1566_v44 }
 0x2d9   :  { %v1982_v6 = vxor.u32 2147483648, %v1976_v24  ;;  %v1571_v29 = vsel %vm1557_vm14, %v1568_v53, %v1570_v1  ;;  %v1986_v18 = vsel %vm1984_vm9, %v1985_v43, %v1976_v24  ;;  %v1573_v52 = vand.u32 65535, %v9013_v20 }
 0x2da   :  { %vm2092_vm0 = vcmp.lt.s32.totalorder %v2091_v5, 0  ;;  %v2093_v59 = vsub.s32 0, %v2091_v5  ;;  %v1575_v36 = vand.u32 65535, %v1571_v29  ;;  %v1576_v30 = vshrl.u32 %v1571_v29, 16 }
 0x2db   :  { %v1983_v3 = vsel %vm1981_vm8, %v1968_v35, %v1982_v6  ;;  %v1574_v56 = vshrl.u32 %v9013_v20, 16  ;;  %v1597_v32 = vand.u32 65535, %v1567_v31  ;;  %v1598_v61 = vshrl.u32 %v1567_v31, 16 }
 0x2dc   :  { %v1987_v45 = vsel %vm1980_vm15, %v1983_v3, %v1986_v18  ;;  %v2094_v48 = vsel %vm2092_vm0, %v2093_v59, %v2091_v5  ;;  %v1578_v58 = vmul.u32 %v1576_v30, %v1573_v52  ;;  %v2083_v25 = vadd.s32 %v8964_v11, %v8966_v0 }
 0x2dd   :  { %v1988_v40 = vsel %vm1977_vm7, nan, %v1987_v45  ;;  %v2095_v15 = vclz %v2094_v48  ;;  %v1540_v27 = vshrl.u32 %v7728_v7, %v8958_v63  ;;  %v1579_v54 = vmul.u32 %v1575_v36, %v1574_v56 }
 0x2de   :  { %2819 = vmatpush.msrb.mxu0 %v1988_v40  ;;  %7603 = vmatpush.msra.mxu2 %v1988_v40  ;;  %v1577_v26 = vmul.u32 %v1575_v36, %v1573_v52  ;;  %v1581_v62 = vshll.u32 %v1578_v58, 16  ;;  %v1600_v49 = vmul.u32 %v1598_v61, %v1573_v52  ;;  %v1561_v10 = vsel %vm1559_vm6, %v1549_v51, 2102212464 }
 0x2df   :  { %v7465_v14 = vadd.s32 4294967294, %v2095_v15  ;;  %v1580_v57 = vmul.u32 %v1576_v30, %v1574_v56  ;;  %v1599_v17 = vmul.u32 %v1597_v32, %v1573_v52  ;;  %v1601_v35 = vmul.u32 %v1597_v32, %v1574_v56 }
 0x2e0   :  { %vm1585_vm2 = vc.u32 %v1577_v26, %v1581_v62  ;;  %v1587_v50 = vadd.s32 %v1581_v62, %v1577_v26  ;;  %v1603_v12 = vshll.u32 %v1600_v49, 16  ;;  %v1583_v11 = vshll.u32 %v1579_v54, 16 }
 0x2e1   :  { %vm7466_vm1 = vcmp.lt.s32.totalorder %v7465_v14, 0  ;;  %v1586_v0 = vsel %vm1585_vm2, 1, %v7727_v2  ;;  %v1602_v63 = vmul.u32 %v1598_v61, %v1574_v56  ;;  %v1605_v53 = vshll.u32 %v1601_v35, 16 }
 0x2e2   :  { %v2098_v55 = vsel %vm7466_vm1, 0, %v7465_v14  ;;  %v1588_v43 = vadd.s32 %v1586_v0, %v1580_v57  ;;  %vm1589_vm3 = vc.u32 %v1587_v50, %v1583_v11  ;;  %vm1607_vm4 = vc.u32 %v1599_v17, %v1603_v12 }
 0x2e3   :  { %v2099_v41 = vsub.s32 32, %v2098_v55  ;;  %v2103_v24 = vsub.s32 4294967266, %v2098_v55  ;;  %v2100_v21 = vshll.u32 %v2091_v5, %v2098_v55  ;;  %v1609_v51 = vadd.s32 %v1603_v12, %v1599_v17 }
 0x2e4   :  { %v1590_v46 = vsel %vm1589_vm3, 1, %v7727_v2  ;;  %v1608_v6 = vsel %vm1607_vm4, 1, %v7727_v2  ;;  %v1582_v1 = vshrl.u32 %v1578_v58, 16  ;;  %v9035_v5 = vmul.f32 %v8374_v42, %v8317_v37 }
 0x2e5   :  { %v2101_v47 = vshrl.u32 %v2083_v25, %v2099_v41  ;;  %v2104_v44 = vadd.s32 127, %v2103_v24  ;;  %v1592_v29 = vadd.s32 %v1590_v46, %v1588_v43  ;;  %v1610_v3 = vadd.s32 %v1608_v6, %v1602_v63 }
 0x2e6   :  { %vm1611_vm5 = vc.u32 %v1609_v51, %v1605_v53  ;;  %v1584_v59 = vshrl.u32 %v1579_v54, 16  ;;  %v1604_v40 = vshrl.u32 %v1600_v49, 16  ;;  %v2113_v48 = vsub.s32 4, %v8994_v23 }
 0x2e7   :  { %v2102_v18 = vor.u32 %v2101_v47, %v2100_v21  ;;  %v2105_v31 = vshll.u32 %v2104_v44, 23  ;;  %v1612_v45 = vsel %vm1611_vm5, 1, %v7727_v2  ;;  %v1593_v36 = vadd.s32 %v1592_v29, %v1582_v1 }
 0x2e8   :  { %v1614_v52 = vadd.s32 %v1612_v45, %v1610_v3  ;;  %v1560_v56 = vsel %vm1556_vm10, %v1540_v27, %v8987_v33  ;;  %v1562_v32 = vsel %vm1558_vm13, %v8985_v60, %v1561_v10  ;;  %v1606_v15 = vshrl.u32 %v1601_v35, 16 }
 0x2e9   :  { %v2106_v30 = vor.u32 4788187, %v2105_v31  ;;  %v9044_v61 = vadd.s32 %v1593_v36, %v1584_v59  ;;  %v1682_v42 = vand.u32 2139095040, %v9035_v5  ;;  %v2109_v25 = vcvt.s32.f32 %v2102_v18 }
 0x2ea   :  { %v1615_v37 = vadd.s32 %v1614_v52, %v1604_v40  ;;  %v9047_v54 = vadd.s32 %v1609_v51, %v1605_v53  ;;  %vm1991_vm6 = vcmp.lt.s32.totalorder %v8820_v39, 0  ;;  %v1563_v14 = vsel %vm1557_vm14, %v1560_v56, %v1562_v32 }
 0x2eb   :  { %v2107_v58 = vand.u32 2147483647, %v2106_v30  ;;  %v1683_v27 = vshrl.u32 %v1682_v42, 23  ;;  %v2114_v60 = vsel %vm1991_vm6, %v2113_v48, %v8994_v23  ;;  %vm1990_vm10 = vcmp.le.f32.partialorder %v1989_v28, 0.7853982 }
 0x2ec   :  { %v1616_v33 = vadd.s32 %v1615_v37, %v1606_v15  ;;  %vm1619_vm7 = vc.u32 %v9044_v61, %v9047_v54  ;;  %v1617_v57 = vmul.u32 %v9013_v20, %v1563_v14  ;;  %v2116_v17 = vsel %vm1990_vm10, 0, %v2114_v60 }
 0x2ed   :  { %v2110_v26 = vmul.f32 %v2109_v25, %v2107_v58  ;;  %v7458_v49 = vadd.s32 4294967169, %v1683_v27  ;;  %v1679_v23 = vand.u32 2147483647, %v9035_v5  ;;  %v2133_v0 = vadd.s32 3, %v2116_v17 }
 0x2ee   :  { %v1620_v62 = vadd.s32 1, %v1616_v33  ;;  %vm2132_vm0 = vweird.f32 %v8820_v39 }
 0x2ef   :  { %v2111_v10 = vxor.u32 2147483648, %v2110_v26  ;;  %v1689_v34 = vadd.s32 1, %v7458_v49  ;;  %v1686_v20 = vand.u32 8388607, %v1679_v23  ;;  %v2134_v44 = vand.u32 3, %v2133_v0 }
 0x2f0   :  { %v1621_v35 = vsel %vm1619_vm7, %v1620_v62, %v1616_v33  ;;  %v1618_v49 = vadd.s32 %v9047_v54, %v9044_v61  ;;  %vm1526_vm7 = vcmp.lt.s32.totalorder %v8829_v4, 0 }
 0x2f1   :  { %v2112_v50 = vsel %vm1991_vm6, %v2111_v10, %v2110_v26  ;;  %v1622_v12 = vadd.s32 %v1621_v35, %v1617_v57  ;;  %vm1690_vm13 = vcmp.gt.s32.totalorder %v1689_v34, 0  ;;  %v1687_v3 = vor.u32 8388608, %v1686_v20 }
 0x2f2   :  { %v2115_v55 = vsel %vm1990_vm10, %v8820_v39, %v2112_v50  ;;  %v1691_v41 = vsel %vm1690_vm13, %v1689_v34, 0  ;;  %vm2139_vm14 = vcmp.eq.s32.totalorder %v2134_v44, 2  ;;  %vm2136_vm9 = vcmp.eq.s32.totalorder %v2134_v44, 0 }
 0x2f3   :  { %v2117_v11 = vmul.f32 %v2115_v55, %v2115_v55  ;;  %v1623_v63 = vadd.s32 536870912, %v1622_v12  ;;  %v1693_v24 = vand.u32 31, %v1691_v41  ;;  %v9069_v18 = vshrl.u32 %v1691_v41, 5 }
 0x2f4   :  { %vm2135_vm15 = vcmp.lt.s32.totalorder %v2134_v44, 2  ;;  %v9098_v17 = vshll.u32 %v1687_v3, 8  ;;  %vm9135_vm6 = vcmp.le.f32.partialorder %v1524_v8, 0.7853982 }
 0x2f5   :  { %v2118_v43 = vmul.f32 -0.001358992, %v2117_v11  ;;  %v2125_v28 = vmul.f32 -0.00019511016, %v2117_v11  ;;  %v9060_v53 = vshrl.u32 %v1623_v63, 30  ;;  %v9064_v21 = vsub.s32 32, %v1693_v24 }
 0x2f6   :  { %v1696_v52 = vshll.u32 %v7728_v7, %v1693_v24  ;;  %v1699_v30 = vshll.u32 %v7729_v9, %v1693_v24  ;;  %v1702_v33 = vshll.u32 %v7730_v13, %v1693_v24  ;;  %v1705_v60 = vshll.u32 %v7731_v16, %v1693_v24 }
 0x2f7   :  { %v2119_v51 = vadd.f32 0.041655596, %v2118_v43  ;;  %v2126_v47 = vadd.f32 0.008332121, %v2125_v28  ;;  %v1625_v46 = vshll.u32 %v9060_v53, 30  ;;  %v1697_v31 = vshrl.u32 %v7729_v9, %v9064_v21 }
 0x2f8   :  { %v1700_v45 = vshrl.u32 %v7730_v13, %v9064_v21  ;;  %v1703_v48 = vshrl.u32 %v7731_v16, %v9064_v21  ;;  %v1706_v56 = vshrl.u32 %v7732_v19, %v9064_v21  ;;  %v1709_v42 = vshrl.u32 %v7733_v22, %v9064_v21 }
 0x2f9   :  { %v2120_v6 = vmul.f32 %v2119_v51, %v2117_v11  ;;  %v2127_v1 = vmul.f32 %v2126_v47, %v2117_v11  ;;  %v9067_v29 = vsub.s32 %v1622_v12, %v1625_v46  ;;  %v9087_v25 = vor.u32 %v1697_v31, %v1696_v52 }
 0x2fa   :  { %v9089_v14 = vor.u32 %v1700_v45, %v1699_v30  ;;  %v1708_v62 = vshll.u32 %v7732_v19, %v1693_v24  ;;  %v9096_v57 = vor.u32 %v1703_v48, %v1702_v33  ;;  %v1707_v50 = vor.u32 %v1706_v56, %v1705_v60 }
 0x2fb   :  { %v2121_v59 = vadd.f32 -0.4999988, %v2120_v6  ;;  %v2128_v36 = vadd.f32 -0.16666654, %v2127_v1  ;;  %vm1627_vm8 = vcmp.lt.s32.totalorder %v9067_v29, 0  ;;  %v1628_v40 = vsub.s32 0, %v9067_v29 }
 0x2fc   :  { %v1710_v12 = vor.u32 %v1709_v42, %v1708_v62  ;;  %vm1711_vm2 = vcmp.lt.s32.totalorder %v9069_v18, 1  ;;  %vm1712_vm3 = vcmp.lt.s32.totalorder %v9069_v18, 2  ;;  %vm1713_vm4 = vcmp.lt.s32.totalorder %v9069_v18, 3 }
 0x2fd   :  { %v2122_v32 = vmul.f32 %v2121_v59, %v2117_v11  ;;  %v2129_v15 = vmul.f32 %v2128_v36, %v2117_v11  ;;  %v1629_v37 = vsel %vm1627_vm8, %v1628_v40, %v9067_v29  ;;  %vm1714_vm5 = vcmp.lt.s32.totalorder %v9069_v18, 4 }
 0x2fe   :  { %v1630_v58 = vclz %v1629_v37  ;;  %v1719_v61 = vsel %vm1711_vm2, %v9087_v25, %v9089_v14  ;;  %v1720_v43 = vsel %vm1714_vm5, %v1707_v50, 920167782  ;;  %v1723_v28 = vsel %vm1711_vm2, %v9089_v14, %v9096_v57 }
 0x2ff   :  { %v2123_v27 = vadd.f32 1.0, %v2122_v32  ;;  %v2130_v26 = vadd.f32 1.0, %v2129_v15  ;;  %v1724_v20 = vsel %vm1714_vm5, %v1710_v12, 1326507024  ;;  %v1721_v6 = vsel %vm1713_vm4, %v9096_v57, %v1720_v43 }
 0x300   :  { %v7456_v10 = vadd.s32 4294967294, %v1630_v58  ;;  %v1725_v3 = vsel %vm1713_vm4, %v1707_v50, %v1724_v20  ;;  %v1728_v31 = vand.u32 65535, %v9098_v17  ;;  %v1729_v40 = vshrl.u32 %v9098_v17, 16 }
 0x301   :  { %v2131_v35 = vmul.f32 %v2130_v26, %v2115_v55  ;;  %v2140_v34 = vxor.u32 2147483648, %v2123_v27  ;;  %v1726_v59 = vsel %vm1712_vm3, %v1723_v28, %v1725_v3  ;;  %v1648_v33 = vsub.s32 4, %v9060_v53 }
 0x302   :  { %vm7457_vm1 = vcmp.lt.s32.totalorder %v7456_v10, 0  ;;  %v1730_v39 = vand.u32 65535, %v1726_v59  ;;  %v1731_v52 = vshrl.u32 %v1726_v59, 16  ;;  %v1695_v26 = vshrl.u32 %v7728_v7, %v9064_v21 }
 0x303   :  { %v2137_v11 = vxor.u32 2147483648, %v2131_v35  ;;  %v1633_v0 = vsel %vm7457_vm1, 0, %v7456_v10  ;;  %v2141_v54 = vsel %vm2139_vm14, %v2140_v34, %v2131_v35  ;;  %v1716_v21 = vsel %vm1714_vm5, %v9096_v57, 2102212464 }
 0x304   :  { %v1634_v55 = vsub.s32 32, %v1633_v0  ;;  %v1635_v63 = vshll.u32 %v9067_v29, %v1633_v0  ;;  %v1638_v41 = vsub.s32 4294967266, %v1633_v0  ;;  %v1722_v29 = vsel %vm1712_vm3, %v1719_v61, %v1721_v6 }
 0x305   :  { %v2138_v24 = vsel %vm2136_vm9, %v2123_v27, %v2137_v11  ;;  %v1752_v36 = vand.u32 65535, %v1722_v29  ;;  %v1753_v30 = vshrl.u32 %v1722_v29, 16  ;;  %v1733_v32 = vmul.u32 %v1731_v52, %v1728_v31 }
 0x306   :  { %v2142_v51 = vsel %vm2135_vm15, %v2138_v24, %v2141_v54  ;;  %v1636_v47 = vshrl.u32 %v1618_v49, %v1634_v55  ;;  %v1639_v46 = vadd.s32 127, %v1638_v41  ;;  %v1734_v15 = vmul.u32 %v1730_v39, %v1729_v40 }
 0x307   :  { %v2143_v1 = vsel %vm2132_vm0, nan, %v2142_v51  ;;  %v1756_v37 = vmul.u32 %v1752_v36, %v1729_v40  ;;  %v1755_v27 = vmul.u32 %v1753_v30, %v1728_v31  ;;  %v1732_v60 = vmul.u32 %v1730_v39, %v1728_v31 }
 0x308   :  { %2848 = vmatpush.msrb.mxu1 %v2143_v1  ;;  %7607 = vmatpush.msra.mxu3 %v2143_v1  ;;  %v1637_v44 = vor.u32 %v1636_v47, %v1635_v63  ;;  %v1640_v45 = vshll.u32 %v1639_v46, 23  ;;  %v1736_v62 = vshll.u32 %v1733_v32, 16  ;;  %v1754_v8 = vmul.u32 %v1752_v36, %v1728_v31 }
 0x309   :  { %v1735_v10 = vmul.u32 %v1731_v52, %v1729_v40  ;;  %v1757_v35 = vmul.u32 %v1753_v30, %v1729_v40  ;;  %v1758_v34 = vshll.u32 %v1755_v27, 16  ;;  %v1738_v50 = vshll.u32 %v1734_v15, 16 }
 0x30a   :  { %v1641_v56 = vor.u32 4788187, %v1640_v45  ;;  %v1644_v58 = vcvt.s32.f32 %v1637_v44  ;;  %vm1740_vm10 = vc.u32 %v1732_v60, %v1736_v62  ;;  %v1742_v12 = vadd.s32 %v1736_v62, %v1732_v60 }
 0x30b   :  { %v1760_v11 = vshll.u32 %v1756_v37, 16  ;;  %v1741_v61 = vsel %vm1740_vm10, 1, %v7727_v2  ;;  %vm1762_vm13 = vc.u32 %v1754_v8, %v1758_v34  ;;  %v1764_v54 = vadd.s32 %v1758_v34, %v1754_v8 }
 0x30c   :  { %v1642_v42 = vand.u32 2147483647, %v1641_v56  ;;  %v1743_v55 = vadd.s32 %v1741_v61, %v1735_v10  ;;  %vm1744_vm14 = vc.u32 %v1742_v12, %v1738_v50  ;;  %v1763_v63 = vsel %vm1762_vm13, 1, %v7727_v2 }
 0x30d   :  { %v1745_v24 = vsel %vm1744_vm14, 1, %v7727_v2  ;;  %v1765_v43 = vadd.s32 %v1763_v63, %v1757_v35  ;;  %vm1766_vm8 = vc.u32 %v1764_v54, %v1760_v11  ;;  %v1737_v20 = vshrl.u32 %v1733_v32, 16 }
 0x30e   :  { %v1645_v49 = vmul.f32 %v1644_v58, %v1642_v42  ;;  %v1747_v51 = vadd.s32 %v1745_v24, %v1743_v55  ;;  %v1767_v47 = vsel %vm1766_vm8, 1, %v7727_v2  ;;  %v1759_v46 = vshrl.u32 %v1755_v27, 16  ;;  %v7647_v24 = vld [vmem:[#allocation2 + $0x40] sm:$0x3] }
 0x30f   :  { %v1769_v6 = vadd.s32 %v1767_v47, %v1765_v43  ;;  %v1715_v1 = vsel %vm1711_vm2, %v1695_v26, %v9087_v25  ;;  %v1717_v29 = vsel %vm1713_vm4, %v9089_v14, %v1716_v21  ;;  %v1739_v3 = vshrl.u32 %v1734_v15, 16 }
 0x310   :  { %v1646_v0 = vxor.u32 2147483648, %v1645_v49  ;;  %v1748_v31 = vadd.s32 %v1747_v51, %v1737_v20  ;;  %v1761_v59 = vshrl.u32 %v1756_v37, 16  ;;  %v1649_v40 = vsel %vm1526_vm7, %v1648_v33, %v9060_v53  ;;  %v7649_v20 = vld [vmem:[#allocation2 + $0x48] sm:$0xff] }
 0x311   :  { %v1770_v36 = vadd.s32 %v1769_v6, %v1759_v46  ;;  %v1768_v52 = vadd.s32 %v1764_v54, %v1760_v11  ;;  %v1718_v25 = vsel %vm1712_vm3, %v1715_v1, %v1717_v29  ;;  %v1651_v14 = vsel %vm9135_vm6, 0, %v1649_v40  ;;  %v7650_v46 = vld [vmem:[#allocation2 + $0x18] sm:$0xff] }
 0x312   :  { %v1647_v41 = vsel %vm1526_vm7, %v1646_v0, %v1645_v49  ;;  %v1749_v39 = vadd.s32 %v1748_v31, %v1739_v3  ;;  %v1772_v58 = vmul.u32 %v9098_v17, %v1718_v25  ;;  %v1668_v33 = vadd.s32 3, %v1651_v14  ;;  %v7651_v3 = vld [vmem:[#allocation2 + $0x30] sm:$0xff] }
 0x313   :  { %v1650_v28 = vsel %vm9135_vm6, %v8829_v4, %v1647_v41  ;;  %v1771_v32 = vadd.s32 %v1770_v36, %v1761_v59  ;;  %vm1667_vm2 = vweird.f32 %v8829_v4  ;;  %vm2792_vm5 = vcmask 261120   ;;  %v2765_v59 = vld [vmem:[#allocation7 + $0x48] sm:$0xff] }
 0x314   :  { %v1652_v57 = vmul.f32 %v1650_v28, %v1650_v28  ;;  %vm1774_vm9 = vc.u32 %v1749_v39, %v1768_v52  ;;  %v1669_v35 = vand.u32 3, %v1668_v33  ;;  %v1773_v47 = vadd.s32 %v1768_v52, %v1749_v39 }
 0x315   :  { %v1775_v37 = vadd.s32 1, %v1771_v32  ;;  %vm1681_vm6 = vcmp.lt.s32.totalorder %v9035_v5, 0  ;;  %vm9176_vm7 = vcmp.le.f32.partialorder %v1679_v23, 0.7853982  ;;  %vm1822_vm8 = vweird.f32 %v9035_v5 }
 0x316   :  { %v1653_v44 = vmul.f32 -0.001358992, %v1652_v57  ;;  %v1660_v45 = vmul.f32 -0.00019511016, %v1652_v57  ;;  %vm1671_vm15 = vcmp.eq.s32.totalorder %v1669_v35, 0  ;;  %vm1674_vm0 = vcmp.eq.s32.totalorder %v1669_v35, 2 }
 0x317   :  { %v1776_v53 = vsel %vm1774_vm9, %v1775_v37, %v1771_v32  ;;  %vm1670_vm1 = vcmp.lt.s32.totalorder %v1669_v35, 2 }
 0x318   :  { %v1654_v30 = vadd.f32 0.041655596, %v1653_v44  ;;  %v1661_v56 = vadd.f32 0.008332121, %v1660_v45  ;;  %v1777_v60 = vadd.s32 %v1776_v53, %v1772_v58  ;;  %v2764_v45 = vld [vmem:[#allocation7 + $0x40] sm:$0xff] }
 0x31a   :  { %v1655_v15 = vmul.f32 %v1654_v30, %v1652_v57  ;;  %v1662_v42 = vmul.f32 %v1661_v56, %v1652_v57  ;;  %v1778_v49 = vadd.s32 536870912, %v1777_v60  ;;  %v2766_v56 = vld [vmem:[#allocation7 + $0x50] sm:$0xff] }
 0x31c   :  { %v1656_v27 = vadd.f32 -0.4999988, %v1655_v15  ;;  %v1663_v26 = vadd.f32 -0.16666654, %v1662_v42  ;;  %v1779_v34 = vshrl.u32 %v1778_v49, 30 }
 0x31e   :  { %v1657_v62 = vmul.f32 %v1656_v27, %v1652_v57  ;;  %v1664_v8 = vmul.f32 %v1663_v26, %v1652_v57  ;;  %v1780_v12 = vshll.u32 %v1779_v34, 30  ;;  %v1803_v14 = vsub.s32 4, %v1779_v34  ;;  %v2767_v26 = vld [vmem:[#allocation7 + $0x58] sm:$0xff] }
 0x320   :  { %v1658_v18 = vadd.f32 1.0, %v1657_v62  ;;  %v1665_v10 = vadd.f32 1.0, %v1664_v8  ;;  %v1781_v0 = vsub.s32 %v1777_v60, %v1780_v12  ;;  %v1804_v27 = vsel %vm1681_vm6, %v1803_v14, %v1779_v34 }
 0x321   :  { %v1806_v23 = vsel %vm9176_vm7, 0, %v1804_v27 }
 0x322   :  { %v1666_v50 = vmul.f32 %v1665_v10, %v1650_v28  ;;  %v1675_v48 = vxor.u32 2147483648, %v1658_v18  ;;  %vm1782_vm3 = vcmp.lt.s32.totalorder %v1781_v0, 0  ;;  %v1783_v21 = vsub.s32 0, %v1781_v0  ;;  %v7648_v28 = vld [vmem:[#allocation2 + $0x8] sm:$0xff] }
 0x324   :  { %v1672_v11 = vxor.u32 2147483648, %v1666_v50  ;;  %v1676_v61 = vsel %vm1674_vm0, %v1675_v48, %v1666_v50  ;;  %v1784_v63 = vsel %vm1782_vm3, %v1783_v21, %v1781_v0 }
 0x325   :  { %v1785_v41 = vclz %v1784_v63  ;;  %v7653_v63 = vld [vmem:[#allocation2 + $0x20] sm:$0xff] }
 0x326   :  { %v1673_v17 = vsel %vm1671_vm15, %v1658_v18, %v1672_v11  ;;  %v1823_v18 = vadd.s32 3, %v1806_v23 }
 0x327   :  { %v1677_v54 = vsel %vm1670_vm1, %v1673_v17, %v1676_v61  ;;  %v7459_v43 = vadd.s32 4294967294, %v1785_v41  ;;  %v7654_v41 = vld [vmem:[#allocation2 + $0x28] sm:$0xff] }
 0x328   :  { %v1678_v55 = vsel %vm1667_vm2, nan, %v1677_v54  ;;  %v1824_v12 = vand.u32 3, %v1823_v18 }
 0x329   :  { %2820 = vmatpush.msrb.mxu0 %v1678_v55  ;;  %7604 = vmatpush.msra.mxu2 %v1678_v55  ;;  %vm7460_vm4 = vcmp.lt.s32.totalorder %v7459_v43, 0  ;;  %v7652_v55 = vld [vmem:[#allocation2 + $0x38] sm:$0x3] }
 0x32a   :  { %v1788_v51 = vsel %vm7460_vm4, 0, %v7459_v43  ;;  %7479 = vmatmul.msk.f32.vlgmr.msrb.gmra.mxu0 %vm2792_vm5, %v2764_v45  ;;  %7480 = vmatmul.msk.f32.vlgmr.msra.gmra.mxu2 %vm2792_vm5, %v2765_v59  ;;  %vm1826_vm10 = vcmp.eq.s32.totalorder %v1824_v12, 0  ;;  %vm1829_vm13 = vcmp.eq.s32.totalorder %v1824_v12, 2  ;;  %vm1825_vm14 = vcmp.lt.s32.totalorder %v1824_v12, 2 }
 0x32b   :  { %7513 = vmatpush.msk.msrb.mxu2 %vm1402_vm11, %v7647_v24  ;;  %v1789_v4 = vsub.s32 32, %v1788_v51  ;;  %v1793_v57 = vsub.s32 4294967266, %v1788_v51  ;;  %v1790_v6 = vshll.u32 %v1781_v0, %v1788_v51  ;;  %v7655_v24 = vld [vmem:[#allocation2 + $0x10] sm:$0xff] }
 0x32d   :  { %4185 = vmatpush.msrb.mxu2 %v7648_v28  ;;  %v1791_v1 = vshrl.u32 %v1773_v47, %v1789_v4  ;;  %v1794_v29 = vadd.s32 127, %v1793_v57  ;;  %v2775_v28 = vpop.permute.xlu2 %2774  ;;  %v2785_v57 = vpop.permute.xlu1 %2784 }
 0x32f   :  { %4186 = vmatpush.msrb.mxu2 %v7649_v20  ;;  %v1792_v31 = vor.u32 %v1791_v1, %v1790_v6  ;;  %v1795_v44 = vshll.u32 %v1794_v29, 23  ;;  %v2780_v20 = vpop.permute.xlu0 %2779 }
 0x331   :  { %4187 = vmatpush.msrb.mxu2 %v7650_v46  ;;  %v1796_v36 = vor.u32 4788187, %v1795_v44  ;;  %v1799_v39 = vcvt.s32.f32 %v1792_v31 }
 0x332   :  { %7481 = vmatmul.msk.f32.gmra.mxu2 %vm2792_vm5, %v2766_v56 }
 0x333   :  { %4188 = vmatpush.msrb.mxu2 %v7651_v3  ;;  %v1797_v40 = vand.u32 2147483647, %v1796_v36 }
 0x335   :  { %v1800_v52 = vmul.f32 %v1799_v39, %v1797_v40  ;;  %v2790_v31 = vpop.permute.xlu2 %2789 }
 0x337   :  { %v1801_v30 = vxor.u32 2147483648, %v1800_v52 }
 0x339   :  { %v1802_v32 = vsel %vm1681_vm6, %v1801_v30, %v1800_v52 }
 0x33a   :  { %v1805_v15 = vsel %vm9176_vm7, %v9035_v5, %v1802_v32  ;;  %7482 = vmatmul.msk.f32.gmra.mxu2 %vm2792_vm5, %v2767_v26  ;;  %v7656_v5 = vld [vmem:[#allocation2] sm:$0xff] }
 0x33b   :  { %v1807_v42 = vmul.f32 %v1805_v15, %v1805_v15 }
 0x33d   :  { %v1808_v37 = vmul.f32 -0.001358992, %v1807_v42  ;;  %v1815_v58 = vmul.f32 -0.00019511016, %v1807_v42 }
 0x33f   :  { %v1809_v53 = vadd.f32 0.041655596, %v1808_v37  ;;  %v1816_v33 = vadd.f32 0.008332121, %v1815_v58  ;;  %v2896_v58 = vstv %s9204_s7 }
 0x341   :  { %v1810_v60 = vmul.f32 %v1809_v53, %v1807_v42  ;;  %v1817_v62 = vmul.f32 %v1816_v33, %v1807_v42 }
 0x343   :  { %v1811_v8 = vadd.f32 -0.4999988, %v1810_v60  ;;  %v1818_v49 = vadd.f32 -0.16666654, %v1817_v62 }
 0x345   :  { %v1812_v10 = vmul.f32 %v1811_v8, %v1807_v42  ;;  %v1819_v35 = vmul.f32 %v1818_v49, %v1807_v42  ;;  %v2892_v42 = vstv %s9202_s6 }
 0x347   :  { %v1813_v50 = vadd.f32 1.0, %v1812_v10  ;;  %v1820_v48 = vadd.f32 1.0, %v1819_v35 }
 0x349   :  { %v1821_v11 = vmul.f32 %v1820_v48, %v1805_v15  ;;  %v1830_v34 = vxor.u32 2147483648, %v1813_v50 }
 0x34b   :  { %v1827_v0 = vxor.u32 2147483648, %v1821_v11  ;;  %v1831_v61 = vsel %vm1829_vm13, %v1830_v34, %v1821_v11 }
 0x34d   :  { %v1828_v17 = vsel %vm1826_vm10, %v1813_v50, %v1827_v0 }
 0x34e   :  { %v1832_v54 = vsel %vm1825_vm14, %v1828_v17, %v1831_v61 }
 0x34f   :  { %v1833_v21 = vsel %vm1822_vm8, nan, %v1832_v54 }
 0x350   :  { %2849 = vmatpush.msrb.mxu1 %v1833_v21  ;;  %7608 = vmatpush.msra.mxu3 %v1833_v21 }
 0x351   :  { %7483 = vmatmul.msk.f32.vlgmr.msrb.gmra.mxu1 %vm2792_vm5, %v2764_v45  ;;  %7484 = vmatmul.msk.f32.vlgmr.msra.gmra.mxu3 %vm2792_vm5, %v2765_v59 }
 0x352   :  { %7518 = vmatpush.msk.msrb.mxu3 %vm1402_vm11, %v7652_v55 }
 0x354   :  { %4214 = vmatpush.msrb.mxu3 %v7653_v63 }
 0x356   :  { %4215 = vmatpush.msrb.mxu3 %v7654_v41 }
 0x358   :  { %4216 = vmatpush.msrb.mxu3 %v7655_v24 }
 0x359   :  { %7485 = vmatmul.msk.f32.gmra.mxu3 %vm2792_vm5, %v2766_v56 }
 0x35a   :  { %4217 = vmatpush.msrb.mxu3 %v7656_v5 }
 0x361   :  { %7486 = vmatmul.msk.f32.gmra.mxu3 %vm2792_vm5, %v2767_v26 }
 0x3a7   :  { %v2822_v51 = vpop.f32.mrf.mxu0 }
 0x3a8   :  { %v9195_v46 = vadd.f32 %v2822_v51, %v2775_v28 }
 0x3aa   :  { %v2863_v29 = vand.u32 2147483647, %v9195_v46 }
 0x3ad   :  { %v2825_v43 = vpop.f32.mrf.mxu2 }
 0x3ae   :  { %v9193_v4 = vadd.f32 %v2825_v43, %v2780_v20 }
 0x3b0   :  { %v2865_v1 = vand.u32 2147483647, %v9193_v4 }
 0x3b2   :  { %v2871_v45 = vadd.f32 %v2865_v1, %v2863_v29 }
 0x3b5   :  { %v2828_v47 = vpop.f32.mrf.mxu2 }
 0x3b6   :  { %v9197_v6 = vadd.f32 %v2828_v47, %v2785_v57 }
 0x3b8   :  { %v2867_v3 = vand.u32 2147483647, %v9197_v6 }
 0x3ba   :  { %v2872_v36 = vadd.f32 %v2871_v45, %v2867_v3 }
 0x3bd   :  { %v2831_v44 = vpop.f32.mrf.mxu2 }
 0x3be   :  { %v2832_v59 = vadd.f32 %v2831_v44, %v2790_v31 }
 0x3c0   :  { %v2869_v40 = vand.u32 2147483647, %v2832_v59 }
 0x3c2   :  { %v2873_v39 = vadd.f32 %v2872_v36, %v2869_v40 }
 0x3c4   :  { %v2874_v52 = vrot.slane %v2873_v39, 4 }
 0x3c6   :  { %v2875_v30 = vadd.f32 %v2874_v52, %v2873_v39 }
 0x3c8   :  { %v2876_v56 = vrot.slane %v2875_v30, 2 }
 0x3ca   :  { %v2877_v25 = vadd.f32 %v2876_v56, %v2875_v30 }
 0x3cc   :  { %v2878_v32 = vrot.slane %v2877_v25, 1 }
 0x3ce   :  { %v2879_v15 = vadd.f32 %v2878_v32, %v2877_v25  ;;  %v2851_v53 = vpop.f32.mrf.mxu1 }
 0x3cf   :  { %v9211_v60 = vadd.f32 %v2851_v53, %v2775_v28 }
 0x3d0   :  { %v2889_v37 = vmul.f32 %v2879_v15, %v8310_v38 }
 0x3d1   :  { %v2864_v18 = vand.u32 2147483647, %v9211_v60 }
 0x3d2   :  { %v2893_v27 = vmul.f32 %v2892_v42, %v2889_v37 }
 0x3d4   :  { %v2854_v14 = vpop.f32.mrf.mxu3  ;;  %v2897_v26 = vadd.f32 %v2896_v58, %v2893_v27 }
 0x3d5   :  { %v9209_v23 = vadd.f32 %v2854_v14, %v2780_v20 }
 0x3d6   :  { %7631 = vtanh.f32 %v2897_v26 }
 0x3d7   :  { %v2866_v8 = vand.u32 2147483647, %v9209_v23 }
 0x3d9   :  { %v2880_v48 = vadd.f32 %v2866_v8, %v2864_v18 }
 0x3dc   :  { %v2857_v33 = vpop.f32.mrf.mxu3  ;;  %v7632_v49 = vpop.eup %7631 }
 0x3dd   :  { %v9213_v62 = vadd.f32 %v2857_v33, %v2785_v57  ;;  %v2901_v35 = vmul.f32 20.0, %v7632_v49 }
 0x3df   :  { %v2868_v10 = vand.u32 2147483647, %v9213_v62  ;;  %v9220_v11 = vadd.f32 30.0, %v2901_v35 }
 0x3e1   :  { %v2881_v34 = vadd.f32 %v2880_v48, %v2868_v10  ;;  %v9224_v17 = vmul.f32 %v9220_v11, %v2832_v59  ;;  %v9238_v36 = vmul.f32 %v9220_v11, %v9197_v6 }
 0x3e3   :  { %v3846_v54 = vand.u32 2139095040, %v9224_v17  ;;  %v3843_v28 = vand.u32 2147483647, %v9224_v17  ;;  %v3536_v15 = vand.u32 2139095040, %v9238_v36 }
 0x3e4   :  { %v2860_v50 = vpop.f32.mrf.mxu3 }
 0x3e5   :  { %v9218_v12 = vadd.f32 %v2860_v50, %v2790_v31  ;;  %v3847_v55 = vshrl.u32 %v3846_v54, 23  ;;  %v3850_v29 = vand.u32 8388607, %v3843_v28  ;;  %v3537_v10 = vshrl.u32 %v3536_v15, 23 }
 0x3e7   :  { %v2870_v0 = vand.u32 2147483647, %v9218_v12  ;;  %v7507_v41 = vadd.s32 4294967169, %v3847_v55  ;;  %v3851_v30 = vor.u32 8388608, %v3850_v29 }
 0x3e9   :  { %v2882_v61 = vadd.f32 %v2881_v34, %v2870_v0  ;;  %v3853_v5 = vadd.s32 1, %v7507_v41  ;;  %v9251_v53 = vshll.u32 %v3851_v30, 8 }
 0x3eb   :  { %v2883_v21 = vrot.slane %v2882_v61, 4  ;;  %vm3854_vm11 = vcmp.gt.s32.totalorder %v3853_v5, 0  ;;  %v3892_v54 = vand.u32 65535, %v9251_v53 }
 0x3ec   :  { %v3855_v20 = vsel %vm3854_vm11, %v3853_v5, 0 }
 0x3ed   :  { %v2884_v63 = vadd.f32 %v2883_v21, %v2882_v61  ;;  %v3857_v47 = vand.u32 31, %v3855_v20  ;;  %v9230_v3 = vshrl.u32 %v3855_v20, 5  ;;  %v3893_v21 = vshrl.u32 %v9251_v53, 16 }
 0x3ef   :  { %v2885_v24 = vrot.slane %v2884_v63, 2  ;;  %v3858_v1 = vsub.s32 32, %v3857_v47  ;;  %v3872_v45 = vshll.u32 %v7732_v19, %v3857_v47  ;;  %v3869_v40 = vshll.u32 %v7731_v16, %v3857_v47 }
 0x3f0   :  { %vm3878_vm9 = vcmp.lt.s32.totalorder %v9230_v3, 4  ;;  %v3860_v14 = vshll.u32 %v7728_v7, %v3857_v47  ;;  %v3863_v37 = vshll.u32 %v7729_v9, %v3857_v47  ;;  %v3866_v27 = vshll.u32 %v7730_v13, %v3857_v47 }
 0x3f1   :  { %v2886_v43 = vadd.f32 %v2885_v24, %v2884_v63  ;;  %v3870_v44 = vshrl.u32 %v7732_v19, %v3858_v1  ;;  %v3873_v59 = vshrl.u32 %v7733_v22, %v3858_v1  ;;  %v3861_v6 = vshrl.u32 %v7729_v9, %v3858_v1 }
 0x3f2   :  { %v3867_v26 = vshrl.u32 %v7731_v16, %v3858_v1  ;;  %vm3877_vm15 = vcmp.lt.s32.totalorder %v9230_v3, 3  ;;  %vm3875_vm0 = vcmp.lt.s32.totalorder %v9230_v3, 1  ;;  %vm3876_vm1 = vcmp.lt.s32.totalorder %v9230_v3, 2 }
 0x3f3   :  { %v2887_v51 = vrot.slane %v2886_v43, 1  ;;  %v3874_v52 = vor.u32 %v3873_v59, %v3872_v45  ;;  %v3871_v56 = vor.u32 %v3870_v44, %v3869_v40  ;;  %v3862_v33 = vor.u32 %v3861_v6, %v3860_v14 }
 0x3f4   :  { %v3868_v49 = vor.u32 %v3867_v26, %v3866_v27  ;;  %v7501_v24 = vadd.s32 4294967169, %v3537_v10  ;;  %v3859_v5 = vshrl.u32 %v7728_v7, %v3858_v1 }
 0x3f5   :  { %v2888_v57 = vadd.f32 %v2887_v51, %v2886_v43  ;;  %v3888_v32 = vsel %vm3878_vm9, %v3874_v52, 1326507024 }
 0x3f6   :  { %v3889_v18 = vsel %vm3877_vm15, %v3871_v56, %v3888_v32  ;;  %v3879_v29 = vsel %vm3875_vm0, %v3859_v5, %v3862_v33 }
 0x3f7   :  { %v2890_v31 = vmul.f32 %v2888_v57, %v8310_v38 }
 0x3f9   :  { %v2894_v39 = vmul.f32 %v2892_v42, %v2890_v31  ;;  %v3864_v42 = vshrl.u32 %v7730_v13, %v3858_v1  ;;  %v3880_v1 = vsel %vm3878_vm9, %v3868_v49, 2102212464 }
 0x3fb   :  { %v2898_v25 = vadd.f32 %v2896_v58, %v2894_v39  ;;  %v3884_v58 = vsel %vm3878_vm9, %v3871_v56, 920167782  ;;  %v3865_v8 = vor.u32 %v3864_v42, %v3863_v37  ;;  %v3543_v39 = vadd.s32 1, %v7501_v24 }
 0x3fc   :  { %v3885_v50 = vsel %vm3877_vm15, %v3868_v49, %v3884_v58 }
 0x3fd   :  { %7633 = vtanh.f32 %v2898_v25  ;;  %v3883_v35 = vsel %vm3875_vm0, %v3862_v33, %v3865_v8  ;;  %v3887_v48 = vsel %vm3875_vm0, %v3865_v8, %v3868_v49  ;;  %v3881_v10 = vsel %vm3877_vm15, %v3865_v8, %v3880_v1 }
 0x3fe   :  { %v3886_v0 = vsel %vm3876_vm1, %v3883_v35, %v3885_v50  ;;  %v3890_v61 = vsel %vm3876_vm1, %v3887_v48, %v3889_v18  ;;  %vm3544_vm7 = vcmp.gt.s32.totalorder %v3543_v39, 0  ;;  %vm3845_vm15 = vcmp.lt.s32.totalorder %v9224_v17, 0 }
 0x3ff   :  { %v3894_v63 = vand.u32 65535, %v3890_v61  ;;  %v3895_v41 = vshrl.u32 %v3890_v61, 16  ;;  %v3916_v43 = vand.u32 65535, %v3886_v0  ;;  %v3917_v20 = vshrl.u32 %v3886_v0, 16 }
 0x400   :  { %v3545_v5 = vsel %vm3544_vm7, %v3543_v39, 0 }
 0x401   :  { %v3897_v47 = vmul.u32 %v3895_v41, %v3892_v54  ;;  %v3898_v57 = vmul.u32 %v3894_v63, %v3893_v21  ;;  %v3919_v31 = vmul.u32 %v3917_v20, %v3892_v54  ;;  %v3920_v44 = vmul.u32 %v3916_v43, %v3893_v21 }
 0x402   :  { %v3896_v59 = vmul.u32 %v3894_v63, %v3892_v54  ;;  %v3899_v52 = vmul.u32 %v3895_v41, %v3893_v21  ;;  %v3918_v30 = vmul.u32 %v3916_v43, %v3892_v54  ;;  %v3921_v6 = vmul.u32 %v3917_v20, %v3893_v21 }
 0x403   :  { %v7634_v34 = vpop.eup %7633  ;;  %v3900_v40 = vshll.u32 %v3897_v47, 16  ;;  %v3922_v56 = vshll.u32 %v3919_v31, 16  ;;  %v3902_v32 = vshll.u32 %v3898_v57, 16  ;;  %v3924_v37 = vshll.u32 %v3920_v44, 16 }
 0x404   :  { %v2902_v55 = vmul.f32 20.0, %v7634_v34  ;;  %v3901_v35 = vshrl.u32 %v3897_v47, 16  ;;  %v3903_v0 = vshrl.u32 %v3898_v57, 16  ;;  %v3882_v21 = vsel %vm3876_vm1, %v3879_v29, %v3881_v10 }
 0x405   :  { %vm3904_vm2 = vc.u32 %v3896_v59, %v3900_v40  ;;  %v3906_v14 = vadd.s32 %v3900_v40, %v3896_v59  ;;  %vm3926_vm3 = vc.u32 %v3918_v30, %v3922_v56  ;;  %v3928_v58 = vadd.s32 %v3922_v56, %v3918_v30 }
 0x406   :  { %v9273_v51 = vadd.f32 30.0, %v2902_v55  ;;  %v3905_v15 = vsel %vm3904_vm2, 1, %v7727_v2  ;;  %v3927_v27 = vsel %vm3926_vm3, 1, %v7727_v2  ;;  %v3923_v55 = vshrl.u32 %v3919_v31, 16 }
 0x407   :  { %v3907_v42 = vadd.s32 %v3905_v15, %v3899_v52  ;;  %vm3908_vm4 = vc.u32 %v3906_v14, %v3902_v32  ;;  %v3929_v33 = vadd.s32 %v3927_v27, %v3921_v6  ;;  %vm3930_vm6 = vc.u32 %v3928_v58, %v3924_v37 }
 0x408   :  { %v9279_v45 = vmul.f32 %v9273_v51, %v9218_v12  ;;  %v3909_v26 = vsel %vm3908_vm4, 1, %v7727_v2  ;;  %v3931_v54 = vsel %vm3930_vm6, 1, %v7727_v2  ;;  %v3533_v41 = vand.u32 2147483647, %v9238_v36 }
 0x409   :  { %v3911_v50 = vadd.s32 %v3909_v26, %v3907_v42  ;;  %v3933_v63 = vadd.s32 %v3931_v54, %v3929_v33  ;;  %v3925_v20 = vshrl.u32 %v3920_v44, 16  ;;  %v9298_v57 = vadd.s32 %v3928_v58, %v3924_v37 }
 0x40a   :  { %v4001_v25 = vand.u32 2139095040, %v9279_v45  ;;  %v3998_v49 = vand.u32 2147483647, %v9279_v45  ;;  %v3936_v1 = vmul.u32 %v9251_v53, %v3882_v21  ;;  %v9303_v3 = vand.u32 8388607, %v3533_v41 }
 0x40b   :  { %v3912_v61 = vadd.s32 %v3911_v50, %v3901_v35  ;;  %v3934_v47 = vadd.s32 %v3933_v63, %v3923_v55  ;;  %v9305_v29 = vand.u32 31, %v3545_v5  ;;  %vm9377_vm4 = vcmp.le.f32.partialorder %v3843_v28, 0.7853982 }
 0x40c   :  { %v4002_v12 = vshrl.u32 %v4001_v25, 23  ;;  %v4005_v48 = vand.u32 8388607, %v3998_v49 }
 0x40d   :  { %v9296_v8 = vadd.s32 %v3912_v61, %v3903_v0  ;;  %v3935_v40 = vadd.s32 %v3934_v47, %v3925_v20 }
 0x40e   :  { %v7510_v18 = vadd.s32 4294967169, %v4002_v12  ;;  %v4006_v24 = vor.u32 8388608, %v4005_v48 }
 0x40f   :  { %vm3938_vm13 = vc.u32 %v9296_v8, %v9298_v57  ;;  %v3939_v56 = vadd.s32 1, %v3935_v40 }
 0x410   :  { %v4008_v34 = vadd.s32 1, %v7510_v18  ;;  %v9311_v44 = vshll.u32 %v4006_v24, 8 }
 0x411   :  { %v3940_v6 = vsel %vm3938_vm13, %v3939_v56, %v3935_v40 }
 0x412   :  { %vm4009_vm10 = vcmp.gt.s32.totalorder %v4008_v34, 0  ;;  %v3941_v58 = vadd.s32 %v3940_v6, %v3936_v1  ;;  %v4047_v63 = vand.u32 65535, %v9311_v44 }
 0x413   :  { %v4010_v43 = vsel %vm4009_vm10, %v4008_v34, 0 }
 0x414   :  { %v4012_v59 = vand.u32 31, %v4010_v43  ;;  %v9307_v31 = vshrl.u32 %v4010_v43, 5  ;;  %v3942_v48 = vadd.s32 536870912, %v3941_v58 }
 0x416   :  { %v4013_v52 = vsub.s32 32, %v4012_v59  ;;  %v4024_v39 = vshll.u32 %v7731_v16, %v4012_v59  ;;  %v4027_v30 = vshll.u32 %v7732_v19, %v4012_v59  ;;  %v4015_v53 = vshll.u32 %v7728_v7, %v4012_v59 }
 0x417   :  { %v4018_v15 = vshll.u32 %v7729_v9, %v4012_v59  ;;  %v4021_v12 = vshll.u32 %v7730_v13, %v4012_v59  ;;  %vm4033_vm14 = vcmp.lt.s32.totalorder %v9307_v31, 4  ;;  %vm4030_vm8 = vcmp.lt.s32.totalorder %v9307_v31, 1 }
 0x418   :  { %v4025_v25 = vshrl.u32 %v7732_v19, %v4013_v52  ;;  %v4028_v32 = vshrl.u32 %v7733_v22, %v4013_v52  ;;  %v4016_v14 = vshrl.u32 %v7729_v9, %v4013_v52  ;;  %v4019_v37 = vshrl.u32 %v7730_v13, %v4013_v52 }
 0x419   :  { %v4022_v42 = vshrl.u32 %v7731_v16, %v4013_v52  ;;  %vm4032_vm11 = vcmp.lt.s32.totalorder %v9307_v31, 3  ;;  %vm4031_vm9 = vcmp.lt.s32.totalorder %v9307_v31, 2  ;;  %v3943_v54 = vshrl.u32 %v3942_v48, 30 }
 0x41a   :  { %v4026_v27 = vor.u32 %v4025_v25, %v4024_v39  ;;  %v4029_v26 = vor.u32 %v4028_v32, %v4027_v30  ;;  %v4017_v33 = vor.u32 %v4016_v14, %v4015_v53  ;;  %v4020_v18 = vor.u32 %v4019_v37, %v4018_v15 }
 0x41b   :  { %v4023_v10 = vor.u32 %v4022_v42, %v4021_v12  ;;  %v3944_v59 = vshll.u32 %v3943_v54, 30  ;;  %v4014_v40 = vshrl.u32 %v7728_v7, %v4013_v52  ;;  %v4048_v30 = vshrl.u32 %v9311_v44, 16 }
 0x41c   :  { %v4039_v35 = vsel %vm4033_vm14, %v4026_v27, 920167782  ;;  %v4043_v50 = vsel %vm4033_vm14, %v4029_v26, 1326507024  ;;  %v4038_v34 = vsel %vm4030_vm8, %v4017_v33, %v4020_v18  ;;  %v9349_v53 = vshrl.u32 %v3545_v5, 5 }
 0x41d   :  { %v4040_v0 = vsel %vm4032_vm11, %v4023_v10, %v4039_v35  ;;  %v4042_v61 = vsel %vm4030_vm8, %v4020_v18, %v4023_v10  ;;  %v4044_v55 = vsel %vm4032_vm11, %v4026_v27, %v4043_v50  ;;  %v4035_v24 = vsel %vm4033_vm14, %v4023_v10, 2102212464 }
 0x41e   :  { %v4041_v21 = vsel %vm4031_vm9, %v4038_v34, %v4040_v0  ;;  %v4045_v43 = vsel %vm4031_vm9, %v4042_v61, %v4044_v55  ;;  %v9352_v25 = vsub.s32 32, %v9305_v29  ;;  %v3945_v32 = vsub.s32 %v3941_v58, %v3944_v59 }
 0x41f   :  { %v4071_v20 = vand.u32 65535, %v4041_v21  ;;  %v4072_v47 = vshrl.u32 %v4041_v21, 16  ;;  %v4049_v1 = vand.u32 65535, %v4045_v43  ;;  %v4050_v39 = vshrl.u32 %v4045_v43, 16 }
 0x420   :  { %v4034_v14 = vsel %vm4030_vm8, %v4014_v40, %v4017_v33  ;;  %v4036_v15 = vsel %vm4032_vm11, %v4020_v18, %v4035_v24  ;;  %v3967_v37 = vsub.s32 4, %v3943_v54  ;;  %v3550_v42 = vshll.u32 %v7728_v7, %v9305_v29 }
 0x421   :  { %v4074_v56 = vmul.u32 %v4072_v47, %v4047_v63  ;;  %v4052_v6 = vmul.u32 %v4050_v39, %v4047_v63  ;;  %v4053_v52 = vmul.u32 %v4049_v1, %v4048_v30  ;;  %v4075_v12 = vmul.u32 %v4071_v20, %v4048_v30 }
 0x422   :  { %vm3946_vm0 = vcmp.lt.s32.totalorder %v3945_v32, 0  ;;  %v3947_v5 = vsub.s32 0, %v3945_v32  ;;  %v4051_v27 = vmul.u32 %v4049_v1, %v4047_v63  ;;  %v3937_v58 = vadd.s32 %v9298_v57, %v9296_v8 }
 0x423   :  { %v4055_v26 = vshll.u32 %v4052_v6, 16  ;;  %v9364_v33 = vsel %vm4031_vm9, %v4034_v14, %v4036_v15  ;;  %v4077_v10 = vshll.u32 %v4074_v56, 16  ;;  %v3553_v18 = vshll.u32 %v7729_v9, %v9305_v29 }
 0x424   :  { %v3948_v35 = vsel %vm3946_vm0, %v3947_v5, %v3945_v32  ;;  %v4054_v50 = vmul.u32 %v4050_v39, %v4048_v30  ;;  %v4057_v0 = vshll.u32 %v4053_v52, 16  ;;  %v4073_v21 = vmul.u32 %v4071_v20, %v4047_v63 }
 0x425   :  { %vm4059_vm1 = vc.u32 %v4051_v27, %v4055_v26  ;;  %v4061_v48 = vadd.s32 %v4055_v26, %v4051_v27  ;;  %v3949_v34 = vclz %v3948_v35  ;;  %v9371_v8 = vsel %vm3845_vm15, %v3967_v37, %v3943_v54 }
 0x426   :  { %v4060_v61 = vsel %vm4059_vm1, 1, %v7727_v2  ;;  %v4076_v31 = vmul.u32 %v4072_v47, %v4048_v30  ;;  %v4079_v55 = vshll.u32 %v4075_v12, 16  ;;  %vm4081_vm3 = vc.u32 %v4073_v21, %v4077_v10 }
 0x427   :  { %v4062_v57 = vadd.s32 %v4060_v61, %v4054_v50  ;;  %v7508_v24 = vadd.s32 4294967294, %v3949_v34  ;;  %vm4063_vm2 = vc.u32 %v4061_v48, %v4057_v0  ;;  %v4083_v43 = vadd.s32 %v4077_v10, %v4073_v21 }
 0x428   :  { %v4056_v59 = vshrl.u32 %v4052_v6, 16  ;;  %v4058_v40 = vshrl.u32 %v4053_v52, 16  ;;  %v4064_v1 = vsel %vm4063_vm2, 1, %v7727_v2  ;;  %v4082_v39 = vsel %vm4081_vm3, 1, %v7727_v2 }
 0x429   :  { %vm7509_vm6 = vcmp.lt.s32.totalorder %v7508_v24, 0  ;;  %v4066_v54 = vadd.s32 %v4064_v1, %v4062_v57  ;;  %v4084_v20 = vadd.s32 %v4082_v39, %v4076_v31  ;;  %vm4085_vm7 = vc.u32 %v4083_v43, %v4079_v55 }
 0x42a   :  { %v3952_v47 = vsel %vm7509_vm6, 0, %v7508_v24  ;;  %v4078_v30 = vshrl.u32 %v4074_v56, 16  ;;  %v4086_v14 = vsel %vm4085_vm7, 1, %v7727_v2  ;;  %v3551_v15 = vshrl.u32 %v7729_v9, %v9352_v25 }
 0x42b   :  { %v3953_v6 = vsub.s32 32, %v3952_v47  ;;  %v3957_v37 = vsub.s32 4294967266, %v3952_v47  ;;  %v4067_v52 = vadd.s32 %v4066_v54, %v4056_v59  ;;  %v4080_v5 = vshrl.u32 %v4075_v12, 16 }
 0x42c   :  { %v3954_v27 = vshll.u32 %v3945_v32, %v3952_v47  ;;  %v4087_v28 = vadd.s32 %v4083_v43, %v4079_v55  ;;  %v4088_v26 = vadd.s32 %v4086_v14, %v4084_v20  ;;  %v3554_v10 = vshrl.u32 %v7730_v13, %v9352_v25 }
 0x42d   :  { %v3955_v35 = vshrl.u32 %v3937_v58, %v3953_v6  ;;  %v3958_v50 = vadd.s32 127, %v3957_v37  ;;  %v4068_v48 = vadd.s32 %v4067_v52, %v4058_v40  ;;  %v3557_v56 = vshrl.u32 %v7731_v16, %v9352_v25 }
 0x42e   :  { %v4089_v34 = vadd.s32 %v4088_v26, %v4078_v30  ;;  %v9388_v0 = vor.u32 %v3551_v15, %v3550_v42  ;;  %v3559_v61 = vshll.u32 %v7731_v16, %v9305_v29  ;;  %v3560_v32 = vshrl.u32 %v7732_v19, %v9352_v25 }
 0x42f   :  { %v3956_v12 = vor.u32 %v3955_v35, %v3954_v27  ;;  %v3959_v21 = vshll.u32 %v3958_v50, 23  ;;  %v9394_v57 = vor.u32 %v3554_v10, %v3553_v18  ;;  %v3556_v58 = vshll.u32 %v7730_v13, %v9305_v29 }
 0x430   :  { %v4090_v31 = vadd.s32 %v4089_v34, %v4080_v5  ;;  %v3561_v55 = vor.u32 %v3560_v32, %v3559_v61  ;;  %v3562_v24 = vshll.u32 %v7732_v19, %v9305_v29  ;;  %v3563_v42 = vshrl.u32 %v7733_v22, %v9352_v25 }
 0x431   :  { %v3960_v43 = vor.u32 4788187, %v3959_v21  ;;  %vm4093_vm10 = vc.u32 %v4068_v48, %v4087_v28  ;;  %v3541_v59 = vor.u32 8388608, %v9303_v3  ;;  %v3558_v40 = vor.u32 %v3557_v56, %v3556_v58 }
 0x432   :  { %v3970_v18 = vsel %vm9377_vm4, 0, %v9371_v8  ;;  %v4091_v1 = vmul.u32 %v9311_v44, %v9364_v33  ;;  %v4094_v39 = vadd.s32 1, %v4090_v31  ;;  %v3564_v54 = vor.u32 %v3563_v42, %v3562_v24 }
 0x433   :  { %v3961_v20 = vand.u32 2147483647, %v3960_v43  ;;  %v3963_v47 = vcvt.s32.f32 %v3956_v12  ;;  %vm3565_vm13 = vcmp.lt.s32.totalorder %v9349_v53, 1  ;;  %vm3568_vm14 = vcmp.lt.s32.totalorder %v9349_v53, 4 }
 0x434   :  { %v4095_v29 = vsel %vm4093_vm10, %v4094_v39, %v4090_v31  ;;  %vm3567_vm8 = vcmp.lt.s32.totalorder %v9349_v53, 3  ;;  %v3573_v3 = vsel %vm3565_vm13, %v9388_v0, %v9394_v57  ;;  %v3574_v8 = vsel %vm3568_vm14, %v3561_v55, 920167782 }
 0x435   :  { %v3964_v44 = vmul.f32 %v3963_v47, %v3961_v20  ;;  %v4096_v33 = vadd.s32 %v4095_v29, %v4091_v1  ;;  %v3575_v30 = vsel %vm3567_vm8, %v3558_v40, %v3574_v8  ;;  %v3577_v14 = vsel %vm3565_vm13, %v9394_v57, %v3558_v40 }
 0x436   :  { %vm3566_vm11 = vcmp.lt.s32.totalorder %v9349_v53, 2  ;;  %v3578_v15 = vsel %vm3568_vm14, %v3564_v54, 1326507024  ;;  %v9425_v6 = vshll.u32 %v3541_v59, 8  ;;  %v3987_v26 = vadd.s32 3, %v3970_v18 }
 0x437   :  { %v3965_v37 = vxor.u32 2147483648, %v3964_v44  ;;  %v4097_v52 = vadd.s32 536870912, %v4096_v33  ;;  %v9429_v5 = vsel %vm3566_vm11, %v3573_v3, %v3575_v30  ;;  %v3579_v27 = vsel %vm3567_vm8, %v3561_v55, %v3578_v15 }
 0x438   :  { %v3580_v10 = vsel %vm3566_vm11, %v3577_v14, %v3579_v27  ;;  %v3582_v32 = vand.u32 65535, %v9425_v6  ;;  %v3583_v12 = vshrl.u32 %v9425_v6, 16  ;;  %v3607_v21 = vshrl.u32 %v9429_v5, 16 }
 0x439   :  { %v3966_v35 = vsel %vm3845_vm15, %v3965_v37, %v3964_v44  ;;  %v9437_v50 = vshrl.u32 %v4097_v52, 30  ;;  %v3584_v56 = vand.u32 65535, %v3580_v10  ;;  %v3585_v34 = vshrl.u32 %v3580_v10, 16 }
 0x43a   :  { %v9442_v61 = vsel %vm9377_vm4, %v9224_v17, %v3966_v35  ;;  %v3549_v55 = vshrl.u32 %v7728_v7, %v9352_v25  ;;  %v9452_v24 = vand.u32 3, %v3987_v26  ;;  %v4092_v42 = vadd.s32 %v4087_v28, %v4068_v48 }
 0x43b   :  { %v3971_v58 = vmul.f32 %v9442_v61, %v9442_v61  ;;  %v4099_v31 = vshll.u32 %v9437_v50, 30  ;;  %v3587_v63 = vmul.u32 %v3585_v34, %v3582_v32  ;;  %v9454_v43 = vmul.u32 %v3584_v56, %v3583_v12 }
 0x43c   :  { %v3570_v39 = vsel %vm3568_vm14, %v3558_v40, 2102212464  ;;  %v3586_v54 = vmul.u32 %v3584_v56, %v3582_v32  ;;  %v3606_v47 = vand.u32 65535, %v9429_v5  ;;  %v9461_v29 = vmul.u32 %v3607_v21, %v3582_v32 }
 0x43d   :  { %v3972_v59 = vmul.f32 -0.001358992, %v3971_v58  ;;  %v3979_v18 = vmul.f32 -0.00019511016, %v3971_v58  ;;  %v9456_v1 = vsub.s32 %v4096_v33, %v4099_v31  ;;  %v3590_v20 = vshll.u32 %v3587_v63, 16 }
 0x43e   :  { %v3589_v48 = vmul.u32 %v3585_v34, %v3583_v12  ;;  %v3592_v8 = vshll.u32 %v9454_v43, 16  ;;  %vm4000_vm0 = vcmp.lt.s32.totalorder %v9279_v45, 0  ;;  %v9472_v37 = vsel %vm3565_vm13, %v3549_v55, %v9388_v0 }
 0x43f   :  { %v3973_v25 = vadd.f32 0.041655596, %v3972_v59  ;;  %v3980_v3 = vadd.f32 0.008332121, %v3979_v18  ;;  %vm4101_vm9 = vcmp.lt.s32.totalorder %v9456_v1, 0  ;;  %v4102_v28 = vsub.s32 0, %v9456_v1 }
 0x440   :  { %vm3594_vm15 = vc.u32 %v3586_v54, %v3590_v20  ;;  %v3596_v44 = vadd.s32 %v3590_v20, %v3586_v54  ;;  %v3612_v10 = vshll.u32 %v9461_v29, 16  ;;  %vm3990_vm2 = vcmp.eq.s32.totalorder %v9452_v24, 0 }
 0x441   :  { %v3974_v33 = vmul.f32 %v3973_v25, %v3971_v58  ;;  %v3981_v30 = vmul.f32 %v3980_v3, %v3971_v58  ;;  %v4103_v40 = vsel %vm4101_vm9, %v4102_v28, %v9456_v1  ;;  %v3595_v14 = vsel %vm3594_vm15, 1, %v7727_v2 }
 0x442   :  { %v4104_v15 = vclz %v4103_v40  ;;  %v3597_v52 = vadd.s32 %v3595_v14, %v3589_v48  ;;  %vm3598_vm1 = vc.u32 %v3596_v44, %v3592_v8  ;;  %vm3993_vm3 = vcmp.eq.s32.totalorder %v9452_v24, 2 }
 0x443   :  { %v3975_v5 = vadd.f32 -0.4999988, %v3974_v33  ;;  %v3982_v27 = vadd.f32 -0.16666654, %v3981_v30  ;;  %v3599_v26 = vsel %vm3598_vm1, 1, %v7727_v2  ;;  %v3571_v56 = vsel %vm3567_vm8, %v9394_v57, %v3570_v39 }
 0x444   :  { %v7511_v35 = vadd.s32 4294967294, %v4104_v15  ;;  %v3608_v34 = vmul.u32 %v3606_v47, %v3582_v32  ;;  %v3610_v0 = vmul.u32 %v3606_v47, %v3583_v12  ;;  %vm3989_vm4 = vcmp.lt.s32.totalorder %v9452_v24, 2 }
 0x445   :  { %v3976_v31 = vmul.f32 %v3975_v5, %v3971_v58  ;;  %v3983_v55 = vmul.f32 %v3982_v27, %v3971_v58  ;;  %v3601_v59 = vadd.s32 %v3599_v26, %v3597_v52  ;;  %v9484_v18 = vmul.f32 %v9273_v51, %v9213_v62  ;;  %v4157_v27 = vld [vmem:[#allocation7 + $0x80] sm:$0xff] }
 0x446   :  { %vm3986_vm6 = vweird.f32 %v9224_v17  ;;  %vm7512_vm7 = vcmp.lt.s32.totalorder %v7511_v35, 0  ;;  %v4122_v54 = vsub.s32 4, %v9437_v50  ;;  %v3611_v20 = vmul.u32 %v3607_v21, %v3583_v12  ;;  %7514 = vmatmul.msk.f32.vlgmr.msrb.gmra.mxu2 %vm1389_vm12, %v4157_v27  ;;  %7519 = vmatmul.msk.f32.vlgmr.msrb.gmra.mxu3 %vm1389_vm12, %v4157_v27 }
 0x447   :  { %vm3616_vm10 = vc.u32 %v3608_v34, %v3612_v10  ;;  %v3977_v25 = vadd.f32 1.0, %v3976_v31  ;;  %v3984_v57 = vadd.f32 1.0, %v3983_v55  ;;  %v4107_v32 = vsel %vm7512_vm7, 0, %v7511_v35 }
 0x448   :  { %v3591_v39 = vshrl.u32 %v3587_v63, 16  ;;  %v4108_v47 = vsub.s32 32, %v4107_v32  ;;  %v4112_v58 = vsub.s32 4294967266, %v4107_v32  ;;  %v3614_v3 = vshll.u32 %v3610_v0, 16 }
 0x449   :  { %v3617_v28 = vsel %vm3616_vm10, 1, %v7727_v2  ;;  %v3985_v48 = vmul.f32 %v3984_v57, %v9442_v61  ;;  %v3994_v62 = vxor.u32 2147483648, %v3977_v25  ;;  %v3618_v44 = vadd.s32 %v3612_v10, %v3608_v34 }
 0x44a   :  { %v3602_v8 = vadd.s32 %v3601_v59, %v3591_v39  ;;  %v4109_v33 = vshll.u32 %v9456_v1, %v4107_v32  ;;  %v4110_v30 = vshrl.u32 %v4092_v42, %v4108_v47  ;;  %v4113_v40 = vadd.s32 127, %v4112_v58 }
 0x44b   :  { %v3619_v12 = vadd.s32 %v3617_v28, %v3611_v20  ;;  %v3991_v21 = vxor.u32 2147483648, %v3985_v48  ;;  %v4123_v63 = vsel %vm4000_vm0, %v4122_v54, %v9437_v50  ;;  %vm3620_vm13 = vc.u32 %v3618_v44, %v3614_v3 }
 0x44c   :  { %v3688_v14 = vand.u32 2147483647, %v9484_v18  ;;  %v4111_v15 = vor.u32 %v4110_v30, %v4109_v33  ;;  %v4114_v52 = vshll.u32 %v4113_v40, 23  ;;  %v3593_v61 = vshrl.u32 %v9454_v43, 16 }
 0x44d   :  { %v3621_v5 = vsel %vm3620_vm13, 1, %v7727_v2  ;;  %v3992_v1 = vsel %vm3990_vm2, %v3977_v25, %v3991_v21  ;;  %v3995_v42 = vsel %vm3993_vm3, %v3994_v62, %v3985_v48  ;;  %v3613_v26 = vshrl.u32 %v9461_v29, 16 }
 0x44e   :  { %v3623_v10 = vadd.s32 %v3621_v5, %v3619_v12  ;;  %v3996_v50 = vsel %vm3989_vm4, %v3992_v1, %v3995_v42  ;;  %v4115_v35 = vor.u32 4788187, %v4114_v52  ;;  %v3603_v43 = vadd.s32 %v3602_v8, %v3593_v61 }
 0x44f   :  { %v3615_v34 = vshrl.u32 %v3610_v0, 16  ;;  %v3997_v31 = vsel %vm3986_vm6, nan, %v3996_v50  ;;  %v3691_v59 = vand.u32 2139095040, %v9484_v18  ;;  %v3695_v29 = vand.u32 8388607, %v3688_v14 }
 0x450   :  { %v3624_v55 = vadd.s32 %v3623_v10, %v3613_v26  ;;  %4255 = vmatpush.msra.mxu0 %v3997_v31  ;;  %v4116_v54 = vand.u32 2147483647, %v4115_v35  ;;  %v4118_v24 = vcvt.s32.f32 %v4111_v15  ;;  %v3622_v20 = vadd.s32 %v3618_v44, %v3614_v3 }
 0x451   :  { %v9513_v25 = vmul.f32 %v9220_v11, %v9193_v4  ;;  %v3572_v0 = vsel %vm3566_vm11, %v9472_v37, %v3571_v56  ;;  %v3692_v57 = vshrl.u32 %v3691_v59, 23  ;;  %vm9520_vm14 = vcmp.le.f32.partialorder %v3998_v49, 0.7853982 }
 0x452   :  { %v3625_v17 = vadd.s32 %v3624_v55, %v3615_v34  ;;  %v4119_v39 = vmul.f32 %v4118_v24, %v4116_v54  ;;  %vm3628_vm8 = vc.u32 %v3603_v43, %v3622_v20  ;;  %v4125_v4 = vsel %vm9520_vm14, 0, %v4123_v63 }
 0x453   :  { %v3226_v47 = vand.u32 2139095040, %v9513_v25  ;;  %v7504_v3 = vadd.s32 4294967169, %v3692_v57  ;;  %v3696_v28 = vor.u32 8388608, %v3695_v29  ;;  %v3626_v37 = vmul.u32 %v9425_v6, %v3572_v0 }
 0x454   :  { %v3629_v58 = vadd.s32 1, %v3625_v17  ;;  %v4120_v53 = vxor.u32 2147483648, %v4119_v39  ;;  %v4142_v8 = vadd.s32 3, %v4125_v4  ;;  %vm3535_vm9 = vcmp.lt.s32.totalorder %v9238_v36, 0 }
 0x455   :  { %v3698_v48 = vadd.s32 1, %v7504_v3  ;;  %v3227_v62 = vshrl.u32 %v3226_v47, 23  ;;  %v9533_v30 = vshll.u32 %v3696_v28, 8  ;;  %vm9540_vm15 = vcmp.le.f32.partialorder %v3533_v41, 0.7853982 }
 0x456   :  { %v3630_v56 = vsel %vm3628_vm8, %v3629_v58, %v3625_v17  ;;  %v4121_v49 = vsel %vm4000_vm0, %v4120_v53, %v4119_v39  ;;  %v9536_v61 = vand.u32 3, %v4142_v8  ;;  %v9544_v42 = vadd.s32 %v3622_v20, %v3603_v43 }
 0x457   :  { %v3631_v44 = vadd.s32 %v3630_v56, %v3626_v37  ;;  %v4124_v33 = vsel %vm9520_vm14, %v9279_v45, %v4121_v49  ;;  %vm3699_vm11 = vcmp.gt.s32.totalorder %v3698_v48, 0  ;;  %v7495_v63 = vadd.s32 4294967169, %v3227_v62 }
 0x458   :  { %v4126_v40 = vmul.f32 %v4124_v33, %v4124_v33  ;;  %v3700_v21 = vsel %vm3699_vm11, %v3698_v48, 0  ;;  %v9547_v26 = vand.u32 65535, %v9533_v30  ;;  %v3223_v10 = vand.u32 2147483647, %v9513_v25 }
 0x459   :  { %v3632_v12 = vadd.s32 536870912, %v3631_v44  ;;  %v3702_v6 = vand.u32 31, %v3700_v21  ;;  %v9551_v31 = vshrl.u32 %v9533_v30, 16  ;;  %v9553_v59 = vshrl.u32 %v3700_v21, 5 }
 0x45a   :  { %v4127_v15 = vmul.f32 -0.001358992, %v4126_v40  ;;  %v4134_v52 = vmul.f32 -0.00019511016, %v4126_v40  ;;  %v9556_v29 = vadd.s32 1, %v7495_v63  ;;  %vm4148_vm0 = vcmp.eq.s32.totalorder %v9536_v61, 2 }
 0x45b   :  { %v3633_v5 = vshrl.u32 %v3632_v12, 30  ;;  %v3703_v27 = vsub.s32 32, %v3702_v6  ;;  %v3705_v20 = vshll.u32 %v7728_v7, %v3702_v6  ;;  %v3708_v0 = vshll.u32 %v7729_v9, %v3702_v6 }
 0x45c   :  { %v4128_v50 = vadd.f32 0.041655596, %v4127_v15  ;;  %v4135_v35 = vadd.f32 0.008332121, %v4134_v52  ;;  %v3711_v57 = vshll.u32 %v7730_v13, %v3702_v6  ;;  %vm4145_vm2 = vcmp.eq.s32.totalorder %v9536_v61, 0 }
 0x45d   :  { %v3634_v34 = vshll.u32 %v3633_v5, 30  ;;  %v3657_v55 = vsub.s32 4, %v3633_v5  ;;  %v3706_v41 = vshrl.u32 %v7729_v9, %v3703_v27  ;;  %v3709_v17 = vshrl.u32 %v7730_v13, %v3703_v27 }
 0x45e   :  { %v4129_v43 = vmul.f32 %v4128_v50, %v4126_v40  ;;  %v4136_v54 = vmul.f32 %v4135_v35, %v4126_v40  ;;  %v3712_v32 = vshrl.u32 %v7731_v16, %v3703_v27  ;;  %v3704_v3 = vshrl.u32 %v7728_v7, %v3703_v27 }
 0x45f   :  { %v9558_v24 = vsub.s32 %v3631_v44, %v3634_v34  ;;  %v3658_v58 = vsel %vm3535_vm9, %v3657_v55, %v3633_v5  ;;  %v3707_v28 = vor.u32 %v3706_v41, %v3705_v20  ;;  %v3715_v53 = vshrl.u32 %v7732_v19, %v3703_v27 }
 0x460   :  { %v4130_v39 = vadd.f32 -0.4999988, %v4129_v43  ;;  %v4137_v47 = vadd.f32 -0.16666654, %v4136_v54  ;;  %vm4144_vm3 = vcmp.lt.s32.totalorder %v9536_v61, 2  ;;  %v3718_v62 = vshrl.u32 %v7733_v22, %v3703_v27 }
 0x461   :  { %vm3636_vm1 = vcmp.lt.s32.totalorder %v9558_v24, 0  ;;  %v3637_v4 = vsub.s32 0, %v9558_v24  ;;  %vm4141_vm4 = vweird.f32 %v9279_v45  ;;  %v3713_v8 = vor.u32 %v3712_v32, %v3711_v57 }
 0x462   :  { %v4131_v37 = vmul.f32 %v4130_v39, %v4126_v40  ;;  %v4138_v56 = vmul.f32 %v4137_v47, %v4126_v40  ;;  %v3714_v44 = vshll.u32 %v7731_v16, %v3702_v6  ;;  %v3717_v12 = vshll.u32 %v7732_v19, %v3702_v6 }
 0x463   :  { %v3638_v48 = vsel %vm3636_vm1, %v3637_v4, %v9558_v24  ;;  %v3660_v15 = vsel %vm9540_vm15, 0, %v3658_v58  ;;  %v3710_v40 = vor.u32 %v3709_v17, %v3708_v0  ;;  %vm3720_vm6 = vcmp.lt.s32.totalorder %v9553_v59, 1 }
 0x464   :  { %v3639_v49 = vclz %v3638_v48  ;;  %v4132_v21 = vadd.f32 1.0, %v4131_v37  ;;  %v4139_v63 = vadd.f32 1.0, %v4138_v56  ;;  %v3716_v5 = vor.u32 %v3715_v53, %v3714_v44 }
 0x465   :  { %v3719_v50 = vor.u32 %v3718_v62, %v3717_v12  ;;  %vm3721_vm7 = vcmp.lt.s32.totalorder %v9553_v59, 2  ;;  %vm3723_vm10 = vcmp.lt.s32.totalorder %v9553_v59, 4  ;;  %vm3722_vm14 = vcmp.lt.s32.totalorder %v9553_v59, 3 }
 0x466   :  { %v7502_v52 = vadd.s32 4294967294, %v3639_v49  ;;  %v4140_v27 = vmul.f32 %v4139_v63, %v4124_v33  ;;  %v4149_v35 = vxor.u32 2147483648, %v4132_v21  ;;  %v3724_v6 = vsel %vm3720_vm6, %v3704_v3, %v3707_v28 }
 0x467   :  { %v3725_v34 = vsel %vm3723_vm10, %v3713_v8, 2102212464  ;;  %v3728_v33 = vsel %vm3720_vm6, %v3707_v28, %v3710_v40  ;;  %v3729_v32 = vsel %vm3723_vm10, %v3716_v5, 920167782  ;;  %v3732_v39 = vsel %vm3720_vm6, %v3710_v40, %v3713_v8 }
 0x468   :  { %vm7503_vm13 = vcmp.lt.s32.totalorder %v7502_v52, 0  ;;  %v4146_v55 = vxor.u32 2147483648, %v4140_v27  ;;  %v4150_v41 = vsel %vm4148_vm0, %v4149_v35, %v4140_v27  ;;  %v3726_v17 = vsel %vm3722_vm14, %v3710_v40, %v3725_v34 }
 0x469   :  { %v3642_v43 = vsel %vm7503_vm13, 0, %v7502_v52  ;;  %v3733_v47 = vsel %vm3723_vm10, %v3719_v50, 1326507024  ;;  %v3730_v3 = vsel %vm3722_vm14, %v3713_v8, %v3729_v32  ;;  %v9613_v53 = vsel %vm3721_vm7, %v3724_v6, %v3726_v17 }
 0x46a   :  { %v3643_v54 = vsub.s32 32, %v3642_v43  ;;  %v3644_v20 = vshll.u32 %v9558_v24, %v3642_v43  ;;  %v3647_v0 = vsub.s32 4294967266, %v3642_v43  ;;  %v4147_v57 = vsel %vm4145_vm2, %v4132_v21, %v4146_v55 }
 0x46b   :  { %v4151_v4 = vsel %vm4144_vm3, %v4147_v57, %v4150_v41  ;;  %v3731_v37 = vsel %vm3721_vm7, %v3728_v33, %v3730_v3  ;;  %v3734_v61 = vsel %vm3722_vm14, %v3716_v5, %v3733_v47  ;;  %vm3234_vm8 = vcmp.gt.s32.totalorder %v9556_v29, 0 }
 0x46c   :  { %v3645_v24 = vshrl.u32 %v9544_v42, %v3643_v54  ;;  %v3648_v58 = vadd.s32 127, %v3647_v0  ;;  %v4152_v28 = vsel %vm4141_vm4, nan, %v4151_v4  ;;  %v3735_v48 = vsel %vm3721_vm7, %v3732_v39, %v3734_v61 }
 0x46d   :  { %4284 = vmatpush.msra.mxu1 %v4152_v28  ;;  %v3761_v62 = vand.u32 65535, %v3731_v37  ;;  %v3739_v49 = vand.u32 65535, %v3735_v48  ;;  %v3740_v45 = vshrl.u32 %v3735_v48, 16  ;;  %v3762_v8 = vshrl.u32 %v3731_v37, 16 }
 0x46e   :  { %v3646_v56 = vor.u32 %v3645_v24, %v3644_v20  ;;  %v3649_v42 = vshll.u32 %v3648_v58, 23  ;;  %v9625_v21 = vand.u32 8388607, %v3223_v10  ;;  %v9627_v63 = vadd.s32 3, %v3660_v15 }
 0x46f   :  { %v3765_v12 = vmul.u32 %v3761_v62, %v9551_v31  ;;  %v3742_v40 = vmul.u32 %v3740_v45, %v9547_v26  ;;  %v3743_v59 = vmul.u32 %v3739_v49, %v9551_v31  ;;  %v3781_v52 = vmul.u32 %v9533_v30, %v9613_v53 }
 0x470   :  { %v3650_v44 = vor.u32 4788187, %v3649_v42  ;;  %v3653_v50 = vcvt.s32.f32 %v3646_v56  ;;  %v3764_v27 = vmul.u32 %v3762_v8, %v9547_v26  ;;  %v3235_v35 = vsel %vm3234_vm8, %v9556_v29, 0 }
 0x471   :  { %v3741_v6 = vmul.u32 %v3739_v49, %v9547_v26  ;;  %v3744_v34 = vmul.u32 %v3740_v45, %v9551_v31  ;;  %v3745_v55 = vshll.u32 %v3742_v40, 16  ;;  %v3763_v15 = vmul.u32 %v3761_v62, %v9547_v26 }
 0x472   :  { %v3651_v5 = vand.u32 2147483647, %v3650_v44  ;;  %v3766_v43 = vmul.u32 %v3762_v8, %v9551_v31  ;;  %v3767_v33 = vshll.u32 %v3764_v27, 16  ;;  %v3769_v54 = vshll.u32 %v3765_v12, 16 }
 0x473   :  { %v3747_v20 = vshll.u32 %v3743_v59, 16  ;;  %vm3749_vm11 = vc.u32 %v3741_v6, %v3745_v55  ;;  %v3751_v0 = vadd.s32 %v3745_v55, %v3741_v6  ;;  %v3237_v17 = vand.u32 31, %v3235_v35 }
 0x474   :  { %v3654_v41 = vmul.f32 %v3653_v50, %v3651_v5  ;;  %v3750_v32 = vsel %vm3749_vm11, 1, %v7727_v2  ;;  %vm3771_vm0 = vc.u32 %v3763_v15, %v3767_v33  ;;  %v3773_v29 = vadd.s32 %v3767_v33, %v3763_v15 }
 0x475   :  { %v3752_v39 = vadd.s32 %v3750_v32, %v3744_v34  ;;  %vm3753_vm1 = vc.u32 %v3751_v0, %v3747_v20  ;;  %v3772_v47 = vsel %vm3771_vm0, 1, %v7727_v2  ;;  %v9641_v4 = vsub.s32 32, %v3237_v17 }
 0x476   :  { %v3655_v57 = vxor.u32 2147483648, %v3654_v41  ;;  %v3754_v31 = vsel %vm3753_vm1, 1, %v7727_v2  ;;  %v3774_v24 = vadd.s32 %v3772_v47, %v3766_v43  ;;  %vm3775_vm2 = vc.u32 %v3773_v29, %v3769_v54 }
 0x477   :  { %v3746_v3 = vshrl.u32 %v3742_v40, 16  ;;  %v3756_v28 = vadd.s32 %v3754_v31, %v3752_v39  ;;  %v3776_v37 = vsel %vm3775_vm2, 1, %v7727_v2  ;;  %v3748_v56 = vshrl.u32 %v3743_v59, 16 }
 0x478   :  { %v3656_v26 = vsel %vm3535_vm9, %v3655_v57, %v3654_v41  ;;  %v3768_v42 = vshrl.u32 %v3764_v27, 16  ;;  %v3778_v48 = vadd.s32 %v3776_v37, %v3774_v24  ;;  %v3770_v49 = vshrl.u32 %v3765_v12, 16 }
 0x479   :  { %v3659_v58 = vsel %vm9540_vm15, %v9238_v36, %v3656_v26  ;;  %v3757_v62 = vadd.s32 %v3756_v28, %v3746_v3  ;;  %v9650_v45 = vadd.s32 %v3773_v29, %v3769_v54  ;;  %v9652_v8 = vshrl.u32 %v3235_v35, 5 }
 0x47a   :  { %v3661_v61 = vmul.f32 %v3659_v58, %v3659_v58  ;;  %v3779_v50 = vadd.s32 %v3778_v48, %v3768_v42  ;;  %v3241_v1 = vshrl.u32 %v7729_v9, %v9641_v4  ;;  %v3240_v6 = vshll.u32 %v7728_v7, %v3237_v17 }
 0x47b   :  { %v9656_v40 = vadd.s32 %v3757_v62, %v3748_v56  ;;  %v3243_v59 = vshll.u32 %v7729_v9, %v3237_v17  ;;  %v3244_v27 = vshrl.u32 %v7730_v13, %v9641_v4  ;;  %v3247_v35 = vshrl.u32 %v7731_v16, %v9641_v4 }
 0x47c   :  { %v3662_v44 = vmul.f32 -0.001358992, %v3661_v61  ;;  %v3669_v5 = vmul.f32 -0.00019511016, %v3661_v61  ;;  %v3780_v55 = vadd.s32 %v3779_v50, %v3770_v49  ;;  %v3246_v15 = vshll.u32 %v7730_v13, %v3237_v17 }
 0x47d   :  { %vm3783_vm9 = vc.u32 %v9656_v40, %v9650_v45  ;;  %v3249_v41 = vshll.u32 %v7731_v16, %v3237_v17  ;;  %v3250_v43 = vshrl.u32 %v7732_v19, %v9641_v4  ;;  %v9670_v0 = vor.u32 %v3241_v1, %v3240_v6 }
 0x47e   :  { %v3663_v12 = vadd.f32 0.041655596, %v3662_v44  ;;  %v3670_v34 = vadd.f32 0.008332121, %v3669_v5  ;;  %v3784_v20 = vadd.s32 1, %v3780_v55  ;;  %v9672_v57 = vor.u32 %v3244_v27, %v3243_v59 }
 0x47f   :  { %v3251_v32 = vor.u32 %v3250_v43, %v3249_v41  ;;  %v3252_v29 = vshll.u32 %v7732_v19, %v3237_v17  ;;  %v3253_v39 = vshrl.u32 %v7733_v22, %v9641_v4  ;;  %v3248_v24 = vor.u32 %v3247_v35, %v3246_v15 }
 0x480   :  { %v3664_v33 = vmul.f32 %v3663_v12, %v3661_v61  ;;  %v3671_v54 = vmul.f32 %v3670_v34, %v3661_v61  ;;  %v3785_v31 = vsel %vm3783_vm9, %v3784_v20, %v3780_v55  ;;  %v3678_v3 = vand.u32 3, %v9627_v63 }
 0x481   :  { %v3786_v28 = vadd.s32 %v3785_v31, %v3781_v52  ;;  %v3231_v37 = vor.u32 8388608, %v9625_v21  ;;  %v3254_v56 = vor.u32 %v3253_v39, %v3252_v29  ;;  %vm3255_vm15 = vcmp.lt.s32.totalorder %v9652_v8, 1 }
 0x482   :  { %v3665_v47 = vadd.f32 -0.4999988, %v3664_v33  ;;  %v3672_v26 = vadd.f32 -0.16666654, %v3671_v54  ;;  %vm3258_vm3 = vcmp.lt.s32.totalorder %v9652_v8, 4  ;;  %vm3257_vm4 = vcmp.lt.s32.totalorder %v9652_v8, 3 }
 0x483   :  { %v3787_v17 = vadd.s32 536870912, %v3786_v28  ;;  %v3263_v63 = vsel %vm3255_vm15, %v9670_v0, %v9672_v57  ;;  %v3264_v30 = vsel %vm3258_vm3, %v3251_v32, 920167782  ;;  %v3268_v49 = vsel %vm3258_vm3, %v3254_v56, 1326507024 }
 0x484   :  { %v3666_v42 = vmul.f32 %v3665_v47, %v3661_v61  ;;  %v3673_v48 = vmul.f32 %v3672_v26, %v3661_v61  ;;  %v3265_v52 = vsel %vm3257_vm4, %v3248_v24, %v3264_v30  ;;  %v3267_v61 = vsel %vm3255_vm15, %v9672_v57, %v3248_v24 }
 0x485   :  { %v9696_v62 = vshrl.u32 %v3787_v17, 30  ;;  %v9700_v44 = vshll.u32 %v3231_v37, 8  ;;  %vm3256_vm6 = vcmp.lt.s32.totalorder %v9652_v8, 2  ;;  %v3269_v1 = vsel %vm3257_vm4, %v3251_v32, %v3268_v49 }
 0x486   :  { %v3667_v53 = vadd.f32 1.0, %v3666_v42  ;;  %v3674_v21 = vadd.f32 1.0, %v3673_v48  ;;  %vm3676_vm7 = vweird.f32 %v9238_v36  ;;  %v3266_v59 = vsel %vm3256_vm6, %v3263_v63, %v3265_v52 }
 0x487   :  { %v3789_v6 = vshll.u32 %v9696_v62, 30  ;;  %v3270_v27 = vsel %vm3256_vm6, %v3267_v61, %v3269_v1  ;;  %vm3679_vm10 = vcmp.lt.s32.totalorder %v3678_v3, 2  ;;  %vm3680_vm13 = vcmp.eq.s32.totalorder %v3678_v3, 0 }
 0x488   :  { %v3675_v5 = vmul.f32 %v3674_v21, %v3659_v58  ;;  %v3684_v50 = vxor.u32 2147483648, %v3667_v53  ;;  %v3274_v58 = vand.u32 65535, %v3270_v27  ;;  %vm3683_vm14 = vcmp.eq.s32.totalorder %v3678_v3, 2 }
 0x489   :  { %v3790_v34 = vsub.s32 %v3786_v28, %v3789_v6  ;;  %v3272_v55 = vand.u32 65535, %v9700_v44  ;;  %v3275_v35 = vshrl.u32 %v3270_v27, 16  ;;  %v3273_v43 = vshrl.u32 %v9700_v44, 16 }
 0x48a   :  { %v3681_v12 = vxor.u32 2147483648, %v3675_v5  ;;  %v3685_v41 = vsel %vm3683_vm14, %v3684_v50, %v3675_v5  ;;  %v3297_v33 = vshrl.u32 %v3266_v59, 16  ;;  %v3296_v32 = vand.u32 65535, %v3266_v59 }
 0x48b   :  { %vm3791_vm8 = vcmp.lt.s32.totalorder %v3790_v34, 0  ;;  %v3792_v20 = vsub.s32 0, %v3790_v34  ;;  %v3277_v39 = vmul.u32 %v3275_v35, %v3272_v55  ;;  %v3278_v47 = vmul.u32 %v3274_v58, %v3273_v43 }
 0x48c   :  { %v3682_v15 = vsel %vm3680_vm13, %v3667_v53, %v3681_v12  ;;  %v3782_v26 = vadd.s32 %v9650_v45, %v9656_v40  ;;  %v3239_v3 = vshrl.u32 %v7728_v7, %v9641_v4  ;;  %v3276_v37 = vmul.u32 %v3274_v58, %v3272_v55 }
 0x48d   :  { %v3686_v54 = vsel %vm3679_vm10, %v3682_v15, %v3685_v41  ;;  %v3793_v31 = vsel %vm3791_vm8, %v3792_v20, %v3790_v34  ;;  %v3280_v56 = vshll.u32 %v3277_v39, 16  ;;  %v3299_v42 = vmul.u32 %v3297_v33, %v3272_v55 }
 0x48e   :  { %v3687_v29 = vsel %vm3676_vm7, nan, %v3686_v54  ;;  %v3794_v28 = vclz %v3793_v31  ;;  %v3259_v48 = vsel %vm3255_vm15, %v3239_v3, %v9670_v0  ;;  %v3260_v36 = vsel %vm3258_vm3, %v3248_v24, 2102212464 }
 0x48f   :  { %4256 = vmatpush.msra.mxu0 %v3687_v29  ;;  %v3279_v17 = vmul.u32 %v3275_v35, %v3273_v43  ;;  %v3300_v63 = vmul.u32 %v3296_v32, %v3273_v43  ;;  %v3282_v53 = vshll.u32 %v3278_v47, 16  ;;  %vm3284_vm11 = vc.u32 %v3276_v37, %v3280_v56 }
 0x490   :  { %v7505_v30 = vadd.s32 4294967294, %v3794_v28  ;;  %v3286_v45 = vadd.s32 %v3280_v56, %v3276_v37  ;;  %v3281_v40 = vshrl.u32 %v3277_v39, 16  ;;  %v3285_v4 = vsel %vm3284_vm11, 1, %v7727_v2 }
 0x491   :  { %v3298_v21 = vmul.u32 %v3296_v32, %v3272_v55  ;;  %v3302_v52 = vshll.u32 %v3299_v42, 16  ;;  %v3287_v61 = vadd.s32 %v3285_v4, %v3279_v17  ;;  %v3304_v49 = vshll.u32 %v3300_v63, 16 }
 0x492   :  { %vm7506_vm0 = vcmp.lt.s32.totalorder %v7505_v30, 0  ;;  %vm3288_vm1 = vc.u32 %v3286_v45, %v3282_v53  ;;  %v3301_v59 = vmul.u32 %v3297_v33, %v3273_v43  ;;  %v3261_v12 = vsel %vm3257_vm4, %v9672_v57, %v3260_v36 }
 0x493   :  { %v3797_v5 = vsel %vm7506_vm0, 0, %v7505_v30  ;;  %v3289_v0 = vsel %vm3288_vm1, 1, %v7727_v2  ;;  %vm3306_vm2 = vc.u32 %v3298_v21, %v3302_v52  ;;  %v3308_v24 = vadd.s32 %v3302_v52, %v3298_v21 }
 0x494   :  { %v3798_v50 = vsub.s32 32, %v3797_v5  ;;  %v3802_v1 = vsub.s32 4294967266, %v3797_v5  ;;  %v3291_v6 = vadd.s32 %v3289_v0, %v3287_v61  ;;  %v3799_v27 = vshll.u32 %v3790_v34, %v3797_v5 }
 0x495   :  { %v3307_v58 = vsel %vm3306_vm2, 1, %v7727_v2  ;;  %vm3310_vm9 = vc.u32 %v3308_v24, %v3304_v49  ;;  %v3812_v54 = vsub.s32 4, %v9696_v62  ;;  %v3283_v20 = vshrl.u32 %v3278_v47, 16 }
 0x496   :  { %v3800_v55 = vshrl.u32 %v3782_v26, %v3798_v50  ;;  %v3803_v35 = vadd.s32 127, %v3802_v1  ;;  %v3292_v15 = vadd.s32 %v3291_v6, %v3281_v40  ;;  %v3309_v41 = vadd.s32 %v3307_v58, %v3301_v59 }
 0x497   :  { %v3311_v32 = vsel %vm3310_vm9, 1, %v7727_v2  ;;  %v9734_v43 = vmul.f32 %v9273_v51, %v9209_v23  ;;  %v3303_v29 = vshrl.u32 %v3299_v42, 16  ;;  %vm3690_vm15 = vcmp.lt.s32.totalorder %v9484_v18, 0 }
 0x498   :  { %v3801_v34 = vor.u32 %v3800_v55, %v3799_v27  ;;  %v3804_v33 = vshll.u32 %v3803_v35, 23  ;;  %v3313_v57 = vadd.s32 %v3311_v32, %v3309_v41  ;;  %v3293_v39 = vadd.s32 %v3292_v15, %v3283_v20 }
 0x499   :  { %v3378_v31 = vand.u32 2147483647, %v9734_v43  ;;  %v3381_v26 = vand.u32 2139095040, %v9734_v43  ;;  %v3305_v28 = vshrl.u32 %v3300_v63, 16  ;;  %v3813_v37 = vsel %vm3690_vm15, %v3812_v54, %v9696_v62 }
 0x49a   :  { %v3805_v3 = vor.u32 4788187, %v3804_v33  ;;  %v3314_v47 = vadd.s32 %v3313_v57, %v3303_v29  ;;  %v3262_v23 = vsel %vm3256_vm6, %v3259_v48, %v3261_v12  ;;  %v3312_v56 = vadd.s32 %v3308_v24, %v3304_v49 }
 0x49b   :  { %v3382_v42 = vshrl.u32 %v3381_v26, 23  ;;  %v3808_v17 = vcvt.s32.f32 %v3801_v34  ;;  %v3385_v53 = vand.u32 8388607, %v3378_v31  ;;  %vm3689_vm4 = vcmp.le.f32.partialorder %v3688_v14, 0.7853982 }
 0x49c   :  { %v3806_v36 = vand.u32 2147483647, %v3805_v3  ;;  %v3315_v30 = vadd.s32 %v3314_v47, %v3305_v28  ;;  %vm3318_vm3 = vc.u32 %v3293_v39, %v3312_v56  ;;  %v3815_v4 = vsel %vm3689_vm4, 0, %v3813_v37 }
 0x49d   :  { %v7498_v45 = vadd.s32 4294967169, %v3382_v42  ;;  %v3316_v62 = vmul.u32 %v9700_v44, %v3262_v23  ;;  %v9751_v48 = vmul.f32 %v9220_v11, %v9195_v46  ;;  %v3386_v61 = vor.u32 8388608, %v3385_v53 }
 0x49e   :  { %v3809_v63 = vmul.f32 %v3808_v17, %v3806_v36  ;;  %v3319_v40 = vadd.s32 1, %v3315_v30  ;;  %v3832_v0 = vadd.s32 3, %v3815_v4  ;;  %v9763_v55 = vadd.s32 %v3312_v56, %v3293_v39 }
 0x49f   :  { %v3388_v8 = vadd.s32 1, %v7498_v45  ;;  %v2916_v44 = vand.u32 2139095040, %v9751_v48  ;;  %v9757_v59 = vshll.u32 %v3386_v61, 8  ;;  %v2913_v15 = vand.u32 2147483647, %v9751_v48 }
 0x4a0   :  { %v3810_v21 = vxor.u32 2147483648, %v3809_v63  ;;  %v3320_v52 = vsel %vm3318_vm3, %v3319_v40, %v3315_v30  ;;  %v9761_v58 = vand.u32 3, %v3832_v0  ;;  %vm3225_vm7 = vcmp.lt.s32.totalorder %v9513_v25, 0 }
 0x4a1   :  { %v3321_v49 = vadd.s32 %v3320_v52, %v3316_v62  ;;  %vm3389_vm6 = vcmp.gt.s32.totalorder %v3388_v8, 0  ;;  %v2917_v41 = vshrl.u32 %v2916_v44, 23  ;;  %v9770_v34 = vand.u32 65535, %v9757_v59 }
 0x4a2   :  { %v3811_v5 = vsel %vm3690_vm15, %v3810_v21, %v3809_v63  ;;  %v3390_v14 = vsel %vm3389_vm6, %v3388_v8, 0  ;;  %vm3838_vm10 = vcmp.eq.s32.totalorder %v9761_v58, 2  ;;  %vm3835_vm14 = vcmp.eq.s32.totalorder %v9761_v58, 0 }
 0x4a3   :  { %v3814_v24 = vsel %vm3689_vm4, %v9484_v18, %v3811_v5  ;;  %v3322_v50 = vadd.s32 536870912, %v3321_v49  ;;  %v3392_v1 = vand.u32 31, %v3390_v14  ;;  %v9767_v32 = vshrl.u32 %v3390_v14, 5 }
 0x4a4   :  { %v3816_v6 = vmul.f32 %v3814_v24, %v3814_v24  ;;  %vm3834_vm8 = vcmp.lt.s32.totalorder %v9761_v58, 2  ;;  %vm3831_vm11 = vweird.f32 %v9484_v18  ;;  %v3428_v5 = vshrl.u32 %v9757_v59, 16 }
 0x4a5   :  { %v3323_v46 = vshrl.u32 %v3322_v50, 30  ;;  %v9759_v11 = vsub.s32 32, %v3392_v1  ;;  %v3395_v29 = vshll.u32 %v7728_v7, %v3392_v1  ;;  %v3398_v39 = vshll.u32 %v7729_v9, %v3392_v1 }
 0x4a6   :  { %v3817_v27 = vmul.f32 -0.001358992, %v3816_v6  ;;  %v3824_v12 = vmul.f32 -0.00019511016, %v3816_v6  ;;  %v3401_v47 = vshll.u32 %v7730_v13, %v3392_v1  ;;  %v3404_v30 = vshll.u32 %v7731_v16, %v3392_v1 }
 0x4a7   :  { %v3324_v35 = vshll.u32 %v3323_v46, 30  ;;  %v3396_v57 = vshrl.u32 %v7729_v9, %v9759_v11  ;;  %v3399_v28 = vshrl.u32 %v7730_v13, %v9759_v11  ;;  %v3402_v23 = vshrl.u32 %v7731_v16, %v9759_v11 }
 0x4a8   :  { %v3818_v54 = vadd.f32 0.041655596, %v3817_v27  ;;  %v3825_v20 = vadd.f32 0.008332121, %v3824_v12  ;;  %v3405_v56 = vshrl.u32 %v7732_v19, %v9759_v11  ;;  %v3347_v17 = vsub.s32 4, %v3323_v46 }
 0x4a9   :  { %v9772_v33 = vsub.s32 %v3321_v49, %v3324_v35  ;;  %v9791_v45 = vor.u32 %v3396_v57, %v3395_v29  ;;  %v3407_v63 = vshll.u32 %v7732_v19, %v3392_v1  ;;  %v3408_v40 = vshrl.u32 %v7733_v22, %v9759_v11 }
 0x4aa   :  { %v3819_v26 = vmul.f32 %v3818_v54, %v3816_v6  ;;  %v3826_v3 = vmul.f32 %v3825_v20, %v3816_v6  ;;  %v9797_v21 = vor.u32 %v3399_v28, %v3398_v39  ;;  %v3403_v52 = vor.u32 %v3402_v23, %v3401_v47 }
 0x4ab   :  { %vm3326_vm13 = vcmp.lt.s32.totalorder %v9772_v33, 0  ;;  %v3327_v37 = vsub.s32 0, %v9772_v33  ;;  %v3406_v61 = vor.u32 %v3405_v56, %v3404_v30  ;;  %v3409_v49 = vor.u32 %v3408_v40, %v3407_v63 }
 0x4ac   :  { %v3820_v42 = vadd.f32 -0.4999988, %v3819_v26  ;;  %v3827_v36 = vadd.f32 -0.16666654, %v3826_v3  ;;  %v7489_v1 = vadd.s32 4294967169, %v2917_v41  ;;  %vm3410_vm1 = vcmp.lt.s32.totalorder %v9767_v32, 1 }
 0x4ad   :  { %v3328_v53 = vsel %vm3326_vm13, %v3327_v37, %v9772_v33  ;;  %vm9803_vm0 = vcmp.le.f32.partialorder %v3223_v10, 0.7853982  ;;  %vm3411_vm2 = vcmp.lt.s32.totalorder %v9767_v32, 2  ;;  %vm3413_vm9 = vcmp.lt.s32.totalorder %v9767_v32, 4 }
 0x4ae   :  { %v3821_v4 = vmul.f32 %v3820_v42, %v3816_v6  ;;  %v3828_v62 = vmul.f32 %v3827_v36, %v3816_v6  ;;  %v3329_v8 = vclz %v3328_v53  ;;  %v9809_v6 = vsel %vm3225_vm7, %v3347_v17, %v3323_v46 }
 0x4af   :  { %v3418_v10 = vsel %vm3410_vm1, %v9791_v45, %v9797_v21  ;;  %v3419_v41 = vsel %vm3413_vm9, %v3406_v61, 920167782  ;;  %v3422_v46 = vsel %vm3410_vm1, %v9797_v21, %v3403_v52  ;;  %v3423_v54 = vsel %vm3413_vm9, %v3409_v49, 1326507024 }
 0x4b0   :  { %v3822_v0 = vadd.f32 1.0, %v3821_v4  ;;  %v3829_v14 = vadd.f32 1.0, %v3828_v62  ;;  %v7496_v50 = vadd.s32 4294967294, %v3329_v8  ;;  %vm3412_vm3 = vcmp.lt.s32.totalorder %v9767_v32, 3 }
 0x4b1   :  { %v3420_v26 = vsel %vm3412_vm3, %v3403_v52, %v3419_v41  ;;  %v3424_v3 = vsel %vm3412_vm3, %v3406_v61, %v3423_v54  ;;  %v9847_v62 = vand.u32 8388607, %v2913_v15  ;;  %v3350_v58 = vsel %vm9803_vm0, 0, %v9809_v6 }
 0x4b2   :  { %v3830_v27 = vmul.f32 %v3829_v14, %v3814_v24  ;;  %v3839_v12 = vxor.u32 2147483648, %v3822_v0  ;;  %vm7497_vm15 = vcmp.lt.s32.totalorder %v7496_v50, 0  ;;  %v3421_v37 = vsel %vm3411_vm2, %v3418_v10, %v3420_v26 }
 0x4b3   :  { %v3332_v35 = vsel %vm7497_vm15, 0, %v7496_v50  ;;  %v3425_v23 = vsel %vm3411_vm2, %v3422_v46, %v3424_v3  ;;  %v3451_v53 = vand.u32 65535, %v3421_v37  ;;  %v3452_v63 = vshrl.u32 %v3421_v37, 16 }
 0x4b4   :  { %v3836_v20 = vxor.u32 2147483648, %v3830_v27  ;;  %v3840_v24 = vsel %vm3838_vm10, %v3839_v12, %v3830_v27  ;;  %v3333_v29 = vsub.s32 32, %v3332_v35  ;;  %v3334_v57 = vshll.u32 %v9772_v33, %v3332_v35 }
 0x4b5   :  { %v3337_v39 = vsub.s32 4294967266, %v3332_v35  ;;  %v3429_v42 = vand.u32 65535, %v3425_v23  ;;  %v3430_v36 = vshrl.u32 %v3425_v23, 16  ;;  %v3394_v18 = vshrl.u32 %v7728_v7, %v9759_v11 }
 0x4b6   :  { %v3837_v28 = vsel %vm3835_vm14, %v3822_v0, %v3836_v20  ;;  %v3335_v47 = vshrl.u32 %v9763_v55, %v3333_v29  ;;  %v3454_v8 = vmul.u32 %v3452_v63, %v9770_v34  ;;  %v2923_v61 = vadd.s32 1, %v7489_v1 }
 0x4b7   :  { %v3841_v33 = vsel %vm3834_vm8, %v3837_v28, %v3840_v24  ;;  %v3338_v56 = vadd.s32 127, %v3337_v39  ;;  %v3432_v40 = vmul.u32 %v3430_v36, %v9770_v34  ;;  %v3433_v4 = vmul.u32 %v3429_v42, %v3428_v5 }
 0x4b8   :  { %v3842_v17 = vsel %vm3831_vm11, nan, %v3841_v33  ;;  %v3336_v30 = vor.u32 %v3335_v47, %v3334_v57  ;;  %v3431_v14 = vmul.u32 %v3429_v42, %v9770_v34  ;;  %v3434_v27 = vmul.u32 %v3430_v36, %v3428_v5 }
 0x4b9   :  { %4285 = vmatpush.msra.mxu1 %v3842_v17  ;;  %v3339_v55 = vshll.u32 %v3338_v56, 23  ;;  %v3435_v50 = vshll.u32 %v3432_v40, 16  ;;  %v3453_v12 = vmul.u32 %v3451_v53, %v9770_v34  ;;  %v3455_v10 = vmul.u32 %v3451_v53, %v3428_v5 }
 0x4ba   :  { %v3343_v0 = vcvt.s32.f32 %v3336_v30  ;;  %v3457_v35 = vshll.u32 %v3454_v8, 16  ;;  %v3437_v46 = vshll.u32 %v3433_v4, 16  ;;  %v3415_v11 = vsel %vm3413_vm9, %v3403_v52, 2102212464 }
 0x4bb   :  { %v3340_v49 = vor.u32 4788187, %v3339_v55  ;;  %vm3439_vm4 = vc.u32 %v3431_v14, %v3435_v50  ;;  %v3441_v6 = vadd.s32 %v3435_v50, %v3431_v14  ;;  %v3456_v1 = vmul.u32 %v3452_v63, %v3428_v5 }
 0x4bc   :  { %v3440_v54 = vsel %vm3439_vm4, 1, %v7727_v2  ;;  %vm3461_vm6 = vc.u32 %v3453_v12, %v3457_v35  ;;  %v3459_v57 = vshll.u32 %v3455_v10, 16  ;;  %v3463_v39 = vadd.s32 %v3457_v35, %v3453_v12 }
 0x4bd   :  { %v3341_v41 = vand.u32 2147483647, %v3340_v49  ;;  %v3442_v24 = vadd.s32 %v3440_v54, %v3434_v27  ;;  %vm3443_vm10 = vc.u32 %v3441_v6, %v3437_v46  ;;  %v3462_v29 = vsel %vm3461_vm6, 1, %v7727_v2 }
 0x4be   :  { %v3444_v34 = vsel %vm3443_vm10, 1, %v7727_v2  ;;  %v3464_v26 = vadd.s32 %v3462_v29, %v3456_v1  ;;  %v3436_v28 = vshrl.u32 %v3432_v40, 16  ;;  %vm2924_vm13 = vcmp.gt.s32.totalorder %v2923_v61, 0 }
 0x4bf   :  { %v3344_v20 = vmul.f32 %v3343_v0, %v3341_v41  ;;  %v3446_v47 = vadd.s32 %v3444_v34, %v3442_v24  ;;  %v3414_v52 = vsel %vm3410_vm1, %v3394_v18, %v9791_v45  ;;  %v3416_v5 = vsel %vm3412_vm3, %v9797_v21, %v3415_v11 }
 0x4c0   :  { %vm3465_vm14 = vc.u32 %v3463_v39, %v3459_v57  ;;  %v2925_v37 = vsel %vm2924_vm13, %v2923_v61, 0  ;;  %v3438_v33 = vshrl.u32 %v3433_v4, 16  ;;  %v3458_v17 = vshrl.u32 %v3454_v8, 16 }
 0x4c1   :  { %v3345_v3 = vxor.u32 2147483648, %v3344_v20  ;;  %v3447_v56 = vadd.s32 %v3446_v47, %v3436_v28  ;;  %v3466_v42 = vsel %vm3465_vm14, 1, %v7727_v2  ;;  %v2927_v45 = vand.u32 31, %v2925_v37 }
 0x4c2   :  { %v3468_v30 = vadd.s32 %v3466_v42, %v3464_v26  ;;  %v3417_v21 = vsel %vm3411_vm2, %v3414_v52, %v3416_v5  ;;  %v3460_v55 = vshrl.u32 %v3455_v10, 16  ;;  %v2921_v4 = vor.u32 8388608, %v9847_v62 }
 0x4c3   :  { %v3346_v23 = vsel %vm3225_vm7, %v3345_v3, %v3344_v20  ;;  %v9876_v63 = vadd.s32 %v3447_v56, %v3438_v33  ;;  %v9879_v18 = vsub.s32 32, %v2927_v45  ;;  %v3367_v0 = vadd.s32 3, %v3350_v58 }
 0x4c4   :  { %v3349_v36 = vsel %vm9803_vm0, %v9513_v25, %v3346_v23  ;;  %v3469_v40 = vadd.s32 %v3468_v30, %v3458_v17  ;;  %v9881_v44 = vadd.s32 %v3463_v39, %v3459_v57  ;;  %v3471_v14 = vmul.u32 %v9757_v59, %v3417_v21 }
 0x4c5   :  { %v3351_v53 = vmul.f32 %v3349_v36, %v3349_v36  ;;  %v2933_v50 = vshll.u32 %v7729_v9, %v2927_v45  ;;  %v2934_v32 = vshrl.u32 %v7730_v13, %v9879_v18  ;;  %v2937_v62 = vshrl.u32 %v7731_v16, %v9879_v18 }
 0x4c6   :  { %v3470_v8 = vadd.s32 %v3469_v40, %v3460_v55  ;;  %vm3473_vm7 = vc.u32 %v9876_v63, %v9881_v44  ;;  %v9891_v58 = vshrl.u32 %v2925_v37, 5  ;;  %v2931_v35 = vshrl.u32 %v7729_v9, %v9879_v18 }
 0x4c7   :  { %v3352_v61 = vmul.f32 -0.001358992, %v3351_v53  ;;  %v3359_v49 = vmul.f32 -0.00019511016, %v3351_v53  ;;  %v2936_v59 = vshll.u32 %v7730_v13, %v2927_v45  ;;  %v9896_v6 = vor.u32 %v2934_v32, %v2933_v50 }
 0x4c8   :  { %v3474_v10 = vadd.s32 1, %v3470_v8  ;;  %v2940_v11 = vshrl.u32 %v7732_v19, %v9879_v18  ;;  %v2939_v1 = vshll.u32 %v7731_v16, %v2927_v45  ;;  %v2942_v20 = vshll.u32 %v7732_v19, %v2927_v45 }
 0x4c9   :  { %v3353_v27 = vadd.f32 0.041655596, %v3352_v61  ;;  %v3360_v12 = vadd.f32 0.008332121, %v3359_v49  ;;  %v2943_v24 = vshrl.u32 %v7733_v22, %v9879_v18  ;;  %v9904_v39 = vor.u32 %v2937_v62, %v2936_v59 }
 0x4ca   :  { %v3475_v54 = vsel %vm3473_vm7, %v3474_v10, %v3470_v8  ;;  %v3368_v26 = vand.u32 3, %v3367_v0  ;;  %v2930_v3 = vshll.u32 %v7728_v7, %v2927_v45  ;;  %v2941_v28 = vor.u32 %v2940_v11, %v2939_v1 }
 0x4cb   :  { %v3354_v41 = vmul.f32 %v3353_v27, %v3351_v53  ;;  %v3361_v46 = vmul.f32 %v3360_v12, %v3351_v53  ;;  %v3476_v57 = vadd.s32 %v3475_v54, %v3471_v14  ;;  %v2944_v47 = vor.u32 %v2943_v24, %v2942_v20 }
 0x4cc   :  { %vm2948_vm8 = vcmp.lt.s32.totalorder %v9891_v58, 4  ;;  %v9908_v23 = vor.u32 %v2931_v35, %v2930_v3  ;;  %vm2945_vm11 = vcmp.lt.s32.totalorder %v9891_v58, 1  ;;  %vm2947_vm0 = vcmp.lt.s32.totalorder %v9891_v58, 3 }
 0x4cd   :  { %v3355_v29 = vadd.f32 -0.4999988, %v3354_v41  ;;  %v3362_v34 = vadd.f32 -0.16666654, %v3361_v46  ;;  %v3477_v37 = vadd.s32 536870912, %v3476_v57  ;;  %v2957_v30 = vsel %vm2945_vm11, %v9896_v6, %v9904_v39 }
 0x4ce   :  { %v2958_v33 = vsel %vm2948_vm8, %v2944_v47, 1326507024  ;;  %vm3366_vm1 = vweird.f32 %v9513_v25  ;;  %v2954_v45 = vsel %vm2948_vm8, %v2941_v28, 920167782  ;;  %v9925_v21 = vshll.u32 %v2921_v4, 8 }
 0x4cf   :  { %v3356_v52 = vmul.f32 %v3355_v29, %v3351_v53  ;;  %v3363_v5 = vmul.f32 %v3362_v34, %v3351_v53  ;;  %v9914_v17 = vshrl.u32 %v3477_v37, 30  ;;  %v2959_v53 = vsel %vm2947_vm0, %v2941_v28, %v2958_v33 }
 0x4d0   :  { %vm2946_vm2 = vcmp.lt.s32.totalorder %v9891_v58, 2  ;;  %vm3369_vm9 = vcmp.lt.s32.totalorder %v3368_v26, 2  ;;  %vm3370_vm15 = vcmp.eq.s32.totalorder %v3368_v26, 0  ;;  %vm3373_vm3 = vcmp.eq.s32.totalorder %v3368_v26, 2 }
 0x4d1   :  { %v3357_v56 = vadd.f32 1.0, %v3356_v52  ;;  %v3364_v42 = vadd.f32 1.0, %v3363_v5  ;;  %v3479_v61 = vshll.u32 %v9914_v17, 30  ;;  %v2960_v49 = vsel %vm2946_vm2, %v2957_v30, %v2959_v53 }
 0x4d2   :  { %v2953_v4 = vsel %vm2945_vm11, %v9908_v23, %v9896_v6  ;;  %v2962_v14 = vand.u32 65535, %v9925_v21  ;;  %v2963_v50 = vshrl.u32 %v9925_v21, 16  ;;  %v2964_v32 = vand.u32 65535, %v2960_v49 }
 0x4d3   :  { %v3365_v55 = vmul.f32 %v3364_v42, %v3349_v36  ;;  %v3374_v40 = vxor.u32 2147483648, %v3357_v56  ;;  %v3480_v8 = vsub.s32 %v3476_v57, %v3479_v61  ;;  %v2955_v36 = vsel %vm2947_vm0, %v9904_v39, %v2954_v45 }
 0x4d4   :  { %v2965_v27 = vshrl.u32 %v2960_v49, 16  ;;  %v2956_v59 = vsel %vm2946_vm2, %v2953_v4, %v2955_v36  ;;  %v2968_v46 = vmul.u32 %v2964_v32, %v2963_v50  ;;  %v2966_v20 = vmul.u32 %v2964_v32, %v2962_v14 }
 0x4d5   :  { %v3371_v0 = vxor.u32 2147483648, %v3365_v55  ;;  %v3375_v62 = vsel %vm3373_vm3, %v3374_v40, %v3365_v55  ;;  %vm3481_vm4 = vcmp.lt.s32.totalorder %v3480_v8, 0  ;;  %v3482_v10 = vsub.s32 0, %v3480_v8 }
 0x4d6   :  { %v2967_v41 = vmul.u32 %v2965_v27, %v2962_v14  ;;  %v2969_v29 = vmul.u32 %v2965_v27, %v2963_v50  ;;  %v2972_v34 = vshll.u32 %v2968_v46, 16  ;;  %v2986_v57 = vand.u32 65535, %v2956_v59 }
 0x4d7   :  { %v3372_v12 = vsel %vm3370_vm15, %v3357_v56, %v3371_v0  ;;  %v3483_v54 = vsel %vm3481_vm4, %v3482_v10, %v3480_v8  ;;  %v2987_v28 = vshrl.u32 %v2956_v59, 16  ;;  %v9949_v56 = vmul.f32 %v9273_v51, %v9211_v60 }
 0x4d8   :  { %v3376_v35 = vsel %vm3369_vm9, %v3372_v12, %v3375_v62  ;;  %v3484_v1 = vclz %v3483_v54  ;;  %v2970_v24 = vshll.u32 %v2967_v41, 16  ;;  %v2990_v33 = vmul.u32 %v2986_v57, %v2963_v50 }
 0x4d9   :  { %v3377_v11 = vsel %vm3366_vm1, nan, %v3376_v35  ;;  %v2989_v5 = vmul.u32 %v2987_v28, %v2962_v14  ;;  %v3472_v42 = vadd.s32 %v9881_v44, %v9876_v63  ;;  %v2929_v55 = vshrl.u32 %v7728_v7, %v9879_v18 }
 0x4da   :  { %4257 = vmatpush.msra.mxu0 %v3377_v11  ;;  %v7499_v3 = vadd.s32 4294967294, %v3484_v1  ;;  %vm2974_vm6 = vc.u32 %v2966_v20, %v2970_v24  ;;  %v2976_v26 = vadd.s32 %v2970_v24, %v2966_v20  ;;  %v2971_v40 = vshrl.u32 %v2967_v41, 16 }
 0x4db   :  { %v2975_v47 = vsel %vm2974_vm6, 1, %v7727_v2  ;;  %v2988_v61 = vmul.u32 %v2986_v57, %v2962_v14  ;;  %v2992_v49 = vshll.u32 %v2989_v5, 16  ;;  %v2991_v32 = vmul.u32 %v2987_v28, %v2963_v50 }
 0x4dc   :  { %vm7500_vm10 = vcmp.lt.s32.totalorder %v7499_v3, 0  ;;  %v2977_v52 = vadd.s32 %v2975_v47, %v2969_v29  ;;  %vm2978_vm13 = vc.u32 %v2976_v26, %v2972_v34  ;;  %v2994_v27 = vshll.u32 %v2990_v33, 16 }
 0x4dd   :  { %v3487_v25 = vsel %vm7500_vm10, 0, %v7499_v3  ;;  %v2979_v37 = vsel %vm2978_vm13, 1, %v7727_v2  ;;  %vm2996_vm14 = vc.u32 %v2988_v61, %v2992_v49  ;;  %v2998_v60 = vadd.s32 %v2992_v49, %v2988_v61 }
 0x4de   :  { %v3488_v30 = vsub.s32 32, %v3487_v25  ;;  %v3492_v45 = vsub.s32 4294967266, %v3487_v25  ;;  %v2981_v53 = vadd.s32 %v2979_v37, %v2977_v52  ;;  %v3489_v0 = vshll.u32 %v3480_v8, %v3487_v25 }
 0x4df   :  { %v3071_v51 = vand.u32 2139095040, %v9949_v56  ;;  %v2997_v62 = vsel %vm2996_vm14, 1, %v7727_v2  ;;  %v2950_v18 = vsel %vm2948_vm8, %v9904_v39, 2102212464  ;;  %vm3000_vm7 = vc.u32 %v2998_v60, %v2994_v27 }
 0x4e0   :  { %v3490_v4 = vshrl.u32 %v3472_v42, %v3488_v30  ;;  %v3493_v36 = vadd.s32 127, %v3492_v45  ;;  %v2982_v44 = vadd.s32 %v2981_v53, %v2971_v40  ;;  %v2999_v14 = vadd.s32 %v2997_v62, %v2991_v32 }
 0x4e1   :  { %v3072_v8 = vshrl.u32 %v3071_v51, 23  ;;  %v3502_v50 = vsub.s32 4, %v9914_v17  ;;  %v2973_v35 = vshrl.u32 %v2968_v46, 16  ;;  %v3001_v59 = vsel %vm3000_vm7, 1, %v7727_v2 }
 0x4e2   :  { %v3491_v12 = vor.u32 %v3490_v4, %v3489_v0  ;;  %v3494_v63 = vshll.u32 %v3493_v36, 23  ;;  %v2949_v41 = vsel %vm2945_vm11, %v2929_v55, %v9908_v23  ;;  %v2993_v11 = vshrl.u32 %v2989_v5, 16 }
 0x4e3   :  { %v3003_v54 = vadd.s32 %v3001_v59, %v2999_v14  ;;  %v7492_v1 = vadd.s32 4294967169, %v3072_v8  ;;  %v2951_v39 = vsel %vm2947_vm0, %v9896_v6, %v2950_v18  ;;  %v9968_v29 = vadd.s32 %v2982_v44, %v2973_v35 }
 0x4e4   :  { %v3495_v10 = vor.u32 4788187, %v3494_v63  ;;  %v3498_v24 = vcvt.s32.f32 %v3491_v12  ;;  %vm3380_vm8 = vcmp.lt.s32.totalorder %v9734_v43, 0  ;;  %v2995_v46 = vshrl.u32 %v2990_v33, 16 }
 0x4e5   :  { %v3004_v34 = vadd.s32 %v3003_v54, %v2993_v11  ;;  %v3078_v57 = vadd.s32 1, %v7492_v1  ;;  %v3503_v23 = vsel %vm3380_vm8, %v3502_v50, %v9914_v17  ;;  %v9974_v26 = vadd.s32 %v2998_v60, %v2994_v27 }
 0x4e6   :  { %v3496_v20 = vand.u32 2147483647, %v3495_v10  ;;  %v2952_v28 = vsel %vm2946_vm2, %v2949_v41, %v2951_v39  ;;  %vm3379_vm0 = vcmp.le.f32.partialorder %v3378_v31, 0.7853982  ;;  %v3068_v37 = vand.u32 2147483647, %v9949_v56 }
 0x4e7   :  { %v3005_v47 = vadd.s32 %v3004_v34, %v2995_v46  ;;  %vm3079_vm11 = vcmp.gt.s32.totalorder %v3078_v57, 0  ;;  %vm3008_vm1 = vc.u32 %v9968_v29, %v9974_v26  ;;  %v3505_v5 = vsel %vm3379_vm0, 0, %v3503_v23 }
 0x4e8   :  { %v3499_v3 = vmul.f32 %v3498_v24, %v3496_v20  ;;  %v3080_v52 = vsel %vm3079_vm11, %v3078_v57, 0  ;;  %v3006_v58 = vmul.u32 %v9925_v21, %v2952_v28  ;;  %v3522_v53 = vadd.s32 3, %v3505_v5 }
 0x4e9   :  { %v3009_v25 = vadd.s32 1, %v3005_v47  ;;  %v3082_v17 = vand.u32 31, %v3080_v52  ;;  %v3075_v40 = vand.u32 8388607, %v3068_v37  ;;  %v9991_v61 = vshrl.u32 %v3080_v52, 5 }
 0x4ea   :  { %v3500_v6 = vxor.u32 2147483648, %v3499_v3  ;;  %v3523_v41 = vand.u32 3, %v3522_v53  ;;  %vm3521_vm4 = vweird.f32 %v9734_v43 }
 0x4eb   :  { %v3010_v30 = vsel %vm3008_vm1, %v3009_v25, %v3005_v47  ;;  %v9987_v45 = vsub.s32 32, %v3082_v17  ;;  %v3085_v32 = vshll.u32 %v7728_v7, %v3082_v17  ;;  %v3088_v27 = vshll.u32 %v7729_v9, %v3082_v17 }
 0x4ec   :  { %v3501_v33 = vsel %vm3380_vm8, %v3500_v6, %v3499_v3  ;;  %v3011_v55 = vadd.s32 %v3010_v30, %v3006_v58  ;;  %v3094_v51 = vshll.u32 %v7731_v16, %v3082_v17  ;;  %v3091_v18 = vshll.u32 %v7730_v13, %v3082_v17 }
 0x4ed   :  { %v3504_v42 = vsel %vm3379_vm0, %v9734_v43, %v3501_v33  ;;  %v3086_v49 = vshrl.u32 %v7729_v9, %v9987_v45  ;;  %v3089_v0 = vshrl.u32 %v7730_v13, %v9987_v45  ;;  %v3092_v60 = vshrl.u32 %v7731_v16, %v9987_v45 }
 0x4ee   :  { %v3506_v31 = vmul.f32 %v3504_v42, %v3504_v42  ;;  %v3012_v36 = vadd.s32 536870912, %v3011_v55  ;;  %v3095_v12 = vshrl.u32 %v7732_v19, %v9987_v45  ;;  %v3098_v50 = vshrl.u32 %v7733_v22, %v9987_v45 }
 0x4ef   :  { %v10007_v14 = vor.u32 %v3086_v49, %v3085_v32  ;;  %v10009_v8 = vor.u32 %v3089_v0, %v3088_v27  ;;  %v3076_v54 = vor.u32 8388608, %v3075_v40  ;;  %v10014_v1 = vor.u32 %v3092_v60, %v3091_v18 }
 0x4f0   :  { %v3507_v21 = vmul.f32 -0.001358992, %v3506_v31  ;;  %v3514_v4 = vmul.f32 -0.00019511016, %v3506_v31  ;;  %v10004_v62 = vshrl.u32 %v3012_v36, 30  ;;  %v3096_v10 = vor.u32 %v3095_v12, %v3094_v51 }
 0x4f1   :  { %v3097_v20 = vshll.u32 %v7732_v19, %v3082_v17  ;;  %vm3100_vm2 = vcmp.lt.s32.totalorder %v9991_v61, 1  ;;  %vm3103_vm9 = vcmp.lt.s32.totalorder %v9991_v61, 4  ;;  %vm3102_vm15 = vcmp.lt.s32.totalorder %v9991_v61, 3 }
 0x4f2   :  { %v3508_v63 = vadd.f32 0.041655596, %v3507_v21  ;;  %v3515_v44 = vadd.f32 0.008332121, %v3514_v4  ;;  %v3014_v11 = vshll.u32 %v10004_v62, 30  ;;  %v3108_v57 = vsel %vm3100_vm2, %v10007_v14, %v10009_v8 }
 0x4f3   :  { %v3099_v34 = vor.u32 %v3098_v50, %v3097_v20  ;;  %v3109_v3 = vsel %vm3103_vm9, %v3096_v10, 920167782  ;;  %v10030_v52 = vshll.u32 %v3076_v54, 8  ;;  %vm3101_vm6 = vcmp.lt.s32.totalorder %v9991_v61, 2 }
 0x4f4   :  { %v3509_v35 = vmul.f32 %v3508_v63, %v3506_v31  ;;  %v3516_v59 = vmul.f32 %v3515_v44, %v3506_v31  ;;  %v3015_v46 = vsub.s32 %v3011_v55, %v3014_v11  ;;  %v3110_v6 = vsel %vm3102_vm15, %v10014_v1, %v3109_v3 }
 0x4f5   :  { %v3111_v58 = vsel %vm3101_vm6, %v3108_v57, %v3110_v6  ;;  %v3112_v30 = vsel %vm3100_vm2, %v10009_v8, %v10014_v1  ;;  %vm3524_vm10 = vcmp.lt.s32.totalorder %v3523_v41, 2  ;;  %vm3525_vm13 = vcmp.eq.s32.totalorder %v3523_v41, 0 }
 0x4f6   :  { %v3510_v24 = vadd.f32 -0.4999988, %v3509_v35  ;;  %v3517_v39 = vadd.f32 -0.16666654, %v3516_v59  ;;  %vm3016_vm3 = vcmp.lt.s32.totalorder %v3015_v46, 0  ;;  %v3017_v47 = vsub.s32 0, %v3015_v46 }
 0x4f7   :  { %vm3528_vm14 = vcmp.eq.s32.totalorder %v3523_v41, 2  ;;  %v3007_v49 = vadd.s32 %v9974_v26, %v9968_v29  ;;  %v3117_v36 = vand.u32 65535, %v10030_v52  ;;  %v3142_v32 = vshrl.u32 %v3111_v58, 16 }
 0x4f8   :  { %v3511_v23 = vmul.f32 %v3510_v24, %v3506_v31  ;;  %v3518_v28 = vmul.f32 %v3517_v39, %v3506_v31  ;;  %v3018_v17 = vsel %vm3016_vm3, %v3017_v47, %v3015_v46  ;;  %v3113_v31 = vsel %vm3103_vm9, %v3099_v34, 1326507024 }
 0x4f9   :  { %v3019_v33 = vclz %v3018_v17  ;;  %v3114_v40 = vsel %vm3102_vm15, %v3096_v10, %v3113_v31  ;;  %v3141_v60 = vand.u32 65535, %v3111_v58  ;;  %v3118_v44 = vshrl.u32 %v10030_v52, 16 }
 0x4fa   :  { %v3512_v5 = vadd.f32 1.0, %v3511_v23  ;;  %v3519_v25 = vadd.f32 1.0, %v3518_v28  ;;  %v3115_v4 = vsel %vm3101_vm6, %v3112_v30, %v3114_v40  ;;  %v3144_v10 = vmul.u32 %v3142_v32, %v3117_v36 }
 0x4fb   :  { %v7490_v0 = vadd.s32 4294967294, %v3019_v33  ;;  %v3120_v27 = vshrl.u32 %v3115_v4, 16  ;;  %v3145_v24 = vmul.u32 %v3141_v60, %v3118_v44  ;;  %v3143_v57 = vmul.u32 %v3141_v60, %v3117_v36 }
 0x4fc   :  { %v3520_v53 = vmul.f32 %v3519_v25, %v3504_v42  ;;  %v3529_v55 = vxor.u32 2147483648, %v3512_v5  ;;  %v3119_v42 = vand.u32 65535, %v3115_v4  ;;  %v3147_v28 = vshll.u32 %v3144_v10, 16 }
 0x4fd   :  { %vm7491_vm7 = vcmp.lt.s32.totalorder %v7490_v0, 0  ;;  %v3122_v35 = vmul.u32 %v3120_v27, %v3117_v36  ;;  %v3124_v41 = vmul.u32 %v3120_v27, %v3118_v44  ;;  %v3149_v17 = vshll.u32 %v3145_v24, 16 }
 0x4fe   :  { %v3526_v21 = vxor.u32 2147483648, %v3520_v53  ;;  %v3530_v12 = vsel %vm3528_vm14, %v3529_v55, %v3520_v53  ;;  %v3022_v63 = vsel %vm7491_vm7, 0, %v7490_v0  ;;  %v3123_v59 = vmul.u32 %v3119_v42, %v3118_v44 }
 0x4ff   :  { %v3023_v29 = vsub.s32 32, %v3022_v63  ;;  %v3027_v26 = vsub.s32 4294967266, %v3022_v63  ;;  %v3024_v11 = vshll.u32 %v3015_v46, %v3022_v63  ;;  %v3121_v39 = vmul.u32 %v3119_v42, %v3117_v36 }
 0x500   :  { %v3527_v51 = vsel %vm3525_vm13, %v3512_v5, %v3526_v21  ;;  %v3125_v34 = vshll.u32 %v3122_v35, 16  ;;  %v3127_v47 = vshll.u32 %v3123_v59, 16  ;;  %v3146_v5 = vmul.u32 %v3142_v32, %v3118_v44 }
 0x501   :  { %v3531_v18 = vsel %vm3524_vm10, %v3527_v51, %v3530_v12  ;;  %v3025_v54 = vshrl.u32 %v3007_v49, %v3023_v29  ;;  %v3028_v20 = vadd.s32 127, %v3027_v26  ;;  %vm3151_vm11 = vc.u32 %v3143_v57, %v3147_v28 }
 0x502   :  { %v3532_v50 = vsel %vm3521_vm4, nan, %v3531_v18  ;;  %vm3129_vm8 = vc.u32 %v3121_v39, %v3125_v34  ;;  %v3131_v6 = vadd.s32 %v3125_v34, %v3121_v39  ;;  %v3152_v33 = vsel %vm3151_vm11, 1, %v7727_v2  ;;  %v4153_v18 = vld [vmem:[#allocation7 + $0x60] sm:$0xff] }
 0x503   :  { %4286 = vmatpush.msra.mxu1 %v3532_v50  ;;  %v3026_v3 = vor.u32 %v3025_v54, %v3024_v11  ;;  %v3029_v23 = vshll.u32 %v3028_v20, 23  ;;  %v3130_v25 = vsel %vm3129_vm8, 1, %v7727_v2  ;;  %v3153_v58 = vadd.s32 %v3147_v28, %v3143_v57 }
 0x504   :  { %v3132_v46 = vadd.s32 %v3130_v25, %v3124_v41  ;;  %vm3133_vm0 = vc.u32 %v3131_v6, %v3127_v47  ;;  %v3154_v55 = vadd.s32 %v3152_v33, %v3146_v5  ;;  %v3105_v40 = vsel %vm3103_vm9, %v10014_v1, 2102212464 }
 0x505   :  { %v3030_v43 = vor.u32 4788187, %v3029_v23  ;;  %v3033_v31 = vcvt.s32.f32 %v3026_v3  ;;  %v3134_v53 = vsel %vm3133_vm0, 1, %v7727_v2  ;;  %v3126_v49 = vshrl.u32 %v3122_v35, 16 }
 0x506   :  { %v3136_v0 = vadd.s32 %v3134_v53, %v3132_v46  ;;  %vm3155_vm1 = vc.u32 %v3153_v58, %v3149_v17  ;;  %v3084_v4 = vshrl.u32 %v7728_v7, %v9987_v45  ;;  %v3128_v32 = vshrl.u32 %v3123_v59, 16 }
 0x507   :  { %v3031_v30 = vand.u32 2147483647, %v3030_v43  ;;  %v3156_v36 = vsel %vm3155_vm1, 1, %v7727_v2  ;;  %v3148_v27 = vshrl.u32 %v3144_v10, 16  ;;  %v3106_v1 = vsel %vm3102_vm15, %v10009_v8, %v3105_v40 }
 0x508   :  { %v3137_v42 = vadd.s32 %v3136_v0, %v3126_v49  ;;  %v3158_v60 = vadd.s32 %v3156_v36, %v3154_v55  ;;  %v3104_v12 = vsel %vm3100_vm2, %v3084_v4, %v10007_v14  ;;  %vm2915_vm9 = vcmp.lt.s32.totalorder %v9751_v48, 0 }
 0x509   :  { %v3034_v21 = vmul.f32 %v3033_v31, %v3031_v30  ;;  %v3150_v44 = vshrl.u32 %v3145_v24, 16  ;;  %vm10070_vm3 = vcmp.le.f32.partialorder %v2913_v15, 0.7853982  ;;  %v3157_v26 = vadd.s32 %v3153_v58, %v3149_v17 }
 0x50a   :  { %v3138_v63 = vadd.s32 %v3137_v42, %v3128_v32  ;;  %v3159_v45 = vadd.s32 %v3158_v60, %v3148_v27  ;;  %v3037_v14 = vsub.s32 4, %v10004_v62  ;;  %v3107_v10 = vsel %vm3101_vm6, %v3104_v12, %v3106_v1 }
 0x50b   :  { %v3035_v51 = vxor.u32 2147483648, %v3034_v21  ;;  %v3161_v54 = vmul.u32 %v10030_v52, %v3107_v10  ;;  %vm3056_vm13 = vweird.f32 %v9751_v48  ;;  %vm3070_vm7 = vcmp.lt.s32.totalorder %v9949_v56, 0 }
 0x50c   :  { %v3160_v50 = vadd.s32 %v3159_v45, %v3150_v44  ;;  %vm3163_vm2 = vc.u32 %v3138_v63, %v3157_v26  ;;  %v3038_v20 = vsel %vm2915_vm9, %v3037_v14, %v10004_v62  ;;  %v3162_v42 = vadd.s32 %v3157_v26, %v3138_v63  ;;  %v4158_v14 = vld [vmem:[#allocation7 + $0x88] sm:$0xff] }
 0x50d   :  { %v3036_v29 = vsel %vm2915_vm9, %v3035_v51, %v3034_v21  ;;  %v3040_v61 = vsel %vm10070_vm3, 0, %v3038_v20  ;;  %7515 = vmatmul.msk.f32.gmra.mxu2 %vm1389_vm12, %v4158_v14  ;;  %7520 = vmatmul.msk.f32.gmra.mxu3 %vm1389_vm12, %v4158_v14  ;;  %v4154_v63 = vld [vmem:[#allocation7 + $0x68] sm:$0xff]  ;;  %vm10095_vm8 = vcmp.le.f32.partialorder %v3068_v37, 0.7853982 }
 0x50e   :  { %v3039_v8 = vsel %vm10070_vm3, %v9751_v48, %v3036_v29  ;;  %v3164_v15 = vadd.s32 1, %v3160_v50  ;;  %v3057_v5 = vadd.s32 3, %v3040_v61 }
 0x50f   :  { %v3041_v35 = vmul.f32 %v3039_v8, %v3039_v8 }
 0x510   :  { %v3165_v24 = vsel %vm3163_vm2, %v3164_v15, %v3160_v50  ;;  %v3058_v33 = vand.u32 3, %v3057_v5  ;;  %v4159_v15 = vld [vmem:[#allocation7 + $0x90] sm:$0xff] }
 0x511   :  { %v3042_v59 = vmul.f32 -0.001358992, %v3041_v35  ;;  %v3049_v11 = vmul.f32 -0.00019511016, %v3041_v35  ;;  %v3166_v57 = vadd.s32 %v3165_v24, %v3161_v54 }
 0x512   :  { %vm3060_vm4 = vcmp.eq.s32.totalorder %v3058_v33, 0  ;;  %vm3063_vm6 = vcmp.eq.s32.totalorder %v3058_v33, 2  ;;  %vm3059_vm10 = vcmp.lt.s32.totalorder %v3058_v33, 2 }
 0x513   :  { %v3043_v39 = vadd.f32 0.041655596, %v3042_v59  ;;  %v3050_v34 = vadd.f32 0.008332121, %v3049_v11  ;;  %v3167_v41 = vadd.s32 536870912, %v3166_v57 }
 0x515   :  { %v3044_v3 = vmul.f32 %v3043_v39, %v3041_v35  ;;  %v3051_v23 = vmul.f32 %v3050_v34, %v3041_v35  ;;  %v3168_v6 = vshrl.u32 %v3167_v41, 30  ;;  %7516 = vmatmul.msk.f32.gmra.mxu2 %vm1389_vm12, %v4159_v15  ;;  %7521 = vmatmul.msk.f32.gmra.mxu3 %vm1389_vm12, %v4159_v15  ;;  %v4155_v39 = vld [vmem:[#allocation7 + $0x70] sm:$0xff]  ;;  %v4160_v41 = vld [vmem:[#allocation7 + $0x98] sm:$0xff] }
 0x517   :  { %v3045_v28 = vadd.f32 -0.4999988, %v3044_v3  ;;  %v3052_v47 = vadd.f32 -0.16666654, %v3051_v23  ;;  %v3169_v25 = vshll.u32 %v3168_v6, 30  ;;  %v3192_v59 = vsub.s32 4, %v3168_v6 }
 0x519   :  { %v3046_v43 = vmul.f32 %v3045_v28, %v3041_v35  ;;  %v3053_v52 = vmul.f32 %v3052_v47, %v3041_v35  ;;  %v3170_v62 = vsub.s32 %v3166_v57, %v3169_v25  ;;  %v3193_v37 = vsel %vm3070_vm7, %v3192_v59, %v3168_v6 }
 0x51a   :  { %v3195_v61 = vsel %vm10095_vm8, 0, %v3193_v37 }
 0x51b   :  { %v3047_v17 = vadd.f32 1.0, %v3046_v43  ;;  %v3054_v46 = vadd.f32 1.0, %v3053_v52  ;;  %vm3171_vm15 = vcmp.lt.s32.totalorder %v3170_v62, 0  ;;  %v3172_v31 = vsub.s32 0, %v3170_v62  ;;  %v4156_v52 = vld [vmem:[#allocation7 + $0x78] sm:$0xff] }
 0x51c   :  { %v3212_v5 = vadd.s32 3, %v3195_v61 }
 0x51d   :  { %v3055_v58 = vmul.f32 %v3054_v46, %v3039_v8  ;;  %v3064_v30 = vxor.u32 2147483648, %v3047_v17  ;;  %v3173_v55 = vsel %vm3171_vm15, %v3172_v31, %v3170_v62  ;;  %7517 = vmatmul.msk.f32.gmra.mxu2 %vm1389_vm12, %v4160_v41  ;;  %7522 = vmatmul.msk.f32.gmra.mxu3 %vm1389_vm12, %v4160_v41  ;;  %vm3211_vm12 = vweird.f32 %v9949_v56 }
 0x51e   :  { %v3174_v40 = vclz %v3173_v55  ;;  %v3213_v46 = vand.u32 3, %v3212_v5 }
 0x51f   :  { %v3061_v53 = vxor.u32 2147483648, %v3055_v58  ;;  %v3065_v0 = vsel %vm3063_vm6, %v3064_v30, %v3055_v58 }
 0x520   :  { %v7493_v4 = vadd.s32 4294967294, %v3174_v40  ;;  %vm3215_vm11 = vcmp.eq.s32.totalorder %v3213_v46, 0  ;;  %vm3218_vm0 = vcmp.eq.s32.totalorder %v3213_v46, 2  ;;  %vm3214_vm1 = vcmp.lt.s32.totalorder %v3213_v46, 2  ;;  %v4190_v40 = vpop.f32.mrf.mxu2 }
 0x521   :  { %v3062_v49 = vsel %vm3060_vm4, %v3047_v17, %v3061_v53 }
 0x522   :  { %v3066_v21 = vsel %vm3059_vm10, %v3062_v49, %v3065_v0  ;;  %vm7494_vm14 = vcmp.lt.s32.totalorder %v7493_v4, 0 }
 0x523   :  { %v3067_v36 = vsel %vm3056_vm13, nan, %v3066_v21  ;;  %v3177_v32 = vsel %vm7494_vm14, 0, %v7493_v4 }
 0x524   :  { %4258 = vmatpush.msra.mxu0 %v3067_v36  ;;  %v3178_v27 = vsub.s32 32, %v3177_v32  ;;  %v3182_v60 = vsub.s32 4294967266, %v3177_v32  ;;  %v3179_v51 = vshll.u32 %v3170_v62, %v3177_v32  ;;  %v4308_v32 = vpop.permute.xlu0 %4307 }
 0x525   :  { %7523 = vmatmul.msk.f32.vlgmr.msra.gmra.mxu0 %vm2792_vm5, %v4153_v18 }
 0x526   :  { %v3180_v12 = vshrl.u32 %v3162_v42, %v3178_v27  ;;  %v3183_v1 = vadd.s32 127, %v3182_v60  ;;  %v4313_v60 = vpop.permute.xlu1 %4312 }
 0x528   :  { %v3181_v44 = vor.u32 %v3180_v12, %v3179_v51  ;;  %v3184_v45 = vshll.u32 %v3183_v1, 23  ;;  %v4318_v12 = vpop.permute.xlu2 %4317 }
 0x52a   :  { %v3185_v29 = vor.u32 4788187, %v3184_v45  ;;  %v3188_v8 = vcvt.s32.f32 %v3181_v44 }
 0x52c   :  { %v3186_v48 = vand.u32 2147483647, %v3185_v29  ;;  %v4219_v29 = vpop.f32.mrf.mxu3 }
 0x52d   :  { %7524 = vmatmul.msk.f32.gmra.mxu0 %vm2792_vm5, %v4154_v63 }
 0x52e   :  { %v3189_v10 = vmul.f32 %v3188_v8, %v3186_v48 }
 0x530   :  { %v3190_v26 = vxor.u32 2147483648, %v3189_v10 }
 0x532   :  { %v3191_v35 = vsel %vm3070_vm7, %v3190_v26, %v3189_v10 }
 0x533   :  { %v3194_v11 = vsel %vm10095_vm8, %v9949_v56, %v3191_v35 }
 0x534   :  { %v3196_v54 = vmul.f32 %v3194_v11, %v3194_v11 }
 0x535   :  { %7525 = vmatmul.msk.f32.gmra.mxu0 %vm2792_vm5, %v4155_v39 }
 0x536   :  { %v3197_v20 = vmul.f32 -0.001358992, %v3196_v54  ;;  %v3204_v24 = vmul.f32 -0.00019511016, %v3196_v54 }
 0x538   :  { %v3198_v34 = vadd.f32 0.041655596, %v3197_v20  ;;  %v3205_v57 = vadd.f32 0.008332121, %v3204_v24 }
 0x53a   :  { %v3199_v3 = vmul.f32 %v3198_v34, %v3196_v54  ;;  %v3206_v23 = vmul.f32 %v3205_v57, %v3196_v54 }
 0x53c   :  { %v3200_v28 = vadd.f32 -0.4999988, %v3199_v3  ;;  %v3207_v47 = vadd.f32 -0.16666654, %v3206_v23  ;;  %v4362_v23 = vstv %s10125_s8 }
 0x53d   :  { %7526 = vmatmul.msk.f32.gmra.mxu0 %vm2792_vm5, %v4156_v52 }
 0x53e   :  { %v3201_v43 = vmul.f32 %v3200_v28, %v3196_v54  ;;  %v3208_v6 = vmul.f32 %v3207_v47, %v3196_v54  ;;  %v4366_v28 = vstv %s10127_s9 }
 0x540   :  { %v3202_v25 = vadd.f32 1.0, %v3201_v43  ;;  %v3209_v17 = vadd.f32 1.0, %v3208_v6 }
 0x542   :  { %v3210_v62 = vmul.f32 %v3209_v17, %v3194_v11  ;;  %v3219_v33 = vxor.u32 2147483648, %v3202_v25 }
 0x544   :  { %v3216_v58 = vxor.u32 2147483648, %v3210_v62  ;;  %v3220_v31 = vsel %vm3218_vm0, %v3219_v33, %v3210_v62 }
 0x546   :  { %v3217_v30 = vsel %vm3215_vm11, %v3202_v25, %v3216_v58 }
 0x547   :  { %v3221_v53 = vsel %vm3214_vm1, %v3217_v30, %v3220_v31 }
 0x548   :  { %v3222_v55 = vsel %vm3211_vm12, nan, %v3221_v53 }
 0x549   :  { %4287 = vmatpush.msra.mxu1 %v3222_v55 }
 0x54a   :  { %7527 = vmatmul.msk.f32.vlgmr.msra.gmra.mxu1 %vm2792_vm5, %v4153_v18 }
 0x552   :  { %7528 = vmatmul.msk.f32.gmra.mxu1 %vm2792_vm5, %v4154_v63  ;;  %v4323_v63 = vpop.permute.xlu0 %4322 }
 0x55a   :  { %7529 = vmatmul.msk.f32.gmra.mxu1 %vm2792_vm5, %v4155_v39 }
 0x562   :  { %7530 = vmatmul.msk.f32.gmra.mxu1 %vm2792_vm5, %v4156_v52 }
 0x590   :  { %v4193_v0 = vpop.f32.mrf.mxu2  ;;  %v4222_v20 = vpop.f32.mrf.mxu3 }
 0x598   :  { %v4196_v36 = vpop.f32.mrf.mxu2  ;;  %v4225_v3 = vpop.f32.mrf.mxu3 }
 0x5a0   :  { %v4199_v18 = vpop.f32.mrf.mxu2  ;;  %v4228_v33 = vpop.f32.mrf.mxu3 }
 0x5a2   :  { %v4260_v49 = vpop.f32.mrf.mxu0 }
 0x5a3   :  { %v4261_v56 = vadd.f32 %v4260_v49, %v4190_v40 }
 0x5a5   :  { %v10118_v1 = vadd.f32 %v4308_v32, %v4261_v56 }
 0x5a7   :  { %v4333_v48 = vand.u32 2147483647, %v10118_v1 }
 0x5aa   :  { %v4263_v21 = vpop.f32.mrf.mxu0 }
 0x5ab   :  { %v4264_v4 = vadd.f32 %v4263_v21, %v4193_v0 }
 0x5ad   :  { %v10116_v51 = vadd.f32 %v4313_v60, %v4264_v4 }
 0x5af   :  { %v4335_v45 = vand.u32 2147483647, %v10116_v51 }
 0x5b1   :  { %v4341_v26 = vadd.f32 %v4335_v45, %v4333_v48 }
 0x5b2   :  { %v4266_v42 = vpop.f32.mrf.mxu0 }
 0x5b3   :  { %v4267_v27 = vadd.f32 %v4266_v42, %v4196_v36 }
 0x5b5   :  { %v10120_v44 = vadd.f32 %v4318_v12, %v4267_v27 }
 0x5b7   :  { %v4337_v8 = vand.u32 2147483647, %v10120_v44 }
 0x5b9   :  { %v4342_v35 = vadd.f32 %v4341_v26, %v4337_v8 }
 0x5ba   :  { %v4269_v14 = vpop.f32.mrf.mxu0 }
 0x5bb   :  { %v4270_v10 = vadd.f32 %v4269_v14, %v4199_v18 }
 0x5bd   :  { %v4331_v50 = vadd.f32 %v4323_v63, %v4270_v10 }
 0x5bf   :  { %v4339_v15 = vand.u32 2147483647, %v4331_v50 }
 0x5c1   :  { %v4343_v59 = vadd.f32 %v4342_v35, %v4339_v15 }
 0x5c3   :  { %v4344_v54 = vrot.slane %v4343_v59, 4 }
 0x5c5   :  { %v4345_v24 = vadd.f32 %v4344_v54, %v4343_v59 }
 0x5c7   :  { %v4289_v11 = vpop.f32.mrf.mxu1  ;;  %v4346_v37 = vrot.slane %v4345_v24, 2 }
 0x5c8   :  { %v4290_v6 = vadd.f32 %v4289_v11, %v4219_v29 }
 0x5c9   :  { %v4347_v39 = vadd.f32 %v4346_v37, %v4345_v24 }
 0x5ca   :  { %v10134_v46 = vadd.f32 %v4308_v32, %v4290_v6 }
 0x5cb   :  { %v4348_v57 = vrot.slane %v4347_v39, 1 }
 0x5cc   :  { %v4334_v53 = vand.u32 2147483647, %v10134_v46 }
 0x5cd   :  { %v4349_v61 = vadd.f32 %v4348_v57, %v4347_v39 }
 0x5cf   :  { %v4292_v34 = vpop.f32.mrf.mxu1  ;;  %v4359_v41 = vmul.f32 %v4349_v61, %v8310_v38 }
 0x5d0   :  { %v4293_v47 = vadd.f32 %v4292_v34, %v4222_v20 }
 0x5d1   :  { %v4363_v5 = vmul.f32 %v4362_v23, %v4359_v41 }
 0x5d2   :  { %v10132_v17 = vadd.f32 %v4313_v60, %v4293_v47 }
 0x5d3   :  { %v4367_v25 = vadd.f32 %v4366_v28, %v4363_v5 }
 0x5d4   :  { %v4336_v58 = vand.u32 2147483647, %v10132_v17 }
 0x5d5   :  { %7635 = vtanh.f32 %v4367_v25 }
 0x5d6   :  { %v4350_v0 = vadd.f32 %v4336_v58, %v4334_v53 }
 0x5d7   :  { %v4295_v43 = vpop.f32.mrf.mxu1 }
 0x5d8   :  { %v4296_v52 = vadd.f32 %v4295_v43, %v4225_v3 }
 0x5da   :  { %v10136_v62 = vadd.f32 %v4318_v12, %v4296_v52 }
 0x5db   :  { %v7636_v31 = vpop.eup %7635 }
 0x5dc   :  { %v4338_v55 = vand.u32 2147483647, %v10136_v62  ;;  %v4371_v49 = vmul.f32 20.0, %v7636_v31 }
 0x5de   :  { %v10143_v4 = vadd.f32 30.0, %v4371_v49  ;;  %v4351_v36 = vadd.f32 %v4350_v0, %v4338_v55 }
 0x5df   :  { %v4298_v30 = vpop.f32.mrf.mxu1 }
 0x5e0   :  { %v4299_v40 = vadd.f32 %v4298_v30, %v4228_v33  ;;  %v10147_v42 = vmul.f32 %v10143_v4, %v4331_v50  ;;  %v10162_v61 = vmul.f32 %v10143_v4, %v10120_v44 }
 0x5e2   :  { %v10141_v21 = vadd.f32 %v4323_v63, %v4299_v40  ;;  %v5316_v27 = vand.u32 2139095040, %v10147_v42  ;;  %v5313_v59 = vand.u32 2147483647, %v10147_v42  ;;  %v5006_v25 = vand.u32 2139095040, %v10162_v61 }
 0x5e4   :  { %v4340_v32 = vand.u32 2147483647, %v10141_v21  ;;  %v5317_v12 = vshrl.u32 %v5316_v27, 23  ;;  %v5320_v39 = vand.u32 8388607, %v5313_v59  ;;  %v5007_v27 = vshrl.u32 %v5006_v25, 23 }
 0x5e6   :  { %v4352_v56 = vadd.f32 %v4351_v36, %v4340_v32  ;;  %v7551_v18 = vadd.s32 4294967169, %v5317_v12  ;;  %v5321_v41 = vor.u32 8388608, %v5320_v39 }
 0x5e8   :  { %v4353_v60 = vrot.slane %v4352_v56, 4  ;;  %v5323_v14 = vadd.s32 1, %v7551_v18  ;;  %v10177_v30 = vshll.u32 %v5321_v41, 8 }
 0x5ea   :  { %v4354_v45 = vadd.f32 %v4353_v60, %v4352_v56  ;;  %vm5324_vm9 = vcmp.gt.s32.totalorder %v5323_v14, 0  ;;  %v5362_v56 = vand.u32 65535, %v10177_v30  ;;  %v5363_v12 = vshrl.u32 %v10177_v30, 16 }
 0x5eb   :  { %v5325_v8 = vsel %vm5324_vm9, %v5323_v14, 0 }
 0x5ec   :  { %v4355_v29 = vrot.slane %v4354_v45, 2  ;;  %v5327_v63 = vand.u32 31, %v5325_v8  ;;  %v10150_v15 = vshrl.u32 %v5325_v8, 5 }
 0x5ee   :  { %v4356_v48 = vadd.f32 %v4355_v29, %v4354_v45  ;;  %v5328_v35 = vsub.s32 32, %v5327_v63  ;;  %v5339_v11 = vshll.u32 %v7731_v16, %v5327_v63  ;;  %v5342_v20 = vshll.u32 %v7732_v19, %v5327_v63 }
 0x5ef   :  { %vm5348_vm3 = vcmp.lt.s32.totalorder %v10150_v15, 4  ;;  %v5330_v5 = vshll.u32 %v7728_v7, %v5327_v63  ;;  %v5333_v43 = vshll.u32 %v7729_v9, %v5327_v63  ;;  %v5336_v52 = vshll.u32 %v7730_v13, %v5327_v63 }
 0x5f0   :  { %v4357_v10 = vrot.slane %v4356_v48, 1  ;;  %v5340_v54 = vshrl.u32 %v7732_v19, %v5328_v35  ;;  %v5343_v24 = vshrl.u32 %v7733_v22, %v5328_v35  ;;  %v5334_v6 = vshrl.u32 %v7730_v13, %v5328_v35 }
 0x5f1   :  { %vm5347_vm2 = vcmp.lt.s32.totalorder %v10150_v15, 3  ;;  %vm5345_vm15 = vcmp.lt.s32.totalorder %v10150_v15, 1  ;;  %vm5346_vm4 = vcmp.lt.s32.totalorder %v10150_v15, 2  ;;  %v5329_v29 = vshrl.u32 %v7728_v7, %v5328_v35 }
 0x5f2   :  { %v4358_v26 = vadd.f32 %v4357_v10, %v4356_v48  ;;  %v5341_v34 = vor.u32 %v5340_v54, %v5339_v11  ;;  %v5344_v57 = vor.u32 %v5343_v24, %v5342_v20  ;;  %v5335_v58 = vor.u32 %v5334_v6, %v5333_v43 }
 0x5f3   :  { %v7545_v20 = vadd.s32 4294967169, %v5007_v27 }
 0x5f4   :  { %v4360_v50 = vmul.f32 %v4358_v26, %v8310_v38  ;;  %v5358_v47 = vsel %vm5348_vm3, %v5344_v57, 1326507024  ;;  %v5354_v44 = vsel %vm5348_vm3, %v5341_v34, 920167782 }
 0x5f5   :  { %v5359_v53 = vsel %vm5347_vm2, %v5341_v34, %v5358_v47 }
 0x5f6   :  { %v4364_v37 = vmul.f32 %v4362_v23, %v4360_v50  ;;  %v5331_v23 = vshrl.u32 %v7729_v9, %v5328_v35 }
 0x5f8   :  { %v4368_v3 = vadd.f32 %v4366_v28, %v4364_v37  ;;  %v5337_v28 = vshrl.u32 %v7731_v16, %v5328_v35  ;;  %v5332_v33 = vor.u32 %v5331_v23, %v5330_v5 }
 0x5fa   :  { %7637 = vtanh.f32 %v4368_v3  ;;  %v5338_v31 = vor.u32 %v5337_v28, %v5336_v52  ;;  %v5353_v55 = vsel %vm5345_vm15, %v5332_v33, %v5335_v58  ;;  %v5349_v50 = vsel %vm5345_vm15, %v5329_v29, %v5332_v33 }
 0x5fb   :  { %v5003_v29 = vand.u32 2147483647, %v10162_v61 }
 0x5fc   :  { %v5355_v40 = vsel %vm5347_vm2, %v5338_v31, %v5354_v44  ;;  %v5357_v49 = vsel %vm5345_vm15, %v5335_v58, %v5338_v31  ;;  %v5350_v14 = vsel %vm5348_vm3, %v5338_v31, 2102212464 }
 0x5fd   :  { %v5356_v36 = vsel %vm5346_vm4, %v5353_v55, %v5355_v40  ;;  %v5360_v32 = vsel %vm5346_vm4, %v5357_v49, %v5359_v53  ;;  %v5351_v35 = vsel %vm5347_vm2, %v5335_v58, %v5350_v14  ;;  %v10222_v15 = vand.u32 8388607, %v5003_v29 }
 0x5fe   :  { %v5364_v45 = vand.u32 65535, %v5360_v32  ;;  %v5365_v18 = vshrl.u32 %v5360_v32, 16  ;;  %v5386_v48 = vand.u32 65535, %v5356_v36  ;;  %v5387_v8 = vshrl.u32 %v5356_v36, 16 }
 0x5ff   :  { %v5013_v36 = vadd.s32 1, %v7545_v20  ;;  %vm5315_vm2 = vcmp.lt.s32.totalorder %v10147_v42, 0 }
 0x600   :  { %v7638_v0 = vpop.eup %7637  ;;  %v5367_v63 = vmul.u32 %v5365_v18, %v5362_v56  ;;  %v5368_v26 = vmul.u32 %v5364_v45, %v5363_v12  ;;  %v5389_v11 = vmul.u32 %v5387_v8, %v5362_v56  ;;  %v5390_v54 = vmul.u32 %v5386_v48, %v5363_v12 }
 0x601   :  { %v4372_v60 = vmul.f32 20.0, %v7638_v0  ;;  %v5366_v37 = vmul.u32 %v5364_v45, %v5362_v56  ;;  %v5369_v34 = vmul.u32 %v5365_v18, %v5363_v12  ;;  %v5388_v3 = vmul.u32 %v5386_v48, %v5362_v56 }
 0x602   :  { %v5370_v39 = vshll.u32 %v5367_v63, 16  ;;  %v5372_v57 = vshll.u32 %v5368_v26, 16  ;;  %v5392_v41 = vshll.u32 %v5389_v11, 16  ;;  %v5391_v23 = vmul.u32 %v5387_v8, %v5363_v12 }
 0x603   :  { %v10198_v10 = vadd.f32 30.0, %v4372_v60  ;;  %v5394_v6 = vshll.u32 %v5390_v54, 16  ;;  %v5371_v25 = vshrl.u32 %v5367_v63, 16  ;;  %v5393_v49 = vshrl.u32 %v5389_v11, 16 }
 0x604   :  { %vm5374_vm6 = vc.u32 %v5366_v37, %v5370_v39  ;;  %v5376_v5 = vadd.s32 %v5370_v39, %v5366_v37  ;;  %vm5396_vm10 = vc.u32 %v5388_v3, %v5392_v41  ;;  %v5373_v56 = vshrl.u32 %v5368_v26, 16 }
 0x605   :  { %v10204_v24 = vmul.f32 %v10198_v10, %v10141_v21  ;;  %v5375_v43 = vsel %vm5374_vm6, 1, %v7727_v2  ;;  %v5398_v21 = vadd.s32 %v5392_v41, %v5388_v3  ;;  %v5397_v28 = vsel %vm5396_vm10, 1, %v7727_v2 }
 0x606   :  { %v5377_v52 = vadd.s32 %v5375_v43, %v5369_v34  ;;  %vm5378_vm13 = vc.u32 %v5376_v5, %v5372_v57  ;;  %v5399_v58 = vadd.s32 %v5397_v28, %v5391_v23  ;;  %v5352_v12 = vsel %vm5346_vm4, %v5349_v50, %v5351_v35 }
 0x607   :  { %v5471_v47 = vand.u32 2139095040, %v10204_v24  ;;  %v5379_v33 = vsel %vm5378_vm13, 1, %v7727_v2  ;;  %vm5400_vm14 = vc.u32 %v5398_v21, %v5394_v6  ;;  %v5468_v40 = vand.u32 2147483647, %v10204_v24 }
 0x608   :  { %v5381_v53 = vadd.s32 %v5379_v33, %v5377_v52  ;;  %v5401_v55 = vsel %vm5400_vm14, 1, %v7727_v2  ;;  %v5395_v45 = vshrl.u32 %v5390_v54, 16  ;;  %v5402_v48 = vadd.s32 %v5398_v21, %v5394_v6 }
 0x609   :  { %v5472_v44 = vshrl.u32 %v5471_v47, 23  ;;  %v5403_v0 = vadd.s32 %v5401_v55, %v5399_v58  ;;  %v5475_v60 = vand.u32 8388607, %v5468_v40  ;;  %vm5014_vm8 = vcmp.gt.s32.totalorder %v5013_v36, 0 }
 0x60a   :  { %v5382_v27 = vadd.s32 %v5381_v53, %v5371_v25  ;;  %v5406_v26 = vmul.u32 %v10177_v30, %v5352_v12  ;;  %v5015_v39 = vsel %vm5014_vm8, %v5013_v36, 0  ;;  %vm10294_vm14 = vcmp.le.f32.partialorder %v5313_v59, 0.7853982 }
 0x60b   :  { %v7554_v31 = vadd.s32 4294967169, %v5472_v44  ;;  %v5404_v18 = vadd.s32 %v5403_v0, %v5393_v49  ;;  %v5476_v8 = vor.u32 8388608, %v5475_v60 }
 0x60c   :  { %v5383_v14 = vadd.s32 %v5382_v27, %v5373_v56  ;;  %v10255_v27 = vand.u32 31, %v5015_v39 }
 0x60d   :  { %v5478_v32 = vadd.s32 1, %v7554_v31  ;;  %v5405_v11 = vadd.s32 %v5404_v18, %v5395_v45  ;;  %v10226_v35 = vshll.u32 %v5476_v8, 8  ;;  %v5011_v45 = vor.u32 8388608, %v10222_v15 }
 0x60e   :  { %vm5408_vm11 = vc.u32 %v5383_v14, %v5402_v48  ;;  %v10262_v18 = vshrl.u32 %v5015_v39, 5 }
 0x60f   :  { %vm5479_vm7 = vcmp.gt.s32.totalorder %v5478_v32, 0  ;;  %v5409_v37 = vadd.s32 1, %v5405_v11 }
 0x610   :  { %v5480_v63 = vsel %vm5479_vm7, %v5478_v32, 0  ;;  %vm5038_vm8 = vcmp.lt.s32.totalorder %v10262_v18, 4 }
 0x611   :  { %v5482_v20 = vand.u32 31, %v5480_v63  ;;  %v10224_v50 = vshrl.u32 %v5480_v63, 5  ;;  %v5410_v3 = vsel %vm5408_vm11, %v5409_v37, %v5405_v11  ;;  %v5517_v11 = vand.u32 65535, %v10226_v35 }
 0x612   :  { %v5411_v5 = vadd.s32 %v5410_v3, %v5406_v26  ;;  %v5518_v26 = vshrl.u32 %v10226_v35, 16  ;;  %vm5035_vm11 = vcmp.lt.s32.totalorder %v10262_v18, 1 }
 0x613   :  { %v5483_v54 = vsub.s32 32, %v5482_v20  ;;  %v5494_v34 = vshll.u32 %v7731_v16, %v5482_v20  ;;  %v5497_v57 = vshll.u32 %v7732_v19, %v5482_v20  ;;  %v5485_v41 = vshll.u32 %v7728_v7, %v5482_v20 }
 0x614   :  { %v5488_v23 = vshll.u32 %v7729_v9, %v5482_v20  ;;  %v5491_v21 = vshll.u32 %v7730_v13, %v5482_v20  ;;  %vm5503_vm0 = vcmp.lt.s32.totalorder %v10224_v50, 4  ;;  %v5412_v25 = vadd.s32 536870912, %v5411_v5 }
 0x615   :  { %v5495_v30 = vshrl.u32 %v7732_v19, %v5483_v54  ;;  %v5498_v47 = vshrl.u32 %v7733_v22, %v5483_v54  ;;  %v5486_v43 = vshrl.u32 %v7729_v9, %v5483_v54  ;;  %v5489_v6 = vshrl.u32 %v7730_v13, %v5483_v54 }
 0x616   :  { %v5492_v44 = vshrl.u32 %v7731_v16, %v5483_v54  ;;  %vm5500_vm1 = vcmp.lt.s32.totalorder %v10224_v50, 1  ;;  %v10244_v49 = vshrl.u32 %v5412_v25, 30  ;;  %vm5502_vm12 = vcmp.lt.s32.totalorder %v10224_v50, 3 }
 0x617   :  { %v5496_v52 = vor.u32 %v5495_v30, %v5494_v34  ;;  %v5499_v28 = vor.u32 %v5498_v47, %v5497_v57  ;;  %v5487_v33 = vor.u32 %v5486_v43, %v5485_v41  ;;  %v5490_v58 = vor.u32 %v5489_v6, %v5488_v23 }
 0x618   :  { %v5493_v31 = vor.u32 %v5492_v44, %v5491_v21  ;;  %vm5501_vm9 = vcmp.lt.s32.totalorder %v10224_v50, 2  ;;  %v5414_v32 = vshll.u32 %v10244_v49, 30  ;;  %v5484_v39 = vshrl.u32 %v7728_v7, %v5483_v54 }
 0x619   :  { %v5509_v53 = vsel %vm5503_vm0, %v5496_v52, 920167782  ;;  %v5513_v55 = vsel %vm5503_vm0, %v5499_v28, 1326507024  ;;  %v5508_v0 = vsel %vm5500_vm1, %v5487_v33, %v5490_v58  ;;  %v10274_v41 = vsub.s32 32, %v10255_v27 }
 0x61a   :  { %v5510_v36 = vsel %vm5502_vm12, %v5493_v31, %v5509_v53  ;;  %v5512_v60 = vsel %vm5500_vm1, %v5490_v58, %v5493_v31  ;;  %v5514_v12 = vsel %vm5502_vm12, %v5496_v52, %v5513_v55  ;;  %v10264_v8 = vsub.s32 %v5411_v5, %v5414_v32 }
 0x61b   :  { %v5511_v56 = vsel %vm5501_vm9, %v5508_v0, %v5510_v36  ;;  %v5515_v63 = vsel %vm5501_vm9, %v5512_v60, %v5514_v12  ;;  %v5407_v30 = vadd.s32 %v5402_v48, %v5383_v14  ;;  %v5505_v47 = vsel %vm5503_vm0, %v5493_v31, 2102212464 }
 0x61c   :  { %v5541_v20 = vand.u32 65535, %v5511_v56  ;;  %v5519_v37 = vand.u32 65535, %v5515_v63  ;;  %v5520_v34 = vshrl.u32 %v5515_v63, 16  ;;  %v5542_v57 = vshrl.u32 %v5511_v56, 16 }
 0x61d   :  { %vm5416_vm3 = vcmp.lt.s32.totalorder %v10264_v8, 0  ;;  %v5417_v3 = vsub.s32 0, %v10264_v8  ;;  %v5504_v6 = vsel %vm5500_vm1, %v5484_v39, %v5487_v33  ;;  %v5437_v54 = vsub.s32 4, %v10244_v49 }
 0x61e   :  { %v5522_v5 = vmul.u32 %v5520_v34, %v5517_v11  ;;  %v5523_v23 = vmul.u32 %v5519_v37, %v5518_v26  ;;  %v5544_v21 = vmul.u32 %v5542_v57, %v5517_v11  ;;  %v5545_v44 = vmul.u32 %v5541_v20, %v5518_v26 }
 0x61f   :  { %v5418_v43 = vsel %vm5416_vm3, %v5417_v3, %v10264_v8  ;;  %v5521_v28 = vmul.u32 %v5519_v37, %v5517_v11  ;;  %v5506_v14 = vsel %vm5502_vm12, %v5490_v58, %v5505_v47  ;;  %v5524_v48 = vmul.u32 %v5520_v34, %v5518_v26 }
 0x620   :  { %v5419_v52 = vclz %v5418_v43  ;;  %v5525_v25 = vshll.u32 %v5522_v5, 16  ;;  %v5543_v31 = vmul.u32 %v5541_v20, %v5517_v11  ;;  %v5547_v53 = vshll.u32 %v5544_v21, 16 }
 0x621   :  { %v5527_v0 = vshll.u32 %v5523_v23, 16  ;;  %v5549_v33 = vshll.u32 %v5545_v44, 16  ;;  %v5546_v12 = vmul.u32 %v5542_v57, %v5518_v26  ;;  %v5507_v34 = vsel %vm5501_vm9, %v5504_v6, %v5506_v14 }
 0x622   :  { %v7552_v55 = vadd.s32 4294967294, %v5419_v52  ;;  %vm5529_vm15 = vc.u32 %v5521_v28, %v5525_v25  ;;  %v5531_v36 = vadd.s32 %v5525_v25, %v5521_v28  ;;  %vm5551_vm4 = vc.u32 %v5543_v31, %v5547_v53 }
 0x623   :  { %v5530_v32 = vsel %vm5529_vm15, 1, %v7727_v2  ;;  %v5553_v56 = vadd.s32 %v5547_v53, %v5543_v31  ;;  %v5552_v58 = vsel %vm5551_vm4, 1, %v7727_v2  ;;  %v5021_v3 = vshrl.u32 %v7729_v9, %v10274_v41 }
 0x624   :  { %vm7553_vm6 = vcmp.lt.s32.totalorder %v7552_v55, 0  ;;  %v5532_v60 = vadd.s32 %v5530_v32, %v5524_v48  ;;  %vm5533_vm10 = vc.u32 %v5531_v36, %v5527_v0  ;;  %v5526_v26 = vshrl.u32 %v5522_v5, 16 }
 0x625   :  { %v5422_v63 = vsel %vm7553_vm6, 0, %v7552_v55  ;;  %v5534_v37 = vsel %vm5533_vm10, 1, %v7727_v2  ;;  %vm5555_vm13 = vc.u32 %v5553_v56, %v5549_v33  ;;  %v5554_v47 = vadd.s32 %v5552_v58, %v5546_v12 }
 0x626   :  { %v5423_v11 = vsub.s32 32, %v5422_v63  ;;  %v5427_v20 = vsub.s32 4294967266, %v5422_v63  ;;  %v5536_v57 = vadd.s32 %v5534_v37, %v5532_v60  ;;  %v5556_v43 = vsel %vm5555_vm13, 1, %v7727_v2 }
 0x627   :  { %v5424_v52 = vshll.u32 %v10264_v8, %v5422_v63  ;;  %v5438_v50 = vsel %vm5315_vm2, %v5437_v54, %v10244_v49  ;;  %v5528_v6 = vshrl.u32 %v5523_v23, 16  ;;  %v5548_v48 = vshrl.u32 %v5544_v21, 16 }
 0x628   :  { %v5425_v28 = vshrl.u32 %v5407_v30, %v5423_v11  ;;  %v5428_v25 = vadd.s32 127, %v5427_v20  ;;  %v5537_v14 = vadd.s32 %v5536_v57, %v5526_v26  ;;  %v5558_v59 = vadd.s32 %v5556_v43, %v5554_v47 }
 0x629   :  { %v5550_v55 = vshrl.u32 %v5545_v44, 16  ;;  %v10303_v5 = vadd.s32 %v5553_v56, %v5549_v33  ;;  %v5024_v8 = vshrl.u32 %v7730_v13, %v10274_v41  ;;  %v5027_v30 = vshrl.u32 %v7731_v16, %v10274_v41 }
 0x62a   :  { %v5426_v31 = vor.u32 %v5425_v28, %v5424_v52  ;;  %v5429_v53 = vshll.u32 %v5428_v25, 23  ;;  %v10305_v0 = vadd.s32 %v5537_v14, %v5528_v6  ;;  %v5559_v36 = vadd.s32 %v5558_v59, %v5548_v48 }
 0x62b   :  { %v5023_v49 = vshll.u32 %v7729_v9, %v10255_v27  ;;  %v5029_v23 = vshll.u32 %v7731_v16, %v10255_v27  ;;  %v5030_v21 = vshrl.u32 %v7732_v19, %v10274_v41  ;;  %v5026_v33 = vshll.u32 %v7730_v13, %v10255_v27 }
 0x62c   :  { %v5430_v32 = vor.u32 4788187, %v5429_v53  ;;  %v5433_v44 = vcvt.s32.f32 %v5426_v31  ;;  %v5560_v54 = vadd.s32 %v5559_v36, %v5550_v55  ;;  %vm5563_vm7 = vc.u32 %v10305_v0, %v10303_v5 }
 0x62d   :  { %v5031_v60 = vor.u32 %v5030_v21, %v5029_v23  ;;  %v5032_v12 = vshll.u32 %v7732_v19, %v10255_v27  ;;  %v5033_v63 = vshrl.u32 %v7733_v22, %v10274_v41  ;;  %v5020_v58 = vshll.u32 %v7728_v7, %v10255_v27 }
 0x62e   :  { %v5431_v56 = vand.u32 2147483647, %v5430_v32  ;;  %v5564_v37 = vadd.s32 1, %v5560_v54  ;;  %v10327_v11 = vor.u32 %v5024_v8, %v5023_v49  ;;  %v10329_v20 = vor.u32 %v5027_v30, %v5026_v33 }
 0x62f   :  { %v5440_v57 = vsel %vm10294_vm14, 0, %v5438_v50  ;;  %v5561_v47 = vmul.u32 %v10226_v35, %v5507_v34  ;;  %v5034_v43 = vor.u32 %v5033_v63, %v5032_v12  ;;  %v10334_v28 = vor.u32 %v5021_v3, %v5020_v58 }
 0x630   :  { %v5434_v26 = vmul.f32 %v5433_v44, %v5431_v56  ;;  %v5565_v52 = vsel %vm5563_vm7, %v5564_v37, %v5560_v54  ;;  %v10339_v25 = vshll.u32 %v5011_v45, 8  ;;  %v5044_v14 = vsel %vm5038_vm8, %v5031_v60, 920167782 }
 0x631   :  { %v5566_v6 = vadd.s32 %v5565_v52, %v5561_v47  ;;  %v5457_v50 = vadd.s32 3, %v5440_v57  ;;  %vm5037_vm0 = vcmp.lt.s32.totalorder %v10262_v18, 3  ;;  %v5047_v35 = vsel %vm5035_vm11, %v10327_v11, %v10329_v20 }
 0x632   :  { %v5435_v27 = vxor.u32 2147483648, %v5434_v26  ;;  %v5048_v15 = vsel %vm5038_vm8, %v5034_v43, 1326507024  ;;  %vm5036_vm1 = vcmp.lt.s32.totalorder %v10262_v18, 2  ;;  %v5043_v59 = vsel %vm5035_vm11, %v10334_v28, %v10327_v11 }
 0x633   :  { %v5567_v34 = vadd.s32 536870912, %v5566_v6  ;;  %v5049_v3 = vsel %vm5037_vm0, %v5031_v60, %v5048_v15  ;;  %v5045_v31 = vsel %vm5037_vm0, %v10329_v20, %v5044_v14  ;;  %v5052_v39 = vand.u32 65535, %v10339_v25 }
 0x634   :  { %v5436_v45 = vsel %vm5315_vm2, %v5435_v27, %v5434_v26  ;;  %v5050_v53 = vsel %vm5036_vm1, %v5047_v35, %v5049_v3  ;;  %v5053_v32 = vshrl.u32 %v10339_v25, 16  ;;  %v5046_v44 = vsel %vm5036_vm1, %v5043_v59, %v5045_v31 }
 0x635   :  { %v5439_v48 = vsel %vm10294_vm14, %v10147_v42, %v5436_v45  ;;  %v10368_v36 = vshrl.u32 %v5567_v34, 30  ;;  %v5054_v8 = vand.u32 65535, %v5050_v53  ;;  %v5055_v30 = vshrl.u32 %v5050_v53, 16 }
 0x636   :  { %v5441_v55 = vmul.f32 %v5439_v48, %v5439_v48  ;;  %v10377_v54 = vshrl.u32 %v7728_v7, %v10274_v41  ;;  %v10381_v63 = vand.u32 3, %v5457_v50  ;;  %v5076_v57 = vand.u32 65535, %v5046_v44 }
 0x637   :  { %v5569_v21 = vshll.u32 %v10368_v36, 30  ;;  %v5057_v33 = vmul.u32 %v5055_v30, %v5052_v39  ;;  %v10379_v56 = vmul.u32 %v5054_v8, %v5053_v32  ;;  %v5056_v58 = vmul.u32 %v5054_v8, %v5052_v39 }
 0x638   :  { %v5442_v49 = vmul.f32 -0.001358992, %v5441_v55  ;;  %v5449_v23 = vmul.f32 -0.00019511016, %v5441_v55  ;;  %v5077_v47 = vshrl.u32 %v5046_v44, 16  ;;  %v5059_v27 = vmul.u32 %v5055_v30, %v5053_v32 }
 0x639   :  { %v10383_v37 = vsub.s32 %v5566_v6, %v5569_v21  ;;  %v5060_v26 = vshll.u32 %v5057_v33, 16  ;;  %v5062_v14 = vshll.u32 %v10379_v56, 16  ;;  %vm5460_vm3 = vcmp.eq.s32.totalorder %v10381_v63, 0 }
 0x63a   :  { %v5443_v60 = vadd.f32 0.041655596, %v5442_v49  ;;  %v5450_v12 = vadd.f32 0.008332121, %v5449_v23  ;;  %vm5463_vm2 = vcmp.eq.s32.totalorder %v10381_v63, 2  ;;  %vm5459_vm4 = vcmp.lt.s32.totalorder %v10381_v63, 2 }
 0x63b   :  { %vm5571_vm12 = vcmp.lt.s32.totalorder %v10383_v37, 0  ;;  %v5572_v41 = vsub.s32 0, %v10383_v37  ;;  %vm5064_vm9 = vc.u32 %v5056_v58, %v5060_v26  ;;  %v5066_v35 = vadd.s32 %v5060_v26, %v5056_v58 }
 0x63c   :  { %v5444_v43 = vmul.f32 %v5443_v60, %v5441_v55  ;;  %v5451_v52 = vmul.f32 %v5450_v12, %v5441_v55  ;;  %v5065_v45 = vsel %vm5064_vm9, 1, %v7727_v2  ;;  %v5079_v8 = vmul.u32 %v5077_v47, %v5052_v39 }
 0x63d   :  { %v5573_v6 = vsel %vm5571_vm12, %v5572_v41, %v10383_v37  ;;  %v5067_v3 = vadd.s32 %v5065_v45, %v5059_v27  ;;  %vm5068_vm15 = vc.u32 %v5066_v35, %v5062_v14  ;;  %vm5456_vm6 = vweird.f32 %v10147_v42 }
 0x63e   :  { %v5445_v15 = vadd.f32 -0.4999988, %v5444_v43  ;;  %v5452_v50 = vadd.f32 -0.16666654, %v5451_v52  ;;  %v5574_v34 = vclz %v5573_v6  ;;  %v5069_v53 = vsel %vm5068_vm15, 1, %v7727_v2 }
 0x63f   :  { %v5562_v30 = vadd.s32 %v10303_v5, %v10305_v0  ;;  %v5040_v23 = vsel %vm5038_vm8, %v10329_v20, 2102212464  ;;  %v5080_v21 = vmul.u32 %v5076_v57, %v5053_v32  ;;  %v5071_v12 = vadd.s32 %v5069_v53, %v5067_v3 }
 0x640   :  { %v5446_v59 = vmul.f32 %v5445_v15, %v5441_v55  ;;  %v5453_v31 = vmul.f32 %v5452_v50, %v5441_v55  ;;  %v7555_v49 = vadd.s32 4294967294, %v5574_v34  ;;  %v5078_v55 = vmul.u32 %v5076_v57, %v5052_v39 }
 0x641   :  { %vm5470_vm10 = vcmp.lt.s32.totalorder %v10204_v24, 0  ;;  %v5592_v58 = vsub.s32 4, %v10368_v36  ;;  %v5061_v26 = vshrl.u32 %v5057_v33, 16  ;;  %v5082_v43 = vshll.u32 %v5079_v8, 16 }
 0x642   :  { %v5447_v44 = vadd.f32 1.0, %v5446_v59  ;;  %v5454_v60 = vadd.f32 1.0, %v5453_v31  ;;  %vm7556_vm13 = vcmp.lt.s32.totalorder %v7555_v49, 0  ;;  %v5063_v0 = vshrl.u32 %v10379_v56, 16 }
 0x643   :  { %v5577_v5 = vsel %vm7556_vm13, 0, %v7555_v49  ;;  %v5081_v20 = vmul.u32 %v5077_v47, %v5053_v32  ;;  %v5084_v35 = vshll.u32 %v5080_v21, 16  ;;  %v5072_v39 = vadd.s32 %v5071_v12, %v5061_v26 }
 0x644   :  { %v5455_v52 = vmul.f32 %v5454_v60, %v5439_v48  ;;  %v5464_v41 = vxor.u32 2147483648, %v5447_v44  ;;  %v5578_v27 = vsub.s32 32, %v5577_v5  ;;  %v5582_v14 = vsub.s32 4294967266, %v5577_v5 }
 0x645   :  { %v5579_v50 = vshll.u32 %v10383_v37, %v5577_v5  ;;  %vm5086_vm14 = vc.u32 %v5078_v55, %v5082_v43  ;;  %v5088_v33 = vadd.s32 %v5082_v43, %v5078_v55  ;;  %v10411_v32 = vmul.f32 %v10198_v10, %v10136_v62 }
 0x646   :  { %v5461_v15 = vxor.u32 2147483648, %v5455_v52  ;;  %v5580_v57 = vshrl.u32 %v5562_v30, %v5578_v27  ;;  %v5583_v6 = vadd.s32 127, %v5582_v14  ;;  %v5087_v45 = vsel %vm5086_vm14, 1, %v7727_v2 }
 0x647   :  { %v5465_v56 = vsel %vm5463_vm2, %v5464_v41, %v5455_v52  ;;  %v5089_v34 = vadd.s32 %v5087_v45, %v5081_v20  ;;  %vm5090_vm7 = vc.u32 %v5088_v33, %v5084_v35  ;;  %v5158_v53 = vand.u32 2147483647, %v10411_v32 }
 0x648   :  { %v5462_v48 = vsel %vm5460_vm3, %v5447_v44, %v5461_v15  ;;  %v5581_v47 = vor.u32 %v5580_v57, %v5579_v50  ;;  %v5584_v3 = vshll.u32 %v5583_v6, 23  ;;  %v5091_v31 = vsel %vm5090_vm7, 1, %v7727_v2 }
 0x649   :  { %v5466_v37 = vsel %vm5459_vm4, %v5462_v48, %v5465_v56  ;;  %v10421_v30 = vmul.f32 %v10143_v4, %v10116_v51  ;;  %v5039_v63 = vsel %vm5035_vm11, %v10377_v54, %v10334_v28  ;;  %v5083_v49 = vshrl.u32 %v5079_v8, 16 }
 0x64a   :  { %v5467_v59 = vsel %vm5456_vm6, nan, %v5466_v37  ;;  %v5585_v62 = vor.u32 4788187, %v5584_v3  ;;  %v5093_v44 = vadd.s32 %v5091_v31, %v5089_v34  ;;  %v5593_v42 = vsel %vm5470_vm10, %v5592_v58, %v10368_v36 }
 0x64b   :  { %5675 = vmatpush.msra.mxu2 %v5467_v59  ;;  %v5041_v60 = vsel %vm5037_vm0, %v10327_v11, %v5040_v23  ;;  %v5073_v12 = vadd.s32 %v5072_v39, %v5063_v0  ;;  %v5161_v51 = vand.u32 2139095040, %v10411_v32  ;;  %v5588_v26 = vcvt.s32.f32 %v5581_v47 }
 0x64c   :  { %v5586_v55 = vand.u32 2147483647, %v5585_v62  ;;  %v5085_v43 = vshrl.u32 %v5080_v21, 16  ;;  %v5094_v52 = vadd.s32 %v5093_v44, %v5083_v49  ;;  %v5092_v41 = vadd.s32 %v5088_v33, %v5084_v35 }
 0x64d   :  { %v5162_v5 = vshrl.u32 %v5161_v51, 23  ;;  %v5165_v28 = vand.u32 8388607, %v5158_v53  ;;  %v4696_v54 = vand.u32 2139095040, %v10421_v30  ;;  %v5042_v36 = vsel %vm5036_vm1, %v5039_v63, %v5041_v60 }
 0x64e   :  { %v5589_v8 = vmul.f32 %v5588_v26, %v5586_v55  ;;  %v5095_v58 = vadd.s32 %v5094_v52, %v5085_v43  ;;  %vm5469_vm8 = vcmp.le.f32.partialorder %v5468_v40, 0.7853982  ;;  %vm5098_vm11 = vc.u32 %v5073_v12, %v5092_v41 }
 0x64f   :  { %v7548_v11 = vadd.s32 4294967169, %v5162_v5  ;;  %v5595_v21 = vsel %vm5469_vm8, 0, %v5593_v42  ;;  %v5096_v27 = vmul.u32 %v10339_v25, %v5042_v36  ;;  %v5166_v14 = vor.u32 8388608, %v5165_v28 }
 0x650   :  { %v5590_v23 = vxor.u32 2147483648, %v5589_v8  ;;  %v5099_v0 = vadd.s32 1, %v5095_v58  ;;  %v4697_v35 = vshrl.u32 %v4696_v54, 23  ;;  %v5612_v39 = vadd.s32 3, %v5595_v21 }
 0x651   :  { %v5168_v20 = vadd.s32 1, %v7548_v11  ;;  %v4693_v45 = vand.u32 2147483647, %v10421_v30  ;;  %v10450_v48 = vshll.u32 %v5166_v14, 8  ;;  %vm5005_vm1 = vcmp.lt.s32.totalorder %v10162_v61, 0 }
 0x652   :  { %v5591_v15 = vsel %vm5470_vm10, %v5590_v23, %v5589_v8  ;;  %v5100_v50 = vsel %vm5098_vm11, %v5099_v0, %v5095_v58  ;;  %v7539_v56 = vadd.s32 4294967169, %v4697_v35  ;;  %v10452_v47 = vand.u32 3, %v5612_v39 }
 0x653   :  { %v10445_v18 = vsel %vm5469_vm8, %v10204_v24, %v5591_v15  ;;  %v5101_v57 = vadd.s32 %v5100_v50, %v5096_v27  ;;  %vm5169_vm0 = vcmp.gt.s32.totalorder %v5168_v20, 0  ;;  %vm10457_vm12 = vcmp.le.f32.partialorder %v5003_v29, 0.7853982 }
 0x654   :  { %v5596_v40 = vmul.f32 %v10445_v18, %v10445_v18  ;;  %v5170_v6 = vsel %vm5169_vm0, %v5168_v20, 0  ;;  %v10461_v49 = vadd.s32 %v5092_v41, %v5073_v12  ;;  %v10465_v44 = vand.u32 8388607, %v4693_v45 }
 0x655   :  { %v5102_v25 = vadd.s32 536870912, %v5101_v57  ;;  %v5172_v33 = vand.u32 31, %v5170_v6  ;;  %v10467_v60 = vshrl.u32 %v5170_v6, 5  ;;  %v10470_v51 = vand.u32 65535, %v10450_v48 }
 0x656   :  { %v5597_v34 = vmul.f32 -0.001358992, %v5596_v40  ;;  %v5604_v37 = vmul.f32 -0.00019511016, %v5596_v40  ;;  %v10472_v55 = vadd.s32 1, %v7539_v56  ;;  %vm5618_vm9 = vcmp.eq.s32.totalorder %v10452_v47, 2 }
 0x657   :  { %v5103_v3 = vshrl.u32 %v5102_v25, 30  ;;  %v5173_v59 = vsub.s32 32, %v5172_v33  ;;  %v5175_v12 = vshll.u32 %v7728_v7, %v5172_v33  ;;  %v5178_v41 = vshll.u32 %v7729_v9, %v5172_v33 }
 0x658   :  { %v5598_v31 = vadd.f32 0.041655596, %v5597_v34  ;;  %v5605_v62 = vadd.f32 0.008332121, %v5604_v37  ;;  %v5181_v36 = vshll.u32 %v7730_v13, %v5172_v33  ;;  %vm5615_vm3 = vcmp.eq.s32.totalorder %v10452_v47, 0 }
 0x659   :  { %v5104_v42 = vshll.u32 %v5103_v3, 30  ;;  %v5127_v29 = vsub.s32 4, %v5103_v3  ;;  %v5176_v52 = vshrl.u32 %v7729_v9, %v5173_v59  ;;  %v5179_v28 = vshrl.u32 %v7730_v13, %v5173_v59 }
 0x65a   :  { %v5599_v26 = vmul.f32 %v5598_v31, %v5596_v40  ;;  %v5606_v43 = vmul.f32 %v5605_v62, %v5596_v40  ;;  %v5182_v58 = vshrl.u32 %v7731_v16, %v5173_v59  ;;  %v5184_v23 = vshll.u32 %v7731_v16, %v5172_v33 }
 0x65b   :  { %v10475_v5 = vsub.s32 %v5101_v57, %v5104_v42  ;;  %v5185_v21 = vshrl.u32 %v7732_v19, %v5173_v59  ;;  %vm5614_vm15 = vcmp.lt.s32.totalorder %v10452_v47, 2  ;;  %v5128_v14 = vsel %vm5005_vm1, %v5127_v29, %v5103_v3 }
 0x65c   :  { %v5600_v54 = vadd.f32 -0.4999988, %v5599_v26  ;;  %v5607_v8 = vadd.f32 -0.16666654, %v5606_v43  ;;  %v5177_v20 = vor.u32 %v5176_v52, %v5175_v12  ;;  %vm5611_vm4 = vweird.f32 %v10204_v24 }
 0x65d   :  { %vm5106_vm2 = vcmp.lt.s32.totalorder %v10475_v5, 0  ;;  %v5107_v11 = vsub.s32 0, %v10475_v5  ;;  %v5180_v15 = vor.u32 %v5179_v28, %v5178_v41  ;;  %v5187_v50 = vshll.u32 %v7732_v19, %v5172_v33 }
 0x65e   :  { %v5601_v0 = vmul.f32 %v5600_v54, %v5596_v40  ;;  %v5608_v27 = vmul.f32 %v5607_v8, %v5596_v40  ;;  %v5188_v39 = vshrl.u32 %v7733_v22, %v5173_v59  ;;  %v5183_v56 = vor.u32 %v5182_v58, %v5181_v36 }
 0x65f   :  { %v5108_v35 = vsel %vm5106_vm2, %v5107_v11, %v10475_v5  ;;  %vm4704_vm6 = vcmp.gt.s32.totalorder %v10472_v55, 0  ;;  %v5130_v40 = vsel %vm10457_vm12, 0, %v5128_v14  ;;  %v5174_v34 = vshrl.u32 %v7728_v7, %v5173_v59 }
 0x660   :  { %v5602_v57 = vadd.f32 1.0, %v5601_v0  ;;  %v5609_v6 = vadd.f32 1.0, %v5608_v27  ;;  %v5109_v25 = vclz %v5108_v35  ;;  %v5186_v37 = vor.u32 %v5185_v21, %v5184_v23 }
 0x661   :  { %v5189_v3 = vor.u32 %v5188_v39, %v5187_v50  ;;  %vm5190_vm10 = vcmp.lt.s32.totalorder %v10467_v60, 1  ;;  %vm5191_vm13 = vcmp.lt.s32.totalorder %v10467_v60, 2  ;;  %vm5192_vm14 = vcmp.lt.s32.totalorder %v10467_v60, 3 }
 0x662   :  { %v5610_v31 = vmul.f32 %v5609_v6, %v10445_v18  ;;  %v5619_v62 = vxor.u32 2147483648, %v5602_v57  ;;  %v7546_v42 = vadd.s32 4294967294, %v5109_v25  ;;  %vm5193_vm7 = vcmp.lt.s32.totalorder %v10467_v60, 4 }
 0x663   :  { %v5194_v33 = vsel %vm5190_vm10, %v5174_v34, %v5177_v20  ;;  %v5198_v43 = vsel %vm5190_vm10, %v5177_v20, %v5180_v15  ;;  %v5202_v29 = vsel %vm5190_vm10, %v5180_v15, %v5183_v56  ;;  %v5199_v18 = vsel %vm5193_vm7, %v5186_v37, 920167782 }
 0x664   :  { %v5616_v26 = vxor.u32 2147483648, %v5610_v31  ;;  %vm7547_vm8 = vcmp.lt.s32.totalorder %v7546_v42, 0  ;;  %v5620_v59 = vsel %vm5618_vm9, %v5619_v62, %v5610_v31  ;;  %v5203_v12 = vsel %vm5193_vm7, %v5189_v3, 1326507024 }
 0x665   :  { %v5112_v52 = vsel %vm7547_vm8, 0, %v7546_v42  ;;  %v5195_v8 = vsel %vm5193_vm7, %v5183_v56, 2102212464  ;;  %v5200_v11 = vsel %vm5192_vm14, %v5183_v56, %v5199_v18  ;;  %v5204_v23 = vsel %vm5192_vm14, %v5186_v37, %v5203_v12 }
 0x666   :  { %v5617_v41 = vsel %vm5615_vm3, %v5602_v57, %v5616_v26  ;;  %v5113_v28 = vsub.s32 32, %v5112_v52  ;;  %v5117_v54 = vsub.s32 4294967266, %v5112_v52  ;;  %v5114_v58 = vshll.u32 %v10475_v5, %v5112_v52 }
 0x667   :  { %v5621_v36 = vsel %vm5614_vm15, %v5617_v41, %v5620_v59  ;;  %v5201_v14 = vsel %vm5191_vm13, %v5198_v43, %v5200_v11  ;;  %v5196_v47 = vsel %vm5192_vm14, %v5180_v15, %v5195_v8  ;;  %v5205_v5 = vsel %vm5191_vm13, %v5202_v29, %v5204_v23 }
 0x668   :  { %v5622_v21 = vsel %vm5611_vm4, nan, %v5621_v36  ;;  %v5115_v0 = vshrl.u32 %v10461_v49, %v5113_v28  ;;  %v5118_v27 = vadd.s32 127, %v5117_v54  ;;  %v5231_v20 = vand.u32 65535, %v5201_v14 }
 0x669   :  { %5704 = vmatpush.msra.mxu3 %v5622_v21  ;;  %v5232_v35 = vshrl.u32 %v5201_v14, 16  ;;  %v5209_v57 = vand.u32 65535, %v5205_v5  ;;  %v5210_v24 = vshrl.u32 %v5205_v5, 16  ;;  %v5208_v6 = vshrl.u32 %v10450_v48, 16 }
 0x66a   :  { %v5116_v50 = vor.u32 %v5115_v0, %v5114_v58  ;;  %v5119_v39 = vshll.u32 %v5118_v27, 23  ;;  %v4701_v25 = vor.u32 8388608, %v10465_v44  ;;  %v4705_v56 = vsel %vm4704_vm6, %v10472_v55, 0 }
 0x66b   :  { %v5234_v49 = vmul.u32 %v5232_v35, %v10470_v51  ;;  %v10530_v34 = vadd.s32 3, %v5130_v40  ;;  %v10534_v37 = vsel %vm5191_vm13, %v5194_v33, %v5196_v47  ;;  %v5212_v3 = vmul.u32 %v5210_v24, %v10470_v51 }
 0x66c   :  { %v5120_v15 = vor.u32 4788187, %v5119_v39  ;;  %v5213_v31 = vmul.u32 %v5209_v57, %v5208_v6  ;;  %v5233_v62 = vmul.u32 %v5231_v20, %v10470_v51  ;;  %v5235_v42 = vmul.u32 %v5231_v20, %v5208_v6 }
 0x66d   :  { %v5237_v26 = vshll.u32 %v5234_v49, 16  ;;  %v5123_v29 = vcvt.s32.f32 %v5116_v50  ;;  %v5211_v59 = vmul.u32 %v5209_v57, %v10470_v51  ;;  %v5215_v52 = vshll.u32 %v5212_v3, 16 }
 0x66e   :  { %v5121_v43 = vand.u32 2147483647, %v5120_v15  ;;  %v5214_v55 = vmul.u32 %v5210_v24, %v5208_v6  ;;  %v5217_v18 = vshll.u32 %v5213_v31, 16  ;;  %v5236_v40 = vmul.u32 %v5232_v35, %v5208_v6 }
 0x66f   :  { %vm5241_vm11 = vc.u32 %v5233_v62, %v5237_v26  ;;  %vm5219_vm0 = vc.u32 %v5211_v59, %v5215_v52  ;;  %v5221_v60 = vadd.s32 %v5215_v52, %v5211_v59  ;;  %v5239_v28 = vshll.u32 %v5235_v42, 16 }
 0x670   :  { %v5124_v12 = vmul.f32 %v5123_v29, %v5121_v43  ;;  %v5242_v33 = vsel %vm5241_vm11, 1, %v7727_v2  ;;  %v5220_v41 = vsel %vm5219_vm0, 1, %v7727_v2  ;;  %v5243_v54 = vadd.s32 %v5237_v26, %v5233_v62 }
 0x671   :  { %v5244_v8 = vadd.s32 %v5242_v33, %v5236_v40  ;;  %v5222_v58 = vadd.s32 %v5220_v41, %v5214_v55  ;;  %vm5223_vm9 = vc.u32 %v5221_v60, %v5217_v18  ;;  %v4707_v11 = vand.u32 31, %v4705_v56 }
 0x672   :  { %v5125_v36 = vxor.u32 2147483648, %v5124_v12  ;;  %v5216_v51 = vshrl.u32 %v5212_v3, 16  ;;  %v5224_v23 = vsel %vm5223_vm9, 1, %v7727_v2  ;;  %vm5245_vm3 = vc.u32 %v5243_v54, %v5239_v28 }
 0x673   :  { %v5251_v21 = vmul.u32 %v10450_v48, %v10534_v37  ;;  %v5226_v27 = vadd.s32 %v5224_v23, %v5222_v58  ;;  %v5246_v14 = vsel %vm5245_vm3, 1, %v7727_v2  ;;  %v10547_v47 = vsub.s32 32, %v4707_v11 }
 0x674   :  { %v5126_v0 = vsel %vm5005_vm1, %v5125_v36, %v5124_v12  ;;  %v5218_v20 = vshrl.u32 %v5213_v31, 16  ;;  %v5238_v35 = vshrl.u32 %v5234_v49, 16  ;;  %v5248_v50 = vadd.s32 %v5246_v14, %v5244_v8 }
 0x675   :  { %v5129_v5 = vsel %vm10457_vm12, %v10162_v61, %v5126_v0  ;;  %v5227_v57 = vadd.s32 %v5226_v27, %v5216_v51  ;;  %v5240_v24 = vshrl.u32 %v5235_v42, 16  ;;  %v10552_v6 = vshrl.u32 %v4705_v56, 5 }
 0x676   :  { %v5131_v39 = vmul.f32 %v5129_v5, %v5129_v5  ;;  %v10554_v48 = vadd.s32 %v5243_v54, %v5239_v28  ;;  %v5249_v15 = vadd.s32 %v5248_v50, %v5238_v35  ;;  %v4710_v37 = vshll.u32 %v7728_v7, %v4707_v11 }
 0x677   :  { %v4711_v3 = vshrl.u32 %v7729_v9, %v10547_v47  ;;  %v10559_v63 = vadd.s32 %v5227_v57, %v5218_v20  ;;  %v4714_v49 = vshrl.u32 %v7730_v13, %v10547_v47  ;;  %v4713_v42 = vshll.u32 %v7729_v9, %v4707_v11 }
 0x678   :  { %v5132_v62 = vmul.f32 -0.001358992, %v5131_v39  ;;  %v5139_v26 = vmul.f32 -0.00019511016, %v5131_v39  ;;  %v5250_v31 = vadd.s32 %v5249_v15, %v5240_v24  ;;  %v4716_v56 = vshll.u32 %v7730_v13, %v4707_v11 }
 0x679   :  { %v4717_v43 = vshrl.u32 %v7731_v16, %v10547_v47  ;;  %vm5253_vm1 = vc.u32 %v10559_v63, %v10554_v48  ;;  %v4719_v52 = vshll.u32 %v7731_v16, %v4707_v11  ;;  %v4720_v18 = vshrl.u32 %v7732_v19, %v10547_v47 }
 0x67a   :  { %v5133_v29 = vadd.f32 0.041655596, %v5132_v62  ;;  %v5140_v59 = vadd.f32 0.008332121, %v5139_v26  ;;  %v5254_v55 = vadd.s32 1, %v5250_v31  ;;  %v4722_v40 = vshll.u32 %v7732_v19, %v4707_v11 }
 0x67b   :  { %v4723_v12 = vshrl.u32 %v7733_v22, %v10547_v47  ;;  %v4712_v41 = vor.u32 %v4711_v3, %v4710_v37  ;;  %v10575_v28 = vor.u32 %v4714_v49, %v4713_v42  ;;  %v4718_v8 = vor.u32 %v4717_v43, %v4716_v56 }
 0x67c   :  { %v5134_v60 = vmul.f32 %v5133_v29, %v5131_v39  ;;  %v5141_v33 = vmul.f32 %v5140_v59, %v5131_v39  ;;  %v5255_v54 = vsel %vm5253_vm1, %v5254_v55, %v5250_v31  ;;  %v4721_v36 = vor.u32 %v4720_v18, %v4719_v52 }
 0x67d   :  { %v4724_v58 = vor.u32 %v4723_v12, %v4722_v40  ;;  %v5256_v0 = vadd.s32 %v5255_v54, %v5251_v21  ;;  %vm4728_vm12 = vcmp.lt.s32.totalorder %v10552_v6, 4  ;;  %v5148_v27 = vand.u32 3, %v10530_v34 }
 0x67e   :  { %v5135_v51 = vadd.f32 -0.4999988, %v5134_v60  ;;  %v5142_v23 = vadd.f32 -0.16666654, %v5141_v33  ;;  %vm4725_vm2 = vcmp.lt.s32.totalorder %v10552_v6, 1  ;;  %vm4727_vm15 = vcmp.lt.s32.totalorder %v10552_v6, 3 }
 0x67f   :  { %v4734_v11 = vsel %vm4728_vm12, %v4721_v36, 920167782  ;;  %v5257_v35 = vadd.s32 536870912, %v5256_v0  ;;  %v4733_v50 = vsel %vm4725_vm2, %v4712_v41, %v10575_v28  ;;  %vm4726_vm4 = vcmp.lt.s32.totalorder %v10552_v6, 2 }
 0x680   :  { %v5136_v14 = vmul.f32 %v5135_v51, %v5131_v39  ;;  %v5143_v20 = vmul.f32 %v5142_v23, %v5131_v39  ;;  %v4735_v21 = vsel %vm4727_vm15, %v4718_v8, %v4734_v11  ;;  %v4737_v34 = vsel %vm4725_vm2, %v10575_v28, %v4718_v8 }
 0x681   :  { %v4738_v57 = vsel %vm4728_vm12, %v4724_v58, 1326507024  ;;  %v10594_v39 = vshrl.u32 %v5257_v35, 30  ;;  %v10598_v37 = vshll.u32 %v4701_v25, 8  ;;  %v4736_v3 = vsel %vm4726_vm4, %v4733_v50, %v4735_v21 }
 0x682   :  { %v5137_v24 = vadd.f32 1.0, %v5136_v14  ;;  %v5144_v15 = vadd.f32 1.0, %v5143_v20  ;;  %v4739_v62 = vsel %vm4727_vm15, %v4721_v36, %v4738_v57  ;;  %vm5149_vm6 = vcmp.lt.s32.totalorder %v5148_v27, 2 }
 0x683   :  { %v5259_v31 = vshll.u32 %v10594_v39, 30  ;;  %vm5150_vm10 = vcmp.eq.s32.totalorder %v5148_v27, 0  ;;  %vm5153_vm13 = vcmp.eq.s32.totalorder %v5148_v27, 2  ;;  %v4740_v42 = vsel %vm4726_vm4, %v4737_v34, %v4739_v62 }
 0x684   :  { %v5145_v26 = vmul.f32 %v5144_v15, %v5129_v5  ;;  %v5154_v49 = vxor.u32 2147483648, %v5137_v24  ;;  %v4742_v25 = vand.u32 65535, %v10598_v37  ;;  %v4767_v43 = vshrl.u32 %v4736_v3, 16 }
 0x685   :  { %v5260_v44 = vsub.s32 %v5256_v0, %v5259_v31  ;;  %v4743_v29 = vshrl.u32 %v10598_v37, 16  ;;  %v4744_v59 = vand.u32 65535, %v4740_v42  ;;  %v4745_v52 = vshrl.u32 %v4740_v42, 16 }
 0x686   :  { %v5151_v56 = vxor.u32 2147483648, %v5145_v26  ;;  %v4766_v55 = vand.u32 65535, %v4736_v3  ;;  %v5155_v18 = vsel %vm5153_vm13, %v5154_v49, %v5145_v26  ;;  %vm5146_vm7 = vweird.f32 %v10162_v61 }
 0x687   :  { %vm5261_vm14 = vcmp.lt.s32.totalorder %v5260_v44, 0  ;;  %v5262_v40 = vsub.s32 0, %v5260_v44  ;;  %v4747_v60 = vmul.u32 %v4745_v52, %v4742_v25  ;;  %v4748_v33 = vmul.u32 %v4744_v59, %v4743_v29 }
 0x688   :  { %v5152_v5 = vsel %vm5150_vm10, %v5137_v24, %v5151_v56  ;;  %v4709_v58 = vshrl.u32 %v7728_v7, %v10547_v47  ;;  %v4769_v51 = vmul.u32 %v4767_v43, %v4742_v25  ;;  %v4746_v0 = vmul.u32 %v4744_v59, %v4742_v25 }
 0x689   :  { %v5156_v12 = vsel %vm5149_vm6, %v5152_v5, %v5155_v18  ;;  %v5263_v36 = vsel %vm5261_vm14, %v5262_v40, %v5260_v44  ;;  %v4750_v11 = vshll.u32 %v4747_v60, 16  ;;  %v4770_v14 = vmul.u32 %v4766_v55, %v4743_v29 }
 0x68a   :  { %v5157_v54 = vsel %vm5146_vm7, nan, %v5156_v12  ;;  %v5264_v23 = vclz %v5263_v36  ;;  %v5252_v20 = vadd.s32 %v10554_v48, %v10559_v63  ;;  %v4729_v61 = vsel %vm4725_vm2, %v4709_v58, %v4712_v41 }
 0x68b   :  { %5676 = vmatpush.msra.mxu2 %v5157_v54  ;;  %v4730_v27 = vsel %vm4728_vm12, %v4718_v8, 2102212464  ;;  %v4749_v35 = vmul.u32 %v4745_v52, %v4743_v29  ;;  %v4752_v21 = vshll.u32 %v4748_v33, 16  ;;  %vm4754_vm8 = vc.u32 %v4746_v0, %v4750_v11 }
 0x68c   :  { %v7549_v50 = vadd.s32 4294967294, %v5264_v23  ;;  %v4756_v47 = vadd.s32 %v4750_v11, %v4746_v0  ;;  %v4751_v34 = vshrl.u32 %v4747_v60, 16  ;;  %v4755_v57 = vsel %vm4754_vm8, 1, %v7727_v2 }
 0x68d   :  { %v4768_v24 = vmul.u32 %v4766_v55, %v4742_v25  ;;  %v4772_v15 = vshll.u32 %v4769_v51, 16  ;;  %v4757_v3 = vadd.s32 %v4755_v57, %v4749_v35  ;;  %v4774_v48 = vshll.u32 %v4770_v14, 16 }
 0x68e   :  { %vm7550_vm11 = vcmp.lt.s32.totalorder %v7549_v50, 0  ;;  %vm4758_vm0 = vc.u32 %v4756_v47, %v4752_v21  ;;  %v4771_v31 = vmul.u32 %v4767_v43, %v4743_v29  ;;  %v4731_v56 = vsel %vm4727_vm15, %v10575_v28, %v4730_v27 }
 0x68f   :  { %v5267_v63 = vsel %vm7550_vm11, 0, %v7549_v50  ;;  %v4759_v41 = vsel %vm4758_vm0, 1, %v7727_v2  ;;  %vm4776_vm9 = vc.u32 %v4768_v24, %v4772_v15  ;;  %v4778_v62 = vadd.s32 %v4772_v15, %v4768_v24 }
 0x690   :  { %v5268_v8 = vsub.s32 32, %v5267_v63  ;;  %v5272_v26 = vsub.s32 4294967266, %v5267_v63  ;;  %v4761_v49 = vadd.s32 %v4759_v41, %v4757_v3  ;;  %v5269_v42 = vshll.u32 %v5260_v44, %v5267_v63 }
 0x691   :  { %v4777_v25 = vsel %vm4776_vm9, 1, %v7727_v2  ;;  %vm4780_vm3 = vc.u32 %v4778_v62, %v4774_v48  ;;  %v5282_v18 = vsub.s32 4, %v10594_v39  ;;  %v4753_v40 = vshrl.u32 %v4748_v33, 16 }
 0x692   :  { %v5270_v59 = vshrl.u32 %v5252_v20, %v5268_v8  ;;  %v5273_v52 = vadd.s32 127, %v5272_v26  ;;  %v4762_v55 = vadd.s32 %v4761_v49, %v4751_v34  ;;  %v4779_v5 = vadd.s32 %v4777_v25, %v4771_v31 }
 0x693   :  { %v4781_v12 = vsel %vm4780_vm3, 1, %v7727_v2  ;;  %v10629_v43 = vmul.f32 %v10198_v10, %v10132_v17  ;;  %v4773_v60 = vshrl.u32 %v4769_v51, 16  ;;  %vm5160_vm1 = vcmp.lt.s32.totalorder %v10411_v32, 0 }
 0x694   :  { %v5271_v44 = vor.u32 %v5270_v59, %v5269_v42  ;;  %v5274_v29 = vshll.u32 %v5273_v52, 23  ;;  %v4783_v28 = vadd.s32 %v4781_v12, %v4779_v5  ;;  %v4763_v54 = vadd.s32 %v4762_v55, %v4753_v40 }
 0x695   :  { %v4848_v36 = vand.u32 2147483647, %v10629_v43  ;;  %v4851_v58 = vand.u32 2139095040, %v10629_v43  ;;  %v4775_v0 = vshrl.u32 %v4770_v14, 16  ;;  %v5283_v11 = vsel %vm5160_vm1, %v5282_v18, %v10594_v39 }
 0x696   :  { %v5275_v23 = vor.u32 4788187, %v5274_v29  ;;  %v4784_v33 = vadd.s32 %v4783_v28, %v4773_v60  ;;  %v4732_v17 = vsel %vm4726_vm4, %v4729_v61, %v4731_v56  ;;  %v4782_v20 = vadd.s32 %v4778_v62, %v4774_v48 }
 0x697   :  { %v4852_v51 = vshrl.u32 %v4851_v58, 23  ;;  %v5278_v35 = vcvt.s32.f32 %v5271_v44  ;;  %v4855_v21 = vand.u32 8388607, %v4848_v36  ;;  %vm5159_vm2 = vcmp.le.f32.partialorder %v5158_v53, 0.7853982 }
 0x698   :  { %v5276_v27 = vand.u32 2147483647, %v5275_v23  ;;  %v4785_v50 = vadd.s32 %v4784_v33, %v4775_v0  ;;  %vm4788_vm12 = vc.u32 %v4763_v54, %v4782_v20  ;;  %v5285_v57 = vsel %vm5159_vm2, 0, %v5283_v11 }
 0x699   :  { %v7542_v47 = vadd.s32 4294967169, %v4852_v51  ;;  %v4786_v39 = vmul.u32 %v10598_v37, %v4732_v17  ;;  %v10646_v61 = vmul.f32 %v10143_v4, %v10118_v1  ;;  %v4856_v3 = vor.u32 8388608, %v4855_v21 }
 0x69a   :  { %v5279_v14 = vmul.f32 %v5278_v35, %v5276_v27  ;;  %v4789_v34 = vadd.s32 1, %v4785_v50  ;;  %v5302_v41 = vadd.s32 3, %v5285_v57  ;;  %v10658_v59 = vadd.s32 %v4782_v20, %v4763_v54 }
 0x69b   :  { %v4858_v6 = vadd.s32 1, %v7542_v47  ;;  %v4386_v37 = vand.u32 2139095040, %v10646_v61  ;;  %v10652_v31 = vshll.u32 %v4856_v3, 8  ;;  %v4383_v55 = vand.u32 2147483647, %v10646_v61 }
 0x69c   :  { %v5280_v24 = vxor.u32 2147483648, %v5279_v14  ;;  %v4790_v15 = vsel %vm4788_vm12, %v4789_v34, %v4785_v50  ;;  %v10656_v25 = vand.u32 3, %v5302_v41  ;;  %vm4695_vm4 = vcmp.lt.s32.totalorder %v10421_v30, 0 }
 0x69d   :  { %v4791_v48 = vadd.s32 %v4790_v15, %v4786_v39  ;;  %vm4859_vm15 = vcmp.gt.s32.totalorder %v4858_v6, 0  ;;  %v4387_v5 = vshrl.u32 %v4386_v37, 23  ;;  %v10665_v44 = vand.u32 65535, %v10652_v31 }
 0x69e   :  { %v5281_v63 = vsel %vm5160_vm1, %v5280_v24, %v5279_v14  ;;  %v4860_v53 = vsel %vm4859_vm15, %v4858_v6, 0  ;;  %vm5308_vm6 = vcmp.eq.s32.totalorder %v10656_v25, 2  ;;  %vm5305_vm13 = vcmp.eq.s32.totalorder %v10656_v25, 0 }
 0x69f   :  { %v5284_v62 = vsel %vm5159_vm2, %v10411_v32, %v5281_v63  ;;  %v4792_v8 = vadd.s32 536870912, %v4791_v48  ;;  %v4862_v26 = vand.u32 31, %v4860_v53  ;;  %v10662_v12 = vshrl.u32 %v4860_v53, 5 }
 0x6a0   :  { %v5286_v49 = vmul.f32 %v5284_v62, %v5284_v62  ;;  %vm5304_vm14 = vcmp.lt.s32.totalorder %v10656_v25, 2  ;;  %vm5301_vm7 = vweird.f32 %v10411_v32  ;;  %v4898_v63 = vshrl.u32 %v10652_v31, 16 }
 0x6a1   :  { %v4793_v1 = vshrl.u32 %v4792_v8, 30  ;;  %v10654_v4 = vsub.s32 32, %v4862_v26  ;;  %v4865_v60 = vshll.u32 %v7728_v7, %v4862_v26  ;;  %v4868_v54 = vshll.u32 %v7729_v9, %v4862_v26 }
 0x6a2   :  { %v5287_v42 = vmul.f32 -0.001358992, %v5286_v49  ;;  %v5294_v56 = vmul.f32 -0.00019511016, %v5286_v49  ;;  %v4871_v33 = vshll.u32 %v7730_v13, %v4862_v26  ;;  %v4874_v50 = vshll.u32 %v7731_v16, %v4862_v26 }
 0x6a3   :  { %v4794_v52 = vshll.u32 %v4793_v1, 30  ;;  %v4866_v28 = vshrl.u32 %v7729_v9, %v10654_v4  ;;  %v4869_v0 = vshrl.u32 %v7730_v13, %v10654_v4  ;;  %v4872_v17 = vshrl.u32 %v7731_v16, %v10654_v4 }
 0x6a4   :  { %v5288_v18 = vadd.f32 0.041655596, %v5287_v42  ;;  %v5295_v40 = vadd.f32 0.008332121, %v5294_v56  ;;  %v4875_v20 = vshrl.u32 %v7732_v19, %v10654_v4  ;;  %v4817_v35 = vsub.s32 4, %v4793_v1 }
 0x6a5   :  { %v10667_v29 = vsub.s32 %v4791_v48, %v4794_v52  ;;  %v10686_v47 = vor.u32 %v4866_v28, %v4865_v60  ;;  %v4877_v14 = vshll.u32 %v7732_v19, %v4862_v26  ;;  %v4878_v34 = vshrl.u32 %v7733_v22, %v10654_v4 }
 0x6a6   :  { %v5289_v58 = vmul.f32 %v5288_v18, %v5286_v49  ;;  %v5296_v23 = vmul.f32 %v5295_v40, %v5286_v49  ;;  %v10692_v24 = vor.u32 %v4869_v0, %v4868_v54  ;;  %v4873_v15 = vor.u32 %v4872_v17, %v4871_v33 }
 0x6a7   :  { %vm4796_vm10 = vcmp.lt.s32.totalorder %v10667_v29, 0  ;;  %v4797_v11 = vsub.s32 0, %v10667_v29  ;;  %v4876_v3 = vor.u32 %v4875_v20, %v4874_v50  ;;  %v4879_v48 = vor.u32 %v4878_v34, %v4877_v14 }
 0x6a8   :  { %v5290_v51 = vadd.f32 -0.4999988, %v5289_v58  ;;  %v5297_v27 = vadd.f32 -0.16666654, %v5296_v23  ;;  %v7533_v26 = vadd.s32 4294967169, %v4387_v5  ;;  %vm4880_vm11 = vcmp.lt.s32.totalorder %v10662_v12, 1 }
 0x6a9   :  { %v4798_v21 = vsel %vm4796_vm10, %v4797_v11, %v10667_v29  ;;  %vm10698_vm8 = vcmp.le.f32.partialorder %v4693_v45, 0.7853982  ;;  %vm4881_vm0 = vcmp.lt.s32.totalorder %v10662_v12, 2  ;;  %vm4883_vm9 = vcmp.lt.s32.totalorder %v10662_v12, 4 }
 0x6aa   :  { %v5291_v57 = vmul.f32 %v5290_v51, %v5286_v49  ;;  %v5298_v39 = vmul.f32 %v5297_v27, %v5286_v49  ;;  %v4799_v6 = vclz %v4798_v21  ;;  %v10704_v49 = vsel %vm4695_vm4, %v4817_v35, %v4793_v1 }
 0x6ab   :  { %v4888_v45 = vsel %vm4880_vm11, %v10686_v47, %v10692_v24  ;;  %v4889_v5 = vsel %vm4883_vm9, %v4876_v3, 920167782  ;;  %v4892_v1 = vsel %vm4880_vm11, %v10692_v24, %v4873_v15  ;;  %v4893_v18 = vsel %vm4883_vm9, %v4879_v48, 1326507024 }
 0x6ac   :  { %v5292_v41 = vadd.f32 1.0, %v5291_v57  ;;  %v5299_v53 = vadd.f32 1.0, %v5298_v39  ;;  %v7540_v8 = vadd.s32 4294967294, %v4799_v6  ;;  %vm4882_vm1 = vcmp.lt.s32.totalorder %v10662_v12, 3 }
 0x6ad   :  { %v4890_v58 = vsel %vm4882_vm1, %v4873_v15, %v4889_v5  ;;  %v4894_v23 = vsel %vm4882_vm1, %v4876_v3, %v4893_v18  ;;  %v10742_v39 = vand.u32 8388607, %v4383_v55  ;;  %v4820_v25 = vsel %vm10698_vm8, 0, %v10704_v49 }
 0x6ae   :  { %v5300_v42 = vmul.f32 %v5299_v53, %v5284_v62  ;;  %v5309_v56 = vxor.u32 2147483648, %v5292_v41  ;;  %vm7541_vm3 = vcmp.lt.s32.totalorder %v7540_v8, 0  ;;  %v4891_v11 = vsel %vm4881_vm0, %v4888_v45, %v4890_v58 }
 0x6af   :  { %v4802_v52 = vsel %vm7541_vm3, 0, %v7540_v8  ;;  %v4895_v17 = vsel %vm4881_vm0, %v4892_v1, %v4894_v23  ;;  %v4921_v21 = vand.u32 65535, %v4891_v11  ;;  %v4922_v14 = vshrl.u32 %v4891_v11, 16 }
 0x6b0   :  { %v5306_v40 = vxor.u32 2147483648, %v5300_v42  ;;  %v5310_v62 = vsel %vm5308_vm6, %v5309_v56, %v5300_v42  ;;  %v4803_v60 = vsub.s32 32, %v4802_v52  ;;  %v4804_v28 = vshll.u32 %v10667_v29, %v4802_v52 }
 0x6b1   :  { %v4807_v54 = vsub.s32 4294967266, %v4802_v52  ;;  %v4899_v51 = vand.u32 65535, %v4895_v17  ;;  %v4900_v27 = vshrl.u32 %v4895_v17, 16  ;;  %v4864_v32 = vshrl.u32 %v7728_v7, %v10654_v4 }
 0x6b2   :  { %v5307_v0 = vsel %vm5305_vm13, %v5292_v41, %v5306_v40  ;;  %v4805_v33 = vshrl.u32 %v10658_v59, %v4803_v60  ;;  %v4924_v6 = vmul.u32 %v4922_v14, %v10665_v44  ;;  %v4393_v3 = vadd.s32 1, %v7533_v26 }
 0x6b3   :  { %v5311_v29 = vsel %vm5304_vm14, %v5307_v0, %v5310_v62  ;;  %v4808_v20 = vadd.s32 127, %v4807_v54  ;;  %v4902_v34 = vmul.u32 %v4900_v27, %v10665_v44  ;;  %v4903_v57 = vmul.u32 %v4899_v51, %v4898_v63 }
 0x6b4   :  { %v5312_v35 = vsel %vm5301_vm7, nan, %v5311_v29  ;;  %v4806_v50 = vor.u32 %v4805_v33, %v4804_v28  ;;  %v4901_v53 = vmul.u32 %v4899_v51, %v10665_v44  ;;  %v4904_v42 = vmul.u32 %v4900_v27, %v4898_v63 }
 0x6b5   :  { %5705 = vmatpush.msra.mxu3 %v5312_v35  ;;  %v4809_v59 = vshll.u32 %v4808_v20, 23  ;;  %v4905_v8 = vshll.u32 %v4902_v34, 16  ;;  %v4923_v56 = vmul.u32 %v4921_v21, %v10665_v44  ;;  %v4925_v45 = vmul.u32 %v4921_v21, %v4898_v63 }
 0x6b6   :  { %v4813_v41 = vcvt.s32.f32 %v4806_v50  ;;  %v4927_v52 = vshll.u32 %v4924_v6, 16  ;;  %v4907_v1 = vshll.u32 %v4903_v57, 16  ;;  %v4885_v4 = vsel %vm4883_vm9, %v4873_v15, 2102212464 }
 0x6b7   :  { %v4810_v48 = vor.u32 4788187, %v4809_v59  ;;  %vm4909_vm12 = vc.u32 %v4901_v53, %v4905_v8  ;;  %v4911_v49 = vadd.s32 %v4905_v8, %v4901_v53  ;;  %v4926_v26 = vmul.u32 %v4922_v14, %v4898_v63 }
 0x6b8   :  { %v4910_v18 = vsel %vm4909_vm12, 1, %v7727_v2  ;;  %vm4931_vm2 = vc.u32 %v4923_v56, %v4927_v52  ;;  %v4929_v28 = vshll.u32 %v4925_v45, 16  ;;  %v4933_v54 = vadd.s32 %v4927_v52, %v4923_v56 }
 0x6b9   :  { %v4811_v5 = vand.u32 2147483647, %v4810_v48  ;;  %v4912_v62 = vadd.s32 %v4910_v18, %v4904_v42  ;;  %vm4913_vm15 = vc.u32 %v4911_v49, %v4907_v1  ;;  %v4932_v60 = vsel %vm4931_vm2, 1, %v7727_v2 }
 0x6ba   :  { %v4914_v44 = vsel %vm4913_vm15, 1, %v7727_v2  ;;  %v4934_v58 = vadd.s32 %v4932_v60, %v4926_v26  ;;  %v4906_v0 = vshrl.u32 %v4902_v34, 16  ;;  %vm4394_vm6 = vcmp.gt.s32.totalorder %v4393_v3, 0 }
 0x6bb   :  { %v4814_v40 = vmul.f32 %v4813_v41, %v4811_v5  ;;  %v4916_v33 = vadd.s32 %v4914_v44, %v4912_v62  ;;  %v4884_v15 = vsel %vm4880_vm11, %v4864_v32, %v10686_v47  ;;  %v4886_v63 = vsel %vm4882_vm1, %v10692_v24, %v4885_v4 }
 0x6bc   :  { %vm4935_vm10 = vc.u32 %v4933_v54, %v4929_v28  ;;  %v4395_v11 = vsel %vm4394_vm6, %v4393_v3, 0  ;;  %v4908_v29 = vshrl.u32 %v4903_v57, 16  ;;  %v4928_v35 = vshrl.u32 %v4924_v6, 16 }
 0x6bd   :  { %v4815_v23 = vxor.u32 2147483648, %v4814_v40  ;;  %v4917_v20 = vadd.s32 %v4916_v33, %v4906_v0  ;;  %v4936_v51 = vsel %vm4935_vm10, 1, %v7727_v2  ;;  %v4397_v47 = vand.u32 31, %v4395_v11 }
 0x6be   :  { %v4938_v50 = vadd.s32 %v4936_v51, %v4934_v58  ;;  %v4887_v24 = vsel %vm4881_vm0, %v4884_v15, %v4886_v63  ;;  %v4930_v59 = vshrl.u32 %v4925_v45, 16  ;;  %v4391_v57 = vor.u32 8388608, %v10742_v39 }
 0x6bf   :  { %v4816_v17 = vsel %vm4695_vm4, %v4815_v23, %v4814_v40  ;;  %v10771_v14 = vadd.s32 %v4917_v20, %v4908_v29  ;;  %v10774_v32 = vsub.s32 32, %v4397_v47  ;;  %v4837_v41 = vadd.s32 3, %v4820_v25 }
 0x6c0   :  { %v4819_v27 = vsel %vm10698_vm8, %v10421_v30, %v4816_v17  ;;  %v4939_v34 = vadd.s32 %v4938_v50, %v4928_v35  ;;  %v10776_v37 = vadd.s32 %v4933_v54, %v4929_v28  ;;  %v4941_v53 = vmul.u32 %v10652_v31, %v4887_v24 }
 0x6c1   :  { %v4821_v21 = vmul.f32 %v4819_v27, %v4819_v27  ;;  %v4403_v8 = vshll.u32 %v7729_v9, %v4397_v47  ;;  %v4404_v12 = vshrl.u32 %v7730_v13, %v10774_v32  ;;  %v4407_v39 = vshrl.u32 %v7731_v16, %v10774_v32 }
 0x6c2   :  { %v4940_v6 = vadd.s32 %v4939_v34, %v4930_v59  ;;  %vm4943_vm4 = vc.u32 %v10771_v14, %v10776_v37  ;;  %v10786_v25 = vshrl.u32 %v4395_v11, 5  ;;  %v4401_v52 = vshrl.u32 %v7729_v9, %v10774_v32 }
 0x6c3   :  { %v4822_v3 = vmul.f32 -0.001358992, %v4821_v21  ;;  %v4829_v48 = vmul.f32 -0.00019511016, %v4821_v21  ;;  %v4406_v31 = vshll.u32 %v7730_v13, %v4397_v47  ;;  %v10791_v49 = vor.u32 %v4404_v12, %v4403_v8 }
 0x6c4   :  { %v4944_v45 = vadd.s32 1, %v4940_v6  ;;  %v4410_v4 = vshrl.u32 %v7732_v19, %v10774_v32  ;;  %v4409_v26 = vshll.u32 %v7731_v16, %v4397_v47  ;;  %v4412_v40 = vshll.u32 %v7732_v19, %v4397_v47 }
 0x6c5   :  { %v4823_v42 = vadd.f32 0.041655596, %v4822_v3  ;;  %v4830_v56 = vadd.f32 0.008332121, %v4829_v48  ;;  %v4413_v62 = vshrl.u32 %v7733_v22, %v10774_v32  ;;  %v10799_v54 = vor.u32 %v4407_v39, %v4406_v31 }
 0x6c6   :  { %v4945_v18 = vsel %vm4943_vm4, %v4944_v45, %v4940_v6  ;;  %v4838_v58 = vand.u32 3, %v4837_v41  ;;  %v4400_v23 = vshll.u32 %v7728_v7, %v4397_v47  ;;  %v4411_v0 = vor.u32 %v4410_v4, %v4409_v26 }
 0x6c7   :  { %v4824_v5 = vmul.f32 %v4823_v42, %v4821_v21  ;;  %v4831_v1 = vmul.f32 %v4830_v56, %v4821_v21  ;;  %v4946_v28 = vadd.s32 %v4945_v18, %v4941_v53  ;;  %v4414_v33 = vor.u32 %v4413_v62, %v4412_v40 }
 0x6c8   :  { %vm4418_vm13 = vcmp.lt.s32.totalorder %v10786_v25, 4  ;;  %v10803_v17 = vor.u32 %v4401_v52, %v4400_v23  ;;  %vm4415_vm14 = vcmp.lt.s32.totalorder %v10786_v25, 1  ;;  %vm4417_vm7 = vcmp.lt.s32.totalorder %v10786_v25, 3 }
 0x6c9   :  { %v4825_v60 = vadd.f32 -0.4999988, %v4824_v5  ;;  %v4832_v44 = vadd.f32 -0.16666654, %v4831_v1  ;;  %v4947_v11 = vadd.s32 536870912, %v4946_v28  ;;  %v4427_v50 = vsel %vm4415_vm14, %v10791_v49, %v10799_v54 }
 0x6ca   :  { %v4428_v29 = vsel %vm4418_vm13, %v4414_v33, 1326507024  ;;  %vm4836_vm8 = vweird.f32 %v10421_v30  ;;  %v4424_v47 = vsel %vm4418_vm13, %v4411_v0, 920167782  ;;  %v10820_v24 = vshll.u32 %v4391_v57, 8 }
 0x6cb   :  { %v4826_v15 = vmul.f32 %v4825_v60, %v4821_v21  ;;  %v4833_v63 = vmul.f32 %v4832_v44, %v4821_v21  ;;  %v10809_v35 = vshrl.u32 %v4947_v11, 30  ;;  %v4429_v21 = vsel %vm4417_vm7, %v4411_v0, %v4428_v29 }
 0x6cc   :  { %vm4416_vm11 = vcmp.lt.s32.totalorder %v10786_v25, 2  ;;  %vm4839_vm0 = vcmp.lt.s32.totalorder %v4838_v58, 2  ;;  %vm4840_vm9 = vcmp.eq.s32.totalorder %v4838_v58, 0  ;;  %vm4843_vm3 = vcmp.eq.s32.totalorder %v4838_v58, 2 }
 0x6cd   :  { %v4827_v20 = vadd.f32 1.0, %v4826_v15  ;;  %v4834_v51 = vadd.f32 1.0, %v4833_v63  ;;  %v4949_v3 = vshll.u32 %v10809_v35, 30  ;;  %v4430_v48 = vsel %vm4416_vm11, %v4427_v50, %v4429_v21 }
 0x6ce   :  { %v4423_v57 = vsel %vm4415_vm14, %v10803_v17, %v10791_v49  ;;  %v4432_v53 = vand.u32 65535, %v10820_v24  ;;  %v4433_v8 = vshrl.u32 %v10820_v24, 16  ;;  %v4434_v12 = vand.u32 65535, %v4430_v48 }
 0x6cf   :  { %v4835_v59 = vmul.f32 %v4834_v51, %v4819_v27  ;;  %v4844_v34 = vxor.u32 2147483648, %v4827_v20  ;;  %v4950_v6 = vsub.s32 %v4946_v28, %v4949_v3  ;;  %v4425_v27 = vsel %vm4417_vm7, %v10799_v54, %v4424_v47 }
 0x6d0   :  { %v4435_v42 = vshrl.u32 %v4430_v48, 16  ;;  %v4426_v31 = vsel %vm4416_vm11, %v4423_v57, %v4425_v27  ;;  %v4438_v1 = vmul.u32 %v4434_v12, %v4433_v8  ;;  %v4436_v40 = vmul.u32 %v4434_v12, %v4432_v53 }
 0x6d1   :  { %v4841_v41 = vxor.u32 2147483648, %v4835_v59  ;;  %v4845_v39 = vsel %vm4843_vm3, %v4844_v34, %v4835_v59  ;;  %vm4951_vm1 = vcmp.lt.s32.totalorder %v4950_v6, 0  ;;  %v4952_v45 = vsub.s32 0, %v4950_v6 }
 0x6d2   :  { %v4437_v5 = vmul.u32 %v4435_v42, %v4432_v53  ;;  %v4439_v60 = vmul.u32 %v4435_v42, %v4433_v8  ;;  %v4442_v44 = vshll.u32 %v4438_v1, 16  ;;  %v4456_v28 = vand.u32 65535, %v4426_v31 }
 0x6d3   :  { %v4842_v56 = vsel %vm4840_vm9, %v4827_v20, %v4841_v41  ;;  %v4953_v18 = vsel %vm4951_vm1, %v4952_v45, %v4950_v6  ;;  %v4457_v0 = vshrl.u32 %v4426_v31, 16  ;;  %v10844_v20 = vmul.f32 %v10198_v10, %v10134_v46 }
 0x6d4   :  { %v4846_v52 = vsel %vm4839_vm0, %v4842_v56, %v4845_v39  ;;  %v4954_v26 = vclz %v4953_v18  ;;  %v4440_v62 = vshll.u32 %v4437_v5, 16  ;;  %v4460_v29 = vmul.u32 %v4456_v28, %v4433_v8 }
 0x6d5   :  { %v4847_v4 = vsel %vm4836_vm8, nan, %v4846_v52  ;;  %v4459_v63 = vmul.u32 %v4457_v0, %v4432_v53  ;;  %v4942_v51 = vadd.s32 %v10776_v37, %v10771_v14  ;;  %v4399_v59 = vshrl.u32 %v7728_v7, %v10774_v32 }
 0x6d6   :  { %5677 = vmatpush.msra.mxu2 %v4847_v4  ;;  %v7543_v23 = vadd.s32 4294967294, %v4954_v26  ;;  %vm4444_vm12 = vc.u32 %v4436_v40, %v4440_v62  ;;  %v4446_v58 = vadd.s32 %v4440_v62, %v4436_v40  ;;  %v4441_v34 = vshrl.u32 %v4437_v5, 16 }
 0x6d7   :  { %v4445_v33 = vsel %vm4444_vm12, 1, %v7727_v2  ;;  %v4458_v3 = vmul.u32 %v4456_v28, %v4432_v53  ;;  %v4462_v48 = vshll.u32 %v4459_v63, 16  ;;  %v4461_v12 = vmul.u32 %v4457_v0, %v4433_v8 }
 0x6d8   :  { %vm7544_vm2 = vcmp.lt.s32.totalorder %v7543_v23, 0  ;;  %v4447_v15 = vadd.s32 %v4445_v33, %v4439_v60  ;;  %vm4448_vm15 = vc.u32 %v4446_v58, %v4442_v44  ;;  %v4464_v42 = vshll.u32 %v4460_v29, 16 }
 0x6d9   :  { %v4957_v30 = vsel %vm7544_vm2, 0, %v7543_v23  ;;  %v4449_v11 = vsel %vm4448_vm15, 1, %v7727_v2  ;;  %vm4466_vm6 = vc.u32 %v4458_v3, %v4462_v48  ;;  %v4468_v46 = vadd.s32 %v4462_v48, %v4458_v3 }
 0x6da   :  { %v4958_v50 = vsub.s32 32, %v4957_v30  ;;  %v4962_v47 = vsub.s32 4294967266, %v4957_v30  ;;  %v4451_v21 = vadd.s32 %v4449_v11, %v4447_v15  ;;  %v4959_v41 = vshll.u32 %v4950_v6, %v4957_v30 }
 0x6db   :  { %v4541_v10 = vand.u32 2139095040, %v10844_v20  ;;  %v4467_v39 = vsel %vm4466_vm6, 1, %v7727_v2  ;;  %v4420_v32 = vsel %vm4418_vm13, %v10799_v54, 2102212464  ;;  %vm4470_vm10 = vc.u32 %v4468_v46, %v4464_v42 }
 0x6dc   :  { %v4960_v57 = vshrl.u32 %v4942_v51, %v4958_v50  ;;  %v4963_v27 = vadd.s32 127, %v4962_v47  ;;  %v4452_v37 = vadd.s32 %v4451_v21, %v4441_v34  ;;  %v4469_v53 = vadd.s32 %v4467_v39, %v4461_v12 }
 0x6dd   :  { %v4542_v6 = vshrl.u32 %v4541_v10, 23  ;;  %v4972_v8 = vsub.s32 4, %v10809_v35  ;;  %v4443_v52 = vshrl.u32 %v4438_v1, 16  ;;  %v4471_v31 = vsel %vm4470_vm10, 1, %v7727_v2 }
 0x6de   :  { %v4961_v56 = vor.u32 %v4960_v57, %v4959_v41  ;;  %v4964_v14 = vshll.u32 %v4963_v27, 23  ;;  %v4419_v5 = vsel %vm4415_vm14, %v4399_v59, %v10803_v17  ;;  %v4463_v4 = vshrl.u32 %v4459_v63, 16 }
 0x6df   :  { %v4473_v18 = vadd.s32 %v4471_v31, %v4469_v53  ;;  %v7536_v26 = vadd.s32 4294967169, %v4542_v6  ;;  %v4421_v54 = vsel %vm4417_vm7, %v10791_v49, %v4420_v32  ;;  %v10863_v60 = vadd.s32 %v4452_v37, %v4443_v52 }
 0x6e0   :  { %v4965_v45 = vor.u32 4788187, %v4964_v14  ;;  %v4968_v62 = vcvt.s32.f32 %v4961_v56  ;;  %vm4850_vm4 = vcmp.lt.s32.totalorder %v10629_v43, 0  ;;  %v4465_v1 = vshrl.u32 %v4460_v29, 16 }
 0x6e1   :  { %v4474_v44 = vadd.s32 %v4473_v18, %v4463_v4  ;;  %v4548_v28 = vadd.s32 1, %v7536_v26  ;;  %v4973_v17 = vsel %vm4850_vm4, %v4972_v8, %v10809_v35  ;;  %v10869_v58 = vadd.s32 %v4468_v46, %v4464_v42 }
 0x6e2   :  { %v4966_v40 = vand.u32 2147483647, %v4965_v45  ;;  %v4422_v0 = vsel %vm4416_vm11, %v4419_v5, %v4421_v54  ;;  %vm4849_vm14 = vcmp.le.f32.partialorder %v4848_v36, 0.7853982  ;;  %v4538_v11 = vand.u32 2147483647, %v10844_v20 }
 0x6e3   :  { %v4475_v33 = vadd.s32 %v4474_v44, %v4465_v1  ;;  %vm4549_vm13 = vcmp.gt.s32.totalorder %v4548_v28, 0  ;;  %vm4478_vm7 = vc.u32 %v10863_v60, %v10869_v58  ;;  %v4975_v63 = vsel %vm4849_vm14, 0, %v4973_v17 }
 0x6e4   :  { %v4969_v23 = vmul.f32 %v4968_v62, %v4966_v40  ;;  %v4550_v15 = vsel %vm4549_vm13, %v4548_v28, 0  ;;  %v4476_v25 = vmul.u32 %v10820_v24, %v4422_v0  ;;  %v4992_v21 = vadd.s32 3, %v4975_v63 }
 0x6e5   :  { %v4479_v30 = vadd.s32 1, %v4475_v33  ;;  %v4552_v35 = vand.u32 31, %v4550_v15  ;;  %v4545_v34 = vand.u32 8388607, %v4538_v11  ;;  %v10886_v3 = vshrl.u32 %v4550_v15, 5 }
 0x6e6   :  { %v4970_v49 = vxor.u32 2147483648, %v4969_v23  ;;  %v4993_v5 = vand.u32 3, %v4992_v21  ;;  %vm4991_vm3 = vweird.f32 %v10629_v43 }
 0x6e7   :  { %v4480_v50 = vsel %vm4478_vm7, %v4479_v30, %v4475_v33  ;;  %v10882_v47 = vsub.s32 32, %v4552_v35  ;;  %v4555_v12 = vshll.u32 %v7728_v7, %v4552_v35  ;;  %v4558_v42 = vshll.u32 %v7729_v9, %v4552_v35 }
 0x6e8   :  { %v4971_v29 = vsel %vm4850_vm4, %v4970_v49, %v4969_v23  ;;  %v4481_v59 = vadd.s32 %v4480_v50, %v4476_v25  ;;  %v4564_v10 = vshll.u32 %v7731_v16, %v4552_v35  ;;  %v4561_v32 = vshll.u32 %v7730_v13, %v4552_v35 }
 0x6e9   :  { %v4974_v51 = vsel %vm4849_vm14, %v10629_v43, %v4971_v29  ;;  %v4556_v48 = vshrl.u32 %v7729_v9, %v10882_v47  ;;  %v4559_v41 = vshrl.u32 %v7730_v13, %v10882_v47  ;;  %v4562_v46 = vshrl.u32 %v7731_v16, %v10882_v47 }
 0x6ea   :  { %v4976_v36 = vmul.f32 %v4974_v51, %v4974_v51  ;;  %v4482_v27 = vadd.s32 536870912, %v4481_v59  ;;  %v4565_v56 = vshrl.u32 %v7732_v19, %v10882_v47  ;;  %v4568_v8 = vshrl.u32 %v7733_v22, %v10882_v47 }
 0x6eb   :  { %v10902_v53 = vor.u32 %v4556_v48, %v4555_v12  ;;  %v10904_v6 = vor.u32 %v4559_v41, %v4558_v42  ;;  %v4546_v18 = vor.u32 8388608, %v4545_v34  ;;  %v10909_v26 = vor.u32 %v4562_v46, %v4561_v32 }
 0x6ec   :  { %v4977_v24 = vmul.f32 -0.001358992, %v4976_v36  ;;  %v4984_v57 = vmul.f32 -0.00019511016, %v4976_v36  ;;  %v10899_v39 = vshrl.u32 %v4482_v27, 30  ;;  %v4566_v45 = vor.u32 %v4565_v56, %v4564_v10 }
 0x6ed   :  { %v4567_v40 = vshll.u32 %v7732_v19, %v4552_v35  ;;  %vm4570_vm8 = vcmp.lt.s32.totalorder %v10886_v3, 1  ;;  %vm4573_vm11 = vcmp.lt.s32.totalorder %v10886_v3, 4  ;;  %vm4572_vm0 = vcmp.lt.s32.totalorder %v10886_v3, 3 }
 0x6ee   :  { %v4978_v14 = vadd.f32 0.041655596, %v4977_v24  ;;  %v4985_v37 = vadd.f32 0.008332121, %v4984_v57  ;;  %v4484_v4 = vshll.u32 %v10899_v39, 30  ;;  %v4578_v28 = vsel %vm4570_vm8, %v10902_v53, %v10904_v6 }
 0x6ef   :  { %v4569_v44 = vor.u32 %v4568_v8, %v4567_v40  ;;  %v4579_v23 = vsel %vm4573_vm11, %v4566_v45, 920167782  ;;  %v10925_v15 = vshll.u32 %v4546_v18, 8  ;;  %vm4571_vm1 = vcmp.lt.s32.totalorder %v10886_v3, 2 }
 0x6f0   :  { %v4979_v52 = vmul.f32 %v4978_v14, %v4976_v36  ;;  %v4986_v31 = vmul.f32 %v4985_v37, %v4976_v36  ;;  %v4485_v1 = vsub.s32 %v4481_v59, %v4484_v4  ;;  %v4580_v49 = vsel %vm4572_vm0, %v10909_v26, %v4579_v23 }
 0x6f1   :  { %v4581_v25 = vsel %vm4571_vm1, %v4578_v28, %v4580_v49  ;;  %v4582_v50 = vsel %vm4570_vm8, %v10904_v6, %v10909_v26  ;;  %vm4994_vm12 = vcmp.lt.s32.totalorder %v4993_v5, 2  ;;  %vm4995_vm2 = vcmp.eq.s32.totalorder %v4993_v5, 0 }
 0x6f2   :  { %v4980_v62 = vadd.f32 -0.4999988, %v4979_v52  ;;  %v4987_v54 = vadd.f32 -0.16666654, %v4986_v31  ;;  %vm4486_vm9 = vcmp.lt.s32.totalorder %v4485_v1, 0  ;;  %v4487_v33 = vsub.s32 0, %v4485_v1 }
 0x6f3   :  { %vm4998_vm15 = vcmp.eq.s32.totalorder %v4993_v5, 2  ;;  %v4477_v48 = vadd.s32 %v10869_v58, %v10863_v60  ;;  %v4587_v27 = vand.u32 65535, %v10925_v15  ;;  %v4612_v12 = vshrl.u32 %v4581_v25, 16 }
 0x6f4   :  { %v4981_v17 = vmul.f32 %v4980_v62, %v4976_v36  ;;  %v4988_v0 = vmul.f32 %v4987_v54, %v4976_v36  ;;  %v4488_v35 = vsel %vm4486_vm9, %v4487_v33, %v4485_v1  ;;  %v4583_v36 = vsel %vm4573_vm11, %v4569_v44, 1326507024 }
 0x6f5   :  { %v4489_v29 = vclz %v4488_v35  ;;  %v4584_v34 = vsel %vm4572_vm0, %v4566_v45, %v4583_v36  ;;  %v4611_v46 = vand.u32 65535, %v4581_v25  ;;  %v4588_v37 = vshrl.u32 %v10925_v15, 16 }
 0x6f6   :  { %v4982_v63 = vadd.f32 1.0, %v4981_v17  ;;  %v4989_v30 = vadd.f32 1.0, %v4988_v0  ;;  %v4585_v57 = vsel %vm4571_vm1, %v4582_v50, %v4584_v34  ;;  %v4614_v45 = vmul.u32 %v4612_v12, %v4587_v27 }
 0x6f7   :  { %v7534_v41 = vadd.s32 4294967294, %v4489_v29  ;;  %v4590_v42 = vshrl.u32 %v4585_v57, 16  ;;  %v4615_v62 = vmul.u32 %v4611_v46, %v4588_v37  ;;  %v4613_v28 = vmul.u32 %v4611_v46, %v4587_v27 }
 0x6f8   :  { %v4990_v21 = vmul.f32 %v4989_v30, %v4974_v51  ;;  %v4999_v59 = vxor.u32 2147483648, %v4982_v63  ;;  %v4589_v51 = vand.u32 65535, %v4585_v57  ;;  %v4617_v0 = vshll.u32 %v4614_v45, 16 }
 0x6f9   :  { %vm7535_vm6 = vcmp.lt.s32.totalorder %v7534_v41, 0  ;;  %v4592_v52 = vmul.u32 %v4590_v42, %v4587_v27  ;;  %v4594_v5 = vmul.u32 %v4590_v42, %v4588_v37  ;;  %v4619_v35 = vshll.u32 %v4615_v62, 16 }
 0x6fa   :  { %v4996_v24 = vxor.u32 2147483648, %v4990_v21  ;;  %v5000_v56 = vsel %vm4998_vm15, %v4999_v59, %v4990_v21  ;;  %v4492_v14 = vsel %vm7535_vm6, 0, %v7534_v41  ;;  %v4593_v31 = vmul.u32 %v4589_v51, %v4588_v37 }
 0x6fb   :  { %v4493_v60 = vsub.s32 32, %v4492_v14  ;;  %v4497_v58 = vsub.s32 4294967266, %v4492_v14  ;;  %v4494_v4 = vshll.u32 %v4485_v1, %v4492_v14  ;;  %v4591_v54 = vmul.u32 %v4589_v51, %v4587_v27 }
 0x6fc   :  { %v4997_v10 = vsel %vm4995_vm2, %v4982_v63, %v4996_v24  ;;  %v4595_v44 = vshll.u32 %v4592_v52, 16  ;;  %v4597_v33 = vshll.u32 %v4593_v31, 16  ;;  %v4616_v63 = vmul.u32 %v4612_v12, %v4588_v37 }
 0x6fd   :  { %v5001_v32 = vsel %vm4994_vm12, %v4997_v10, %v5000_v56  ;;  %v4495_v18 = vshrl.u32 %v4477_v48, %v4493_v60  ;;  %v4498_v40 = vadd.s32 127, %v4497_v58  ;;  %vm4621_vm4 = vc.u32 %v4613_v28, %v4617_v0 }
 0x6fe   :  { %v5002_v8 = vsel %vm4991_vm3, nan, %v5001_v32  ;;  %vm4599_vm10 = vc.u32 %v4591_v54, %v4595_v44  ;;  %v4601_v49 = vadd.s32 %v4595_v44, %v4591_v54  ;;  %v4622_v29 = vsel %vm4621_vm4, 1, %v7727_v2  ;;  %v5623_v32 = vld [vmem:[#allocation7 + $0xa0] sm:$0xff] }
 0x6ff   :  { %5706 = vmatpush.msra.mxu3 %v5002_v8  ;;  %v4496_v23 = vor.u32 %v4495_v18, %v4494_v4  ;;  %v4499_v17 = vshll.u32 %v4498_v40, 23  ;;  %v4600_v30 = vsel %vm4599_vm10, 1, %v7727_v2  ;;  %v4623_v25 = vadd.s32 %v4617_v0, %v4613_v28 }
 0x700   :  { %v4602_v1 = vadd.s32 %v4600_v30, %v4594_v5  ;;  %vm4603_vm13 = vc.u32 %v4601_v49, %v4597_v33  ;;  %v4624_v59 = vadd.s32 %v4622_v29, %v4616_v63  ;;  %v4575_v34 = vsel %vm4573_vm11, %v10909_v26, 2102212464 }
 0x701   :  { %v4500_v43 = vor.u32 4788187, %v4499_v17  ;;  %v4503_v36 = vcvt.s32.f32 %v4496_v23  ;;  %v4604_v21 = vsel %vm4603_vm13, 1, %v7727_v2  ;;  %v4596_v48 = vshrl.u32 %v4592_v52, 16 }
 0x702   :  { %v4606_v41 = vadd.s32 %v4604_v21, %v4602_v1  ;;  %vm4625_vm14 = vc.u32 %v4623_v25, %v4619_v35  ;;  %v4554_v57 = vshrl.u32 %v7728_v7, %v10882_v47  ;;  %v4598_v12 = vshrl.u32 %v4593_v31, 16 }
 0x703   :  { %v4501_v50 = vand.u32 2147483647, %v4500_v43  ;;  %v4626_v27 = vsel %vm4625_vm14, 1, %v7727_v2  ;;  %v4618_v42 = vshrl.u32 %v4614_v45, 16  ;;  %v4576_v26 = vsel %vm4572_vm0, %v10904_v6, %v4575_v34 }
 0x704   :  { %v4607_v51 = vadd.s32 %v4606_v41, %v4596_v48  ;;  %v4628_v46 = vadd.s32 %v4626_v27, %v4624_v59  ;;  %v4574_v56 = vsel %vm4570_vm8, %v4554_v57, %v10902_v53  ;;  %vm4385_vm7 = vcmp.lt.s32.totalorder %v10646_v61, 0 }
 0x705   :  { %v4504_v24 = vmul.f32 %v4503_v36, %v4501_v50  ;;  %v4620_v37 = vshrl.u32 %v4615_v62, 16  ;;  %vm10965_vm11 = vcmp.le.f32.partialorder %v4383_v55, 0.7853982  ;;  %v4627_v58 = vadd.s32 %v4623_v25, %v4619_v35 }
 0x706   :  { %v4608_v14 = vadd.s32 %v4607_v51, %v4598_v12  ;;  %v4629_v47 = vadd.s32 %v4628_v46, %v4618_v42  ;;  %v4507_v53 = vsub.s32 4, %v10899_v39  ;;  %v4577_v45 = vsel %vm4571_vm1, %v4574_v56, %v4576_v26 }
 0x707   :  { %v4505_v10 = vxor.u32 2147483648, %v4504_v24  ;;  %v4631_v18 = vmul.u32 %v10925_v15, %v4577_v45  ;;  %vm4526_vm12 = vweird.f32 %v10646_v61  ;;  %v5624_v45 = vld [vmem:[#allocation7 + $0xa8] sm:$0xff]  ;;  %vm4540_vm15 = vcmp.lt.s32.totalorder %v10844_v20, 0 }
 0x708   :  { %v4630_v8 = vadd.s32 %v4629_v47, %v4620_v37  ;;  %vm4633_vm8 = vc.u32 %v4608_v14, %v4627_v58  ;;  %v4508_v40 = vsel %vm4385_vm7, %v4507_v53, %v10899_v39  ;;  %v4632_v51 = vadd.s32 %v4627_v58, %v4608_v14 }
 0x709   :  { %v4506_v60 = vsel %vm4385_vm7, %v4505_v10, %v4504_v24  ;;  %v4510_v3 = vsel %vm10965_vm11, 0, %v4508_v40  ;;  %vm10988_vm6 = vcmp.le.f32.partialorder %v4538_v11, 0.7853982  ;;  %vm4681_vm14 = vweird.f32 %v10844_v20 }
 0x70a   :  { %v4509_v6 = vsel %vm10965_vm11, %v10646_v61, %v4506_v60  ;;  %v4634_v55 = vadd.s32 1, %v4630_v8  ;;  %v4527_v63 = vadd.s32 3, %v4510_v3 }
 0x70b   :  { %v4511_v52 = vmul.f32 %v4509_v6, %v4509_v6 }
 0x70c   :  { %v4635_v62 = vsel %vm4633_vm8, %v4634_v55, %v4630_v8  ;;  %v4528_v29 = vand.u32 3, %v4527_v63  ;;  %v5626_v63 = vld [vmem:[#allocation7 + $0xb8] sm:$0xff] }
 0x70d   :  { %v4512_v31 = vmul.f32 -0.001358992, %v4511_v52  ;;  %v4519_v4 = vmul.f32 -0.00019511016, %v4511_v52  ;;  %v4636_v28 = vadd.s32 %v4635_v62, %v4631_v18  ;;  %v5625_v62 = vld [vmem:[#allocation7 + $0xb0] sm:$0xff] }
 0x70e   :  { %vm4530_vm9 = vcmp.eq.s32.totalorder %v4528_v29, 0  ;;  %vm4533_vm3 = vcmp.eq.s32.totalorder %v4528_v29, 2  ;;  %vm4529_vm1 = vcmp.lt.s32.totalorder %v4528_v29, 2 }
 0x70f   :  { %v4513_v54 = vadd.f32 0.041655596, %v4512_v31  ;;  %v4520_v44 = vadd.f32 0.008332121, %v4519_v4  ;;  %v4637_v5 = vadd.s32 536870912, %v4636_v28 }
 0x711   :  { %v4514_v23 = vmul.f32 %v4513_v54, %v4511_v52  ;;  %v4521_v17 = vmul.f32 %v4520_v44, %v4511_v52  ;;  %v4638_v49 = vshrl.u32 %v4637_v5, 30 }
 0x713   :  { %v4515_v0 = vadd.f32 -0.4999988, %v4514_v23  ;;  %v4522_v33 = vadd.f32 -0.16666654, %v4521_v17  ;;  %v4639_v30 = vshll.u32 %v4638_v49, 30 }
 0x715   :  { %v4516_v43 = vmul.f32 %v4515_v0, %v4511_v52  ;;  %v4523_v15 = vmul.f32 %v4522_v33, %v4511_v52  ;;  %v4640_v39 = vsub.s32 %v4636_v28, %v4639_v30  ;;  %v4662_v52 = vsub.s32 4, %v4638_v49 }
 0x717   :  { %v4517_v35 = vadd.f32 1.0, %v4516_v43  ;;  %v4524_v1 = vadd.f32 1.0, %v4523_v15  ;;  %vm4641_vm0 = vcmp.lt.s32.totalorder %v4640_v39, 0  ;;  %v4642_v36 = vsub.s32 0, %v4640_v39 }
 0x718   :  { %v4663_v40 = vsel %vm4540_vm15, %v4662_v52, %v4638_v49 }
 0x719   :  { %v4525_v25 = vmul.f32 %v4524_v1, %v4509_v6  ;;  %v4534_v50 = vxor.u32 2147483648, %v4517_v35  ;;  %v4643_v59 = vsel %vm4641_vm0, %v4642_v36, %v4640_v39  ;;  %v4665_v11 = vsel %vm10988_vm6, 0, %v4663_v40 }
 0x71a   :  { %v4644_v34 = vclz %v4643_v59  ;;  %v4682_v5 = vadd.s32 3, %v4665_v11  ;;  %v5634_v59 = vpop.permute.xlu1 %5633 }
 0x71b   :  { %v4531_v21 = vxor.u32 2147483648, %v4525_v25  ;;  %v4535_v41 = vsel %vm4533_vm3, %v4534_v50, %v4525_v25 }
 0x71c   :  { %v7537_v57 = vadd.s32 4294967294, %v4644_v34  ;;  %v4683_v30 = vand.u32 3, %v4682_v5  ;;  %v5639_v34 = vpop.permute.xlu2 %5638 }
 0x71d   :  { %v4532_v48 = vsel %vm4530_vm9, %v4517_v35, %v4531_v21 }
 0x71e   :  { %v4536_v24 = vsel %vm4529_vm1, %v4532_v48, %v4535_v41  ;;  %vm7538_vm2 = vcmp.lt.s32.totalorder %v7537_v57, 0  ;;  %vm4685_vm10 = vcmp.eq.s32.totalorder %v4683_v30, 0  ;;  %vm4688_vm4 = vcmp.eq.s32.totalorder %v4683_v30, 2 }
 0x71f   :  { %v4537_v27 = vsel %vm4526_vm12, nan, %v4536_v24  ;;  %v4647_v12 = vsel %vm7538_vm2, 0, %v7537_v57  ;;  %vm4684_vm13 = vcmp.lt.s32.totalorder %v4683_v30, 2  ;;  %v5644_v24 = vpop.permute.xlu0 %5643 }
 0x720   :  { %5678 = vmatpush.msra.mxu2 %v4537_v27  ;;  %v4648_v42 = vsub.s32 32, %v4647_v12  ;;  %v4652_v46 = vsub.s32 4294967266, %v4647_v12  ;;  %v4649_v10 = vshll.u32 %v4640_v39, %v4647_v12 }
 0x721   :  { %7557 = vmatmul.msk.f32.vlgmr.msra.gmra.mxu2 %vm2792_vm5, %v5623_v32 }
 0x722   :  { %v4650_v56 = vshrl.u32 %v4632_v51, %v4648_v42  ;;  %v4653_v26 = vadd.s32 127, %v4652_v46  ;;  %v5649_v42 = vpop.permute.xlu1 %5648 }
 0x724   :  { %v4651_v37 = vor.u32 %v4650_v56, %v4649_v10  ;;  %v4654_v47 = vshll.u32 %v4653_v26, 23 }
 0x726   :  { %v4655_v60 = vor.u32 4788187, %v4654_v47  ;;  %v4658_v61 = vcvt.s32.f32 %v4651_v37 }
 0x728   :  { %v4656_v53 = vand.u32 2147483647, %v4655_v60 }
 0x729   :  { %7558 = vmatmul.msk.f32.gmra.mxu2 %vm2792_vm5, %v5624_v45 }
 0x72a   :  { %v4659_v6 = vmul.f32 %v4658_v61, %v4656_v53 }
 0x72c   :  { %v4660_v8 = vxor.u32 2147483648, %v4659_v6 }
 0x72e   :  { %v4661_v58 = vsel %vm4540_vm15, %v4660_v8, %v4659_v6 }
 0x72f   :  { %v4664_v55 = vsel %vm10988_vm6, %v10844_v20, %v4661_v58  ;;  %v5750_v58 = vstv %s11011_s10 }
 0x730   :  { %v4666_v31 = vmul.f32 %v4664_v55, %v4664_v55 }
 0x731   :  { %7559 = vmatmul.msk.f32.gmra.mxu2 %vm2792_vm5, %v5625_v62 }
 0x732   :  { %v4667_v4 = vmul.f32 -0.001358992, %v4666_v31  ;;  %v4674_v18 = vmul.f32 -0.00019511016, %v4666_v31 }
 0x734   :  { %v4668_v54 = vadd.f32 0.041655596, %v4667_v4  ;;  %v4675_v44 = vadd.f32 0.008332121, %v4674_v18 }
 0x736   :  { %v4669_v28 = vmul.f32 %v4668_v54, %v4666_v31  ;;  %v4676_v3 = vmul.f32 %v4675_v44, %v4666_v31 }
 0x738   :  { %v4670_v23 = vadd.f32 -0.4999988, %v4669_v28  ;;  %v4677_v17 = vadd.f32 -0.16666654, %v4676_v3 }
 0x739   :  { %7560 = vmatmul.msk.f32.gmra.mxu2 %vm2792_vm5, %v5626_v63 }
 0x73a   :  { %v4671_v0 = vmul.f32 %v4670_v23, %v4666_v31  ;;  %v4678_v33 = vmul.f32 %v4677_v17, %v4666_v31 }
 0x73c   :  { %v4672_v43 = vadd.f32 1.0, %v4671_v0  ;;  %v4679_v15 = vadd.f32 1.0, %v4678_v33 }
 0x73e   :  { %v4680_v49 = vmul.f32 %v4679_v15, %v4664_v55  ;;  %v4689_v35 = vxor.u32 2147483648, %v4672_v43  ;;  %v5754_v55 = vstv %s11013_s11 }
 0x740   :  { %v4686_v1 = vxor.u32 2147483648, %v4680_v49  ;;  %v4690_v29 = vsel %vm4688_vm4, %v4689_v35, %v4680_v49 }
 0x742   :  { %v4687_v39 = vsel %vm4685_vm10, %v4672_v43, %v4686_v1 }
 0x743   :  { %v4691_v25 = vsel %vm4684_vm13, %v4687_v39, %v4690_v29 }
 0x744   :  { %v4692_v50 = vsel %vm4681_vm14, nan, %v4691_v25 }
 0x745   :  { %5707 = vmatpush.msra.mxu3 %v4692_v50 }
 0x746   :  { %7561 = vmatmul.msk.f32.vlgmr.msra.gmra.mxu3 %vm2792_vm5, %v5623_v32 }
 0x74e   :  { %7562 = vmatmul.msk.f32.gmra.mxu3 %vm2792_vm5, %v5624_v45 }
 0x756   :  { %7563 = vmatmul.msk.f32.gmra.mxu3 %vm2792_vm5, %v5625_v62 }
 0x75e   :  { %7564 = vmatmul.msk.f32.gmra.mxu3 %vm2792_vm5, %v5626_v63 }
 0x7a4   :  { %v5680_v36 = vpop.f32.mrf.mxu2 }
 0x7a5   :  { %v11007_v20 = vadd.f32 %v5680_v36, %v5634_v59 }
 0x7a7   :  { %v5721_v12 = vand.u32 2147483647, %v11007_v20 }
 0x7ac   :  { %v5683_v21 = vpop.f32.mrf.mxu2 }
 0x7ad   :  { %v11005_v41 = vadd.f32 %v5683_v21, %v5639_v34 }
 0x7af   :  { %v5723_v27 = vand.u32 2147483647, %v11005_v41 }
 0x7b1   :  { %v5729_v10 = vadd.f32 %v5723_v27, %v5721_v12 }
 0x7b4   :  { %v5686_v48 = vpop.f32.mrf.mxu2 }
 0x7b5   :  { %v5687_v57 = vadd.f32 %v5686_v48, %v5644_v24 }
 0x7b7   :  { %v5725_v51 = vand.u32 2147483647, %v5687_v57 }
 0x7b9   :  { %v5730_v26 = vadd.f32 %v5729_v10, %v5725_v51 }
 0x7bc   :  { %v5689_v46 = vpop.f32.mrf.mxu2 }
 0x7bd   :  { %v5690_v56 = vadd.f32 %v5689_v46, %v5649_v42 }
 0x7bf   :  { %v5727_v37 = vand.u32 2147483647, %v5690_v56 }
 0x7c1   :  { %v5731_v47 = vadd.f32 %v5730_v26, %v5727_v37 }
 0x7c3   :  { %v5732_v32 = vrot.slane %v5731_v47, 4 }
 0x7c5   :  { %v5733_v53 = vadd.f32 %v5732_v32, %v5731_v47 }
 0x7c7   :  { %v5734_v61 = vrot.slane %v5733_v53, 2 }
 0x7c9   :  { %v5709_v60 = vpop.f32.mrf.mxu3  ;;  %v5735_v6 = vadd.f32 %v5734_v61, %v5733_v53 }
 0x7ca   :  { %v11020_v62 = vadd.f32 %v5709_v60, %v5634_v59 }
 0x7cb   :  { %v5736_v45 = vrot.slane %v5735_v6, 1 }
 0x7cc   :  { %v5722_v28 = vand.u32 2147483647, %v11020_v62 }
 0x7cd   :  { %v5737_v14 = vadd.f32 %v5736_v45, %v5735_v6 }
 0x7cf   :  { %v5747_v52 = vmul.f32 %v5737_v14, %v8310_v38 }
 0x7d1   :  { %v5712_v8 = vpop.f32.mrf.mxu3  ;;  %v5751_v31 = vmul.f32 %v5750_v58, %v5747_v52 }
 0x7d2   :  { %v11018_v40 = vadd.f32 %v5712_v8, %v5639_v34 }
 0x7d3   :  { %v5755_v4 = vadd.f32 %v5754_v55, %v5751_v31 }
 0x7d4   :  { %v5724_v44 = vand.u32 2147483647, %v11018_v40 }
 0x7d5   :  { %7639 = vtanh.f32 %v5755_v4 }
 0x7d6   :  { %v5738_v5 = vadd.f32 %v5724_v44, %v5722_v28 }
 0x7d9   :  { %v5715_v18 = vpop.f32.mrf.mxu3 }
 0x7da   :  { %v11022_v54 = vadd.f32 %v5715_v18, %v5644_v24 }
 0x7db   :  { %v7640_v11 = vpop.eup %7639 }
 0x7dc   :  { %v5726_v3 = vand.u32 2147483647, %v11022_v54  ;;  %v5759_v23 = vmul.f32 20.0, %v7640_v11 }
 0x7de   :  { %v11029_v33 = vadd.f32 30.0, %v5759_v23  ;;  %v5739_v63 = vadd.f32 %v5738_v5, %v5726_v3 }
 0x7e0   :  { %v11033_v15 = vmul.f32 %v11029_v33, %v5690_v56 }
 0x7e1   :  { %v5718_v17 = vpop.f32.mrf.mxu3 }
 0x7e2   :  { %v11027_v0 = vadd.f32 %v5718_v17, %v5649_v42  ;;  %v6704_v49 = vand.u32 2139095040, %v11033_v15  ;;  %v6701_v51 = vand.u32 2147483647, %v11033_v15  ;;  %v11041_v42 = vmul.f32 %v11029_v33, %v5687_v57 }
 0x7e4   :  { %v5728_v43 = vand.u32 2147483647, %v11027_v0  ;;  %v6705_v1 = vshrl.u32 %v6704_v49, 23  ;;  %v6708_v47 = vand.u32 8388607, %v6701_v51  ;;  %v6394_v6 = vand.u32 2139095040, %v11041_v42 }
 0x7e6   :  { %v5740_v30 = vadd.f32 %v5739_v63, %v5728_v43  ;;  %v7585_v29 = vadd.s32 4294967169, %v6705_v1  ;;  %v6709_v53 = vor.u32 8388608, %v6708_v47  ;;  %v6395_v3 = vshrl.u32 %v6394_v6, 23 }
 0x7e8   :  { %v5741_v35 = vrot.slane %v5740_v30, 4  ;;  %v6711_v50 = vadd.s32 1, %v7585_v29  ;;  %v11062_v18 = vshll.u32 %v6709_v53, 8 }
 0x7ea   :  { %v5742_v39 = vadd.f32 %v5741_v35, %v5740_v30  ;;  %vm6712_vm7 = vcmp.gt.s32.totalorder %v6711_v50, 0  ;;  %v6750_v30 = vand.u32 65535, %v11062_v18  ;;  %v6751_v35 = vshrl.u32 %v11062_v18, 16 }
 0x7eb   :  { %v6713_v21 = vsel %vm6712_vm7, %v6711_v50, 0 }
 0x7ec   :  { %v5743_v25 = vrot.slane %v5742_v39, 2  ;;  %v6715_v34 = vand.u32 31, %v6713_v21  ;;  %v11036_v27 = vshrl.u32 %v6713_v21, 5 }
 0x7ee   :  { %v5744_v36 = vadd.f32 %v5743_v25, %v5742_v39  ;;  %v6716_v24 = vsub.s32 32, %v6715_v34  ;;  %v6727_v46 = vshll.u32 %v7731_v16, %v6715_v34  ;;  %v6730_v56 = vshll.u32 %v7732_v19, %v6715_v34 }
 0x7ef   :  { %vm6736_vm11 = vcmp.lt.s32.totalorder %v11036_v27, 4  ;;  %v6718_v61 = vshll.u32 %v7728_v7, %v6715_v34  ;;  %v6721_v8 = vshll.u32 %v7729_v9, %v6715_v34  ;;  %v6724_v52 = vshll.u32 %v7730_v13, %v6715_v34 }
 0x7f0   :  { %v5745_v59 = vrot.slane %v5744_v36, 1  ;;  %v6728_v10 = vshrl.u32 %v7732_v19, %v6716_v24  ;;  %v6731_v26 = vshrl.u32 %v7733_v22, %v6716_v24  ;;  %v6719_v45 = vshrl.u32 %v7729_v9, %v6716_v24 }
 0x7f1   :  { %v6722_v14 = vshrl.u32 %v7730_v13, %v6716_v24  ;;  %vm6735_vm8 = vcmp.lt.s32.totalorder %v11036_v27, 3  ;;  %vm6733_vm0 = vcmp.lt.s32.totalorder %v11036_v27, 1  ;;  %vm6734_vm9 = vcmp.lt.s32.totalorder %v11036_v27, 2 }
 0x7f2   :  { %v5746_v48 = vadd.f32 %v5745_v59, %v5744_v36  ;;  %v6729_v32 = vor.u32 %v6728_v10, %v6727_v46  ;;  %v6732_v60 = vor.u32 %v6731_v26, %v6730_v56  ;;  %v6720_v31 = vor.u32 %v6719_v45, %v6718_v61 }
 0x7f3   :  { %v6723_v4 = vor.u32 %v6722_v14, %v6721_v8  ;;  %v6717_v29 = vshrl.u32 %v7728_v7, %v6716_v24  ;;  %v7579_v36 = vadd.s32 4294967169, %v6395_v3  ;;  %v6391_v10 = vand.u32 2147483647, %v11041_v42 }
 0x7f4   :  { %v5748_v12 = vmul.f32 %v5746_v48, %v8310_v38  ;;  %v6746_v57 = vsel %vm6736_vm11, %v6732_v60, 1326507024 }
 0x7f5   :  { %v6747_v11 = vsel %vm6735_vm8, %v6729_v32, %v6746_v57  ;;  %v6741_v28 = vsel %vm6733_vm0, %v6720_v31, %v6723_v4  ;;  %v6737_v48 = vsel %vm6733_vm0, %v6717_v29, %v6720_v31 }
 0x7f6   :  { %v5752_v37 = vmul.f32 %v5750_v58, %v5748_v12  ;;  %v6742_v58 = vsel %vm6736_vm11, %v6729_v32, 920167782 }
 0x7f8   :  { %v5756_v38 = vadd.f32 %v5754_v55, %v5752_v37  ;;  %v6725_v55 = vshrl.u32 %v7731_v16, %v6716_v24 }
 0x7fa   :  { %7641 = vtanh.f32 %v5756_v38  ;;  %v6726_v44 = vor.u32 %v6725_v55, %v6724_v52  ;;  %v6401_v38 = vadd.s32 1, %v7579_v36 }
 0x7fc   :  { %v6743_v23 = vsel %vm6735_vm8, %v6726_v44, %v6742_v58  ;;  %v6745_v17 = vsel %vm6733_vm0, %v6723_v4, %v6726_v44  ;;  %v6738_v24 = vsel %vm6736_vm11, %v6726_v44, 2102212464  ;;  %vm6402_vm15 = vcmp.gt.s32.totalorder %v6401_v38, 0 }
 0x7fd   :  { %v6744_v63 = vsel %vm6734_vm9, %v6741_v28, %v6743_v23  ;;  %v6748_v43 = vsel %vm6734_vm9, %v6745_v17, %v6747_v11  ;;  %v6739_v28 = vsel %vm6735_vm8, %v6723_v4, %v6738_v24  ;;  %v11106_v4 = vand.u32 8388607, %v6391_v10 }
 0x7fe   :  { %v6752_v1 = vand.u32 65535, %v6748_v43  ;;  %v6753_v39 = vshrl.u32 %v6748_v43, 16  ;;  %v6774_v25 = vand.u32 65535, %v6744_v63  ;;  %v6775_v50 = vshrl.u32 %v6744_v63, 16 }
 0x7ff   :  { %v6399_v27 = vor.u32 8388608, %v11106_v4  ;;  %vm6703_vm11 = vcmp.lt.s32.totalorder %v11033_v15, 0 }
 0x800   :  { %v7642_v5 = vpop.eup %7641  ;;  %v6755_v59 = vmul.u32 %v6753_v39, %v6750_v30  ;;  %v6756_v34 = vmul.u32 %v6752_v1, %v6751_v35  ;;  %v6777_v12 = vmul.u32 %v6775_v50, %v6750_v30  ;;  %v6778_v46 = vmul.u32 %v6774_v25, %v6751_v35 }
 0x801   :  { %v5760_v49 = vmul.f32 20.0, %v7642_v5  ;;  %v6754_v26 = vmul.u32 %v6752_v1, %v6750_v30  ;;  %v6757_v47 = vmul.u32 %v6753_v39, %v6751_v35  ;;  %v6776_v32 = vmul.u32 %v6774_v25, %v6750_v30 }
 0x802   :  { %v6758_v37 = vshll.u32 %v6755_v59, 16  ;;  %v6780_v60 = vshll.u32 %v6777_v12, 16  ;;  %v6760_v57 = vshll.u32 %v6756_v34, 16  ;;  %v6779_v45 = vmul.u32 %v6775_v50, %v6751_v35 }
 0x803   :  { %v11081_v21 = vadd.f32 30.0, %v5760_v49  ;;  %v6782_v8 = vshll.u32 %v6778_v46, 16  ;;  %v6759_v3 = vshrl.u32 %v6755_v59, 16  ;;  %v6761_v63 = vshrl.u32 %v6756_v34, 16 }
 0x804   :  { %vm6762_vm3 = vc.u32 %v6754_v26, %v6758_v37  ;;  %v6764_v61 = vadd.s32 %v6758_v37, %v6754_v26  ;;  %vm6784_vm1 = vc.u32 %v6776_v32, %v6780_v60  ;;  %v6786_v55 = vadd.s32 %v6780_v60, %v6776_v32 }
 0x805   :  { %v11088_v56 = vmul.f32 %v11081_v21, %v11027_v0  ;;  %v6763_v6 = vsel %vm6762_vm3, 1, %v7727_v2  ;;  %v6785_v58 = vsel %vm6784_vm1, 1, %v7727_v2  ;;  %v6740_v49 = vsel %vm6734_vm9, %v6737_v48, %v6739_v28 }
 0x806   :  { %v6765_v14 = vadd.s32 %v6763_v6, %v6757_v47  ;;  %vm6766_vm12 = vc.u32 %v6764_v61, %v6760_v57  ;;  %v6787_v31 = vadd.s32 %v6785_v58, %v6779_v45  ;;  %vm6788_vm2 = vc.u32 %v6786_v55, %v6782_v8 }
 0x807   :  { %v6859_v53 = vand.u32 2139095040, %v11088_v56  ;;  %v6767_v52 = vsel %vm6766_vm12, 1, %v7727_v2  ;;  %v6856_v44 = vand.u32 2147483647, %v11088_v56  ;;  %v6789_v30 = vsel %vm6788_vm2, 1, %v7727_v2 }
 0x808   :  { %v6769_v23 = vadd.s32 %v6767_v52, %v6765_v14  ;;  %v6781_v35 = vshrl.u32 %v6777_v12, 16  ;;  %v6791_v1 = vadd.s32 %v6789_v30, %v6787_v31  ;;  %v6403_v25 = vsel %vm6402_vm15, %v6401_v38, 0 }
 0x809   :  { %v6860_v0 = vshrl.u32 %v6859_v53, 23  ;;  %v6863_v17 = vand.u32 8388607, %v6856_v44  ;;  %v6783_v36 = vshrl.u32 %v6778_v46, 16  ;;  %v6790_v24 = vadd.s32 %v6786_v55, %v6782_v8 }
 0x80a   :  { %v6770_v43 = vadd.s32 %v6769_v23, %v6759_v3  ;;  %v6792_v59 = vadd.s32 %v6791_v1, %v6781_v35  ;;  %v6794_v37 = vmul.u32 %v11062_v18, %v6740_v49  ;;  %v11110_v48 = vand.u32 31, %v6403_v25 }
 0x80b   :  { %v7588_v11 = vadd.s32 4294967169, %v6860_v0  ;;  %v6864_v29 = vor.u32 8388608, %v6863_v17  ;;  %vm11175_vm2 = vcmp.le.f32.partialorder %v6701_v51, 0.7853982 }
 0x80c   :  { %v6771_v39 = vadd.s32 %v6770_v43, %v6761_v63  ;;  %v6793_v26 = vadd.s32 %v6792_v59, %v6783_v36 }
 0x80d   :  { %v6866_v5 = vadd.s32 1, %v7588_v11  ;;  %v11114_v32 = vshll.u32 %v6864_v29, 8 }
 0x80e   :  { %vm6796_vm10 = vc.u32 %v6771_v39, %v6790_v24  ;;  %v6797_v38 = vadd.s32 1, %v6793_v26 }
 0x80f   :  { %vm6867_vm6 = vcmp.gt.s32.totalorder %v6866_v5, 0  ;;  %v6905_v1 = vand.u32 65535, %v11114_v32 }
 0x810   :  { %v6868_v50 = vsel %vm6867_vm6, %v6866_v5, 0  ;;  %v6798_v45 = vsel %vm6796_vm10, %v6797_v38, %v6793_v26 }
 0x811   :  { %v6870_v34 = vand.u32 31, %v6868_v50  ;;  %v11112_v12 = vshrl.u32 %v6868_v50, 5  ;;  %v6799_v55 = vadd.s32 %v6798_v45, %v6794_v37 }
 0x813   :  { %v6871_v47 = vsub.s32 32, %v6870_v34  ;;  %v6882_v60 = vshll.u32 %v7731_v16, %v6870_v34  ;;  %v6885_v46 = vshll.u32 %v7732_v19, %v6870_v34  ;;  %v6873_v53 = vshll.u32 %v7728_v7, %v6870_v34 }
 0x814   :  { %v6876_v6 = vshll.u32 %v7729_v9, %v6870_v34  ;;  %v6879_v0 = vshll.u32 %v7730_v13, %v6870_v34  ;;  %vm6891_vm4 = vcmp.lt.s32.totalorder %v11112_v12, 4  ;;  %vm6888_vm13 = vcmp.lt.s32.totalorder %v11112_v12, 1 }
 0x815   :  { %v6883_v57 = vshrl.u32 %v7732_v19, %v6871_v47  ;;  %v6886_v18 = vshrl.u32 %v7733_v22, %v6871_v47  ;;  %v6874_v61 = vshrl.u32 %v7729_v9, %v6871_v47  ;;  %v6877_v8 = vshrl.u32 %v7730_v13, %v6871_v47 }
 0x816   :  { %v6880_v14 = vshrl.u32 %v7731_v16, %v6871_v47  ;;  %v6800_v17 = vadd.s32 536870912, %v6799_v55  ;;  %vm6890_vm14 = vcmp.lt.s32.totalorder %v11112_v12, 3  ;;  %vm6889_vm7 = vcmp.lt.s32.totalorder %v11112_v12, 2 }
 0x817   :  { %v6884_v58 = vor.u32 %v6883_v57, %v6882_v60  ;;  %v6887_v52 = vor.u32 %v6886_v18, %v6885_v46  ;;  %v6875_v31 = vor.u32 %v6874_v61, %v6873_v53  ;;  %v6878_v11 = vor.u32 %v6877_v8, %v6876_v6 }
 0x818   :  { %v6881_v28 = vor.u32 %v6880_v14, %v6879_v0  ;;  %v6801_v30 = vshrl.u32 %v6800_v17, 30  ;;  %v6872_v29 = vshrl.u32 %v7728_v7, %v6871_v47  ;;  %v6906_v46 = vshrl.u32 %v11114_v32, 16 }
 0x819   :  { %v6897_v3 = vsel %vm6891_vm4, %v6884_v58, 920167782  ;;  %v6901_v23 = vsel %vm6891_vm4, %v6887_v52, 1326507024  ;;  %v6896_v5 = vsel %vm6888_vm13, %v6875_v31, %v6878_v11  ;;  %v11152_v53 = vshrl.u32 %v6403_v25, 5 }
 0x81a   :  { %v6898_v63 = vsel %vm6890_vm14, %v6881_v28, %v6897_v3  ;;  %v6900_v43 = vsel %vm6888_vm13, %v6878_v11, %v6881_v28  ;;  %v6902_v35 = vsel %vm6890_vm14, %v6884_v58, %v6901_v23  ;;  %v6802_v34 = vshll.u32 %v6801_v30, 30 }
 0x81b   :  { %v6899_v49 = vsel %vm6889_vm7, %v6896_v5, %v6898_v63  ;;  %v6903_v50 = vsel %vm6889_vm7, %v6900_v43, %v6902_v35  ;;  %v6893_v26 = vsel %vm6891_vm4, %v6881_v28, 2102212464  ;;  %v11155_v47 = vsub.s32 32, %v11110_v48 }
 0x81c   :  { %v6929_v36 = vand.u32 65535, %v6899_v49  ;;  %v6930_v59 = vshrl.u32 %v6899_v49, 16  ;;  %v6907_v37 = vand.u32 65535, %v6903_v50  ;;  %v6908_v60 = vshrl.u32 %v6903_v50, 16 }
 0x81d   :  { %v6795_v57 = vadd.s32 %v6790_v24, %v6771_v39  ;;  %v6803_v18 = vsub.s32 %v6799_v55, %v6802_v34  ;;  %v6892_v61 = vsel %vm6888_vm13, %v6872_v29, %v6875_v31  ;;  %v6894_v45 = vsel %vm6890_vm14, %v6878_v11, %v6893_v26 }
 0x81e   :  { %v6932_v38 = vmul.u32 %v6930_v59, %v6905_v1  ;;  %v6910_v6 = vmul.u32 %v6908_v60, %v6905_v1  ;;  %v6911_v8 = vmul.u32 %v6907_v37, %v6906_v46  ;;  %v6933_v0 = vmul.u32 %v6929_v36, %v6906_v46 }
 0x81f   :  { %vm6804_vm8 = vcmp.lt.s32.totalorder %v6803_v18, 0  ;;  %v6805_v58 = vsub.s32 0, %v6803_v18  ;;  %v6909_v52 = vmul.u32 %v6907_v37, %v6905_v1  ;;  %v6825_v28 = vsub.s32 4, %v6801_v30 }
 0x820   :  { %v6935_v14 = vshll.u32 %v6932_v38, 16  ;;  %v6913_v25 = vshll.u32 %v6910_v6, 16  ;;  %v6912_v3 = vmul.u32 %v6908_v60, %v6906_v46  ;;  %v6931_v23 = vmul.u32 %v6929_v36, %v6905_v1 }
 0x821   :  { %v6934_v17 = vmul.u32 %v6930_v59, %v6906_v46  ;;  %v6806_v39 = vsel %vm6804_vm8, %v6805_v58, %v6803_v18  ;;  %v6915_v24 = vshll.u32 %v6911_v8, 16  ;;  %v6937_v43 = vshll.u32 %v6933_v0, 16 }
 0x822   :  { %vm6917_vm0 = vc.u32 %v6909_v52, %v6913_v25  ;;  %v6919_v55 = vadd.s32 %v6913_v25, %v6909_v52  ;;  %v6807_v31 = vclz %v6806_v39  ;;  %vm6939_vm9 = vc.u32 %v6931_v23, %v6935_v14 }
 0x823   :  { %v6918_v5 = vsel %vm6917_vm0, 1, %v7727_v2  ;;  %v6941_v11 = vadd.s32 %v6935_v14, %v6931_v23  ;;  %v6940_v49 = vsel %vm6939_vm9, 1, %v7727_v2  ;;  %v6895_v29 = vsel %vm6889_vm7, %v6892_v61, %v6894_v45 }
 0x824   :  { %v6920_v63 = vadd.s32 %v6918_v5, %v6912_v3  ;;  %vm6921_vm3 = vc.u32 %v6919_v55, %v6915_v24  ;;  %v7586_v35 = vadd.s32 4294967294, %v6807_v31  ;;  %v6942_v50 = vadd.s32 %v6940_v49, %v6934_v17 }
 0x825   :  { %v6922_v1 = vsel %vm6921_vm3, 1, %v7727_v2  ;;  %v11168_v36 = vsel %vm6703_vm11, %v6825_v28, %v6801_v30  ;;  %v6914_v59 = vshrl.u32 %v6910_v6, 16  ;;  %vm6943_vm1 = vc.u32 %v6941_v11, %v6937_v43 }
 0x826   :  { %v6924_v34 = vadd.s32 %v6922_v1, %v6920_v63  ;;  %vm7587_vm12 = vcmp.lt.s32.totalorder %v7586_v35, 0  ;;  %v6916_v26 = vshrl.u32 %v6911_v8, 16  ;;  %v6936_v37 = vshrl.u32 %v6932_v38, 16 }
 0x827   :  { %v6944_v60 = vsel %vm6943_vm1, 1, %v7727_v2  ;;  %v6810_v46 = vsel %vm7587_vm12, 0, %v7586_v35  ;;  %v6409_v12 = vshrl.u32 %v7729_v9, %v11155_v47  ;;  %v6938_v45 = vshrl.u32 %v6933_v0, 16 }
 0x828   :  { %v6925_v14 = vadd.s32 %v6924_v34, %v6914_v59  ;;  %v6946_v58 = vadd.s32 %v6944_v60, %v6942_v50  ;;  %v6811_v30 = vsub.s32 32, %v6810_v46  ;;  %v6815_v6 = vsub.s32 4294967266, %v6810_v46 }
 0x829   :  { %v6949_v8 = vmul.u32 %v11114_v32, %v6895_v29  ;;  %v11182_v52 = vadd.s32 %v6941_v11, %v6937_v43  ;;  %v6408_v28 = vshll.u32 %v7728_v7, %v11110_v48  ;;  %v6812_v3 = vshll.u32 %v6803_v18, %v6810_v46 }
 0x82a   :  { %v11180_v38 = vadd.s32 %v6925_v14, %v6916_v26  ;;  %v6947_v25 = vadd.s32 %v6946_v58, %v6936_v37  ;;  %v6813_v23 = vshrl.u32 %v6795_v57, %v6811_v30  ;;  %v6816_v17 = vadd.s32 127, %v6815_v6 }
 0x82b   :  { %v6412_v51 = vshrl.u32 %v7730_v13, %v11155_v47  ;;  %v11190_v0 = vor.u32 %v6409_v12, %v6408_v28  ;;  %v6411_v32 = vshll.u32 %v7729_v9, %v11110_v48  ;;  %v6414_v31 = vshll.u32 %v7730_v13, %v11110_v48 }
 0x82c   :  { %v6948_v39 = vadd.s32 %v6947_v25, %v6938_v45  ;;  %vm6951_vm15 = vc.u32 %v11180_v38, %v11182_v52  ;;  %v6814_v24 = vor.u32 %v6813_v23, %v6812_v3  ;;  %v6817_v55 = vshll.u32 %v6816_v17, 23 }
 0x82d   :  { %v6415_v57 = vshrl.u32 %v7731_v16, %v11155_v47  ;;  %v11198_v5 = vor.u32 %v6412_v51, %v6411_v32  ;;  %v6417_v11 = vshll.u32 %v7731_v16, %v11110_v48  ;;  %v6418_v63 = vshrl.u32 %v7732_v19, %v11155_v47 }
 0x82e   :  { %v6952_v18 = vadd.s32 1, %v6948_v39  ;;  %v6818_v43 = vor.u32 4788187, %v6817_v55  ;;  %v6420_v35 = vshll.u32 %v7732_v19, %v11110_v48  ;;  %v6421_v29 = vshrl.u32 %v7733_v22, %v11155_v47 }
 0x82f   :  { %v6416_v49 = vor.u32 %v6415_v57, %v6414_v31  ;;  %v6821_v1 = vcvt.s32.f32 %v6814_v24  ;;  %v6419_v59 = vor.u32 %v6418_v63, %v6417_v11  ;;  %vm6423_vm6 = vcmp.lt.s32.totalorder %v11152_v53, 1 }
 0x830   :  { %v6953_v50 = vsel %vm6951_vm15, %v6952_v18, %v6948_v39  ;;  %v6819_v34 = vand.u32 2147483647, %v6818_v43  ;;  %v6422_v37 = vor.u32 %v6421_v29, %v6420_v35  ;;  %vm6426_vm10 = vcmp.lt.s32.totalorder %v11152_v53, 4 }
 0x831   :  { %v6954_v26 = vadd.s32 %v6953_v50, %v6949_v8  ;;  %v6828_v48 = vsel %vm11175_vm2, 0, %v11168_v36  ;;  %vm6425_vm4 = vcmp.lt.s32.totalorder %v11152_v53, 3  ;;  %v6431_v60 = vsel %vm6423_vm6, %v11190_v0, %v11198_v5 }
 0x832   :  { %v6432_v46 = vsel %vm6426_vm10, %v6419_v59, 920167782  ;;  %v6822_v14 = vmul.f32 %v6821_v1, %v6819_v34  ;;  %v6435_v30 = vsel %vm6423_vm6, %v11198_v5, %v6416_v49  ;;  %v6436_v36 = vsel %vm6426_vm10, %v6422_v37, 1326507024 }
 0x833   :  { %v6955_v58 = vadd.s32 536870912, %v6954_v26  ;;  %v6433_v12 = vsel %vm6425_vm4, %v6416_v49, %v6432_v46  ;;  %v11232_v6 = vshll.u32 %v6399_v27, 8  ;;  %vm6424_vm13 = vcmp.lt.s32.totalorder %v11152_v53, 2 }
 0x834   :  { %v6823_v45 = vxor.u32 2147483648, %v6822_v14  ;;  %v6437_v25 = vsel %vm6425_vm4, %v6419_v59, %v6436_v36  ;;  %v6845_v28 = vadd.s32 3, %v6828_v48  ;;  %v11241_v3 = vsel %vm6424_vm13, %v6431_v60, %v6433_v12 }
 0x835   :  { %v11234_v8 = vshrl.u32 %v6955_v58, 30  ;;  %v6438_v23 = vsel %vm6424_vm13, %v6435_v30, %v6437_v25  ;;  %v6440_v39 = vand.u32 65535, %v11232_v6  ;;  %v6441_v32 = vshrl.u32 %v11232_v6, 16 }
 0x836   :  { %v6824_v4 = vsel %vm6703_vm11, %v6823_v45, %v6822_v14  ;;  %v6442_v17 = vand.u32 65535, %v6438_v23  ;;  %v6443_v24 = vshrl.u32 %v6438_v23, 16  ;;  %v6465_v57 = vshrl.u32 %v11241_v3, 16 }
 0x837   :  { %v6957_v27 = vshll.u32 %v11234_v8, 30  ;;  %v11251_v51 = vsel %vm11175_vm2, %v11033_v15, %v6824_v4  ;;  %v11260_v18 = vand.u32 3, %v6845_v28  ;;  %v6407_v11 = vshrl.u32 %v7728_v7, %v11155_v47 }
 0x838   :  { %v6829_v55 = vmul.f32 %v11251_v51, %v11251_v51  ;;  %v11264_v61 = vmul.u32 %v6443_v24, %v6440_v39  ;;  %v11266_v63 = vmul.u32 %v6442_v17, %v6441_v32  ;;  %v6428_v1 = vsel %vm6426_vm10, %v6416_v49, 2102212464 }
 0x839   :  { %v11257_v31 = vsub.s32 %v6954_v26, %v6957_v27  ;;  %v6444_v50 = vmul.u32 %v6442_v17, %v6440_v39  ;;  %v6464_v34 = vand.u32 65535, %v11241_v3  ;;  %v11275_v48 = vmul.u32 %v6465_v57, %v6440_v39 }
 0x83a   :  { %v6830_v43 = vmul.f32 -0.001358992, %v6829_v55  ;;  %v6837_v35 = vmul.f32 -0.00019511016, %v6829_v55  ;;  %v6448_v59 = vshll.u32 %v11264_v61, 16  ;;  %v6447_v46 = vmul.u32 %v6443_v24, %v6441_v32 }
 0x83b   :  { %vm6959_vm14 = vcmp.lt.s32.totalorder %v11257_v31, 0  ;;  %v6960_v29 = vsub.s32 0, %v11257_v31  ;;  %v6450_v30 = vshll.u32 %v11266_v63, 16  ;;  %v6950_v36 = vadd.s32 %v11182_v52, %v11180_v38 }
 0x83c   :  { %v6831_v26 = vadd.f32 0.041655596, %v6830_v43  ;;  %v6838_v47 = vadd.f32 0.008332121, %v6837_v35  ;;  %vm6452_vm7 = vc.u32 %v6444_v50, %v6448_v59  ;;  %v6454_v14 = vadd.s32 %v6448_v59, %v6444_v50 }
 0x83d   :  { %v6961_v37 = vsel %vm6959_vm14, %v6960_v29, %v11257_v31  ;;  %v6453_v49 = vsel %vm6452_vm7, 1, %v7727_v2  ;;  %v11284_v25 = vsel %vm6423_vm6, %v6407_v11, %v11190_v0  ;;  %vm6848_vm8 = vcmp.eq.s32.totalorder %v11260_v18, 0 }
 0x83e   :  { %v6962_v60 = vclz %v6961_v37  ;;  %v6832_v58 = vmul.f32 %v6831_v26, %v6829_v55  ;;  %v6839_v12 = vmul.f32 %v6838_v47, %v6829_v55  ;;  %v6455_v23 = vadd.s32 %v6453_v49, %v6447_v46 }
 0x83f   :  { %vm6456_vm11 = vc.u32 %v6454_v14, %v6450_v30  ;;  %vm6851_vm0 = vcmp.eq.s32.totalorder %v11260_v18, 2  ;;  %v6429_v4 = vsel %vm6425_vm4, %v11198_v5, %v6428_v1  ;;  %v6470_v52 = vshll.u32 %v11275_v48, 16 }
 0x840   :  { %v7589_v45 = vadd.s32 4294967294, %v6962_v60  ;;  %v6833_v28 = vadd.f32 -0.4999988, %v6832_v58  ;;  %v6840_v3 = vadd.f32 -0.16666654, %v6839_v12  ;;  %v6457_v38 = vsel %vm6456_vm11, 1, %v7727_v2 }
 0x841   :  { %vm6847_vm3 = vcmp.lt.s32.totalorder %v11260_v18, 2  ;;  %v6468_v24 = vmul.u32 %v6464_v34, %v6441_v32  ;;  %vm6858_vm1 = vcmp.lt.s32.totalorder %v11088_v56, 0  ;;  %vm6844_vm12 = vweird.f32 %v11033_v15 }
 0x842   :  { %vm7590_vm9 = vcmp.lt.s32.totalorder %v7589_v45, 0  ;;  %v6834_v27 = vmul.f32 %v6833_v28, %v6829_v55  ;;  %v6841_v0 = vmul.f32 %v6840_v3, %v6829_v55  ;;  %v6449_v35 = vshrl.u32 %v11264_v61, 16 }
 0x843   :  { %v6965_v17 = vsel %vm7590_vm9, 0, %v7589_v45  ;;  %v6466_v29 = vmul.u32 %v6464_v34, %v6440_v39  ;;  %v6459_v50 = vadd.s32 %v6457_v38, %v6455_v23  ;;  %v6469_v59 = vmul.u32 %v6465_v57, %v6441_v32 }
 0x844   :  { %v6966_v11 = vsub.s32 32, %v6965_v17  ;;  %v6970_v43 = vsub.s32 4294967266, %v6965_v17  ;;  %v6835_v5 = vadd.f32 1.0, %v6834_v27  ;;  %v6842_v1 = vadd.f32 1.0, %v6841_v0 }
 0x845   :  { %v6967_v26 = vshll.u32 %v11257_v31, %v6965_v17  ;;  %vm6474_vm2 = vc.u32 %v6466_v29, %v6470_v52  ;;  %v6472_v46 = vshll.u32 %v6468_v24, 16  ;;  %v6476_v30 = vadd.s32 %v6470_v52, %v6466_v29 }
 0x846   :  { %v6968_v55 = vshrl.u32 %v6950_v36, %v6966_v11  ;;  %v6971_v47 = vadd.s32 127, %v6970_v43  ;;  %v6843_v37 = vmul.f32 %v6842_v1, %v11251_v51  ;;  %v6852_v60 = vxor.u32 2147483648, %v6835_v5 }
 0x847   :  { %v6475_v14 = vsel %vm6474_vm2, 1, %v7727_v2  ;;  %v6980_v34 = vsub.s32 4, %v11234_v8  ;;  %v6460_v49 = vadd.s32 %v6459_v50, %v6449_v35  ;;  %v11303_v32 = vmul.f32 %v11081_v21, %v11022_v54 }
 0x848   :  { %v6969_v58 = vor.u32 %v6968_v55, %v6967_v26  ;;  %v6972_v12 = vshll.u32 %v6971_v47, 23  ;;  %v6477_v61 = vadd.s32 %v6475_v14, %v6469_v59  ;;  %v6849_v39 = vxor.u32 2147483648, %v6843_v37 }
 0x849   :  { %v6451_v57 = vshrl.u32 %v11266_v63, 16  ;;  %v6471_v51 = vshrl.u32 %v11275_v48, 16  ;;  %vm6478_vm15 = vc.u32 %v6476_v30, %v6472_v46  ;;  %v6853_v45 = vsel %vm6851_vm0, %v6852_v60, %v6843_v37 }
 0x84a   :  { %v6973_v31 = vor.u32 4788187, %v6972_v12  ;;  %v6850_v36 = vsel %vm6848_vm8, %v6835_v5, %v6849_v39  ;;  %v6479_v28 = vsel %vm6478_vm15, 1, %v7727_v2  ;;  %v6546_v3 = vand.u32 2147483647, %v11303_v32 }
 0x84b   :  { %v6854_v54 = vsel %vm6847_vm3, %v6850_v36, %v6853_v45  ;;  %v6976_v38 = vcvt.s32.f32 %v6969_v58  ;;  %v6481_v52 = vadd.s32 %v6479_v28, %v6477_v61  ;;  %v6981_v48 = vsel %vm6858_vm1, %v6980_v34, %v11234_v8 }
 0x84c   :  { %v6974_v23 = vand.u32 2147483647, %v6973_v31  ;;  %v6855_v63 = vsel %vm6844_vm12, nan, %v6854_v54  ;;  %v6461_v27 = vadd.s32 %v6460_v49, %v6451_v57  ;;  %v6549_v0 = vand.u32 2139095040, %v11303_v32 }
 0x84d   :  { %7033 = vmatpush.msrb.mxu0 %v6855_v63  ;;  %v6473_v11 = vshrl.u32 %v6468_v24, 16  ;;  %v6482_v43 = vadd.s32 %v6481_v52, %v6471_v51  ;;  %v6553_v18 = vand.u32 8388607, %v6546_v3  ;;  %v6480_v35 = vadd.s32 %v6476_v30, %v6472_v46 }
 0x84e   :  { %v6977_v17 = vmul.f32 %v6976_v38, %v6974_v23  ;;  %v6550_v29 = vshrl.u32 %v6549_v0, 23  ;;  %v11325_v15 = vmul.f32 %v11029_v33, %v11005_v41  ;;  %vm6857_vm6 = vcmp.le.f32.partialorder %v6856_v44, 0.7853982 }
 0x84f   :  { %v6430_v5 = vsel %vm6424_vm13, %v11284_v25, %v6429_v4  ;;  %v6483_v1 = vadd.s32 %v6482_v43, %v6473_v11  ;;  %v6983_v24 = vsel %vm6857_vm6, 0, %v6981_v48  ;;  %vm6486_vm10 = vc.u32 %v6461_v27, %v6480_v35 }
 0x850   :  { %v6978_v8 = vxor.u32 2147483648, %v6977_v17  ;;  %v7582_v50 = vadd.s32 4294967169, %v6550_v29  ;;  %v6554_v55 = vor.u32 8388608, %v6553_v18  ;;  %v6484_v47 = vmul.u32 %v11232_v6, %v6430_v5 }
 0x851   :  { %v6487_v26 = vadd.s32 1, %v6483_v1  ;;  %v6084_v44 = vand.u32 2139095040, %v11325_v15  ;;  %v7000_v46 = vadd.s32 3, %v6983_v24  ;;  %vm6393_vm13 = vcmp.lt.s32.totalorder %v11041_v42, 0 }
 0x852   :  { %v6979_v59 = vsel %vm6858_vm1, %v6978_v8, %v6977_v17  ;;  %v6556_v37 = vadd.s32 1, %v7582_v50  ;;  %v11337_v12 = vshll.u32 %v6554_v55, 8  ;;  %v11342_v6 = vadd.s32 %v6480_v35, %v6461_v27 }
 0x853   :  { %v6982_v41 = vsel %vm6857_vm6, %v11088_v56, %v6979_v59  ;;  %v6488_v53 = vsel %vm6486_vm10, %v6487_v26, %v6483_v1  ;;  %v6085_v39 = vshrl.u32 %v6084_v44, 23  ;;  %v11339_v31 = vand.u32 3, %v7000_v46 }
 0x854   :  { %v6984_v60 = vmul.f32 %v6982_v41, %v6982_v41  ;;  %v6489_v25 = vadd.s32 %v6488_v53, %v6484_v47  ;;  %vm6557_vm4 = vcmp.gt.s32.totalorder %v6556_v37, 0  ;;  %vm11346_vm14 = vcmp.le.f32.partialorder %v6391_v10, 0.7853982 }
 0x855   :  { %v6558_v58 = vsel %vm6557_vm4, %v6556_v37, 0  ;;  %v11351_v54 = vand.u32 65535, %v11337_v12  ;;  %v6081_v23 = vand.u32 2147483647, %v11325_v15  ;;  %v7573_v48 = vadd.s32 4294967169, %v6085_v39 }
 0x856   :  { %v6985_v4 = vmul.f32 -0.001358992, %v6984_v60  ;;  %v6992_v14 = vmul.f32 -0.00019511016, %v6984_v60  ;;  %v6490_v30 = vadd.s32 536870912, %v6489_v25  ;;  %v6560_v61 = vand.u32 31, %v6558_v58 }
 0x857   :  { %v11354_v63 = vshrl.u32 %v6558_v58, 5  ;;  %vm7006_vm7 = vcmp.eq.s32.totalorder %v11339_v31, 2  ;;  %vm7003_vm11 = vcmp.eq.s32.totalorder %v11339_v31, 0  ;;  %vm7002_vm8 = vcmp.lt.s32.totalorder %v11339_v31, 2 }
 0x858   :  { %v6986_v34 = vadd.f32 0.041655596, %v6985_v4  ;;  %v6993_v49 = vadd.f32 0.008332121, %v6992_v14  ;;  %v6491_v57 = vshrl.u32 %v6490_v30, 30  ;;  %v6561_v51 = vsub.s32 32, %v6560_v61 }
 0x859   :  { %v6563_v43 = vshll.u32 %v7728_v7, %v6560_v61  ;;  %v6566_v5 = vshll.u32 %v7729_v9, %v6560_v61  ;;  %v6569_v1 = vshll.u32 %v7730_v13, %v6560_v61  ;;  %vm6999_vm0 = vweird.f32 %v11088_v56 }
 0x85a   :  { %v6987_v36 = vmul.f32 %v6986_v34, %v6984_v60  ;;  %v6994_v45 = vmul.f32 %v6993_v49, %v6984_v60  ;;  %v6492_v38 = vshll.u32 %v6491_v57, 30  ;;  %v6515_v52 = vsub.s32 4, %v6491_v57 }
 0x85b   :  { %v6564_v17 = vshrl.u32 %v7729_v9, %v6561_v51  ;;  %v6567_v10 = vshrl.u32 %v7730_v13, %v6561_v51  ;;  %v6570_v18 = vshrl.u32 %v7731_v16, %v6561_v51  ;;  %v6573_v35 = vshrl.u32 %v7732_v19, %v6561_v51 }
 0x85c   :  { %v6988_v27 = vadd.f32 -0.4999988, %v6987_v36  ;;  %v6995_v0 = vadd.f32 -0.16666654, %v6994_v45  ;;  %v11360_v11 = vsub.s32 %v6489_v25, %v6492_v38  ;;  %v6516_v50 = vsel %vm6393_vm13, %v6515_v52, %v6491_v57 }
 0x85d   :  { %v6572_v59 = vshll.u32 %v7731_v16, %v6560_v61  ;;  %v6565_v47 = vor.u32 %v6564_v17, %v6563_v43  ;;  %v6568_v37 = vor.u32 %v6567_v10, %v6566_v5  ;;  %v6576_v53 = vshrl.u32 %v7733_v22, %v6561_v51 }
 0x85e   :  { %v6989_v29 = vmul.f32 %v6988_v27, %v6984_v60  ;;  %v6996_v8 = vmul.f32 %v6995_v0, %v6984_v60  ;;  %vm6494_vm9 = vcmp.lt.s32.totalorder %v11360_v11, 0  ;;  %v6495_v24 = vsub.s32 0, %v11360_v11 }
 0x85f   :  { %v6571_v60 = vor.u32 %v6570_v18, %v6569_v1  ;;  %v6574_v46 = vor.u32 %v6573_v35, %v6572_v59  ;;  %v6575_v58 = vshll.u32 %v7732_v19, %v6560_v61  ;;  %v6518_v30 = vsel %vm11346_vm14, 0, %v6516_v50 }
 0x860   :  { %v6990_v26 = vadd.f32 1.0, %v6989_v29  ;;  %v6997_v55 = vadd.f32 1.0, %v6996_v8  ;;  %v6496_v44 = vsel %vm6494_vm9, %v6495_v24, %v11360_v11  ;;  %v6562_v39 = vshrl.u32 %v7728_v7, %v6561_v51 }
 0x861   :  { %v6497_v14 = vclz %v6496_v44  ;;  %v11382_v34 = vand.u32 8388607, %v6081_v23  ;;  %v6091_v49 = vadd.s32 1, %v7573_v48  ;;  %v6577_v45 = vor.u32 %v6576_v53, %v6575_v58 }
 0x862   :  { %v6998_v25 = vmul.f32 %v6997_v55, %v6982_v41  ;;  %v7007_v4 = vxor.u32 2147483648, %v6990_v26  ;;  %vm6578_vm3 = vcmp.lt.s32.totalorder %v11354_v63, 1  ;;  %vm6580_vm1 = vcmp.lt.s32.totalorder %v11354_v63, 3 }
 0x863   :  { %v7580_v36 = vadd.s32 4294967294, %v6497_v14  ;;  %vm6581_vm12 = vcmp.lt.s32.totalorder %v11354_v63, 4  ;;  %v6586_v61 = vsel %vm6578_vm3, %v6565_v47, %v6568_v37  ;;  %vm6579_vm15 = vcmp.lt.s32.totalorder %v11354_v63, 2 }
 0x864   :  { %v7004_v57 = vxor.u32 2147483648, %v6998_v25  ;;  %v7008_v41 = vsel %vm7006_vm7, %v7007_v4, %v6998_v25  ;;  %v6583_v38 = vsel %vm6581_vm12, %v6571_v60, 2102212464  ;;  %v6587_v52 = vsel %vm6581_vm12, %v6574_v46, 920167782 }
 0x865   :  { %vm7581_vm2 = vcmp.lt.s32.totalorder %v7580_v36, 0  ;;  %v6588_v0 = vsel %vm6580_vm1, %v6571_v60, %v6587_v52  ;;  %v6590_v18 = vsel %vm6578_vm3, %v6568_v37, %v6571_v60  ;;  %v6582_v35 = vsel %vm6578_vm3, %v6562_v39, %v6565_v47 }
 0x866   :  { %v7005_v51 = vsel %vm7003_vm11, %v6990_v26, %v7004_v57  ;;  %v6500_v27 = vsel %vm7581_vm2, 0, %v7580_v36  ;;  %v6584_v31 = vsel %vm6580_vm1, %v6568_v37, %v6583_v38  ;;  %v6589_v29 = vsel %vm6579_vm15, %v6586_v61, %v6588_v0 }
 0x867   :  { %v7009_v48 = vsel %vm7002_vm8, %v7005_v51, %v7008_v41  ;;  %v6501_v10 = vsub.s32 32, %v6500_v27  ;;  %v6505_v43 = vsub.s32 4294967266, %v6500_v27  ;;  %v6591_v8 = vsel %vm6581_vm12, %v6577_v45, 1326507024 }
 0x868   :  { %v7010_v17 = vsel %vm6999_vm0, nan, %v7009_v48  ;;  %v6502_v56 = vshll.u32 %v11360_v11, %v6500_v27  ;;  %v6592_v24 = vsel %vm6580_vm1, %v6574_v46, %v6591_v8  ;;  %v6619_v59 = vand.u32 65535, %v6589_v29 }
 0x869   :  { %7053 = vmatpush.msrb.mxu1 %v7010_v17  ;;  %v6503_v5 = vshrl.u32 %v11342_v6, %v6501_v10  ;;  %v6506_v1 = vadd.s32 127, %v6505_v43  ;;  %v6593_v50 = vsel %vm6579_vm15, %v6590_v18, %v6592_v24  ;;  %v6620_v26 = vshrl.u32 %v6589_v29, 16 }
 0x86a   :  { %vm6092_vm6 = vcmp.gt.s32.totalorder %v6091_v49, 0  ;;  %v6597_v37 = vand.u32 65535, %v6593_v50  ;;  %v6598_v44 = vshrl.u32 %v6593_v50, 16  ;;  %v11420_v60 = vadd.s32 3, %v6518_v30 }
 0x86b   :  { %v6504_v55 = vor.u32 %v6503_v5, %v6502_v56  ;;  %v6507_v47 = vshll.u32 %v6506_v1, 23  ;;  %v6596_v11 = vshrl.u32 %v11337_v12, 16  ;;  %v6622_v6 = vmul.u32 %v6620_v26, %v11351_v54 }
 0x86c   :  { %v6089_v53 = vor.u32 8388608, %v11382_v34  ;;  %v11427_v46 = vsel %vm6579_vm15, %v6582_v35, %v6584_v31  ;;  %v6600_v4 = vmul.u32 %v6598_v44, %v11351_v54  ;;  %v6093_v14 = vsel %vm6092_vm6, %v6091_v49, 0 }
 0x86d   :  { %v6508_v25 = vor.u32 4788187, %v6507_v47  ;;  %v6601_v58 = vmul.u32 %v6597_v37, %v6596_v11  ;;  %v6621_v39 = vmul.u32 %v6619_v59, %v11351_v54  ;;  %v6623_v57 = vmul.u32 %v6619_v59, %v6596_v11 }
 0x86e   :  { %v6625_v30 = vshll.u32 %v6622_v6, 16  ;;  %v6511_v45 = vcvt.s32.f32 %v6504_v55  ;;  %v6599_v41 = vmul.u32 %v6597_v37, %v11351_v54  ;;  %v6603_v61 = vshll.u32 %v6600_v4, 16 }
 0x86f   :  { %v6509_v36 = vand.u32 2147483647, %v6508_v25  ;;  %v6602_v51 = vmul.u32 %v6598_v44, %v6596_v11  ;;  %v6605_v38 = vshll.u32 %v6601_v58, 16  ;;  %v6624_v52 = vmul.u32 %v6620_v26, %v6596_v11 }
 0x870   :  { %vm6629_vm10 = vc.u32 %v6621_v39, %v6625_v30  ;;  %vm6607_vm4 = vc.u32 %v6599_v41, %v6603_v61  ;;  %v6609_v48 = vadd.s32 %v6603_v61, %v6599_v41  ;;  %v6627_v0 = vshll.u32 %v6623_v57, 16 }
 0x871   :  { %v6512_v63 = vmul.f32 %v6511_v45, %v6509_v36  ;;  %v6630_v27 = vsel %vm6629_vm10, 1, %v7727_v2  ;;  %v6608_v49 = vsel %vm6607_vm4, 1, %v7727_v2  ;;  %v6631_v17 = vadd.s32 %v6625_v30, %v6621_v39 }
 0x872   :  { %v6632_v10 = vadd.s32 %v6630_v27, %v6624_v52  ;;  %v6610_v18 = vadd.s32 %v6608_v49, %v6602_v51  ;;  %vm6611_vm7 = vc.u32 %v6609_v48, %v6605_v38  ;;  %v6095_v35 = vand.u32 31, %v6093_v14 }
 0x873   :  { %v6513_v43 = vxor.u32 2147483648, %v6512_v63  ;;  %v6604_v54 = vshrl.u32 %v6600_v4, 16  ;;  %v6612_v31 = vsel %vm6611_vm7, 1, %v7727_v2  ;;  %vm6633_vm11 = vc.u32 %v6631_v17, %v6627_v0 }
 0x874   :  { %v6639_v29 = vmul.u32 %v11337_v12, %v11427_v46  ;;  %v6614_v56 = vadd.s32 %v6612_v31, %v6610_v18  ;;  %v6634_v5 = vsel %vm6633_vm11, 1, %v7727_v2  ;;  %v11440_v1 = vsub.s32 32, %v6095_v35 }
 0x875   :  { %v6514_v8 = vsel %vm6393_vm13, %v6513_v43, %v6512_v63  ;;  %v6606_v50 = vshrl.u32 %v6601_v58, 16  ;;  %v6626_v59 = vshrl.u32 %v6622_v6, 16  ;;  %v6636_v26 = vadd.s32 %v6634_v5, %v6632_v10 }
 0x876   :  { %v6517_v24 = vsel %vm11346_vm14, %v11041_v42, %v6514_v8  ;;  %v6615_v47 = vadd.s32 %v6614_v56, %v6604_v54  ;;  %v6628_v37 = vshrl.u32 %v6623_v57, 16  ;;  %v11445_v44 = vshrl.u32 %v6093_v14, 5 }
 0x877   :  { %v6519_v55 = vmul.f32 %v6517_v24, %v6517_v24  ;;  %v11447_v12 = vadd.s32 %v6631_v17, %v6627_v0  ;;  %v6637_v11 = vadd.s32 %v6636_v26, %v6626_v59  ;;  %v6098_v25 = vshll.u32 %v7728_v7, %v6095_v35 }
 0x878   :  { %v6099_v46 = vshrl.u32 %v7729_v9, %v11440_v1  ;;  %v11452_v28 = vadd.s32 %v6615_v47, %v6606_v50  ;;  %v6102_v6 = vshrl.u32 %v7730_v13, %v11440_v1  ;;  %v6101_v57 = vshll.u32 %v7729_v9, %v6095_v35 }
 0x879   :  { %v6520_v4 = vmul.f32 -0.001358992, %v6519_v55  ;;  %v6527_v39 = vmul.f32 -0.00019511016, %v6519_v55  ;;  %v6638_v58 = vadd.s32 %v6637_v11, %v6628_v37  ;;  %v6104_v14 = vshll.u32 %v7730_v13, %v6095_v35 }
 0x87a   :  { %v6105_v30 = vshrl.u32 %v7731_v16, %v11440_v1  ;;  %vm6641_vm13 = vc.u32 %v11452_v28, %v11447_v12  ;;  %v6107_v41 = vshll.u32 %v7731_v16, %v6095_v35  ;;  %v6108_v51 = vshrl.u32 %v7732_v19, %v11440_v1 }
 0x87b   :  { %v6521_v36 = vadd.f32 0.041655596, %v6520_v4  ;;  %v6528_v45 = vadd.f32 0.008332121, %v6527_v39  ;;  %v6642_v61 = vadd.s32 1, %v6638_v58  ;;  %v6110_v38 = vshll.u32 %v7732_v19, %v6095_v35 }
 0x87c   :  { %v6111_v52 = vshrl.u32 %v7733_v22, %v11440_v1  ;;  %v6100_v27 = vor.u32 %v6099_v46, %v6098_v25  ;;  %v11468_v49 = vor.u32 %v6102_v6, %v6101_v57  ;;  %v6106_v17 = vor.u32 %v6105_v30, %v6104_v14 }
 0x87d   :  { %v6522_v63 = vmul.f32 %v6521_v36, %v6519_v55  ;;  %v6529_v48 = vmul.f32 %v6528_v45, %v6519_v55  ;;  %v6643_v0 = vsel %vm6641_vm13, %v6642_v61, %v6638_v58  ;;  %v6109_v10 = vor.u32 %v6108_v51, %v6107_v41 }
 0x87e   :  { %v6112_v43 = vor.u32 %v6111_v52, %v6110_v38  ;;  %v6644_v31 = vadd.s32 %v6643_v0, %v6639_v29  ;;  %vm6116_vm14 = vcmp.lt.s32.totalorder %v11445_v44, 4  ;;  %v6536_v8 = vand.u32 3, %v11420_v60 }
 0x87f   :  { %v6523_v18 = vadd.f32 -0.4999988, %v6522_v63  ;;  %v6530_v54 = vadd.f32 -0.16666654, %v6529_v48  ;;  %vm6113_vm8 = vcmp.lt.s32.totalorder %v11445_v44, 1  ;;  %vm6115_vm0 = vcmp.lt.s32.totalorder %v11445_v44, 3 }
 0x880   :  { %v6122_v35 = vsel %vm6116_vm14, %v6109_v10, 920167782  ;;  %v6645_v50 = vadd.s32 536870912, %v6644_v31  ;;  %v6121_v59 = vsel %vm6113_vm8, %v6100_v27, %v11468_v49  ;;  %vm6114_vm9 = vcmp.lt.s32.totalorder %v11445_v44, 2 }
 0x881   :  { %v6524_v56 = vmul.f32 %v6523_v18, %v6519_v55  ;;  %v6531_v5 = vmul.f32 %v6530_v54, %v6519_v55  ;;  %v6123_v29 = vsel %vm6115_vm0, %v6106_v17, %v6122_v35  ;;  %v6125_v60 = vsel %vm6113_vm8, %v11468_v49, %v6106_v17 }
 0x882   :  { %v6126_v26 = vsel %vm6116_vm14, %v6112_v43, 1326507024  ;;  %v11487_v55 = vshrl.u32 %v6645_v50, 30  ;;  %v11491_v11 = vshll.u32 %v6089_v53, 8  ;;  %v6124_v25 = vsel %vm6114_vm9, %v6121_v59, %v6123_v29 }
 0x883   :  { %v6525_v47 = vadd.f32 1.0, %v6524_v56  ;;  %v6532_v37 = vadd.f32 1.0, %v6531_v5  ;;  %v6127_v46 = vsel %vm6115_vm0, %v6109_v10, %v6126_v26  ;;  %vm6537_vm3 = vcmp.lt.s32.totalorder %v6536_v8, 2 }
 0x884   :  { %v6647_v6 = vshll.u32 %v11487_v55, 30  ;;  %vm6538_vm1 = vcmp.eq.s32.totalorder %v6536_v8, 0  ;;  %vm6541_vm12 = vcmp.eq.s32.totalorder %v6536_v8, 2  ;;  %v6128_v58 = vsel %vm6114_vm9, %v6125_v60, %v6127_v46 }
 0x885   :  { %v6533_v4 = vmul.f32 %v6532_v37, %v6517_v24  ;;  %v6542_v39 = vxor.u32 2147483648, %v6525_v47  ;;  %v6130_v53 = vand.u32 65535, %v11491_v11  ;;  %v6155_v14 = vshrl.u32 %v6124_v25, 16 }
 0x886   :  { %v6648_v34 = vsub.s32 %v6644_v31, %v6647_v6  ;;  %v6131_v30 = vshrl.u32 %v11491_v11, 16  ;;  %v6132_v36 = vand.u32 65535, %v6128_v58  ;;  %v6133_v45 = vshrl.u32 %v6128_v58, 16 }
 0x887   :  { %v6539_v57 = vxor.u32 2147483648, %v6533_v4  ;;  %v6154_v41 = vand.u32 65535, %v6124_v25  ;;  %v6543_v61 = vsel %vm6541_vm12, %v6542_v39, %v6533_v4  ;;  %vm6534_vm15 = vweird.f32 %v11041_v42 }
 0x888   :  { %vm6649_vm2 = vcmp.lt.s32.totalorder %v6648_v34, 0  ;;  %v6650_v51 = vsub.s32 0, %v6648_v34  ;;  %v6135_v52 = vmul.u32 %v6133_v45, %v6130_v53  ;;  %v6136_v63 = vmul.u32 %v6132_v36, %v6131_v30 }
 0x889   :  { %v6540_v24 = vsel %vm6538_vm1, %v6525_v47, %v6539_v57  ;;  %v6097_v10 = vshrl.u32 %v7728_v7, %v11440_v1  ;;  %v6157_v43 = vmul.u32 %v6155_v14, %v6130_v53  ;;  %v6134_v54 = vmul.u32 %v6132_v36, %v6130_v53 }
 0x88a   :  { %v6544_v38 = vsel %vm6537_vm3, %v6540_v24, %v6543_v61  ;;  %v6651_v0 = vsel %vm6649_vm2, %v6650_v51, %v6648_v34  ;;  %v6138_v31 = vshll.u32 %v6135_v52, 16  ;;  %v6158_v35 = vmul.u32 %v6154_v41, %v6131_v30 }
 0x88b   :  { %v6545_v48 = vsel %vm6534_vm15, nan, %v6544_v38  ;;  %v6652_v18 = vclz %v6651_v0  ;;  %v6640_v56 = vadd.s32 %v11447_v12, %v11452_v28  ;;  %v6117_v42 = vsel %vm6113_vm8, %v6097_v10, %v6100_v27 }
 0x88c   :  { %7034 = vmatpush.msrb.mxu0 %v6545_v48  ;;  %v6118_v8 = vsel %vm6116_vm14, %v6106_v17, 2102212464  ;;  %v6137_v5 = vmul.u32 %v6133_v45, %v6131_v30  ;;  %v6140_v59 = vshll.u32 %v6136_v63, 16  ;;  %vm6142_vm6 = vc.u32 %v6134_v54, %v6138_v31 }
 0x88d   :  { %v7583_v50 = vadd.s32 4294967294, %v6652_v18  ;;  %v6144_v1 = vadd.s32 %v6138_v31, %v6134_v54  ;;  %v6139_v29 = vshrl.u32 %v6135_v52, 16  ;;  %v6143_v60 = vsel %vm6142_vm6, 1, %v7727_v2 }
 0x88e   :  { %v6156_v26 = vmul.u32 %v6154_v41, %v6130_v53  ;;  %v6160_v47 = vshll.u32 %v6157_v43, 16  ;;  %v6145_v37 = vadd.s32 %v6143_v60, %v6137_v5  ;;  %v6162_v12 = vshll.u32 %v6158_v35, 16 }
 0x88f   :  { %vm7584_vm10 = vcmp.lt.s32.totalorder %v7583_v50, 0  ;;  %vm6146_vm4 = vc.u32 %v6144_v1, %v6140_v59  ;;  %v6159_v39 = vmul.u32 %v6155_v14, %v6131_v30  ;;  %v6119_v58 = vsel %vm6115_vm0, %v11468_v49, %v6118_v8 }
 0x890   :  { %v6655_v28 = vsel %vm7584_vm10, 0, %v7583_v50  ;;  %v6147_v27 = vsel %vm6146_vm4, 1, %v7727_v2  ;;  %vm6164_vm7 = vc.u32 %v6156_v26, %v6160_v47  ;;  %v6166_v25 = vadd.s32 %v6160_v47, %v6156_v26 }
 0x891   :  { %v6656_v17 = vsub.s32 32, %v6655_v28  ;;  %v6660_v46 = vsub.s32 4294967266, %v6655_v28  ;;  %v6149_v4 = vadd.s32 %v6147_v27, %v6145_v37  ;;  %v6657_v6 = vshll.u32 %v6648_v34, %v6655_v28 }
 0x892   :  { %v6165_v57 = vsel %vm6164_vm7, 1, %v7727_v2  ;;  %vm6168_vm11 = vc.u32 %v6166_v25, %v6162_v12  ;;  %v6670_v24 = vsub.s32 4, %v11487_v55  ;;  %v6141_v61 = vshrl.u32 %v6136_v63, 16 }
 0x893   :  { %v6658_v53 = vshrl.u32 %v6640_v56, %v6656_v17  ;;  %v6661_v36 = vadd.s32 127, %v6660_v46  ;;  %v6150_v45 = vadd.s32 %v6149_v4, %v6139_v29  ;;  %v6167_v41 = vadd.s32 %v6165_v57, %v6159_v39 }
 0x894   :  { %v6169_v51 = vsel %vm6168_vm11, 1, %v7727_v2  ;;  %v11522_v14 = vmul.f32 %v11081_v21, %v11018_v40  ;;  %v6161_v38 = vshrl.u32 %v6157_v43, 16  ;;  %vm6548_vm13 = vcmp.lt.s32.totalorder %v11303_v32, 0 }
 0x895   :  { %v6659_v34 = vor.u32 %v6658_v53, %v6657_v6  ;;  %v6662_v30 = vshll.u32 %v6661_v36, 23  ;;  %v6171_v49 = vadd.s32 %v6169_v51, %v6167_v41  ;;  %v6151_v52 = vadd.s32 %v6150_v45, %v6141_v61 }
 0x896   :  { %v6236_v48 = vand.u32 2147483647, %v11522_v14  ;;  %v6239_v0 = vand.u32 2139095040, %v11522_v14  ;;  %v6163_v18 = vshrl.u32 %v6158_v35, 16  ;;  %v6671_v54 = vsel %vm6548_vm13, %v6670_v24, %v11487_v55 }
 0x897   :  { %v6663_v10 = vor.u32 4788187, %v6662_v30  ;;  %v6172_v63 = vadd.s32 %v6171_v49, %v6161_v38  ;;  %v6120_v40 = vsel %vm6114_vm9, %v6117_v42, %v6119_v58  ;;  %v6170_v31 = vadd.s32 %v6166_v25, %v6162_v12 }
 0x898   :  { %v6240_v43 = vshrl.u32 %v6239_v0, 23  ;;  %v6666_v8 = vcvt.s32.f32 %v6659_v34  ;;  %v6243_v50 = vand.u32 8388607, %v6236_v48  ;;  %vm6547_vm8 = vcmp.le.f32.partialorder %v6546_v3, 0.7853982 }
 0x899   :  { %v6664_v56 = vand.u32 2147483647, %v6663_v10  ;;  %v6173_v5 = vadd.s32 %v6172_v63, %v6163_v18  ;;  %vm6176_vm14 = vc.u32 %v6151_v52, %v6170_v31  ;;  %v6673_v29 = vsel %vm6547_vm8, 0, %v6671_v54 }
 0x89a   :  { %v7576_v59 = vadd.s32 4294967169, %v6240_v43  ;;  %v6174_v55 = vmul.u32 %v11491_v11, %v6120_v40  ;;  %v11539_v42 = vmul.f32 %v11029_v33, %v11007_v20  ;;  %v6244_v47 = vor.u32 8388608, %v6243_v50 }
 0x89b   :  { %v6667_v35 = vmul.f32 %v6666_v8, %v6664_v56  ;;  %v6177_v1 = vadd.s32 1, %v6173_v5  ;;  %v6690_v28 = vadd.s32 3, %v6673_v29  ;;  %v11551_v57 = vadd.s32 %v6170_v31, %v6151_v52 }
 0x89c   :  { %v6246_v44 = vadd.s32 1, %v7576_v59  ;;  %v5774_v11 = vand.u32 2139095040, %v11539_v42  ;;  %v11545_v4 = vshll.u32 %v6244_v47, 8  ;;  %v5771_v36 = vand.u32 2147483647, %v11539_v42 }
 0x89d   :  { %v6668_v60 = vxor.u32 2147483648, %v6667_v35  ;;  %v6178_v26 = vsel %vm6176_vm14, %v6177_v1, %v6173_v5  ;;  %v11549_v58 = vand.u32 3, %v6690_v28  ;;  %vm6083_vm9 = vcmp.lt.s32.totalorder %v11325_v15, 0 }
 0x89e   :  { %v6179_v37 = vadd.s32 %v6178_v26, %v6174_v55  ;;  %vm6247_vm0 = vcmp.gt.s32.totalorder %v6246_v44, 0  ;;  %v5775_v45 = vshrl.u32 %v5774_v11, 23  ;;  %v11558_v51 = vand.u32 65535, %v11545_v4 }
 0x89f   :  { %v6669_v12 = vsel %vm6548_vm13, %v6668_v60, %v6667_v35  ;;  %v6248_v3 = vsel %vm6247_vm0, %v6246_v44, 0  ;;  %vm6696_vm3 = vcmp.eq.s32.totalorder %v11549_v58, 2  ;;  %vm6693_vm12 = vcmp.eq.s32.totalorder %v11549_v58, 0 }
 0x8a0   :  { %v6672_v27 = vsel %vm6547_vm8, %v11303_v32, %v6669_v12  ;;  %v6180_v25 = vadd.s32 536870912, %v6179_v37  ;;  %v6250_v17 = vand.u32 31, %v6248_v3  ;;  %v11555_v61 = vshrl.u32 %v6248_v3, 5 }
 0x8a1   :  { %v6674_v46 = vmul.f32 %v6672_v27, %v6672_v27  ;;  %vm6692_vm2 = vcmp.lt.s32.totalorder %v11549_v58, 2  ;;  %vm6689_vm15 = vweird.f32 %v11303_v32  ;;  %vm11591_vm6 = vcmp.le.f32.partialorder %v6081_v23, 0.7853982 }
 0x8a2   :  { %v6181_v20 = vshrl.u32 %v6180_v25, 30  ;;  %v11547_v33 = vsub.s32 32, %v6250_v17  ;;  %v6253_v30 = vshll.u32 %v7728_v7, %v6250_v17  ;;  %v6256_v49 = vshll.u32 %v7729_v9, %v6250_v17 }
 0x8a3   :  { %v6675_v39 = vmul.f32 -0.001358992, %v6674_v46  ;;  %v6682_v6 = vmul.f32 -0.00019511016, %v6674_v46  ;;  %v6259_v18 = vshll.u32 %v7730_v13, %v6250_v17  ;;  %v6262_v8 = vshll.u32 %v7731_v16, %v6250_v17 }
 0x8a4   :  { %v6182_v53 = vshll.u32 %v6181_v20, 30  ;;  %v6254_v38 = vshrl.u32 %v7729_v9, %v11547_v33  ;;  %v6257_v10 = vshrl.u32 %v7730_v13, %v11547_v33  ;;  %v6260_v54 = vshrl.u32 %v7731_v16, %v11547_v33 }
 0x8a5   :  { %v6676_v41 = vadd.f32 0.041655596, %v6675_v39  ;;  %v6683_v24 = vadd.f32 0.008332121, %v6682_v6  ;;  %v6263_v40 = vshrl.u32 %v7732_v19, %v11547_v33  ;;  %v6205_v56 = vsub.s32 4, %v6181_v20 }
 0x8a6   :  { %v11560_v34 = vsub.s32 %v6179_v37, %v6182_v53  ;;  %v11579_v50 = vor.u32 %v6254_v38, %v6253_v30  ;;  %v6265_v59 = vshll.u32 %v7732_v19, %v6250_v17  ;;  %v6266_v35 = vshrl.u32 %v7733_v22, %v11547_v33 }
 0x8a7   :  { %v6677_v52 = vmul.f32 %v6676_v41, %v6674_v46  ;;  %v6684_v0 = vmul.f32 %v6683_v24, %v6674_v46  ;;  %v11585_v44 = vor.u32 %v6257_v10, %v6256_v49  ;;  %v6261_v60 = vor.u32 %v6260_v54, %v6259_v18 }
 0x8a8   :  { %vm6184_vm1 = vcmp.lt.s32.totalorder %v11560_v34, 0  ;;  %v6185_v63 = vsub.s32 0, %v11560_v34  ;;  %v6264_v26 = vor.u32 %v6263_v40, %v6262_v8  ;;  %v6267_v47 = vor.u32 %v6266_v35, %v6265_v59 }
 0x8a9   :  { %v6678_v31 = vadd.f32 -0.4999988, %v6677_v52  ;;  %v6685_v43 = vadd.f32 -0.16666654, %v6684_v0  ;;  %v6286_v37 = vshrl.u32 %v11545_v4, 16  ;;  %v7567_v25 = vadd.s32 4294967169, %v5775_v45 }
 0x8aa   :  { %v6186_v5 = vsel %vm6184_vm1, %v6185_v63, %v11560_v34  ;;  %v11597_v11 = vsel %vm6083_vm9, %v6205_v56, %v6181_v20  ;;  %vm6268_vm10 = vcmp.lt.s32.totalorder %v11555_v61, 1  ;;  %vm6269_vm4 = vcmp.lt.s32.totalorder %v11555_v61, 2 }
 0x8ab   :  { %v6679_v1 = vmul.f32 %v6678_v31, %v6674_v46  ;;  %v6686_v29 = vmul.f32 %v6685_v43, %v6674_v46  ;;  %v6187_v55 = vclz %v6186_v5  ;;  %vm6271_vm7 = vcmp.lt.s32.totalorder %v11555_v61, 4 }
 0x8ac   :  { %v6276_v23 = vsel %vm6268_vm10, %v11579_v50, %v11585_v44  ;;  %v6277_v53 = vsel %vm6271_vm7, %v6264_v26, 920167782  ;;  %v6280_v20 = vsel %vm6268_vm10, %v11585_v44, %v6261_v60  ;;  %v6281_v45 = vsel %vm6271_vm7, %v6267_v47, 1326507024 }
 0x8ad   :  { %v6680_v12 = vadd.f32 1.0, %v6679_v1  ;;  %v6687_v28 = vadd.f32 1.0, %v6686_v29  ;;  %v7574_v3 = vadd.s32 4294967294, %v6187_v55  ;;  %vm6270_vm13 = vcmp.lt.s32.totalorder %v11555_v61, 3 }
 0x8ae   :  { %v6278_v49 = vsel %vm6270_vm13, %v6261_v60, %v6277_v53  ;;  %v6282_v52 = vsel %vm6270_vm13, %v6264_v26, %v6281_v45  ;;  %v11635_v1 = vand.u32 8388607, %v5771_v36  ;;  %v6208_v58 = vsel %vm11591_vm6, 0, %v11597_v11 }
 0x8af   :  { %v6688_v46 = vmul.f32 %v6687_v28, %v6672_v27  ;;  %v6697_v39 = vxor.u32 2147483648, %v6680_v12  ;;  %vm7575_vm11 = vcmp.lt.s32.totalorder %v7574_v3, 0  ;;  %v6279_v18 = vsel %vm6269_vm4, %v6276_v23, %v6278_v49 }
 0x8b0   :  { %v6190_v6 = vsel %vm7575_vm11, 0, %v7574_v3  ;;  %v6283_v63 = vsel %vm6269_vm4, %v6280_v20, %v6282_v52  ;;  %v6309_v8 = vand.u32 65535, %v6279_v18  ;;  %v6310_v5 = vshrl.u32 %v6279_v18, 16 }
 0x8b1   :  { %v6694_v41 = vxor.u32 2147483648, %v6688_v46  ;;  %v6698_v27 = vsel %vm6696_vm3, %v6697_v39, %v6688_v46  ;;  %v6191_v24 = vsub.s32 32, %v6190_v6  ;;  %v6192_v30 = vshll.u32 %v11560_v34, %v6190_v6 }
 0x8b2   :  { %v6195_v38 = vsub.s32 4294967266, %v6190_v6  ;;  %v6287_v40 = vand.u32 65535, %v6283_v63  ;;  %v6288_v31 = vshrl.u32 %v6283_v63, 16  ;;  %v6252_v32 = vshrl.u32 %v7728_v7, %v11547_v33 }
 0x8b3   :  { %v6695_v0 = vsel %vm6693_vm12, %v6680_v12, %v6694_v41  ;;  %v6193_v10 = vshrl.u32 %v11551_v57, %v6191_v24  ;;  %v6312_v29 = vmul.u32 %v6310_v5, %v11558_v51  ;;  %v5781_v55 = vadd.s32 1, %v7567_v25 }
 0x8b4   :  { %v6699_v34 = vsel %vm6692_vm2, %v6695_v0, %v6698_v27  ;;  %v6196_v54 = vadd.s32 127, %v6195_v38  ;;  %v6290_v59 = vmul.u32 %v6288_v31, %v11558_v51  ;;  %v6291_v35 = vmul.u32 %v6287_v40, %v6286_v37 }
 0x8b5   :  { %v6700_v43 = vsel %vm6689_vm15, nan, %v6699_v34  ;;  %v6194_v56 = vor.u32 %v6193_v10, %v6192_v30  ;;  %v6289_v12 = vmul.u32 %v6287_v40, %v11558_v51  ;;  %v6292_v3 = vmul.u32 %v6288_v31, %v6286_v37 }
 0x8b6   :  { %7054 = vmatpush.msrb.mxu1 %v6700_v43  ;;  %v6197_v57 = vshll.u32 %v6196_v54, 23  ;;  %v6293_v28 = vshll.u32 %v6290_v59, 16  ;;  %v6311_v46 = vmul.u32 %v6309_v8, %v11558_v51  ;;  %v6313_v39 = vmul.u32 %v6309_v8, %v6286_v37 }
 0x8b7   :  { %v6201_v47 = vcvt.s32.f32 %v6194_v56  ;;  %v6315_v23 = vshll.u32 %v6312_v29, 16  ;;  %v6295_v53 = vshll.u32 %v6291_v35, 16  ;;  %v6273_v33 = vsel %vm6271_vm7, %v6261_v60, 2102212464 }
 0x8b8   :  { %v6198_v26 = vor.u32 4788187, %v6197_v57  ;;  %vm6297_vm14 = vc.u32 %v6289_v12, %v6293_v28  ;;  %v6299_v11 = vadd.s32 %v6293_v28, %v6289_v12  ;;  %v6314_v25 = vmul.u32 %v6310_v5, %v6286_v37 }
 0x8b9   :  { %v6298_v20 = vsel %vm6297_vm14, 1, %v7727_v2  ;;  %vm6319_vm8 = vc.u32 %v6311_v46, %v6315_v23  ;;  %v6317_v24 = vshll.u32 %v6313_v39, 16  ;;  %v6321_v30 = vadd.s32 %v6315_v23, %v6311_v46 }
 0x8ba   :  { %v6199_v6 = vand.u32 2147483647, %v6198_v26  ;;  %v6300_v41 = vadd.s32 %v6298_v20, %v6292_v3  ;;  %vm6301_vm0 = vc.u32 %v6299_v11, %v6295_v53  ;;  %v6320_v27 = vsel %vm6319_vm8, 1, %v7727_v2 }
 0x8bb   :  { %v6302_v51 = vsel %vm6301_vm0, 1, %v7727_v2  ;;  %v6322_v38 = vadd.s32 %v6320_v27, %v6314_v25  ;;  %v6294_v52 = vshrl.u32 %v6290_v59, 16  ;;  %vm5782_vm3 = vcmp.gt.s32.totalorder %v5781_v55, 0 }
 0x8bc   :  { %v6202_v45 = vmul.f32 %v6201_v47, %v6199_v6  ;;  %v6304_v0 = vadd.s32 %v6302_v51, %v6300_v41  ;;  %v6272_v60 = vsel %vm6268_vm10, %v6252_v32, %v11579_v50  ;;  %v6274_v37 = vsel %vm6270_vm13, %v11585_v44, %v6273_v33 }
 0x8bd   :  { %vm6323_vm1 = vc.u32 %v6321_v30, %v6317_v24  ;;  %v5783_v10 = vsel %vm5782_vm3, %v5781_v55, 0  ;;  %v6296_v63 = vshrl.u32 %v6291_v35, 16  ;;  %v6316_v31 = vshrl.u32 %v6312_v29, 16 }
 0x8be   :  { %v6203_v49 = vxor.u32 2147483648, %v6202_v45  ;;  %v6305_v34 = vadd.s32 %v6304_v0, %v6294_v52  ;;  %v6324_v54 = vsel %vm6323_vm1, 1, %v7727_v2  ;;  %v5785_v50 = vand.u32 31, %v5783_v10 }
 0x8bf   :  { %v6326_v43 = vadd.s32 %v6324_v54, %v6322_v38  ;;  %v6275_v44 = vsel %vm6269_vm4, %v6272_v60, %v6274_v37  ;;  %v6318_v5 = vshrl.u32 %v6313_v39, 16  ;;  %v5779_v59 = vor.u32 8388608, %v11635_v1 }
 0x8c0   :  { %v6204_v18 = vsel %vm6083_vm9, %v6203_v49, %v6202_v45  ;;  %v11664_v8 = vadd.s32 %v6305_v34, %v6296_v63  ;;  %v11667_v35 = vsub.s32 32, %v5785_v50  ;;  %v6225_v26 = vadd.s32 3, %v6208_v58 }
 0x8c1   :  { %v6207_v40 = vsel %vm11591_vm6, %v11325_v15, %v6204_v18  ;;  %v6327_v57 = vadd.s32 %v6326_v43, %v6316_v31  ;;  %v11669_v17 = vadd.s32 %v6321_v30, %v6317_v24  ;;  %v6329_v47 = vmul.u32 %v11545_v4, %v6275_v44 }
 0x8c2   :  { %v6209_v56 = vmul.f32 %v6207_v40, %v6207_v40  ;;  %v5791_v12 = vshll.u32 %v7729_v9, %v5785_v50  ;;  %v5792_v61 = vshrl.u32 %v7730_v13, %v11667_v35  ;;  %v5795_v1 = vshrl.u32 %v7731_v16, %v11667_v35 }
 0x8c3   :  { %v6328_v29 = vadd.s32 %v6327_v57, %v6318_v5  ;;  %vm6331_vm9 = vc.u32 %v11664_v8, %v11669_v17  ;;  %v11679_v58 = vshrl.u32 %v5783_v10, 5  ;;  %v5789_v39 = vshrl.u32 %v7729_v9, %v11667_v35 }
 0x8c4   :  { %v6210_v32 = vmul.f32 -0.001358992, %v6209_v56  ;;  %v6217_v55 = vmul.f32 -0.00019511016, %v6209_v56  ;;  %v5794_v4 = vshll.u32 %v7730_v13, %v5785_v50  ;;  %v11684_v53 = vor.u32 %v5792_v61, %v5791_v12 }
 0x8c5   :  { %v6332_v46 = vadd.s32 1, %v6328_v29  ;;  %v5798_v11 = vshrl.u32 %v7732_v19, %v11667_v35  ;;  %v5797_v20 = vshll.u32 %v7731_v16, %v5785_v50  ;;  %v5800_v25 = vshll.u32 %v7732_v19, %v5785_v50 }
 0x8c6   :  { %v6211_v28 = vadd.f32 0.041655596, %v6210_v32  ;;  %v6218_v3 = vadd.f32 0.008332121, %v6217_v55  ;;  %v5801_v45 = vshrl.u32 %v7733_v22, %v11667_v35  ;;  %v11692_v24 = vor.u32 %v5795_v1, %v5794_v4 }
 0x8c7   :  { %v6333_v33 = vsel %vm6331_vm9, %v6332_v46, %v6328_v29  ;;  %v6226_v30 = vand.u32 3, %v6225_v26  ;;  %v5788_v38 = vshll.u32 %v7728_v7, %v5785_v50  ;;  %v5799_v49 = vor.u32 %v5798_v11, %v5797_v20 }
 0x8c8   :  { %v6212_v23 = vmul.f32 %v6211_v28, %v6209_v56  ;;  %v6219_v6 = vmul.f32 %v6218_v3, %v6209_v56  ;;  %v6334_v51 = vadd.s32 %v6333_v33, %v6329_v47  ;;  %v5802_v52 = vor.u32 %v5801_v45, %v5800_v25 }
 0x8c9   :  { %vm5806_vm12 = vcmp.lt.s32.totalorder %v11679_v58, 4  ;;  %v11696_v10 = vor.u32 %v5789_v39, %v5788_v38  ;;  %vm5803_vm2 = vcmp.lt.s32.totalorder %v11679_v58, 1  ;;  %vm5805_vm15 = vcmp.lt.s32.totalorder %v11679_v58, 3 }
 0x8ca   :  { %v6213_v41 = vadd.f32 -0.4999988, %v6212_v23  ;;  %v6220_v27 = vadd.f32 -0.16666654, %v6219_v6  ;;  %v6335_v37 = vadd.s32 536870912, %v6334_v51  ;;  %v5815_v31 = vsel %vm5803_vm2, %v11684_v53, %v11692_v24 }
 0x8cb   :  { %v5816_v18 = vsel %vm5806_vm12, %v5802_v52, 1326507024  ;;  %vm6224_vm6 = vweird.f32 %v11325_v15  ;;  %v5812_v43 = vsel %vm5806_vm12, %v5799_v49, 920167782  ;;  %vm5804_vm10 = vcmp.lt.s32.totalorder %v11679_v58, 2 }
 0x8cc   :  { %v6214_v0 = vmul.f32 %v6213_v41, %v6209_v56  ;;  %v6221_v60 = vmul.f32 %v6220_v27, %v6209_v56  ;;  %v11702_v54 = vshrl.u32 %v6335_v37, 30  ;;  %v5817_v50 = vsel %vm5805_vm15, %v5799_v49, %v5816_v18 }
 0x8cd   :  { %v11713_v56 = vshll.u32 %v5779_v59, 8  ;;  %vm6227_vm4 = vcmp.lt.s32.totalorder %v6226_v30, 2  ;;  %vm6228_vm7 = vcmp.eq.s32.totalorder %v6226_v30, 0  ;;  %vm6231_vm11 = vcmp.eq.s32.totalorder %v6226_v30, 2 }
 0x8ce   :  { %v6215_v63 = vadd.f32 1.0, %v6214_v0  ;;  %v6222_v34 = vadd.f32 1.0, %v6221_v60  ;;  %v6337_v57 = vshll.u32 %v11702_v54, 30  ;;  %v5818_v32 = vsel %vm5804_vm10, %v5815_v31, %v5817_v50 }
 0x8cf   :  { %v5811_v59 = vsel %vm5803_vm2, %v11696_v10, %v11684_v53  ;;  %v5820_v29 = vand.u32 65535, %v11713_v56  ;;  %v5821_v47 = vshrl.u32 %v11713_v56, 16  ;;  %v5822_v12 = vand.u32 65535, %v5818_v32 }
 0x8d0   :  { %v6223_v44 = vmul.f32 %v6222_v34, %v6207_v40  ;;  %v6232_v5 = vxor.u32 2147483648, %v6215_v63  ;;  %v6338_v26 = vsub.s32 %v6334_v51, %v6337_v57  ;;  %v5813_v40 = vsel %vm5805_vm15, %v11692_v24, %v5812_v43 }
 0x8d1   :  { %v5823_v61 = vshrl.u32 %v5818_v32, 16  ;;  %v5814_v39 = vsel %vm5804_vm10, %v5811_v59, %v5813_v40  ;;  %v5826_v23 = vmul.u32 %v5822_v12, %v5821_v47  ;;  %v5824_v20 = vmul.u32 %v5822_v12, %v5820_v29 }
 0x8d2   :  { %v6229_v55 = vxor.u32 2147483648, %v6223_v44  ;;  %v6233_v3 = vsel %vm6231_vm11, %v6232_v5, %v6223_v44  ;;  %vm6339_vm13 = vcmp.lt.s32.totalorder %v6338_v26, 0  ;;  %v6340_v1 = vsub.s32 0, %v6338_v26 }
 0x8d3   :  { %v5825_v4 = vmul.u32 %v5823_v61, %v5820_v29  ;;  %v5827_v45 = vmul.u32 %v5823_v61, %v5821_v47  ;;  %v5830_v41 = vshll.u32 %v5826_v23, 16  ;;  %v5844_v27 = vand.u32 65535, %v5814_v39 }
 0x8d4   :  { %v6230_v28 = vsel %vm6228_vm7, %v6215_v63, %v6229_v55  ;;  %v6341_v11 = vsel %vm6339_vm13, %v6340_v1, %v6338_v26  ;;  %v5845_v38 = vshrl.u32 %v5814_v39, 16  ;;  %v11737_v18 = vmul.f32 %v11081_v21, %v11020_v62 }
 0x8d5   :  { %v6234_v46 = vsel %vm6227_vm4, %v6230_v28, %v6233_v3  ;;  %v6342_v33 = vclz %v6341_v11  ;;  %v5828_v25 = vshll.u32 %v5825_v4, 16  ;;  %v5848_v37 = vmul.u32 %v5844_v27, %v5821_v47 }
 0x8d6   :  { %v6235_v6 = vsel %vm6224_vm6, nan, %v6234_v46  ;;  %v5847_v0 = vmul.u32 %v5845_v38, %v5820_v29  ;;  %v6330_v63 = vadd.s32 %v11669_v17, %v11664_v8  ;;  %v5787_v50 = vshrl.u32 %v7728_v7, %v11667_v35 }
 0x8d7   :  { %7035 = vmatpush.msrb.mxu0 %v6235_v6  ;;  %v7577_v51 = vadd.s32 4294967294, %v6342_v33  ;;  %vm5832_vm14 = vc.u32 %v5824_v20, %v5828_v25  ;;  %v5834_v30 = vadd.s32 %v5828_v25, %v5824_v20  ;;  %v5829_v44 = vshrl.u32 %v5825_v4, 16 }
 0x8d8   :  { %v5833_v49 = vsel %vm5832_vm14, 1, %v7727_v2  ;;  %v5846_v5 = vmul.u32 %v5844_v27, %v5820_v29  ;;  %v5850_v57 = vshll.u32 %v5847_v0, 16  ;;  %v5849_v40 = vmul.u32 %v5845_v38, %v5821_v47 }
 0x8d9   :  { %vm7578_vm8 = vcmp.lt.s32.totalorder %v7577_v51, 0  ;;  %v5835_v52 = vadd.s32 %v5833_v49, %v5827_v45  ;;  %vm5836_vm0 = vc.u32 %v5834_v30, %v5830_v41  ;;  %v5852_v12 = vshll.u32 %v5848_v37, 16 }
 0x8da   :  { %v6345_v15 = vsel %vm7578_vm8, 0, %v7577_v51  ;;  %v5837_v60 = vsel %vm5836_vm0, 1, %v7727_v2  ;;  %vm5854_vm3 = vc.u32 %v5846_v5, %v5850_v57  ;;  %v5856_v62 = vadd.s32 %v5850_v57, %v5846_v5 }
 0x8db   :  { %v6346_v34 = vsub.s32 32, %v6345_v15  ;;  %v6350_v31 = vsub.s32 4294967266, %v6345_v15  ;;  %v5839_v43 = vadd.s32 %v5837_v60, %v5835_v52  ;;  %v6347_v32 = vshll.u32 %v6338_v26, %v6345_v15 }
 0x8dc   :  { %v5929_v21 = vand.u32 2139095040, %v11737_v18  ;;  %v5855_v28 = vsel %vm5854_vm3, 1, %v7727_v2  ;;  %v5808_v35 = vsel %vm5806_vm12, %v11692_v24, 2102212464  ;;  %vm5858_vm1 = vc.u32 %v5856_v62, %v5852_v12 }
 0x8dd   :  { %v6348_v55 = vshrl.u32 %v6330_v63, %v6346_v34  ;;  %v6351_v59 = vadd.s32 127, %v6350_v31  ;;  %v5840_v17 = vadd.s32 %v5839_v43, %v5829_v44  ;;  %v5857_v29 = vadd.s32 %v5855_v28, %v5849_v40 }
 0x8de   :  { %v5930_v26 = vshrl.u32 %v5929_v21, 23  ;;  %v6360_v47 = vsub.s32 4, %v11702_v54  ;;  %v5831_v1 = vshrl.u32 %v5826_v23, 16  ;;  %v5859_v46 = vsel %vm5858_vm1, 1, %v7727_v2 }
 0x8df   :  { %v6349_v61 = vor.u32 %v6348_v55, %v6347_v32  ;;  %v6352_v8 = vshll.u32 %v6351_v59, 23  ;;  %v5807_v39 = vsel %vm5803_vm2, %v5787_v50, %v11696_v10  ;;  %v5851_v4 = vshrl.u32 %v5847_v0, 16 }
 0x8e0   :  { %v5861_v6 = vadd.s32 %v5859_v46, %v5857_v29  ;;  %v7570_v11 = vadd.s32 4294967169, %v5930_v26  ;;  %v5809_v24 = vsel %vm5805_vm15, %v11684_v53, %v5808_v35  ;;  %v11756_v25 = vadd.s32 %v5840_v17, %v5831_v1 }
 0x8e1   :  { %v6353_v3 = vor.u32 4788187, %v6352_v8  ;;  %v6356_v20 = vcvt.s32.f32 %v6349_v61  ;;  %vm6238_vm9 = vcmp.lt.s32.totalorder %v11522_v14, 0  ;;  %v5853_v23 = vshrl.u32 %v5848_v37, 16 }
 0x8e2   :  { %v5862_v45 = vadd.s32 %v5861_v6, %v5851_v4  ;;  %v5936_v41 = vadd.s32 1, %v7570_v11  ;;  %v6361_v10 = vsel %vm6238_vm9, %v6360_v47, %v11702_v54  ;;  %v11762_v51 = vadd.s32 %v5856_v62, %v5852_v12 }
 0x8e3   :  { %v6354_v33 = vand.u32 2147483647, %v6353_v3  ;;  %v5810_v30 = vsel %vm5804_vm10, %v5807_v39, %v5809_v24  ;;  %vm6237_vm2 = vcmp.le.f32.partialorder %v6236_v48, 0.7853982  ;;  %v5926_v15 = vand.u32 2147483647, %v11737_v18 }
 0x8e4   :  { %v5863_v38 = vadd.s32 %v5862_v45, %v5853_v23  ;;  %vm5937_vm12 = vcmp.gt.s32.totalorder %v5936_v41, 0  ;;  %vm5866_vm15 = vc.u32 %v11756_v25, %v11762_v51  ;;  %v6363_v52 = vsel %vm6237_vm2, 0, %v6361_v10 }
 0x8e5   :  { %v6357_v27 = vmul.f32 %v6356_v20, %v6354_v33  ;;  %v5938_v49 = vsel %vm5937_vm12, %v5936_v41, 0  ;;  %v5864_v58 = vmul.u32 %v11713_v56, %v5810_v30  ;;  %v6380_v31 = vadd.s32 3, %v6363_v52 }
 0x8e6   :  { %v5867_v0 = vadd.s32 1, %v5863_v38  ;;  %v5940_v54 = vand.u32 31, %v5938_v49  ;;  %v5933_v50 = vand.u32 8388607, %v5926_v15  ;;  %v11779_v44 = vshrl.u32 %v5938_v49, 5 }
 0x8e7   :  { %v6358_v53 = vxor.u32 2147483648, %v6357_v27  ;;  %v6381_v46 = vand.u32 3, %v6380_v31  ;;  %vm6379_vm11 = vweird.f32 %v11522_v14 }
 0x8e8   :  { %v5868_v63 = vsel %vm5866_vm15, %v5867_v0, %v5863_v38  ;;  %v11775_v34 = vsub.s32 32, %v5940_v54  ;;  %v5943_v59 = vshll.u32 %v7728_v7, %v5940_v54  ;;  %v5946_v40 = vshll.u32 %v7729_v9, %v5940_v54 }
 0x8e9   :  { %v6359_v60 = vsel %vm6238_vm9, %v6358_v53, %v6357_v27  ;;  %v5869_v43 = vadd.s32 %v5868_v63, %v5864_v58  ;;  %v5952_v62 = vshll.u32 %v7731_v16, %v5940_v54  ;;  %v5949_v28 = vshll.u32 %v7730_v13, %v5940_v54 }
 0x8ea   :  { %v6362_v37 = vsel %vm6237_vm2, %v11522_v14, %v6359_v60  ;;  %v5944_v5 = vshrl.u32 %v7729_v9, %v11775_v34  ;;  %v5947_v57 = vshrl.u32 %v7730_v13, %v11775_v34  ;;  %v5950_v12 = vshrl.u32 %v7731_v16, %v11775_v34 }
 0x8eb   :  { %v6364_v48 = vmul.f32 %v6362_v37, %v6362_v37  ;;  %v5870_v55 = vadd.s32 536870912, %v5869_v43  ;;  %v5953_v21 = vshrl.u32 %v7732_v19, %v11775_v34  ;;  %v5956_v3 = vshrl.u32 %v7733_v22, %v11775_v34 }
 0x8ec   :  { %v11795_v35 = vor.u32 %v5944_v5, %v5943_v59  ;;  %v11797_v29 = vor.u32 %v5947_v57, %v5946_v40  ;;  %v5934_v4 = vor.u32 8388608, %v5933_v50  ;;  %v11802_v6 = vor.u32 %v5950_v12, %v5949_v28 }
 0x8ed   :  { %v6365_v56 = vmul.f32 -0.001358992, %v6364_v48  ;;  %v6372_v32 = vmul.f32 -0.00019511016, %v6364_v48  ;;  %v11792_v17 = vshrl.u32 %v5870_v55, 30  ;;  %v5954_v26 = vor.u32 %v5953_v21, %v5952_v62 }
 0x8ee   :  { %v5955_v11 = vshll.u32 %v7732_v19, %v5940_v54  ;;  %vm5958_vm6 = vcmp.lt.s32.totalorder %v11779_v44, 1  ;;  %vm5961_vm10 = vcmp.lt.s32.totalorder %v11779_v44, 4  ;;  %vm5960_vm4 = vcmp.lt.s32.totalorder %v11779_v44, 3 }
 0x8ef   :  { %v6366_v61 = vadd.f32 0.041655596, %v6365_v56  ;;  %v6373_v8 = vadd.f32 0.008332121, %v6372_v32  ;;  %v5872_v39 = vshll.u32 %v11792_v17, 30  ;;  %v5966_v45 = vsel %vm5958_vm6, %v11795_v35, %v11797_v29 }
 0x8f0   :  { %v5957_v23 = vor.u32 %v5956_v3, %v5955_v11  ;;  %v5967_v41 = vsel %vm5961_vm10, %v5954_v26, 920167782  ;;  %v11818_v53 = vshll.u32 %v5934_v4, 8  ;;  %vm5959_vm13 = vcmp.lt.s32.totalorder %v11779_v44, 2 }
 0x8f1   :  { %v6367_v47 = vmul.f32 %v6366_v61, %v6364_v48  ;;  %v6374_v1 = vmul.f32 %v6373_v8, %v6364_v48  ;;  %v5873_v24 = vsub.s32 %v5869_v43, %v5872_v39  ;;  %v5968_v38 = vsel %vm5960_vm4, %v11802_v6, %v5967_v41 }
 0x8f2   :  { %v5969_v60 = vsel %vm5959_vm13, %v5966_v45, %v5968_v38  ;;  %v5970_v58 = vsel %vm5958_vm6, %v11797_v29, %v11802_v6  ;;  %v5971_v63 = vsel %vm5961_vm10, %v5957_v23, 1326507024  ;;  %vm6382_vm14 = vcmp.lt.s32.totalorder %v6381_v46, 2 }
 0x8f3   :  { %v6368_v33 = vadd.f32 -0.4999988, %v6367_v47  ;;  %v6375_v20 = vadd.f32 -0.16666654, %v6374_v1  ;;  %vm5874_vm7 = vcmp.lt.s32.totalorder %v5873_v24, 0  ;;  %v5875_v30 = vsub.s32 0, %v5873_v24 }
 0x8f4   :  { %v5972_v43 = vsel %vm5960_vm4, %v5954_v26, %v5971_v63  ;;  %vm6383_vm8 = vcmp.eq.s32.totalorder %v6381_v46, 0  ;;  %vm6386_vm0 = vcmp.eq.s32.totalorder %v6381_v46, 2  ;;  %v5865_v50 = vadd.s32 %v11762_v51, %v11756_v25 }
 0x8f5   :  { %v6369_v27 = vmul.f32 %v6368_v33, %v6364_v48  ;;  %v6376_v10 = vmul.f32 %v6375_v20, %v6364_v48  ;;  %v5876_v0 = vsel %vm5874_vm7, %v5875_v30, %v5873_v24  ;;  %v5973_v56 = vsel %vm5959_vm13, %v5970_v58, %v5972_v43 }
 0x8f6   :  { %v5877_v54 = vclz %v5876_v0  ;;  %v5975_v32 = vand.u32 65535, %v11818_v53  ;;  %v6000_v55 = vshrl.u32 %v5969_v60, 16  ;;  %v5978_v59 = vshrl.u32 %v5973_v56, 16 }
 0x8f7   :  { %v6370_v49 = vadd.f32 1.0, %v6369_v27  ;;  %v6377_v52 = vadd.f32 1.0, %v6376_v10  ;;  %v5999_v40 = vand.u32 65535, %v5969_v60  ;;  %v5976_v61 = vshrl.u32 %v11818_v53, 16 }
 0x8f8   :  { %v7568_v5 = vadd.s32 4294967294, %v5877_v54  ;;  %v6002_v28 = vmul.u32 %v6000_v55, %v5975_v32  ;;  %v5980_v3 = vmul.u32 %v5978_v59, %v5975_v32  ;;  %vm5773_vm15 = vcmp.lt.s32.totalorder %v11539_v42, 0 }
 0x8f9   :  { %v6378_v48 = vmul.f32 %v6377_v52, %v6362_v37  ;;  %v6387_v31 = vxor.u32 2147483648, %v6370_v49  ;;  %v5977_v37 = vand.u32 65535, %v5973_v56  ;;  %v6003_v11 = vmul.u32 %v5999_v40, %v5976_v61 }
 0x8fa   :  { %vm7569_vm3 = vcmp.lt.s32.totalorder %v7568_v5, 0  ;;  %v5983_v20 = vshll.u32 %v5980_v3, 16  ;;  %v6001_v23 = vmul.u32 %v5999_v40, %v5975_v32  ;;  %v5982_v46 = vmul.u32 %v5978_v59, %v5976_v61 }
 0x8fb   :  { %v6384_v57 = vxor.u32 2147483648, %v6378_v48  ;;  %v6388_v62 = vsel %vm6386_vm0, %v6387_v31, %v6378_v48  ;;  %v5880_v21 = vsel %vm7569_vm3, 0, %v7568_v5  ;;  %v5981_v47 = vmul.u32 %v5977_v37, %v5976_v61 }
 0x8fc   :  { %v5881_v25 = vsub.s32 32, %v5880_v21  ;;  %v5885_v51 = vsub.s32 4294967266, %v5880_v21  ;;  %v5882_v1 = vshll.u32 %v5873_v24, %v5880_v21  ;;  %v5979_v33 = vmul.u32 %v5977_v37, %v5975_v32 }
 0x8fd   :  { %v6385_v12 = vsel %vm6383_vm8, %v6370_v49, %v6384_v57  ;;  %v6005_v27 = vshll.u32 %v6002_v28, 16  ;;  %v5985_v10 = vshll.u32 %v5981_v47, 16  ;;  %v6004_v38 = vmul.u32 %v6000_v55, %v5976_v61 }
 0x8fe   :  { %v6389_v8 = vsel %vm6382_vm14, %v6385_v12, %v6388_v62  ;;  %v5883_v39 = vshrl.u32 %v5865_v50, %v5881_v25  ;;  %v5886_v4 = vadd.s32 127, %v5885_v51  ;;  %vm5987_vm1 = vc.u32 %v5979_v33, %v5983_v20 }
 0x8ff   :  { %v6390_v26 = vsel %vm6379_vm11, nan, %v6389_v8  ;;  %v5989_v30 = vadd.s32 %v5983_v20, %v5979_v33  ;;  %v5988_v49 = vsel %vm5987_vm1, 1, %v7727_v2  ;;  %v6007_v52 = vshll.u32 %v6003_v11, 16 }
 0x900   :  { %7055 = vmatpush.msrb.mxu1 %v6390_v26  ;;  %v5884_v45 = vor.u32 %v5883_v39, %v5882_v1  ;;  %v5887_v41 = vshll.u32 %v5886_v4, 23  ;;  %vm6009_vm9 = vc.u32 %v6001_v23, %v6005_v27  ;;  %v5990_v24 = vadd.s32 %v5988_v49, %v5982_v46 }
 0x901   :  { %vm5991_vm12 = vc.u32 %v5989_v30, %v5985_v10  ;;  %v6010_v0 = vsel %vm6009_vm9, 1, %v7727_v2  ;;  %v6011_v54 = vadd.s32 %v6005_v27, %v6001_v23  ;;  %v5963_v31 = vsel %vm5961_vm10, %v11802_v6, 2102212464 }
 0x902   :  { %v5888_v14 = vor.u32 4788187, %v5887_v41  ;;  %v5891_v58 = vcvt.s32.f32 %v5884_v45  ;;  %v5992_v63 = vsel %vm5991_vm12, 1, %v7727_v2  ;;  %v6012_v48 = vadd.s32 %v6010_v0, %v6004_v38 }
 0x903   :  { %v5984_v43 = vshrl.u32 %v5980_v3, 16  ;;  %v5994_v50 = vadd.s32 %v5992_v63, %v5990_v24  ;;  %vm6013_vm2 = vc.u32 %v6011_v54, %v6007_v52  ;;  %v5942_v57 = vshrl.u32 %v7728_v7, %v11775_v34 }
 0x904   :  { %v5889_v60 = vand.u32 2147483647, %v5888_v14  ;;  %v6014_v56 = vsel %vm6013_vm2, 1, %v7727_v2  ;;  %v5986_v32 = vshrl.u32 %v5981_v47, 16  ;;  %v6006_v37 = vshrl.u32 %v6002_v28, 16 }
 0x905   :  { %v5995_v55 = vadd.s32 %v5994_v50, %v5984_v43  ;;  %v6016_v59 = vadd.s32 %v6014_v56, %v6012_v48  ;;  %v5962_v12 = vsel %vm5958_vm6, %v5942_v57, %v11795_v35  ;;  %v5964_v6 = vsel %vm5960_vm4, %v11797_v29, %v5963_v31 }
 0x906   :  { %v5892_v5 = vmul.f32 %v5891_v58, %v5889_v60  ;;  %v6008_v21 = vshrl.u32 %v6003_v11, 16  ;;  %vm11858_vm10 = vcmp.le.f32.partialorder %v5771_v36, 0.7853982  ;;  %v6015_v25 = vadd.s32 %v6011_v54, %v6007_v52 }
 0x907   :  { %v5996_v62 = vadd.s32 %v5995_v55, %v5986_v32  ;;  %v6017_v34 = vadd.s32 %v6016_v59, %v6006_v37  ;;  %v5895_v35 = vsub.s32 4, %v11792_v17  ;;  %v5965_v51 = vsel %vm5959_vm13, %v5962_v12, %v5964_v6 }
 0x908   :  { %v5893_v40 = vxor.u32 2147483648, %v5892_v5  ;;  %v6019_v1 = vmul.u32 %v11818_v53, %v5965_v51  ;;  %vm5914_vm14 = vweird.f32 %v11539_v42  ;;  %vm5928_vm0 = vcmp.lt.s32.totalorder %v11737_v18, 0 }
 0x909   :  { %v6018_v28 = vadd.s32 %v6017_v34, %v6008_v21  ;;  %vm6021_vm6 = vc.u32 %v5996_v62, %v6015_v25  ;;  %v5896_v39 = vsel %vm5773_vm15, %v5895_v35, %v11792_v17  ;;  %v6020_v32 = vadd.s32 %v6015_v25, %v5996_v62  ;;  %v7011_v34 = vld [vmem:[#allocation7 + $0xc0] sm:$0x1] }
 0x90a   :  { %v5894_v8 = vsel %vm5773_vm15, %v5893_v40, %v5892_v5  ;;  %v5898_v44 = vsel %vm11858_vm10, 0, %v5896_v39  ;;  %vm5927_vm3 = vcmp.le.f32.partialorder %v5926_v15, 0.7853982  ;;  %vm6069_vm2 = vweird.f32 %v11737_v18 }
 0x90b   :  { %v5897_v29 = vsel %vm11858_vm10, %v11539_v42, %v5894_v8  ;;  %v6022_v36 = vadd.s32 1, %v6018_v28  ;;  %v5915_v30 = vadd.s32 3, %v5898_v44 }
 0x90c   :  { %v5899_v26 = vmul.f32 %v5897_v29, %v5897_v29 }
 0x90d   :  { %v6023_v4 = vsel %vm6021_vm6, %v6022_v36, %v6018_v28  ;;  %v5916_v24 = vand.u32 3, %v5915_v30 }
 0x90e   :  { %v5900_v3 = vmul.f32 -0.001358992, %v5899_v26  ;;  %v5907_v47 = vmul.f32 -0.00019511016, %v5899_v26  ;;  %v6024_v20 = vadd.s32 %v6023_v4, %v6019_v1 }
 0x90f   :  { %vm5918_vm7 = vcmp.eq.s32.totalorder %v5916_v24, 0  ;;  %vm5921_vm11 = vcmp.eq.s32.totalorder %v5916_v24, 2  ;;  %vm5917_vm13 = vcmp.lt.s32.totalorder %v5916_v24, 2 }
 0x910   :  { %v5901_v11 = vadd.f32 0.041655596, %v5900_v3  ;;  %v5908_v33 = vadd.f32 0.008332121, %v5907_v47  ;;  %v6025_v41 = vadd.s32 536870912, %v6024_v20 }
 0x912   :  { %v5902_v23 = vmul.f32 %v5901_v11, %v5899_v26  ;;  %v5909_v45 = vmul.f32 %v5908_v33, %v5899_v26  ;;  %v6026_v10 = vshrl.u32 %v6025_v41, 30 }
 0x914   :  { %v5903_v46 = vadd.f32 -0.4999988, %v5902_v23  ;;  %v5910_v27 = vadd.f32 -0.16666654, %v5909_v45  ;;  %v6027_v14 = vshll.u32 %v6026_v10, 30  ;;  %v6050_v25 = vsub.s32 4, %v6026_v10 }
 0x916   :  { %v5904_v38 = vmul.f32 %v5903_v46, %v5899_v26  ;;  %v5911_v53 = vmul.f32 %v5910_v27, %v5899_v26  ;;  %v6028_v17 = vsub.s32 %v6024_v20, %v6027_v14  ;;  %v6051_v3 = vsel %vm5928_vm0, %v6050_v25, %v6026_v10 }
 0x917   :  { %v6053_v39 = vsel %vm5927_vm3, 0, %v6051_v3 }
 0x918   :  { %v5905_v49 = vadd.f32 1.0, %v5904_v38  ;;  %v5912_v52 = vadd.f32 1.0, %v5911_v53  ;;  %vm6029_vm4 = vcmp.lt.s32.totalorder %v6028_v17, 0  ;;  %v6030_v60 = vsub.s32 0, %v6028_v17 }
 0x919   :  { %v6070_v44 = vadd.s32 3, %v6053_v39 }
 0x91a   :  { %v5913_v0 = vmul.f32 %v5912_v52, %v5897_v29  ;;  %v5922_v54 = vxor.u32 2147483648, %v5905_v49  ;;  %v6031_v63 = vsel %vm6029_vm4, %v6030_v60, %v6028_v17  ;;  %v7016_v52 = vpop.permute.xlu2 %7015  ;;  %v7070_v60 = vstv %s11886_s13 }
 0x91b   :  { %v6032_v48 = vclz %v6031_v63  ;;  %v6071_v46 = vand.u32 3, %v6070_v44 }
 0x91c   :  { %v5919_v58 = vxor.u32 2147483648, %v5913_v0  ;;  %v5923_v43 = vsel %vm5921_vm11, %v5922_v54, %v5913_v0  ;;  %v7066_v0 = vstv %s11884_s12 }
 0x91d   :  { %v7571_v5 = vadd.s32 4294967294, %v6032_v48  ;;  %vm6073_vm1 = vcmp.eq.s32.totalorder %v6071_v46, 0  ;;  %vm6076_vm9 = vcmp.eq.s32.totalorder %v6071_v46, 2  ;;  %vm6072_vm12 = vcmp.lt.s32.totalorder %v6071_v46, 2 }
 0x91e   :  { %v5920_v31 = vsel %vm5918_vm7, %v5905_v49, %v5919_v58 }
 0x91f   :  { %v5924_v50 = vsel %vm5917_vm13, %v5920_v31, %v5923_v43  ;;  %vm7572_vm8 = vcmp.lt.s32.totalorder %v7571_v5, 0 }
 0x920   :  { %v5925_v57 = vsel %vm5914_vm14, nan, %v5924_v50  ;;  %v6035_v56 = vsel %vm7572_vm8, 0, %v7571_v5 }
 0x921   :  { %7036 = vmatpush.msrb.mxu0 %v5925_v57  ;;  %v6036_v55 = vsub.s32 32, %v6035_v56  ;;  %v6040_v37 = vsub.s32 4294967266, %v6035_v56  ;;  %v6037_v59 = vshll.u32 %v6028_v17, %v6035_v56 }
 0x922   :  { %7591 = vmatmul.msk.f32.vlgmr.msrb.gmra.mxu0 %vm2792_vm5, %v7011_v34 }
 0x923   :  { %v6038_v40 = vshrl.u32 %v6020_v32, %v6036_v55  ;;  %v6041_v12 = vadd.s32 127, %v6040_v37 }
 0x925   :  { %v6039_v6 = vor.u32 %v6038_v40, %v6037_v59  ;;  %v6042_v21 = vshll.u32 %v6041_v12, 23 }
 0x927   :  { %v6043_v61 = vor.u32 4788187, %v6042_v21  ;;  %v6046_v42 = vcvt.s32.f32 %v6039_v6 }
 0x929   :  { %v6044_v8 = vand.u32 2147483647, %v6043_v61 }
 0x92b   :  { %v6047_v35 = vmul.f32 %v6046_v42, %v6044_v8 }
 0x92d   :  { %v6048_v29 = vxor.u32 2147483648, %v6047_v35 }
 0x92f   :  { %v6049_v62 = vsel %vm5928_vm0, %v6048_v29, %v6047_v35 }
 0x930   :  { %v6052_v51 = vsel %vm5927_vm3, %v11737_v18, %v6049_v62 }
 0x931   :  { %v6054_v28 = vmul.f32 %v6052_v51, %v6052_v51 }
 0x933   :  { %v6055_v26 = vmul.f32 -0.001358992, %v6054_v28  ;;  %v6062_v36 = vmul.f32 -0.00019511016, %v6054_v28 }
 0x935   :  { %v6056_v47 = vadd.f32 0.041655596, %v6055_v26  ;;  %v6063_v1 = vadd.f32 0.008332121, %v6062_v36 }
 0x937   :  { %v6057_v4 = vmul.f32 %v6056_v47, %v6054_v28  ;;  %v6064_v11 = vmul.f32 %v6063_v1, %v6054_v28 }
 0x939   :  { %v6058_v33 = vadd.f32 -0.4999988, %v6057_v4  ;;  %v6065_v20 = vadd.f32 -0.16666654, %v6064_v11 }
 0x93b   :  { %v6059_v23 = vmul.f32 %v6058_v33, %v6054_v28  ;;  %v6066_v45 = vmul.f32 %v6065_v20, %v6054_v28 }
 0x93d   :  { %v6060_v41 = vadd.f32 1.0, %v6059_v23  ;;  %v6067_v15 = vadd.f32 1.0, %v6066_v45 }
 0x93f   :  { %v6068_v27 = vmul.f32 %v6067_v15, %v6052_v51  ;;  %v6077_v30 = vxor.u32 2147483648, %v6060_v41 }
 0x941   :  { %v6074_v38 = vxor.u32 2147483648, %v6068_v27  ;;  %v6078_v53 = vsel %vm6076_vm9, %v6077_v30, %v6068_v27 }
 0x943   :  { %v6075_v10 = vsel %vm6073_vm1, %v6060_v41, %v6074_v38 }
 0x944   :  { %v6079_v14 = vsel %vm6072_vm12, %v6075_v10, %v6078_v53 }
 0x945   :  { %v6080_v49 = vsel %vm6069_vm2, nan, %v6079_v14 }
 0x946   :  { %7056 = vmatpush.msrb.mxu1 %v6080_v49 }
 0x947   :  { %7592 = vmatmul.msk.f32.vlgmr.msrb.gmra.mxu1 %vm2792_vm5, %v7011_v34 }
 0x99f   :  { %v7038_v17 = vpop.f32.mrf.mxu0 }
 0x9a0   :  { %v7039_v24 = vadd.f32 %v7038_v17, %v7016_v52 }
 0x9a2   :  { %v7061_v54 = vand.u32 2147483647, %v7039_v24 }
 0x9a4   :  { %v7067_v58 = vmul.f32 %v7066_v0, %v7061_v54 }
 0x9a6   :  { %v7071_v63 = vadd.f32 %v7070_v60, %v7067_v58 }
 0x9a8   :  { %7643 = vtanh.f32 %v7071_v63 }
 0x9ae   :  { %v7644_v18 = vpop.eup %7643 }
 0x9af   :  { %v7075_v48 = vmul.f32 20.0, %v7644_v18 }
 0x9b1   :  { %v7077_v31 = vadd.f32 30.0, %v7075_v48 }
 0x9b3   :  { %v11890_v43 = vmul.f32 %v7077_v31, %v7039_v24 }
 0x9b5   :  { %v7084_v50 = vand.u32 2139095040, %v11890_v43  ;;  %v7081_v59 = vand.u32 2147483647, %v11890_v43 }
 0x9b7   :  { %v7085_v5 = vshrl.u32 %v7084_v50, 23  ;;  %v7088_v25 = vand.u32 8388607, %v7081_v59 }
 0x9b9   :  { %v7595_v57 = vadd.s32 4294967169, %v7085_v5  ;;  %v7089_v11 = vor.u32 8388608, %v7088_v25 }
 0x9bb   :  { %v7091_v56 = vadd.s32 1, %v7595_v57  ;;  %v11932_v15 = vshll.u32 %v7089_v11, 8 }
 0x9bd   :  { %vm7092_vm5 = vcmp.gt.s32.totalorder %v7091_v56, 0  ;;  %v7130_v10 = vand.u32 65535, %v11932_v15  ;;  %v7131_v54 = vshrl.u32 %v11932_v15, 16 }
 0x9be   :  { %v7093_v32 = vsel %vm7092_vm5, %v7091_v56, 0 }
 0x9bf   :  { %v7095_v55 = vand.u32 31, %v7093_v32  ;;  %v11896_v6 = vshrl.u32 %v7093_v32, 5 }
 0x9c1   :  { %v11894_v40 = vsub.s32 32, %v7095_v55  ;;  %v7101_v21 = vshll.u32 %v7729_v9, %v7095_v55  ;;  %v7104_v61 = vshll.u32 %v7730_v13, %v7095_v55  ;;  %v7107_v42 = vshll.u32 %v7731_v16, %v7095_v55 }
 0x9c2   :  { %v7110_v29 = vshll.u32 %v7732_v19, %v7095_v55  ;;  %v7098_v1 = vshll.u32 %v7728_v7, %v7095_v55  ;;  %vm7116_vm15 = vcmp.lt.s32.totalorder %v11896_v6, 4  ;;  %vm7113_vm10 = vcmp.lt.s32.totalorder %v11896_v6, 1 }
 0x9c3   :  { %v7102_v34 = vshrl.u32 %v7730_v13, %v11894_v40  ;;  %v7105_v8 = vshrl.u32 %v7731_v16, %v11894_v40  ;;  %v7108_v35 = vshrl.u32 %v7732_v19, %v11894_v40  ;;  %v7111_v62 = vshrl.u32 %v7733_v22, %v11894_v40 }
 0x9c4   :  { %v7058_v37 = vpop.f32.mrf.mxu1  ;;  %v7099_v36 = vshrl.u32 %v7729_v9, %v11894_v40  ;;  %vm7115_vm6 = vcmp.lt.s32.totalorder %v11896_v6, 3  ;;  %vm7114_vm4 = vcmp.lt.s32.totalorder %v11896_v6, 2 }
 0x9c5   :  { %v7059_v12 = vadd.f32 %v7058_v37, %v7016_v52  ;;  %v11912_v51 = vor.u32 %v7102_v34, %v7101_v21  ;;  %v7106_v28 = vor.u32 %v7105_v8, %v7104_v61  ;;  %v7109_v3 = vor.u32 %v7108_v35, %v7107_v42 }
 0x9c6   :  { %v7112_v47 = vor.u32 %v7111_v62, %v7110_v29  ;;  %v7100_v44 = vor.u32 %v7099_v36, %v7098_v1 }
 0x9c7   :  { %v7062_v26 = vand.u32 2147483647, %v7059_v12  ;;  %v7125_v33 = vsel %vm7113_vm10, %v11912_v51, %v7106_v28  ;;  %v7122_v45 = vsel %vm7116_vm15, %v7109_v3, 920167782  ;;  %v7118_v25 = vsel %vm7116_vm15, %v7106_v28, 2102212464 }
 0x9c8   :  { %v7126_v39 = vsel %vm7116_vm15, %v7112_v47, 1326507024  ;;  %v7121_v46 = vsel %vm7113_vm10, %v7100_v44, %v11912_v51  ;;  %v7123_v27 = vsel %vm7115_vm6, %v7106_v28, %v7122_v45  ;;  %v7119_v28 = vsel %vm7115_vm6, %v11912_v51, %v7118_v25 }
 0x9c9   :  { %v7068_v4 = vmul.f32 %v7066_v0, %v7062_v26  ;;  %v7127_v20 = vsel %vm7115_vm6, %v7109_v3, %v7126_v39  ;;  %v7124_v38 = vsel %vm7114_vm4, %v7121_v46, %v7123_v27  ;;  %v7097_v3 = vshrl.u32 %v7728_v7, %v11894_v40 }
 0x9ca   :  { %v7128_v41 = vsel %vm7114_vm4, %v7125_v33, %v7127_v20  ;;  %v7155_v52 = vshrl.u32 %v7124_v38, 16  ;;  %v7154_v0 = vand.u32 65535, %v7124_v38 }
 0x9cb   :  { %v7072_v23 = vadd.f32 %v7070_v60, %v7068_v4  ;;  %v7133_v30 = vshrl.u32 %v7128_v41, 16  ;;  %v7132_v17 = vand.u32 65535, %v7128_v41  ;;  %v7117_v33 = vsel %vm7113_vm10, %v7097_v3, %v7100_v44 }
 0x9cc   :  { %v7157_v63 = vmul.u32 %v7155_v52, %v7130_v10  ;;  %v11952_v5 = vmul.u32 %v7154_v0, %v7131_v54  ;;  %v7156_v32 = vmul.u32 %v7154_v0, %v7130_v10  ;;  %v7159_v62 = vmul.u32 %v7155_v52, %v7131_v54 }
 0x9cd   :  { %7645 = vtanh.f32 %v7072_v23  ;;  %v11942_v14 = vmul.u32 %v7133_v30, %v7130_v10  ;;  %v7134_v18 = vmul.u32 %v7132_v17, %v7130_v10  ;;  %v11948_v48 = vmul.u32 %v7132_v17, %v7131_v54 }
 0x9ce   :  { %v7160_v55 = vshll.u32 %v7157_v63, 16  ;;  %v7162_v61 = vshll.u32 %v11952_v5, 16  ;;  %v7137_v42 = vmul.u32 %v7133_v30, %v7131_v54  ;;  %v7161_v46 = vshrl.u32 %v7157_v63, 16 }
 0x9cf   :  { %v7138_v60 = vshll.u32 %v11942_v14, 16  ;;  %v7140_v37 = vshll.u32 %v11948_v48, 16  ;;  %v7139_v20 = vshrl.u32 %v11942_v14, 16  ;;  %v7141_v23 = vshrl.u32 %v11948_v48, 16 }
 0x9d0   :  { %vm7164_vm11 = vc.u32 %v7156_v32, %v7160_v55  ;;  %v11959_v8 = vadd.s32 %v7160_v55, %v7156_v32  ;;  %v7120_v25 = vsel %vm7114_vm4, %v7117_v33, %v7119_v28 }
 0x9d1   :  { %vm7142_vm7 = vc.u32 %v7134_v18, %v7138_v60  ;;  %v7144_v57 = vadd.s32 %v7138_v60, %v7134_v18  ;;  %v7165_v29 = vsel %vm7164_vm11, 1, %v7727_v2 }
 0x9d2   :  { %v7143_v34 = vsel %vm7142_vm7, 1, %v7727_v2  ;;  %vm7168_vm14 = vc.u32 %v11959_v8, %v7162_v61  ;;  %v7167_v39 = vadd.s32 %v7165_v29, %v7159_v62 }
 0x9d3   :  { %v7646_v53 = vpop.eup %7645  ;;  %vm7146_vm13 = vc.u32 %v7144_v57, %v7140_v37  ;;  %v7145_v26 = vadd.s32 %v7143_v34, %v7137_v42  ;;  %v7169_v11 = vsel %vm7168_vm14, 1, %v7727_v2  ;;  %vm7083_vm14 = vcmp.lt.s32.totalorder %v11890_v43, 0 }
 0x9d4   :  { %v7076_v49 = vmul.f32 20.0, %v7646_v53  ;;  %v7147_v1 = vsel %vm7146_vm13, 1, %v7727_v2  ;;  %v7171_v38 = vadd.s32 %v7169_v11, %v7167_v39 }
 0x9d5   :  { %v7149_v41 = vadd.s32 %v7147_v1, %v7145_v26  ;;  %v12036_v26 = vadd.s32 %v11959_v8, %v7162_v61 }
 0x9d6   :  { %v7078_v24 = vadd.f32 30.0, %v7076_v49  ;;  %v7172_v18 = vadd.s32 %v7171_v38, %v7161_v46 }
 0x9d7   :  { %v7150_v60 = vadd.s32 %v7149_v41, %v7139_v20 }
 0x9d8   :  { %v11946_v58 = vmul.f32 %v7078_v24, %v7059_v12 }
 0x9d9   :  { %v12029_v34 = vadd.s32 %v7150_v60, %v7141_v23 }
 0x9da   :  { %v7236_v31 = vand.u32 2147483647, %v11946_v58  ;;  %v7239_v50 = vand.u32 2139095040, %v11946_v58 }
 0x9db   :  { %vm7176_vm12 = vc.u32 %v12029_v34, %v12036_v26 }
 0x9dc   :  { %v7240_v56 = vshrl.u32 %v7239_v50, 23  ;;  %v7243_v12 = vand.u32 8388607, %v7236_v31 }
 0x9de   :  { %v7598_v21 = vadd.s32 4294967169, %v7240_v56  ;;  %v7244_v36 = vor.u32 8388608, %v7243_v12 }
 0x9e0   :  { %v7246_v35 = vadd.s32 1, %v7598_v21  ;;  %v11980_v40 = vshll.u32 %v7244_v36, 8 }
 0x9e2   :  { %vm7247_vm8 = vcmp.gt.s32.totalorder %v7246_v35, 0  ;;  %v7285_v57 = vand.u32 65535, %v11980_v40  ;;  %v7286_v12 = vshrl.u32 %v11980_v40, 16 }
 0x9e3   :  { %v7248_v47 = vsel %vm7247_vm8, %v7246_v35, 0  ;;  %vm12069_vm8 = vcmp.le.f32.partialorder %v7081_v59, 0.7853982 }
 0x9e4   :  { %v7250_v4 = vand.u32 31, %v7248_v47  ;;  %v11982_v27 = vshrl.u32 %v7248_v47, 5 }
 0x9e6   :  { %v11978_v45 = vsub.s32 32, %v7250_v4  ;;  %v7253_v30 = vshll.u32 %v7728_v7, %v7250_v4  ;;  %v7256_v44 = vshll.u32 %v7729_v9, %v7250_v4  ;;  %v7259_v53 = vshll.u32 %v7730_v13, %v7250_v4 }
 0x9e7   :  { %v7262_v49 = vshll.u32 %v7731_v16, %v7250_v4  ;;  %v7265_v17 = vshll.u32 %v7732_v19, %v7250_v4  ;;  %vm7268_vm0 = vcmp.lt.s32.totalorder %v11982_v27, 1  ;;  %vm7271_vm3 = vcmp.lt.s32.totalorder %v11982_v27, 4 }
 0x9e8   :  { %v7254_v51 = vshrl.u32 %v7729_v9, %v11978_v45  ;;  %v7257_v10 = vshrl.u32 %v7730_v13, %v11978_v45  ;;  %v7260_v14 = vshrl.u32 %v7731_v16, %v11978_v45  ;;  %v7263_v52 = vshrl.u32 %v7732_v19, %v11978_v45 }
 0x9e9   :  { %v7266_v24 = vshrl.u32 %v7733_v22, %v11978_v45  ;;  %v7163_v22 = vshrl.u32 %v11952_v5, 16  ;;  %vm7270_vm1 = vcmp.lt.s32.totalorder %v11982_v27, 3  ;;  %vm7269_vm9 = vcmp.lt.s32.totalorder %v11982_v27, 2 }
 0x9ea   :  { %v11999_v0 = vor.u32 %v7254_v51, %v7253_v30  ;;  %v12001_v9 = vor.u32 %v7257_v10, %v7256_v44  ;;  %v7261_v54 = vor.u32 %v7260_v14, %v7259_v53  ;;  %v7264_v13 = vor.u32 %v7263_v52, %v7262_v49 }
 0x9eb   :  { %v7267_v63 = vor.u32 %v7266_v24, %v7265_v17  ;;  %v7173_v55 = vadd.s32 %v7172_v18, %v7163_v22  ;;  %v7174_v4 = vmul.u32 %v11932_v15, %v7120_v25  ;;  %v7252_v38 = vshrl.u32 %v7728_v7, %v11978_v45 }
 0x9ec   :  { %v7276_v16 = vsel %vm7268_vm0, %v11999_v0, %v12001_v9  ;;  %v7280_v19 = vsel %vm7268_vm0, %v12001_v9, %v7261_v54  ;;  %v7277_v48 = vsel %vm7271_vm3, %v7264_v13, 920167782  ;;  %v7273_v10 = vsel %vm7271_vm3, %v7261_v54, 2102212464 }
 0x9ed   :  { %v7281_v50 = vsel %vm7271_vm3, %v7267_v63, 1326507024  ;;  %v7278_v56 = vsel %vm7270_vm1, %v7261_v54, %v7277_v48  ;;  %v7177_v47 = vadd.s32 1, %v7173_v55  ;;  %v7272_v7 = vsel %vm7268_vm0, %v7252_v38, %v11999_v0 }
 0x9ee   :  { %v7282_v32 = vsel %vm7270_vm1, %v7264_v13, %v7281_v50  ;;  %v7279_v37 = vsel %vm7269_vm9, %v7276_v16, %v7278_v56  ;;  %v7274_v13 = vsel %vm7270_vm1, %v12001_v9, %v7273_v10  ;;  %v7175_v25 = vadd.s32 %v12036_v26, %v12029_v34 }
 0x9ef   :  { %v7283_v21 = vsel %vm7269_vm9, %v7280_v19, %v7282_v32  ;;  %v7309_v29 = vand.u32 65535, %v7279_v37  ;;  %v7310_v62 = vshrl.u32 %v7279_v37, 16  ;;  %v7178_v41 = vsel %vm7176_vm12, %v7177_v47, %v7173_v55 }
 0x9f0   :  { %v7287_v42 = vand.u32 65535, %v7283_v21  ;;  %v7288_v35 = vshrl.u32 %v7283_v21, 16  ;;  %v7179_v44 = vadd.s32 %v7178_v41, %v7174_v4  ;;  %v7275_v50 = vsel %vm7269_vm9, %v7272_v7, %v7274_v13 }
 0x9f1   :  { %v7312_v1 = vmul.u32 %v7310_v62, %v7285_v57  ;;  %v7313_v39 = vmul.u32 %v7309_v29, %v7286_v12  ;;  %v7311_v33 = vmul.u32 %v7309_v29, %v7285_v57  ;;  %v7314_v28 = vmul.u32 %v7310_v62, %v7286_v12 }
 0x9f2   :  { %v7290_v36 = vmul.u32 %v7288_v35, %v7285_v57  ;;  %v7291_v3 = vmul.u32 %v7287_v42, %v7286_v12  ;;  %v7289_v11 = vmul.u32 %v7287_v42, %v7285_v57  ;;  %v7292_v20 = vmul.u32 %v7288_v35, %v7286_v12 }
 0x9f3   :  { %v7315_v5 = vshll.u32 %v7312_v1, 16  ;;  %v7317_v8 = vshll.u32 %v7313_v39, 16  ;;  %v7180_v24 = vadd.s32 536870912, %v7179_v44  ;;  %v7316_v45 = vshrl.u32 %v7312_v1, 16 }
 0x9f4   :  { %v7293_v23 = vshll.u32 %v7290_v36, 16  ;;  %v7295_v6 = vshll.u32 %v7291_v3, 16  ;;  %v7294_v49 = vshrl.u32 %v7290_v36, 16  ;;  %v7296_v54 = vshrl.u32 %v7291_v3, 16 }
 0x9f5   :  { %vm7319_vm5 = vc.u32 %v7311_v33, %v7315_v5  ;;  %v7321_v30 = vadd.s32 %v7315_v5, %v7311_v33  ;;  %v12055_v18 = vshrl.u32 %v7180_v24, 30  ;;  %v7318_v16 = vshrl.u32 %v7313_v39, 16 }
 0x9f6   :  { %vm7297_vm2 = vc.u32 %v7289_v11, %v7293_v23  ;;  %v7299_v61 = vadd.s32 %v7293_v23, %v7289_v11  ;;  %v7320_v51 = vsel %vm7319_vm5, 1, %v7727_v2  ;;  %v7329_v32 = vmul.u32 %v11980_v40, %v7275_v50 }
 0x9f7   :  { %v7298_v46 = vsel %vm7297_vm2, 1, %v7727_v2  ;;  %v7322_v14 = vadd.s32 %v7320_v51, %v7314_v28  ;;  %vm7323_vm10 = vc.u32 %v7321_v30, %v7317_v8  ;;  %v7325_v48 = vadd.s32 %v7321_v30, %v7317_v8 }
 0x9f8   :  { %v7300_v15 = vadd.s32 %v7298_v46, %v7292_v20  ;;  %vm7301_vm15 = vc.u32 %v7299_v61, %v7295_v6  ;;  %v7324_v17 = vsel %vm7323_vm10, 1, %v7727_v2  ;;  %vm7238_vm0 = vcmp.lt.s32.totalorder %v11946_v58, 0 }
 0x9f9   :  { %v7302_v53 = vsel %vm7301_vm15, 1, %v7727_v2  ;;  %v7326_v60 = vadd.s32 %v7324_v17, %v7322_v14  ;;  %v7182_v2 = vshll.u32 %v12055_v18, 30  ;;  %vm12082_vm3 = vcmp.le.f32.partialorder %v7236_v31, 0.7853982 }
 0x9fa   :  { %v7304_v52 = vadd.s32 %v7302_v53, %v7300_v15  ;;  %vm7379_vm10 = vweird.f32 %v11946_v58 }
 0x9fb   :  { %v7327_v19 = vadd.s32 %v7326_v60, %v7316_v45  ;;  %v7183_v57 = vsub.s32 %v7179_v44, %v7182_v2 }
 0x9fc   :  { %v7305_v63 = vadd.s32 %v7304_v52, %v7294_v49 }
 0x9fd   :  { %v7328_v0 = vadd.s32 %v7327_v19, %v7318_v16  ;;  %vm7184_vm4 = vcmp.lt.s32.totalorder %v7183_v57, 0  ;;  %v7185_v9 = vsub.s32 0, %v7183_v57 }
 0x9fe   :  { %v7306_v22 = vadd.s32 %v7305_v63, %v7296_v54 }
 0x9ff   :  { %v7332_v56 = vadd.s32 1, %v7328_v0  ;;  %v7186_v21 = vsel %vm7184_vm4, %v7185_v9, %v7183_v57  ;;  %vm7224_vm4 = vweird.f32 %v11890_v43 }
 0xa00   :  { %vm7331_vm6 = vc.u32 %v7306_v22, %v7325_v48  ;;  %v7187_v12 = vclz %v7186_v21  ;;  %v7330_v34 = vadd.s32 %v7325_v48, %v7306_v22  ;;  %v7205_v22 = vsub.s32 4, %v12055_v18 }
 0xa01   :  { %v7333_v55 = vsel %vm7331_vm6, %v7332_v56, %v7328_v0  ;;  %vm7394_vm6 = vcmask 1040384  }
 0xa02   :  { %v7334_v37 = vadd.s32 %v7333_v55, %v7329_v32  ;;  %v7596_v35 = vadd.s32 4294967294, %v7187_v12  ;;  %v7206_v9 = vsel %vm7083_vm14, %v7205_v22, %v12055_v18 }
 0xa03   :  { %v7208_v12 = vsel %vm12069_vm8, 0, %v7206_v9 }
 0xa04   :  { %v7335_v42 = vadd.s32 536870912, %v7334_v37  ;;  %vm7597_vm7 = vcmp.lt.s32.totalorder %v7596_v35, 0 }
 0xa05   :  { %v7190_v62 = vsel %vm7597_vm7, 0, %v7596_v35 }
 0xa06   :  { %v12061_v29 = vshrl.u32 %v7335_v42, 30  ;;  %v7191_v36 = vsub.s32 32, %v7190_v62  ;;  %v7195_v3 = vsub.s32 4294967266, %v7190_v62  ;;  %v7192_v47 = vshll.u32 %v7183_v57, %v7190_v62 }
 0xa08   :  { %v7337_v27 = vshll.u32 %v12061_v29, 30  ;;  %v7193_v1 = vshrl.u32 %v7175_v25, %v7191_v36  ;;  %v7196_v39 = vadd.s32 127, %v7195_v3  ;;  %v7360_v57 = vsub.s32 4, %v12061_v29 }
 0xa0a   :  { %v7338_v40 = vsub.s32 %v7334_v37, %v7337_v27  ;;  %v7194_v11 = vor.u32 %v7193_v1, %v7192_v47  ;;  %v7197_v20 = vshll.u32 %v7196_v39, 23  ;;  %v7361_v21 = vsel %vm7238_vm0, %v7360_v57, %v12061_v29 }
 0xa0b   :  { %v7363_v25 = vsel %vm12082_vm3, 0, %v7361_v21 }
 0xa0c   :  { %vm7339_vm11 = vcmp.lt.s32.totalorder %v7338_v40, 0  ;;  %v7340_v4 = vsub.s32 0, %v7338_v40  ;;  %v7198_v33 = vor.u32 4788187, %v7197_v20  ;;  %v7201_v61 = vcvt.s32.f32 %v7194_v11 }
 0xa0d   :  { %v7380_v39 = vadd.s32 3, %v7363_v25 }
 0xa0e   :  { %v7341_v23 = vsel %vm7339_vm11, %v7340_v4, %v7338_v40  ;;  %v7199_v5 = vand.u32 2147483647, %v7198_v33 }
 0xa0f   :  { %v7342_v6 = vclz %v7341_v23 }
 0xa10   :  { %v7202_v8 = vmul.f32 %v7201_v61, %v7199_v5 }
 0xa11   :  { %v7599_v28 = vadd.s32 4294967294, %v7342_v6 }
 0xa12   :  { %v7203_v30 = vxor.u32 2147483648, %v7202_v8 }
 0xa13   :  { %vm7600_vm13 = vcmp.lt.s32.totalorder %v7599_v28, 0 }
 0xa14   :  { %v7345_v41 = vsel %vm7600_vm13, 0, %v7599_v28  ;;  %v7204_v10 = vsel %vm7083_vm14, %v7203_v30, %v7202_v8  ;;  %v7381_v28 = vand.u32 3, %v7380_v39 }
 0xa15   :  { %v7346_v26 = vsub.s32 32, %v7345_v41  ;;  %v7350_v46 = vsub.s32 4294967266, %v7345_v41  ;;  %v7347_v38 = vshll.u32 %v7338_v40, %v7345_v41  ;;  %v7207_v53 = vsel %vm12069_vm8, %v11890_v43, %v7204_v10 }
 0xa16   :  { %v7209_v52 = vmul.f32 %v7207_v53, %v7207_v53  ;;  %v7225_v40 = vadd.s32 3, %v7208_v12  ;;  %vm7383_vm2 = vcmp.eq.s32.totalorder %v7381_v28, 0  ;;  %vm7386_vm5 = vcmp.eq.s32.totalorder %v7381_v28, 2 }
 0xa17   :  { %v7348_v15 = vshrl.u32 %v7330_v34, %v7346_v26  ;;  %v7351_v51 = vadd.s32 127, %v7350_v46  ;;  %v7397_v26 = vlaneseq  ;;  %vm7382_vm15 = vcmp.lt.s32.totalorder %v7381_v28, 2 }
 0xa18   :  { %v7210_v24 = vmul.f32 -0.001358992, %v7209_v52  ;;  %v7217_v7 = vmul.f32 -0.00019511016, %v7209_v52  ;;  %v7226_v20 = vand.u32 3, %v7225_v40 }
 0xa19   :  { %v7349_v14 = vor.u32 %v7348_v15, %v7347_v38  ;;  %v7352_v49 = vshll.u32 %v7351_v51, 23  ;;  %vm7399_vm7 = vcmp.lt.s32.totalorder %v7397_v26, 256 }
 0xa1a   :  { %v7218_v60 = vadd.f32 0.008332121, %v7217_v7  ;;  %v7211_v54 = vadd.f32 0.041655596, %v7210_v24  ;;  %vm7228_vm1 = vcmp.eq.s32.totalorder %v7226_v20, 0  ;;  %vm7227_vm9 = vcmp.lt.s32.totalorder %v7226_v20, 2 }
 0xa1b   :  { %v7353_v17 = vor.u32 4788187, %v7352_v49  ;;  %v7356_v45 = vcvt.s32.f32 %v7349_v14  ;;  %vm7231_vm12 = vcmp.eq.s32.totalorder %v7226_v20, 2 }
 0xa1c   :  { %v7219_v63 = vmul.f32 %v7218_v60, %v7209_v52  ;;  %v7212_v50 = vmul.f32 %v7211_v54, %v7209_v52 }
 0xa1d   :  { %v7354_v59 = vand.u32 2147483647, %v7353_v17 }
 0xa1e   :  { %v7220_v19 = vadd.f32 -0.16666654, %v7219_v63  ;;  %v7213_v55 = vadd.f32 -0.4999988, %v7212_v50 }
 0xa1f   :  { %v7357_v13 = vmul.f32 %v7356_v45, %v7354_v59 }
 0xa20   :  { %v7221_v32 = vmul.f32 %v7220_v19, %v7209_v52  ;;  %v7214_v62 = vmul.f32 %v7213_v55, %v7209_v52 }
 0xa21   :  { %v7358_v16 = vxor.u32 2147483648, %v7357_v13 }
 0xa22   :  { %v7222_v42 = vadd.f32 1.0, %v7221_v32  ;;  %v7215_v4 = vadd.f32 1.0, %v7214_v62 }
 0xa23   :  { %v7359_v2 = vsel %vm7238_vm0, %v7358_v16, %v7357_v13 }
 0xa24   :  { %v7362_v0 = vsel %vm12082_vm3, %v11946_v58, %v7359_v2  ;;  %v7223_v47 = vmul.f32 %v7222_v42, %v7207_v53  ;;  %v7232_v5 = vxor.u32 2147483648, %v7215_v4 }
 0xa25   :  { %v7364_v56 = vmul.f32 %v7362_v0, %v7362_v0 }
 0xa26   :  { %v7229_v23 = vxor.u32 2147483648, %v7223_v47  ;;  %v7233_v46 = vsel %vm7231_vm12, %v7232_v5, %v7223_v47 }
 0xa27   :  { %v7365_v37 = vmul.f32 -0.001358992, %v7364_v56  ;;  %v7372_v31 = vmul.f32 -0.00019511016, %v7364_v56 }
 0xa28   :  { %v7230_v41 = vsel %vm7228_vm1, %v7215_v4, %v7229_v23 }
 0xa29   :  { %v7366_v35 = vadd.f32 0.041655596, %v7365_v37  ;;  %v7373_v27 = vadd.f32 0.008332121, %v7372_v31  ;;  %v7234_v38 = vsel %vm7227_vm9, %v7230_v41, %v7233_v46 }
 0xa2a   :  { %v7235_v53 = vsel %vm7224_vm4, nan, %v7234_v38 }
 0xa2b   :  { %v7367_v36 = vmul.f32 %v7366_v35, %v7364_v56  ;;  %v7374_v3 = vmul.f32 %v7373_v27, %v7364_v56 }
 0xa2d   :  { %v7368_v18 = vadd.f32 -0.4999988, %v7367_v36  ;;  %v7375_v1 = vadd.f32 -0.16666654, %v7374_v3 }
 0xa2f   :  { %v7369_v11 = vmul.f32 %v7368_v18, %v7364_v56  ;;  %v7376_v29 = vmul.f32 %v7375_v1, %v7364_v56 }
 0xa31   :  { %v7370_v6 = vadd.f32 1.0, %v7369_v11  ;;  %v7377_v33 = vadd.f32 1.0, %v7376_v29 }
 0xa33   :  { %v7378_v61 = vmul.f32 %v7377_v33, %v7362_v0  ;;  %v7387_v8 = vxor.u32 2147483648, %v7370_v6 }
 0xa35   :  { %v7384_v34 = vxor.u32 2147483648, %v7378_v61  ;;  %v7388_v44 = vsel %vm7386_vm5, %v7387_v8, %v7378_v61 }
 0xa37   :  { %v7385_v30 = vsel %vm7383_vm2, %v7370_v6, %v7384_v34 }
 0xa38   :  { %v7389_v15 = vsel %vm7382_vm15, %v7385_v30, %v7388_v44 }
 0xa39   :  { %v7390_v51 = vsel %vm7379_vm10, nan, %v7389_v15 }
 0xa3a   :  { %v7393_v10 = vrot.slane %v7390_v51, 7 }
 0xa3c   :  { %v7395_v14 = vsel %vm7394_vm6, %v7235_v53, %v7393_v10 }
 0xa3d   :  { %7401 = vst.msk [vmem:[#allocation8] sm:$0x3] %vm7399_vm7, %v7395_v14 }
 0xa3e   :  { %7412 = dma.vmem_to_hbm [thread:$0]  %s7408_s15, 32, %s7410_s18, [#allocation5]  }
 0xa3f   :  { %7721 = dma.done.wait [#allocation5], 32  }
 0xa40   :  { %7722 = vsyncadd [#allocation5], 4294967264 }
 0xa41   :  { %7417 = vsyncpa [#allocation4], 1 }
 0xa42   :  { %7418 = vsyncpa [#allocation5], 1 }
 0xa43   :  { %7419 = vsyncpa [#allocation6], 1 }

</bundles_post_ra>
